<compile_context>
chip_gen: v7x
topology: tpu7x:2x2x1
jax: 0.10.0
libtpu: 0.0.40
codegen_flags: <defaults>
</compile_context>

<pallas_src>
import functools

import jax
import jax.numpy as jnp
from jax.experimental import pallas as pl
from jax.experimental.pallas import tpu as pltpu


_ITEMSIZE = 4  # float32 input

# VMEM sizing: v7x has 64 MiB physical VMEM per TensorCore (v5e/v6e have 128),
# so a 48 MiB limit is safe on every generation; the tile picker budgets 40 MiB
# against that same number so the declared limit and the chosen tiles agree.
_VMEM_LIMIT_BYTES = 48 * 1024 * 1024
_VMEM_BUDGET_BYTES = 40 * 1024 * 1024
# ~4 MiB of output per grid step keeps the ~0.35us fixed per-step overhead under
# ~10% of the HBM write time on v5e/v6e/v7x.
_OUT_BYTES_PER_STEP = 4 * 1024 * 1024


def _pick_tiles(B, C, L, sgcs, out_itemsize=4,
                vmem_budget_bytes=_VMEM_BUDGET_BYTES,
                out_bytes_per_step=_OUT_BYTES_PER_STEP):
    """Pick (TB, TL) for input blocks (TB, C, TL) / output blocks (TB, C, TL*sgcs).

    VMEM model per input element (b, c, l):
      2 * 4                  double-buffered f32 input block
      2 * sgcs * out_size    double-buffered lane-dense output block
      ~2 * sgcs * 4          in-kernel temporaries (lane-repeated x + compare result)
    """
    per_elem = 2 * _ITEMSIZE + 2 * sgcs * out_itemsize + 2 * sgcs * _ITEMSIZE
    vmem_elems = max(1, vmem_budget_bytes // per_elem)
    target_elems = max(1, out_bytes_per_step // (out_itemsize * sgcs))
    elems = min(vmem_elems, target_elems)      # input elements per grid step

    if C * L <= elems:
        # Full L per block; fold batches to amortize the fixed per-step cost.
        tl = L
        tb = max(1, min(B, elems // (C * L)))
        if tb >= B:
            # Whole problem would be a single grid step; split it so both v7x
            # TensorCores get work (harmless on single-core chips).
            if B > 1:
                tb = pl.cdiv(B, 2)
            elif L >= 256:
                tl = max(128, ((L // 2) // 128) * 128)
    else:
        tb = 1
        if L <= 128:
            tl = L
        else:
            tl = min(max(1, elems // C), L)
            tl = max(128, (tl // 128) * 128)   # lane-aligned tile
            # TODO(synk): if C is so large that even a 128-lane tile overflows
            # VMEM, split C and do a two-pass channel min/max.
    return tb, tl


def _lane_dense_spikes(x, sgcs, out_dtype):
    """x: (C, TL) f32 -> (C, TL*sgcs) interleaved 0/1 spike map (lane-dense)."""
    tl = x.shape[-1]
    w = tl * sgcs
    # Channel min/max folded into divide-free thresholds:
    #   (x - mn)/(mx - mn) > v   <=>   x > mn + v*(mx - mn)
    # (mx == mn reproduces the 0/0 = NaN -> all-False reference behaviour).
    mn = jnp.min(x, axis=0, keepdims=True)                  # (1, TL)
    mx = jnp.max(x, axis=0, keepdims=True)                  # (1, TL)
    # Thresholds built directly in flat lane space: only the small (1, TL) rows
    # are lane-repeated; valve comes from an in-kernel iota (no tiny side input).
    mn_rep = jnp.repeat(mn, sgcs, axis=-1)                  # (1, W)
    rng_rep = jnp.repeat(mx - mn, sgcs, axis=-1)            # (1, W)
    k = jax.lax.broadcasted_iota(jnp.int32, (1, w), 1) % sgcs
    valve = 0.05 + k.astype(jnp.float32) * (1.0 / sgcs)     # (1, W)
    thr = mn_rep + valve * rng_rep                          # (1, W)
    # Lane-dense repeat_interleave of x itself (the unavoidable output stream).
    x_rep = jnp.repeat(x, sgcs, axis=-1)                    # (C, W)
    return (x_rep > thr).astype(out_dtype)


def _spk_kernel(x_ref, o_ref, *, sgcs):
    # x_ref: (TB, C, TL) f32 ;  o_ref: (TB, C, TL*sgcs) lane-dense interleaved.
    tb = x_ref.shape[0]
    if tb == 1:
        # Single batch row per block (the common / proven path).
        o_ref[0] = _lane_dense_spikes(x_ref[0], sgcs, o_ref.dtype)
    else:
        # Batch folded into the block: same 2-D compute, one batch row per
        # in-kernel loop step (the DMA blocks stay large either way).
        @pl.loop(0, tb)
        def _(b):
            o_ref[b] = _lane_dense_spikes(x_ref[b], sgcs, o_ref.dtype)


def _spk_pallas(x, sgcs, tb, tl, out_dtype):
    B, C, L = x.shape
    w = tl * sgcs
    out_itemsize = jnp.dtype(out_dtype).itemsize
    return pl.pallas_call(
        functools.partial(_spk_kernel, sgcs=sgcs),
        out_shape=jax.ShapeDtypeStruct((B, C, L * sgcs), out_dtype),
        grid=(pl.cdiv(B, tb), pl.cdiv(L, tl)),
        in_specs=[pl.BlockSpec((tb, C, tl), lambda b, j: (b, 0, j))],
        out_specs=pl.BlockSpec((tb, C, w), lambda b, j: (b, 0, j)),
        compiler_params=pltpu.CompilerParams(
            dimension_semantics=("parallel", "parallel"),
            vmem_limit_bytes=_VMEM_LIMIT_BYTES),
        cost_estimate=pl.CostEstimate(
            flops=int(B * C * L * (sgcs + 3)),
            transcendentals=0,
            bytes_accessed=int(_ITEMSIZE * B * C * L
                               + out_itemsize * B * C * L * sgcs)),
    )(x)


def spk_forward(x, sgcs=10, out_dtype=jnp.float32):
    """Pallas implementation of spk.forward for x of shape (B, C, L).

    out_dtype defaults to float32 (matches the PyTorch module); pass jnp.int8 /
    jnp.bfloat16 to shrink the sgcs-amplified HBM write stream if the consumer
    tolerates it.
    """
    assert x.ndim == 3, x.shape
    assert sgcs >= 1
    x = x.astype(jnp.float32)
    B, C, L = (int(d) for d in x.shape)
    tb, tl = _pick_tiles(B, C, L, sgcs,
                         out_itemsize=jnp.dtype(out_dtype).itemsize)
    return _spk_pallas(x, sgcs, tb, tl, out_dtype)


def spk_reference(x, sgcs=10):
    """Pure-JAX mirror of the PyTorch forward (divide form)."""
    mn = jnp.min(x, axis=1, keepdims=True)
    mx = jnp.max(x, axis=1, keepdims=True)
    x0 = (x - mn) / (mx - mn)
    valve = 0.05 + jnp.arange(sgcs, dtype=jnp.float32) * (1.0 / sgcs)
    inp = jnp.repeat(x0, sgcs, axis=2)                                # (B, C, L*sgcs)
    valve_tiled = jnp.tile(valve, x.shape[2])[None, None, :]          # (1, 1, L*sgcs)
    return (inp > valve_tiled).astype(jnp.float32)


def spk_reference_threshold(x, sgcs=10):
    """Divide-free reformulation used by the kernel: x0 > v <=> x > mn + v*(mx-mn)."""
    B, C, L = x.shape
    mn = jnp.min(x, axis=1)                                           # (B, L)
    mx = jnp.max(x, axis=1)
    valve = 0.05 + jnp.arange(sgcs, dtype=jnp.float32) * (1.0 / sgcs)
    thr = mn[:, :, None] + valve[None, None, :] * (mx - mn)[:, :, None]
    cmp = x[:, :, :, None] > thr[:, None, :, :]
    return cmp.reshape(B, C, L * sgcs).astype(jnp.float32)


if __name__ == "__main__":
    key = jax.random.PRNGKey(0)
    B, C, L = 2, 4, 256
    sgcs = 10
    x = jax.random.normal(key, (B, C, L), dtype=jnp.float32)

    out = jax.block_until_ready(spk_forward(x, sgcs=sgcs))

    assert out.shape == (B, C, L * sgcs), out.shape
    assert out.dtype == jnp.float32, out.dtype

    # Exact check against the mathematically equivalent threshold-form reference.
    ref_exact = spk_reference_threshold(x, sgcs=sgcs)
    assert jnp.array_equal(out, ref_exact), "Pallas output mismatch vs reference"

    # The literal divide-form PyTorch mirror can differ from the threshold form
    # only by float rounding exactly at a threshold boundary; allow a vanishing
    # fraction of such ties.
    ref_torch = spk_reference(x, sgcs=sgcs)
    mismatch = int(jnp.sum(out != ref_torch))
    assert mismatch <= max(4, out.size // 10000), f"too many mismatches: {mismatch}"

    # Lock in the batch-folded (TB > 1) path and ragged batch/L handling.
    x2 = jax.random.normal(jax.random.PRNGKey(1), (3, 4, 200), dtype=jnp.float32)
    out2 = jax.block_until_ready(spk_forward(x2, sgcs=sgcs))
    assert out2.shape == (3, 4, 200 * sgcs), out2.shape
    assert jnp.array_equal(out2, spk_reference_threshold(x2, sgcs=sgcs))

    print("KERNEL_OK")
</pallas_src>

<mosaic_0001>
module attributes {stable_mosaic.version = 11 : i64} {
  func.func @_spk_kernel(%arg0: i32, %arg1: i32, %arg2: memref<1x4x256xf32, #tpu.memory_space<vmem>>, %arg3: memref<1x4x2560xf32, #tpu.memory_space<vmem>>) attributes {dimension_semantics = [#tpu.dimension_semantics<parallel>, #tpu.dimension_semantics<parallel>], iteration_bounds = array<i64: 2, 1>, scalar_prefetch = 0 : i64, scratch_operands = 0 : i64, tpu.core_type = #tpu.core_type<tc>, window_params = [{transform_indices = @transform_0, window_bounds = array<i64: 1, 4, 256>}, {transform_indices = @transform_1, window_bounds = array<i64: 1, 4, 2560>}]} {
    %c0 = arith.constant 0 : index
    %c0_0 = arith.constant 0 : index
    %c0_1 = arith.constant 0 : index
    %0 = vector.load %arg2[%c0, %c0_0, %c0_1] : memref<1x4x256xf32, #tpu.memory_space<vmem>>, vector<1x4x256xf32>
    %1 = vector.shape_cast %0 : vector<1x4x256xf32> to vector<4x256xf32>
    %cst = arith.constant dense<0x7F800000> : vector<256xf32>
    %2 = vector.multi_reduction <minimumf>, %1, %cst [0] : vector<4x256xf32> to vector<256xf32>
    %3 = vector.shape_cast %2 : vector<256xf32> to vector<1x256xf32>
    %cst_2 = arith.constant dense<0xFF800000> : vector<256xf32>
    %4 = vector.multi_reduction <maximumf>, %1, %cst_2 [0] : vector<4x256xf32> to vector<256xf32>
    %5 = vector.shape_cast %4 : vector<256xf32> to vector<1x256xf32>
    %6 = vector.shape_cast %3 : vector<1x256xf32> to vector<1x256x1xf32>
    %7 = vector.broadcast %6 : vector<1x256x1xf32> to vector<1x256x10xf32>
    %8 = vector.shape_cast %7 : vector<1x256x10xf32> to vector<1x2560xf32>
    %9 = arith.subf %5, %3 : vector<1x256xf32>
    %10 = vector.shape_cast %9 : vector<1x256xf32> to vector<1x256x1xf32>
    %11 = vector.broadcast %10 : vector<1x256x1xf32> to vector<1x256x10xf32>
    %12 = vector.shape_cast %11 : vector<1x256x10xf32> to vector<1x2560xf32>
    %13 = tpu.iota {dimensions = array<i32: 1>} : vector<1x2560xi32>
    %c10_i32 = arith.constant 10 : i32
    %c0_i32 = arith.constant 0 : i32
    %14 = arith.cmpi eq, %c10_i32, %c0_i32 : i32
    %c1_i32 = arith.constant 1 : i32
    %15 = arith.select %14, %c1_i32, %c10_i32 : i32
    %16 = vector.broadcast %15 : i32 to vector<1x2560xi32>
    %17 = arith.remsi %13, %16 : vector<1x2560xi32>
    %c0_i32_3 = arith.constant 0 : i32
    %18 = vector.broadcast %c0_i32_3 : i32 to vector<1x2560xi32>
    %19 = arith.cmpi ne, %17, %18 : vector<1x2560xi32>
    %c0_i32_4 = arith.constant 0 : i32
    %20 = vector.broadcast %c0_i32_4 : i32 to vector<1x2560xi32>
    %21 = arith.cmpi slt, %17, %20 : vector<1x2560xi32>
    %c0_i32_5 = arith.constant 0 : i32
    %22 = arith.cmpi slt, %15, %c0_i32_5 : i32
    %23 = vector.broadcast %22 : i1 to vector<1x2560xi1>
    %24 = vector.broadcast %23 : vector<1x2560xi1> to vector<1x2560xi1>
    %25 = arith.xori %21, %24 : vector<1x2560xi1>
    %26 = arith.andi %25, %19 : vector<1x2560xi1>
    %27 = vector.broadcast %15 : i32 to vector<1x2560xi32>
    %28 = arith.addi %17, %27 : vector<1x2560xi32>
    %29 = arith.select %26, %28, %17 : vector<1x2560xi1>, vector<1x2560xi32>
    %30 = arith.sitofp %29 : vector<1x2560xi32> to vector<1x2560xf32>
    %cst_6 = arith.constant 1.000000e-01 : f32
    %31 = vector.broadcast %cst_6 : f32 to vector<1x2560xf32>
    %32 = arith.mulf %30, %31 : vector<1x2560xf32>
    %cst_7 = arith.constant 5.000000e-02 : f32
    %33 = vector.broadcast %cst_7 : f32 to vector<1x2560xf32>
    %34 = arith.addf %33, %32 : vector<1x2560xf32>
    %35 = arith.mulf %34, %12 : vector<1x2560xf32>
    %36 = arith.addf %8, %35 : vector<1x2560xf32>
    %37 = vector.shape_cast %1 : vector<4x256xf32> to vector<4x256x1xf32>
    %38 = vector.broadcast %37 : vector<4x256x1xf32> to vector<4x256x10xf32>
    %39 = vector.shape_cast %38 : vector<4x256x10xf32> to vector<4x2560xf32>
    %40 = vector.broadcast %36 : vector<1x2560xf32> to vector<4x2560xf32>
    %41 = arith.cmpf ogt, %39, %40 : vector<4x2560xf32>
    %42 = arith.extui %41 : vector<4x2560xi1> to vector<4x2560xi32>
    %43 = arith.sitofp %42 : vector<4x2560xi32> to vector<4x2560xf32>
    %c0_8 = arith.constant 0 : index
    %c0_9 = arith.constant 0 : index
    %c0_10 = arith.constant 0 : index
    %44 = vector.load %arg3[%c0_8, %c0_9, %c0_10] : memref<1x4x2560xf32, #tpu.memory_space<vmem>>, vector<1x4x2560xf32>
    %45 = vector.shape_cast %44 : vector<1x4x2560xf32> to vector<4x2560xf32>
    %46 = vector.shape_cast %43 : vector<4x2560xf32> to vector<1x4x2560xf32>
    tpu.vector_store %arg3[%c0_8, %c0_9, %c0_10], %46 {strides = array<i32>} : memref<1x4x2560xf32, #tpu.memory_space<vmem>>, vector<1x4x2560xf32>,
    return
  }
  func.func @transform_0(%arg0: i32, %arg1: i32) -> (i32, i32, i32) {
    %c0_i32 = arith.constant 0 : i32
    %c0_i32_0 = arith.constant 0 : i32
    return %arg0, %c0_i32, %arg1 : i32, i32, i32
  }
  func.func @transform_1(%arg0: i32, %arg1: i32) -> (i32, i32, i32) {
    %c0_i32 = arith.constant 0 : i32
    %c0_i32_0 = arith.constant 0 : i32
    return %arg0, %c0_i32, %arg1 : i32, i32, i32
  }
}

</mosaic_0001>

<bundles_post_ra>
// kernel: tpu_custom_call.1
= control target key start
LH: loop header
LB: loop body
LE: loop exit
PB: predicated region body
PF: predicated region fallthrough
CT: control target
= control target key end

     0   :  { %s17665_s0 = inlined_call_operand.hbm [shape: f32[2,4,256], index: 0, kind: input, shape index: {}]   ;;  %s17666_s1 = inlined_call_operand.hbm [shape: f32[2,4,2560], index: 1, kind: output, shape index: {}]  }
   0x1   :  { %18054 = sst [smem:[#allocation592_spill]] %s17665_s0 }
   0x2   :  { %18055 = sst [smem:[#allocation593_spill]] %s17666_s1 }
   0x3   :  { %6 = vsyncpa [#allocation3], 0 }
   0x4   :  { %8 = vsyncpa [#allocation3 + $0x1], 0 }
   0x5   :  { %9 = vsyncpa [#allocation4], 0 }
   0x6   :  { %11 = vsyncpa [#allocation4 + $0x1], 0  ;;  %s11261_s6 = smov 0   ;;  %s11263_s7 = smov 0  }
   0x7   :  { %s11265_s8 = smov 0   ;;  %s11267_s9 = smov 0  }
   0x8   :  { %s11269_s10 = smov 0   ;;  %s11271_s11 = smov 0  }
   0x9 LB: > { %18056 = sst [smem:[#allocation8_spill]] %s11161_s6  ;;  %s10863_s12 = sadd.s32 4294967295, %s11181_s11   ;;  %s11181_s11 = sphi %s11271_s11, %s17_s11   ;;  %s11177_s10 = sphi %s11269_s10, %s20211_s10   ;;  %s11173_s9 = sphi %s11267_s9, %s20210_s9   ;;  %s11169_s8 = sphi %s11265_s8, %s20209_s8   ;;  %s11165_s7 = sphi %s11263_s7, %s20208_s7   ;;  %s11161_s6 = sphi %s11261_s6, %s20207_s6  }
   0xa   : > { %18057 = sst [smem:[#allocation9_spill]] %s11165_s7  ;;  %s10864_s13 = sadd.s32 4294967294, %s11181_s11  }
   0xb   : > { %18058 = sst [smem:[#allocation10_spill]] %s11169_s8  ;;  %s29_s14 = sadd.s32 1, %s11177_s10 }
   0xc   : > { %18059 = sst [smem:[#allocation11_spill]] %s11173_s9  ;;  %s38_s15 = sadd.s32 1, %s11169_s8 }
   0xd   : > { %18060 = sst [smem:[#allocation12_spill]] %s11177_s10  ;;  %p31_p0 = scmp.ge.s32.totalorder %s29_s14, 2 }
   0xe   : > { %18061 = sst [smem:[#allocation13_spill]] %s11181_s11  ;;  %p45_p1 = scmp.ne.s32.totalorder %s11169_s8, %s11165_s7 }
   0xf   : > { %p46_p2 = scmp.eq.s32.totalorder %s11181_s11, 0  ;;  %p51_p3 = scmp.ne.s32.totalorder %s11165_s7, %s11161_s6 }
  0x10   : > { %s20213_s14 = smov (%p31_p0, %s29_s14), 0  ;;  %p52_p5 = scmp.eq.s32.totalorder %s10863_s12, 0 }
  0x11   : > { %18062 = sst [smem:[#allocation14_spill]] %s20213_s14  ;;  %p11302_p4 = por %p46_p2, %p45_p1 }
  0x12   : > { %s33_s17 = ssub.s32 %s11177_s10, %s20213_s14  ;;  %p77_p6 = scmp.eq.s32.totalorder %s10863_s12, 1 }
  0x13   : > { %p36_p7 = scmp.eq.s32.totalorder %s33_s17, 0  ;;  %p11308_p8 = por %p52_p5, %p51_p3 }
  0x14   : > { %p11312_p9 = por %p77_p6, %p45_p1  ;;  %p83_p10 = scmp.eq.s32.totalorder %s10864_s13, 1 }
  0x15   : > { %s11317_s20 = scalar_select %p36_p7, %s11169_s8, %s38_s15  }
  0x16   : > { %s18065_s19 = scalar_select %p11312_p9, 1, 0 }
  0x17   : > { %18067 = sst [smem:[#allocation16_spill]] %s11317_s20  ;;  %p11319_p11 = por %p83_p10, %p51_p3 }
  0x18   : > { %18066 = sst [smem:[#allocation15_spill]] %s18065_s19  ;;  %p10950_p13 = scmp.lt.s32.totalorder %s11181_s11, 2 }
  0x19   : > { %s18068_s21 = scalar_select %p11319_p11, 1, 0 }
  0x1a   : > { %s103_s22 = sand.u32 1, %s11169_s8   ;;  %s10895_s24 = sshll.u32 %s11177_s10, 7 }
  0x1b   : > { %18069 = sst [smem:[#allocation17_spill]] %s18068_s21  ;;  %s10867_s23 = sshll.u32 %s103_s22, 3 }
  0x1c   : > { %s18070_s0 = sld [smem:[#allocation592_spill]]  ;;  %s107_s28 = scalar_lea.vmem [#allocation2], %s10867_s23 }
  0x1d   : > { %s117_s29 = sshll.u32 %s107_s28, 4  ;;  %p11336_p0 = pnand %p10950_p13, %p11302_p4  ;;  %s11332_s29 = int_to_ptr.vmem [resolvable:$true] %s117_s29 }
  0x1e   : > { %s104_s2 = scalar_lea.sflag [#allocation3], %s103_s22 }
  0x1f   : > { %p11071_p5 = pneg %p11336_p0 }
  0x22   : > { %s11330_s27 = scalar_lea.hbm %s18070_s0, %s10895_s24  ;;  %s11074_s12 = scalar_lea.hbm %s18070_s0, 256 }
  0x23   : > { %s11069_s3 = scalar_lea.hbm %s11330_s27, 128  ;;  %p11075_p4 = scmp.lt.u32.totalorder %s11330_s27, %s18070_s0 }
  0x24   : > { %p11070_p3 = scmp.ne.s32.totalorder %s11330_s27, %s11069_s3  ;;  %p11076_p10 = scmp.lt.u32.totalorder %s11074_s12, %s11069_s3 }
  0x25   : > { %p11078_p12 = scmp.lt.u32.totalorder %s11069_s3, %s11330_s27 }
  0x26   : > { %p11072_p6 = pnand %p11071_p5, %p11070_p3  ;;  %p11077_p13 = por %p11076_p10, %p11075_p4 }
  0x28   : > { %p11073_p7 = pneg %p11072_p6  ;;  %p11079_p1 = por %p11078_p12, %p11077_p13 }
  0x2a   : > { %p11080_p2 = pnand %p11079_p1, %p11073_p7 }
  0x2c   : > { %11083 = shalt.err (!%p11080_p2)
}
  0x2d   : > { %s11084_s16 = scalar_lea.vmem %s11332_s29, 128  ;;  %s11183_s17 = smov [#allocation2]  }
  0x2e   : > { %p11085_p3 = scmp.ne.s32.totalorder %s11332_s29, %s11084_s16  ;;  %s11089_s22 = sshll.u32 %s11183_s17, 4  ;;  %s11090_s22 = int_to_ptr.vmem [resolvable:$false] %s11089_s22 }
  0x2f   : > { %s11091_s23 = scalar_lea.vmem %s11090_s22, 256  ;;  %p11092_p9 = scmp.lt.s32.totalorder %s11332_s29, %s11090_s22 }
  0x30   : > { %p11087_p6 = pnand %p11085_p3, %p11071_p5  ;;  %p11093_p4 = scmp.lt.s32.totalorder %s11091_s23, %s11084_s16 }
  0x32   : > { %p11088_p11 = pneg %p11087_p6  ;;  %p11094_p10 = por %p11093_p4, %p11092_p9 }
  0x34   : > { %p11095_p12 = pnand %p11094_p10, %p11088_p11 }
  0x36   : > { %11098 = shalt.err (!%p11095_p12)
}
  0x37   : > { %10945 = dma.hbm_to_vmem [thread:$0]  (!%p11336_p0), %s11330_s27, 128, %s11332_s29, %s104_s2  }
  0x38   : > { %p18072_p1 = scmp.lt.s32.totalorder %s11181_s11, 3  ;;  %p18073_p2 = scmp.ge.s32.totalorder %s11181_s11, 1 }
  0x3a   : > { %p123_p5 = pnand %p18073_p2, %p18072_p1 }
  0x3c   : > { %126 = sbr.rel (%p123_p5) target bundleno = 2338 (0x922), region = 24 }
  0x43   : > { %s11372_s24 = sand.u32 1, %s11165_s7  }
  0x44   : > { %18074 = sst [smem:[#allocation18_spill]] %s11372_s24  ;;  %s10871_s25 = sshll.u32 %s11372_s24, 3 }
  0x45   : > { %s129_s26 = scalar_lea.sflag [#allocation3], %s11372_s24  ;;  %s11376_s28 = scalar_lea.vmem [#allocation2], %s10871_s25 }
  0x46   : > { %18075 = sst [smem:[#allocation19_spill]] %s11376_s28 }
  0x47   : > { %11152 = dma.done.wait (%p11308_p8), %s129_s26, 128  }
  0x48   : > { %11154 = vsyncadd (%p11308_p8), %s129_s26, 4294967168  ;;  %vm157_vm0 = vcmask 1043456   ;;  %v153_v0 = vld [vmem:[%s11376_s28] sm:$0xff]  ;;  %v11184_v16 = vmov 1983009808   ;;  %v17774_v18 = vlaneseq  ;;  %v17830_v34 = vmov 0.0  }
  0x49   : > { %v158_v1 = vsel %vm157_vm0, %v153_v0, inf  ;;  %v11388_v8 = vcombine.high %v153_v0, %v153_v0  ;;  %v314_v17 = vunpack.c.l.s4 %v11184_v16  ;;  %v11185_v19 = vmov 1934713408   ;;  %s17786_s18 = smov 10   ;;  %s17770_s27 = smov 80  }
  0x4a   : > { %v159_v2 = vrot.slane %v158_v1, 4  ;;  %v329_v20 = vunpack.c.l.s4 %v11185_v19  ;;  %v11425_v22 = vshrl.u32 %v17774_v18, 7  ;;  %s17768_s29 = smov 90   ;;  %s17708_s30 = smov 32   ;;  %vm17975_vm1 = vcmask 80896  }
  0x4b   : > { %v165_v9 = vsel %vm157_vm0, %v11388_v8, inf  ;;  %v315_v21 = vunpack.c.0.s8 %v314_v17  ;;  %s17706_s2 = smov 42   ;;  %s17678_s3 = smov 112   ;;  %vm17985_vm2 = vcmask 162816   ;;  %vm17984_vm3 = vcmask 15360  }
  0x4c   : > { %v160_v3 = vmin.f32 %v158_v1, %v159_v2  ;;  %v166_v10 = vrot.slane %v165_v9, 4  ;;  %v330_v23 = vunpack.c.0.s8 %v329_v20  ;;  %s17676_s4 = smov 122   ;;  %s17674_s5 = smov 64   ;;  %vm17980_vm4 = vcmask 97280  }
  0x4d   : > { %v11428_v24 = vsub.s32 %v315_v21, %v11425_v22  ;;  %s17672_s12 = smov 74   ;;  %s17670_s13 = smov 16   ;;  %vm17983_vm5 = vcmask 244736   ;;  %vm17982_vm6 = vcmask 179200   ;;  %vm17979_vm7 = vcmask 326656  }
  0x4e   : > { %v161_v4 = vrot.slane %v160_v3, 2  ;;  %v167_v11 = vmin.f32 %v165_v9, %v166_v10  ;;  %v11431_v25 = vsub.s32 %v330_v23, %v11425_v22  ;;  %s17668_s15 = smov 26   ;;  %s17784_s16 = smov 20   ;;  %vm17976_vm8 = vcmask 261120  }
  0x4f   : > { %s17782_s17 = smov 30   ;;  %s17780_s22 = smov 40   ;;  %vm17981_vm9 = vcmask 408576   ;;  %vm17977_vm10 = vcmask 31744   ;;  %vm17978_vm11 = vcmask 113664   ;;  %vm17986_vm12 = vcmask 490496  }
  0x50   : > { %v162_v5 = vmin.f32 %v160_v3, %v161_v4  ;;  %v168_v12 = vrot.slane %v167_v11, 2  ;;  %s17778_s23 = smov 50   ;;  %s17766_s25 = smov 100   ;;  %vm17993_vm13 = vcmask 343040   ;;  %vm17994_vm14 = vcmask 572416  }
  0x51   : > { %s17760_s26 = smov 110   ;;  %s18118_s0 = smov 54   ;;  %vm17990_vm15 = vcmask 424960  }
  0x52   : > { %v163_v6 = vrot.slane %v162_v5, 1  ;;  %v169_v13 = vmin.f32 %v167_v11, %v168_v12  ;;  %s18121_s14 = smov 64   ;;  %s18122_s10 = smov 74  }
  0x53   : > { %s18125_s20 = smov 84   ;;  %s18126_s8 = smov 94  }
  0x54   : > { %v11384_v7 = vmin.f32 %v162_v5, %v163_v6  ;;  %v170_v14 = vrot.slane %v169_v13, 1  ;;  %s18129_s7 = smov 104   ;;  %s18130_s11 = smov 114  }
  0x55   : > { %s18133_s21 = smov 124   ;;  %s18134_s6 = smov 6  }
  0x56   : > { %187 = vbcast.lane.b32.xlu0 %v11384_v7, 256  ;;  %195 = vbcast.lane.b32.xlu1 %v11384_v7, 272  ;;  %v11406_v15 = vmin.f32 %v169_v13, %v170_v14  ;;  %s18137_s1 = smov 16   ;;  %s18138_s19 = smov 26  }
  0x57   : > { %s18141_s9 = smov 36   ;;  %s18142_s24 = smov 46  }
  0x58   : > { %s18145_s28 = smov 56  }
  0x5a   : > { %191 = vbcast.lane.b32.xlu0 %v11384_v7, 264  ;;  %199 = vbcast.lane.b32.xlu1 %v11384_v7, 280 }
  0x5e   : > { %203 = vbcast.lane.b32.xlu0 %v11384_v7, 288  ;;  %207 = vbcast.lane.b32.xlu1 %v11384_v7, 296 }
  0x62   : > { %211 = vbcast.lane.b32.xlu0 %v11384_v7, 304  ;;  %215 = vbcast.lane.b32.xlu1 %v11384_v7, 312 }
  0x66   : > { %219 = vbcast.lane.b32.xlu0 %v11384_v7, 320  ;;  %223 = vbcast.lane.b32.xlu1 %v11384_v7, 328 }
  0x6a   : > { %227 = vbcast.lane.b32.xlu0 %v11384_v7, 336  ;;  %231 = vbcast.lane.b32.xlu1 %v11384_v7, 344 }
  0x6e   : > { %235 = vbcast.lane.b32.xlu0 %v11384_v7, 352  ;;  %239 = vbcast.lane.b32.xlu1 %v11384_v7, 360 }
  0x72   : > { %243 = vbcast.lane.b32.xlu0 %v11384_v7, 368  ;;  %247 = vbcast.lane.b32.xlu1 %v11384_v7, 376 }
  0x76   : > { %250 = vbcast.lane.b32.xlu0 %v11406_v15, 256  ;;  %254 = vbcast.lane.b32.xlu1 %v11406_v15, 264 }
  0x7a   : > { %258 = vbcast.lane.b32.xlu0 %v11406_v15, 272  ;;  %262 = vbcast.lane.b32.xlu1 %v11406_v15, 280 }
  0x7e   : > { %266 = vbcast.lane.b32.xlu0 %v11406_v15, 288  ;;  %270 = vbcast.lane.b32.xlu1 %v11406_v15, 296 }
  0x82   : > { %274 = vbcast.lane.b32.xlu0 %v11406_v15, 304  ;;  %278 = vbcast.lane.b32.xlu1 %v11406_v15, 312 }
  0x86   : > { %282 = vbcast.lane.b32.xlu0 %v11406_v15, 320  ;;  %286 = vbcast.lane.b32.xlu1 %v11406_v15, 328 }
  0x8a   : > { %290 = vbcast.lane.b32.xlu0 %v11406_v15, 336  ;;  %294 = vbcast.lane.b32.xlu1 %v11406_v15, 344 }
  0x8e   : > { %298 = vbcast.lane.b32.xlu0 %v11406_v15, 352  ;;  %302 = vbcast.lane.b32.xlu1 %v11406_v15, 360 }
  0x92   : > { %306 = vbcast.lane.b32.xlu0 %v11406_v15, 368  ;;  %310 = vbcast.lane.b32.xlu1 %v11406_v15, 376 }
  0xc8   : > { %v188_v26 = vpop.permute.xlu0 %187  ;;  %v11433_v27 = vpop.permute.xlu1 %195 }
  0xc9   : > { %v319_v28 = vrot.slane %v188_v26, %v11428_v24  ;;  %v11441_v30 = vrot.slane %v11433_v27, %v11428_v24  ;;  %v312_v50 = vcombine.high %v188_v26, %v17830_v34  ;;  %v410_v62 = vcombine.high %v11433_v27, %v17830_v34 }
  0xcb   : > { %v11437_v29 = vrot.slane %v319_v28, %v11431_v25  ;;  %v432_v38 = vrot.slane %v11441_v30, %v11431_v25  ;;  %v327_v51 = vcombine.high %v319_v28, %v17830_v34  ;;  %v11490_v53 = vrot.slane %v312_v50, %v11428_v24 }
  0xcc   : > { %v192_v31 = vpop.permute.xlu0 %191  ;;  %v11443_v32 = vpop.permute.xlu1 %199  ;;  %v425_v63 = vcombine.high %v11441_v30, %v17830_v34  ;;  %v424_v2 = vrot.slane %v410_v62, %v11428_v24 }
  0xcd   : > { %v368_v33 = vrot.slane %v192_v31, %v11428_v24  ;;  %v357_v35 = vcombine.high %v11437_v29, %v17830_v34  ;;  %v11452_v37 = vrot.slane %v11443_v32, %v11428_v24  ;;  %v455_v41 = vcombine.high %v432_v38, %v17830_v34 }
  0xce   : > { %v341_v54 = vrot.slane %v327_v51, %v11431_v25  ;;  %v361_v55 = vcombine.high %v192_v31, %v17830_v34  ;;  %v349_v58 = vrot.slane %v11490_v53, %v11431_v25  ;;  %v439_v4 = vrot.slane %v425_v63, %v11431_v25 }
  0xcf   : > { %1881 = vrot.lane.b32.xlu0 %v357_v35, %s17786_s18  ;;  %v383_v36 = vrot.slane %v368_v33, %v11431_v25  ;;  %v481_v43 = vrot.slane %v11452_v37, %v11431_v25  ;;  %v376_v56 = vcombine.high %v368_v33, %v17830_v34  ;;  %v459_v6 = vcombine.high %v11443_v32, %v17830_v34 }
  0xd0   : > { %v11456_v39 = vpop.permute.xlu0 %203  ;;  %v11468_v44 = vpop.permute.xlu1 %207  ;;  %v358_v57 = vcombine.high %v341_v54, %v17830_v34  ;;  %v11503_v59 = vrot.slane %v361_v55, %v11428_v24  ;;  %v359_v60 = vcombine.high %v349_v58, %v17830_v34  ;;  %v474_v9 = vcombine.high %v11452_v37, %v17830_v34 }
  0xd1   : > { %1909 = vrot.lane.b32.xlu1 %v383_v36, %s17770_s27  ;;  %v406_v40 = vcombine.high %v383_v36, %v17830_v34  ;;  %v11464_v42 = vrot.slane %v11456_v39, %v11428_v24  ;;  %v504_v45 = vcombine.high %v481_v43, %v17830_v34  ;;  %v11475_v46 = vrot.slane %v11468_v44, %v11428_v24 }
  0xd2   : > { %v390_v61 = vrot.slane %v376_v56, %v11431_v25  ;;  %v398_v1 = vrot.slane %v11503_v59, %v11431_v25  ;;  %v456_v10 = vcombine.high %v439_v4, %v17830_v34  ;;  %v447_v11 = vrot.slane %v424_v2, %v11431_v25 }
  0xd3   : > { %1913 = vrot.lane.b32.xlu0 %v406_v40, %s17768_s29  ;;  %v530_v47 = vrot.slane %v11464_v42, %v11431_v25  ;;  %v579_v49 = vrot.slane %v11475_v46, %v11431_v25  ;;  %v473_v13 = vrot.slane %v459_v6, %v11428_v24  ;;  %v488_v16 = vrot.slane %v474_v9, %v11431_v25 }
  0xd4   : > { %v407_v0 = vcombine.high %v390_v61, %v17830_v34  ;;  %v408_v3 = vcombine.high %v398_v1, %v17830_v34  ;;  %v11523_v5 = vpop.permute.xlu0 %211  ;;  %v11532_v12 = vpop.permute.xlu1 %215  ;;  %v457_v14 = vcombine.high %v447_v11, %v17830_v34  ;;  %v508_v20 = vcombine.high %v11456_v39, %v17830_v34 }
  0xd5   : > { %1941 = vrot.lane.b32.xlu1 %v432_v38, %s17708_s30  ;;  %v553_v48 = vcombine.high %v530_v47, %v17830_v34  ;;  %v602_v52 = vcombine.high %v579_v49, %v17830_v34  ;;  %v523_v21 = vcombine.high %v11464_v42, %v17830_v34  ;;  %v505_v23 = vcombine.high %v488_v16, %v17830_v34  ;;  %s17716_s30 = smov 92  }
  0xd6   : > { %v496_v26 = vrot.slane %v473_v13, %v11431_v25  ;;  %v522_v28 = vrot.slane %v508_v20, %v11428_v24  ;;  %v342_v33 = vcombine.high %v11490_v53, %v17830_v34  ;;  %v572_v38 = vcombine.high %v11475_v46, %v17830_v34 }
  0xd7   : > { %1945 = vrot.lane.b32.xlu0 %v455_v41, %s17706_s2  ;;  %v537_v31 = vrot.slane %v523_v21, %v11431_v25  ;;  %v391_v40 = vcombine.high %v11503_v59, %v17830_v34  ;;  %v440_v46 = vcombine.high %v424_v2, %v17830_v34  ;;  %v489_v50 = vcombine.high %v473_v13, %v17830_v34  ;;  %s17712_s2 = smov 102  }
  0xd8   : > { %v11539_v17 = vpop.permute.xlu0 %219  ;;  %v11542_v19 = vpop.permute.xlu1 %223  ;;  %v506_v30 = vcombine.high %v496_v26, %v17830_v34  ;;  %v545_v36 = vrot.slane %v522_v28, %v11431_v25  ;;  %v356_v42 = vrot.slane %v342_v33, %v11431_v25  ;;  %v538_v55 = vcombine.high %v522_v28, %v17830_v34 }
  0xd9   : > { %1973 = vrot.lane.b32.xlu1 %v481_v43, %s17678_s3  ;;  %s17684_s3 = smov 82   ;;  %v554_v35 = vcombine.high %v537_v31, %v17830_v34  ;;  %v586_v43 = vrot.slane %v572_v38, %v11431_v25  ;;  %v557_v59 = vcombine.high %v11468_v44, %v17830_v34  ;;  %v613_v9 = vrot.slane %v11523_v5, %v11428_v24 }
  0xda   : > { %v555_v41 = vcombine.high %v545_v36, %v17830_v34 }
  0xdb   : > { %1977 = vrot.lane.b32.xlu0 %v504_v45, %s17676_s4  ;;  %s17682_s4 = smov 72   ;;  %v571_v63 = vrot.slane %v557_v59, %v11428_v24  ;;  %v603_v2 = vcombine.high %v586_v43, %v17830_v34  ;;  %v628_v21 = vrot.slane %v613_v9, %v11431_v25 }
  0xdc   : > { %v11552_v27 = vpop.permute.xlu0 %227  ;;  %v11558_v32 = vpop.permute.xlu1 %231 }
  0xdd   : > { %2005 = vrot.lane.b32.xlu1 %v530_v47, %s17674_s5  ;;  %s17680_s5 = smov 62   ;;  %v360_v47 = vcombine.high %v356_v42, %v17830_v34 }
  0xdf   : > { %2009 = vrot.lane.b32.xlu0 %v553_v48, %s17672_s12  ;;  %s17704_s12 = smov 52   ;;  %v405_v48 = vrot.slane %v391_v40, %v11431_v25  ;;  %v662_v40 = vrot.slane %v11532_v12, %v11428_v24 }
  0xe0   : > { %v11566_v37 = vpop.permute.xlu0 %235  ;;  %v11571_v39 = vpop.permute.xlu1 %239 }
  0xe1   : > { %2037 = vrot.lane.b32.xlu1 %v579_v49, %s17670_s13  ;;  %s17764_s13 = smov 2   ;;  %v409_v51 = vcombine.high %v405_v48, %v17830_v34 }
  0xe3   : > { %2041 = vrot.lane.b32.xlu0 %v602_v52, %s17668_s15  ;;  %s17762_s15 = smov 120   ;;  %v454_v52 = vrot.slane %v440_v46, %v11431_v25 }
  0xe4   : > { %v11580_v45 = vpop.permute.xlu0 %243  ;;  %v11586_v49 = vpop.permute.xlu1 %247 }
  0xe5   : > { %1885 = vrot.lane.b32.xlu1 %v341_v54, %s17784_s16  ;;  %v458_v56 = vcombine.high %v454_v52, %v17830_v34 }
  0xe7   : > { %1889 = vrot.lane.b32.xlu0 %v358_v57, %s17782_s17  ;;  %v503_v57 = vrot.slane %v489_v50, %v11431_v25 }
  0xe8   : > { %v11593_v53 = vpop.permute.xlu0 %250  ;;  %v11596_v54 = vpop.permute.xlu1 %254 }
  0xe9   : > { %1893 = vrot.lane.b32.xlu1 %v349_v58, %s17780_s22 }
  0xeb   : > { %1897 = vrot.lane.b32.xlu0 %v359_v60, %s17778_s23  ;;  %v507_v60 = vcombine.high %v503_v57, %v17830_v34 }
  0xec   : > { %v11603_v58 = vpop.permute.xlu0 %258  ;;  %v11610_v62 = vpop.permute.xlu1 %262 }
  0xed   : > { %1917 = vrot.lane.b32.xlu1 %v390_v61, %s17766_s25  ;;  %v552_v61 = vrot.slane %v538_v55, %v11431_v25 }
  0xef   : > { %1921 = vrot.lane.b32.xlu0 %v407_v0, %s17760_s26  ;;  %v556_v0 = vcombine.high %v552_v61, %v17830_v34 }
  0xf0   : > { %v11616_v44 = vpop.permute.xlu0 %266 }
  0xf1   : > { %1925 = vrot.lane.b32.xlu1 %v398_v1, %s17762_s15  ;;  %v11619_v1 = vpop.permute.xlu1 %270 }
  0xf3   : > { %1929 = vrot.lane.b32.xlu0 %v408_v3, %s17764_s13  ;;  %v594_v3 = vrot.slane %v571_v63, %v11431_v25 }
  0xf4   : > { %v11626_v6 = vpop.permute.xlu0 %274 }
  0xf5   : > { %1949 = vrot.lane.b32.xlu1 %v439_v4, %s17704_s12  ;;  %s17714_s12 = smov 12   ;;  %v587_v4 = vcombine.high %v571_v63, %v17830_v34  ;;  %v11633_v13 = vpop.permute.xlu1 %278 }
  0xf7   : > { %1953 = vrot.lane.b32.xlu0 %v456_v10, %s17680_s5  ;;  %s17686_s5 = smov 4   ;;  %v604_v10 = vcombine.high %v594_v3, %v17830_v34 }
  0xf9   : > { %1957 = vrot.lane.b32.xlu1 %v447_v11, %s17682_s4  ;;  %s17688_s4 = smov 14   ;;  %v601_v11 = vrot.slane %v587_v4, %v11431_v25 }
  0xfb   : > { %1961 = vrot.lane.b32.xlu0 %v457_v14, %s17684_s3  ;;  %s17690_s3 = smov 24   ;;  %v606_v14 = vcombine.high %v11523_v5, %v17830_v34  ;;  %v605_v20 = vcombine.high %v601_v11, %v17830_v34  ;;  %v651_v5 = vcombine.high %v628_v21, %v17830_v34 }
  0xfd   : > { %1981 = vrot.lane.b32.xlu1 %v488_v16, %s17686_s5  ;;  %s17692_s5 = smov 34   ;;  %v621_v16 = vcombine.high %v613_v9, %v17830_v34  ;;  %v620_v28 = vrot.slane %v606_v14, %v11428_v24 }
  0xff   : > { %1985 = vrot.lane.b32.xlu0 %v505_v23, %s17688_s4  ;;  %s17694_s4 = smov 84   ;;  %v11642_v23 = vpop.permute.xlu0 %282  ;;  %v636_v38 = vcombine.high %v620_v28, %v17830_v34 }
 0x101   : > { %1989 = vrot.lane.b32.xlu1 %v496_v26, %s17690_s3  ;;  %s17696_s3 = smov 94   ;;  %v11645_v26 = vpop.permute.xlu1 %286 }
 0x103   : > { %1993 = vrot.lane.b32.xlu0 %v506_v30, %s17692_s5  ;;  %s17698_s5 = smov 104   ;;  %v635_v30 = vrot.slane %v621_v16, %v11431_v25 }
 0x105   : > { %2013 = vrot.lane.b32.xlu1 %v537_v31, %s17694_s4  ;;  %s17700_s4 = smov 114   ;;  %v11652_v31 = vpop.permute.xlu0 %290  ;;  %v652_v33 = vcombine.high %v635_v30, %v17830_v34 }
 0x107   : > { %2017 = vrot.lane.b32.xlu0 %v554_v35, %s17696_s3  ;;  %s17702_s3 = smov 36   ;;  %v643_v35 = vrot.slane %v620_v28, %v11431_v25 }
 0x109   : > { %2021 = vrot.lane.b32.xlu1 %v545_v36, %s17698_s5  ;;  %s17772_s5 = smov 70   ;;  %v11657_v36 = vpop.permute.xlu1 %294 }
 0x10b   : > { %2025 = vrot.lane.b32.xlu0 %v555_v41, %s17700_s4  ;;  %s17775_s4 = smov 60   ;;  %v653_v41 = vcombine.high %v643_v35, %v17830_v34 }
 0x10d   : > { %2045 = vrot.lane.b32.xlu1 %v586_v43, %s17702_s3  ;;  %s17710_s3 = smov 22   ;;  %v11666_v43 = vpop.permute.xlu0 %298  ;;  %v11669_v46 = vpop.permute.xlu1 %302 }
 0x10f   : > { %1905 = vrot.lane.b32.xlu0 %v360_v47, %s17772_s5  ;;  %v655_v47 = vcombine.high %v11532_v12, %v17830_v34 }
 0x111   : > { %1901 = vrot.lane.b32.xlu1 %v356_v42, %s17775_s4  ;;  %v650_v42 = vrot.slane %v636_v38, %v11431_v25  ;;  %v669_v55 = vrot.slane %v655_v47, %v11428_v24  ;;  %v11682_v12 = vpop.permute.xlu1 %310  ;;  %v760_v47 = vrot.slane %v11542_v19, %v11428_v24 }
 0x113   : > { %1937 = vrot.lane.b32.xlu0 %v409_v51, %s17710_s3  ;;  %s17718_s3 = smov 54   ;;  %v654_v50 = vcombine.high %v650_v42, %v17830_v34  ;;  %v677_v51 = vrot.slane %v662_v40, %v11431_v25  ;;  %v685_v63 = vcombine.high %v669_v55, %v17830_v34 }
 0x115   : > { %1933 = vrot.lane.b32.xlu1 %v405_v48, %s17714_s12  ;;  %s17720_s12 = smov 6   ;;  %v670_v48 = vcombine.high %v662_v40, %v17830_v34  ;;  %v699_v9 = vrot.slane %v685_v63, %v11431_v25 }
 0x117   : > { %1969 = vrot.lane.b32.xlu0 %v458_v56, %s17712_s2  ;;  %s17732_s2 = smov 44   ;;  %v700_v56 = vcombine.high %v677_v51, %v17830_v34 }
 0x119   : > { %1965 = vrot.lane.b32.xlu1 %v454_v52, %s17716_s30  ;;  %s17722_s30 = smov 124   ;;  %v11678_v52 = vpop.permute.xlu0 %306 }
 0x11b   : > { %2001 = vrot.lane.b32.xlu0 %v507_v60, %s17718_s3  ;;  %s17724_s3 = smov 46  }
 0x11d   : > { %1997 = vrot.lane.b32.xlu1 %v503_v57, %s17732_s2  ;;  %s17738_s2 = smov 116   ;;  %v684_v57 = vrot.slane %v670_v48, %v11431_v25 }
 0x11f   : > { %2033 = vrot.lane.b32.xlu0 %v556_v0, %s17720_s12  ;;  %s17726_s12 = smov 56   ;;  %v701_v60 = vcombine.high %v684_v57, %v17830_v34  ;;  %v711_v0 = vrot.slane %v11539_v17, %v11428_v24 }
 0x121   : > { %2029 = vrot.lane.b32.xlu1 %v552_v61, %s17722_s30  ;;  %s17728_s30 = smov 66   ;;  %v692_v61 = vrot.slane %v669_v55, %v11431_v25  ;;  %v11707_v14 = vrot.slane %v711_v0, %v11431_v25 }
 0x123   : > { %2049 = vrot.lane.b32.xlu0 %v603_v2, %s17724_s3  ;;  %s17730_s3 = smov 76   ;;  %v702_v4 = vcombine.high %v692_v61, %v17830_v34  ;;  %18078 = vst [vmem:[#allocation22_spill] sm:$0xff] %v11707_v14 }
 0x125   : > { %2053 = vrot.lane.b32.xlu1 %v594_v3, %s17726_s12  ;;  %s17748_s12 = smov 86  }
 0x127   : > { %2057 = vrot.lane.b32.xlu0 %v604_v10, %s17728_s30  ;;  %s17734_s30 = smov 96   ;;  %v704_v10 = vcombine.high %v11539_v17, %v17830_v34 }
 0x129   : > { %2061 = vrot.lane.b32.xlu1 %v601_v11, %s17730_s3  ;;  %s17736_s3 = smov 106   ;;  %v719_v11 = vcombine.high %v711_v0, %v17830_v34  ;;  %v718_v28 = vrot.slane %v704_v10, %v11428_v24 }
 0x12b   : > { %2065 = vrot.lane.b32.xlu0 %v605_v20, %s17748_s12  ;;  %s17758_s12 = smov 68  }
 0x12d   : > { %2069 = vrot.lane.b32.xlu1 %v628_v21, %s17734_s30  ;;  %s17740_s30 = smov 126   ;;  %v703_v21 = vcombine.high %v699_v9, %v17830_v34 }
 0x12f   : > { %2073 = vrot.lane.b32.xlu0 %v651_v5, %s17736_s3  ;;  %s17742_s3 = smov 8   ;;  %v749_v5 = vcombine.high %v11707_v14, %v17830_v34 }
 0x131   : > { %2077 = vrot.lane.b32.xlu1 %v635_v30, %s17738_s2  ;;  %s17744_s2 = smov 18   ;;  %v733_v30 = vrot.slane %v719_v11, %v11431_v25 }
 0x133   : > { %2081 = vrot.lane.b32.xlu0 %v652_v33, %s17740_s30  ;;  %s17746_s30 = smov 28   ;;  %v750_v40 = vcombine.high %v733_v30, %v17830_v34 }
 0x135   : > { %2085 = vrot.lane.b32.xlu1 %v643_v35, %s17742_s3  ;;  %s17794_s3 = smov 38   ;;  %v734_v35 = vcombine.high %v718_v28, %v17830_v34 }
 0x137   : > { %2089 = vrot.lane.b32.xlu0 %v653_v41, %s17744_s2  ;;  %s17750_s2 = smov 48   ;;  %v741_v41 = vrot.slane %v718_v28, %v11431_v25 }
 0x139   : > { %2093 = vrot.lane.b32.xlu1 %v650_v42, %s17746_s30  ;;  %s17752_s30 = smov 58  }
 0x13b   : > { %2097 = vrot.lane.b32.xlu0 %v654_v50, %s17794_s3  ;;  %v751_v50 = vcombine.high %v741_v41, %v17830_v34  ;;  %s18117_s3 = smov 44  }
 0x13d   : > { %2101 = vrot.lane.b32.xlu1 %v677_v51, %s17750_s2  ;;  %s17754_s2 = smov 78   ;;  %v748_v51 = vrot.slane %v734_v35, %v11431_v25 }
 0x13f   : > { %2105 = vrot.lane.b32.xlu0 %v700_v56, %s17752_s30  ;;  %s17756_s30 = smov 88   ;;  %v753_v56 = vcombine.high %v11542_v19, %v17830_v34  ;;  %v752_v63 = vcombine.high %v748_v51, %v17830_v34 }
 0x141   : > { %2109 = vrot.lane.b32.xlu1 %v684_v57, %s17758_s12  ;;  %v11688_v59 = vpop.permute.xlu0 %1881  ;;  %s17788_s12 = smov 118   ;;  %v768_v57 = vcombine.high %v760_v47, %v17830_v34 }
 0x143   : > { %v11695_v2 = vpop.permute.xlu1 %1909  ;;  %2113 = vrot.lane.b32.xlu0 %v701_v60, %s17754_s2  ;;  %s17792_s2 = smov 98   ;;  %v775_v60 = vrot.slane %v760_v47, %v11431_v25  ;;  %v782_v10 = vrot.slane %v768_v57, %v11431_v25 }
 0x144   : > { %18076 = vst [vmem:[#allocation20_spill] sm:$0xff] %v11695_v2 }
 0x145   : > { %2117 = vrot.lane.b32.xlu1 %v692_v61, %s17756_s30  ;;  %v11699_v3 = vpop.permute.xlu0 %1913  ;;  %s17790_s30 = smov 108   ;;  %v798_v19 = vcombine.high %v775_v60, %v17830_v34 }
 0x146   : > { %18077 = vst [vmem:[#allocation21_spill] sm:$0xff] %v11699_v3 }
 0x147   : > { %v11709_v16 = vpop.permute.xlu1 %1941  ;;  %2121 = vrot.lane.b32.xlu0 %v702_v4, %s17792_s2  ;;  %v767_v4 = vrot.slane %v753_v56, %v11428_v24  ;;  %v802_v56 = vcombine.high %v11552_v27, %v17830_v34  ;;  %s18116_s2 = smov 34  }
 0x149   : > { %2125 = vrot.lane.b32.xlu1 %v699_v9, %s17790_s30  ;;  %v11713_v20 = vpop.permute.xlu0 %1945  ;;  %s18115_s30 = smov 24  }
 0x14b   : > { %v11717_v17 = vpop.permute.xlu1 %1973  ;;  %2129 = vrot.lane.b32.xlu0 %v703_v21, %s17788_s12  ;;  %v783_v21 = vcombine.high %v767_v4, %v17830_v34  ;;  %s18112_s12 = smov 14  }
 0x14c   : > { %18079 = vst [vmem:[#allocation23_spill] sm:$0xff] %v11717_v17 }
 0x14d   : > { %2133 = vrot.lane.b32.xlu1 %v749_v5, %s17786_s18  ;;  %v11724_v33 = vpop.permute.xlu0 %1977  ;;  %v799_v5 = vcombine.high %v782_v10, %v17830_v34  ;;  %s18111_s18 = smov 4  }
 0x14f   : > { %v11727_v38 = vpop.permute.xlu1 %2005  ;;  %2137 = vrot.lane.b32.xlu0 %v733_v30, %s17784_s16  ;;  %v790_v30 = vrot.slane %v767_v4, %v11431_v25  ;;  %s18108_s16 = smov 122  }
 0x150   : > { %18080 = vst [vmem:[#allocation24_spill] sm:$0xff] %v11727_v38 }
 0x151   : > { %2141 = vrot.lane.b32.xlu1 %v750_v40, %s17782_s17  ;;  %v11733_v42 = vpop.permute.xlu0 %2009  ;;  %v809_v40 = vrot.slane %v11552_v27, %v11428_v24  ;;  %v800_v47 = vcombine.high %v790_v30, %v17830_v34  ;;  %s18107_s17 = smov 112  }
 0x152   : > { %18081 = vst [vmem:[#allocation25_spill] sm:$0xff] %v11733_v42 }
 0x153   : > { %v11737_v48 = vpop.permute.xlu1 %2037  ;;  %2145 = vrot.lane.b32.xlu0 %v741_v41, %s17780_s22  ;;  %v817_v57 = vcombine.high %v809_v40, %v17830_v34  ;;  %s18104_s22 = smov 102  }
 0x154   : > { %18082 = vst [vmem:[#allocation26_spill] sm:$0xff] %v11737_v48 }
 0x155   : > { %2149 = vrot.lane.b32.xlu1 %v751_v50, %s17778_s23  ;;  %v11743_v55 = vpop.permute.xlu0 %2041  ;;  %v797_v50 = vrot.slane %v783_v21, %v11431_v25  ;;  %s18103_s23 = smov 92  }
 0x156   : > { %18083 = vst [vmem:[#allocation27_spill] sm:$0xff] %v11743_v55 }
 0x157   : > { %v11749_v61 = vpop.permute.xlu1 %1885  ;;  %2153 = vrot.lane.b32.xlu0 %v748_v51, %s17775_s4  ;;  %v801_v4 = vcombine.high %v797_v50, %v17830_v34  ;;  %s18100_s4 = smov 82  }
 0x159   : > { %2157 = vrot.lane.b32.xlu1 %v752_v63, %s17772_s5  ;;  %v11754_v0 = vpop.permute.xlu0 %1889  ;;  %s18099_s5 = smov 72  }
 0x15b   : > { %v11757_v9 = vpop.permute.xlu1 %1893  ;;  %2161 = vrot.lane.b32.xlu0 %v775_v60, %s17770_s27  ;;  %v824_v60 = vrot.slane %v809_v40, %v11431_v25  ;;  %s18096_s27 = smov 62  }
 0x15d   : > { %2165 = vrot.lane.b32.xlu1 %v798_v19, %s17768_s29  ;;  %v11763_v11 = vpop.permute.xlu0 %1897  ;;  %v847_v27 = vcombine.high %v824_v60, %v17830_v34  ;;  %s18095_s29 = smov 52  }
 0x15e   : > { %18084 = vst [vmem:[#allocation28_spill] sm:$0xff] %v11763_v11 }
 0x15f   : > { %v11766_v28 = vpop.permute.xlu1 %1917  ;;  %2169 = vrot.lane.b32.xlu0 %v782_v10, %s17766_s25  ;;  %v816_v10 = vrot.slane %v802_v56, %v11428_v24  ;;  %s18093_s25 = smov 42  }
 0x160   : > { %18085 = vst [vmem:[#allocation29_spill] sm:$0xff] %v11766_v28 }
 0x161   : > { %2173 = vrot.lane.b32.xlu1 %v799_v5, %s17760_s26  ;;  %v11772_v35 = vpop.permute.xlu0 %1921  ;;  %s18088_s26 = smov 12   ;;  %v831_v5 = vrot.slane %v817_v57, %v11431_v25  ;;  %v832_v40 = vcombine.high %v816_v10, %v17830_v34  ;;  %v839_v56 = vrot.slane %v816_v10, %v11431_v25  ;;  %v858_v57 = vrot.slane %v11558_v32, %v11428_v24 }
 0x162   : > { %18086 = vst [vmem:[#allocation30_spill] sm:$0xff] %v11772_v35  ;;  %v851_v10 = vcombine.high %v11558_v32, %v17830_v34 }
 0x163   : > { %v11776_v41 = vpop.permute.xlu1 %1925  ;;  %2177 = vrot.lane.b32.xlu0 %v790_v30, %s17762_s15  ;;  %s18089_s15 = smov 22   ;;  %v846_v18 = vrot.slane %v832_v40, %v11431_v25  ;;  %v873_v14 = vrot.slane %v858_v57, %v11431_v25 }
 0x165   : > { %2181 = vrot.lane.b32.xlu1 %v800_v47, %s17764_s13  ;;  %v11782_v51 = vpop.permute.xlu0 %1929  ;;  %s18092_s13 = smov 32   ;;  %v850_v38 = vcombine.high %v846_v18, %v17830_v34  ;;  %v896_v32 = vcombine.high %v873_v14, %v17830_v34 }
 0x167   : > { %v11788_v63 = vpop.permute.xlu1 %1949  ;;  %2185 = vrot.lane.b32.xlu0 %v797_v50, %s18088_s26  ;;  %v848_v50 = vcombine.high %v831_v5, %v17830_v34 }
 0x168   : > { %18087 = vst [vmem:[#allocation31_spill] sm:$0xff] %v11788_v63 }
 0x169   : > { %2189 = vrot.lane.b32.xlu1 %v801_v4, %s18089_s15  ;;  %v11793_v19 = vpop.permute.xlu0 %1953 }
 0x16a   : > { %18090 = vst [vmem:[#allocation32_spill] sm:$0xff] %v11793_v19 }
 0x16b   : > { %v11796_v21 = vpop.permute.xlu1 %1957  ;;  %2193 = vrot.lane.b32.xlu0 %v824_v60, %s18092_s13 }
 0x16c   : > { %18091 = vst [vmem:[#allocation33_spill] sm:$0xff] %v11796_v21 }
 0x16d   : > { %2197 = vrot.lane.b32.xlu1 %v847_v27, %s18093_s25  ;;  %v11802_v30 = vpop.permute.xlu0 %1961  ;;  %v849_v27 = vcombine.high %v839_v56, %v17830_v34 }
 0x16e   : > { %18094 = vst [vmem:[#allocation34_spill] sm:$0xff] %v11802_v30 }
 0x16f   : > { %v11805_v47 = vpop.permute.xlu1 %1981  ;;  %2201 = vrot.lane.b32.xlu0 %v831_v5, %s18095_s29 }
 0x171   : > { %2205 = vrot.lane.b32.xlu1 %v848_v50, %s18096_s27  ;;  %v11811_v4 = vpop.permute.xlu0 %1985  ;;  %v866_v50 = vcombine.high %v858_v57, %v17830_v34 }
 0x172   : > { %18097 = vst [vmem:[#allocation35_spill] sm:$0xff] %v11811_v4 }
 0x173   : > { %v11815_v60 = vpop.permute.xlu1 %1989  ;;  %2209 = vrot.lane.b32.xlu0 %v839_v56, %s18099_s5  ;;  %v865_v56 = vrot.slane %v851_v10, %v11428_v24  ;;  %v880_v57 = vrot.slane %v866_v50, %v11431_v25 }
 0x174   : > { %18098 = vst [vmem:[#allocation36_spill] sm:$0xff] %v11815_v60 }
 0x175   : > { %2213 = vrot.lane.b32.xlu1 %v849_v27, %s18100_s4  ;;  %v11821_v5 = vpop.permute.xlu0 %1993  ;;  %v888_v10 = vrot.slane %v865_v56, %v11431_v25 }
 0x176   : > { %18101 = vst [vmem:[#allocation37_spill] sm:$0xff] %v11821_v5 }
 0x177   : > { %v11827_v42 = vpop.permute.xlu1 %2013  ;;  %2217 = vrot.lane.b32.xlu0 %v846_v18, %s18103_s23  ;;  %v881_v18 = vcombine.high %v865_v56, %v17830_v34  ;;  %v900_v56 = vcombine.high %v11566_v37, %v17830_v34 }
 0x178   : > { %18102 = vst [vmem:[#allocation38_spill] sm:$0xff] %v11827_v42 }
 0x179   : > { %2221 = vrot.lane.b32.xlu1 %v850_v38, %s18104_s22  ;;  %v11832_v40 = vpop.permute.xlu0 %2017  ;;  %v897_v38 = vcombine.high %v880_v57, %v17830_v34 }
 0x17a   : > { %18105 = vst [vmem:[#allocation39_spill] sm:$0xff] %v11832_v40 }
 0x17b   : > { %v11835_v27 = vpop.permute.xlu1 %2021  ;;  %2225 = vrot.lane.b32.xlu0 %v873_v14, %s18107_s17  ;;  %v907_v14 = vrot.slane %v11566_v37, %v11428_v24 }
 0x17c   : > { %18106 = vst [vmem:[#allocation40_spill] sm:$0xff] %v11835_v27 }
 0x17d   : > { %2229 = vrot.lane.b32.xlu1 %v896_v32, %s18108_s16  ;;  %v11841_v42 = vpop.permute.xlu0 %2025  ;;  %v898_v32 = vcombine.high %v888_v10, %v17830_v34  ;;  %v922_v40 = vrot.slane %v907_v14, %v11431_v25 }
 0x17e   : > { %18109 = vst [vmem:[#allocation41_spill] sm:$0xff] %v11841_v42  ;;  %v895_v42 = vrot.slane %v881_v18, %v11431_v25 }
 0x17f   : > { %v11844_v55 = vpop.permute.xlu1 %2045  ;;  %2233 = vrot.lane.b32.xlu0 %v880_v57, %s18111_s18  ;;  %v945_v37 = vcombine.high %v922_v40, %v17830_v34 }
 0x180   : > { %18110 = vst [vmem:[#allocation42_spill] sm:$0xff] %v11844_v55  ;;  %v899_v48 = vcombine.high %v895_v42, %v17830_v34 }
 0x181   : > { %2237 = vrot.lane.b32.xlu1 %v897_v38, %s18112_s12  ;;  %v11850_v27 = vpop.permute.xlu0 %1905  ;;  %v915_v38 = vcombine.high %v907_v14, %v17830_v34 }
 0x182   : > { %18113 = vst [vmem:[#allocation43_spill] sm:$0xff] %v11850_v27 }
 0x183   : > { %v11854_v50 = vpop.permute.xlu1 %1901  ;;  %2241 = vrot.lane.b32.xlu0 %v888_v10, %s18115_s30  ;;  %v914_v10 = vrot.slane %v900_v56, %v11428_v24  ;;  %v929_v14 = vrot.slane %v915_v38, %v11431_v25 }
 0x184   : > { %18114 = vst [vmem:[#allocation44_spill] sm:$0xff] %v11854_v50 }
 0x185   : > { %2245 = vrot.lane.b32.xlu1 %v898_v32, %s18116_s2  ;;  %v11860_v57 = vpop.permute.xlu0 %1937  ;;  %v937_v56 = vrot.slane %v914_v10, %v11431_v25 }
 0x187   : > { %v11866_v55 = vpop.permute.xlu1 %1933  ;;  %2249 = vrot.lane.b32.xlu0 %v895_v42, %s18117_s3  ;;  %v930_v42 = vcombine.high %v914_v10, %v17830_v34  ;;  %v949_v10 = vcombine.high %v11571_v39, %v17830_v34 }
 0x189   : > { %2253 = vrot.lane.b32.xlu1 %v899_v48, %s18118_s0  ;;  %v11871_v18 = vpop.permute.xlu0 %1969  ;;  %v946_v48 = vcombine.high %v929_v14, %v17830_v34 }
 0x18a   : > { %18119 = vst [vmem:[#allocation45_spill] sm:$0xff] %v11871_v18 }
 0x18b   : > { %v11874_v32 = vpop.permute.xlu1 %1965  ;;  %2257 = vrot.lane.b32.xlu0 %v922_v40, %s18121_s14  ;;  %v956_v40 = vrot.slane %v11571_v39, %v11428_v24 }
 0x18c   : > { %18120 = vst [vmem:[#allocation46_spill] sm:$0xff] %v11874_v32 }
 0x18d   : > { %2261 = vrot.lane.b32.xlu1 %v945_v37, %s18122_s10  ;;  %v11880_v17 = vpop.permute.xlu0 %2001  ;;  %v947_v37 = vcombine.high %v937_v56, %v17830_v34 }
 0x18e   : > { %18123 = vst [vmem:[#allocation47_spill] sm:$0xff] %v11880_v17  ;;  %v944_v17 = vrot.slane %v930_v42, %v11431_v25 }
 0x18f   : > { %v11883_v35 = vpop.permute.xlu1 %1997  ;;  %2265 = vrot.lane.b32.xlu0 %v929_v14, %s18125_s20 }
 0x190   : > { %18124 = vst [vmem:[#allocation48_spill] sm:$0xff] %v11883_v35  ;;  %v971_v35 = vrot.slane %v956_v40, %v11431_v25 }
 0x191   : > { %2269 = vrot.lane.b32.xlu1 %v946_v48, %s18126_s8  ;;  %v11889_v5 = vpop.permute.xlu0 %2033  ;;  %v964_v48 = vcombine.high %v956_v40, %v17830_v34 }
 0x192   : > { %18127 = vst [vmem:[#allocation49_spill] sm:$0xff] %v11889_v5  ;;  %v994_v39 = vcombine.high %v971_v35, %v17830_v34 }
 0x193   : > { %v11893_v38 = vpop.permute.xlu1 %2029  ;;  %2273 = vrot.lane.b32.xlu0 %v937_v56, %s18129_s7  ;;  %v963_v56 = vrot.slane %v949_v10, %v11428_v24  ;;  %v978_v40 = vrot.slane %v964_v48, %v11431_v25 }
 0x194   : > { %18128 = vst [vmem:[#allocation50_spill] sm:$0xff] %v11893_v38  ;;  %v948_v38 = vcombine.high %v944_v17, %v17830_v34 }
 0x195   : > { %2277 = vrot.lane.b32.xlu1 %v947_v37, %s18130_s11  ;;  %v11899_v14 = vpop.permute.xlu0 %2049  ;;  %v986_v10 = vrot.slane %v963_v56, %v11431_v25 }
 0x196   : > { %18131 = vst [vmem:[#allocation51_spill] sm:$0xff] %v11899_v14 }
 0x197   : > { %v11905_v5 = vpop.permute.xlu1 %2053  ;;  %2281 = vrot.lane.b32.xlu0 %v944_v17, %s18133_s21  ;;  %v979_v17 = vcombine.high %v963_v56, %v17830_v34  ;;  %v998_v56 = vcombine.high %v11580_v45, %v17830_v34 }
 0x198   : > { %18132 = vst [vmem:[#allocation52_spill] sm:$0xff] %v11905_v5 }
 0x199   : > { %2285 = vrot.lane.b32.xlu1 %v948_v38, %s18134_s6  ;;  %v11910_v42 = vpop.permute.xlu0 %2057  ;;  %v995_v38 = vcombine.high %v978_v40, %v17830_v34 }
 0x19a   : > { %18135 = vst [vmem:[#allocation53_spill] sm:$0xff] %v11910_v42 }
 0x19b   : > { %v11913_v37 = vpop.permute.xlu1 %2061  ;;  %2289 = vrot.lane.b32.xlu0 %v971_v35, %s18137_s1  ;;  %v1005_v35 = vrot.slane %v11580_v45, %v11428_v24 }
 0x19c   : > { %18136 = vst [vmem:[#allocation54_spill] sm:$0xff] %v11913_v37 }
 0x19d   : > { %2293 = vrot.lane.b32.xlu1 %v994_v39, %s18138_s19  ;;  %v11919_v5 = vpop.permute.xlu0 %2065  ;;  %v996_v39 = vcombine.high %v986_v10, %v17830_v34  ;;  %s18154_s19 = smov 106  }
 0x19e   : > { %18139 = vst [vmem:[#allocation55_spill] sm:$0xff] %v11919_v5 }
 0x19f   : > { %v11922_v14 = vpop.permute.xlu1 %2069  ;;  %2297 = vrot.lane.b32.xlu0 %v978_v40, %s18141_s9  ;;  %s18146_s9 = smov 66  }
 0x1a0   : > { %18140 = vst [vmem:[#allocation56_spill] sm:$0xff] %v11922_v14  ;;  %v993_v14 = vrot.slane %v979_v17, %v11431_v25 }
 0x1a1   : > { %2301 = vrot.lane.b32.xlu1 %v995_v38, %s18142_s24  ;;  %v11928_v37 = vpop.permute.xlu0 %2073  ;;  %v1013_v38 = vcombine.high %v1005_v35, %v17830_v34  ;;  %s18149_s24 = smov 76  }
 0x1a2   : > { %18143 = vst [vmem:[#allocation57_spill] sm:$0xff] %v11928_v37  ;;  %v1020_v37 = vrot.slane %v1005_v35, %v11431_v25 }
 0x1a3   : > { %v11932_v48 = vpop.permute.xlu1 %2077  ;;  %2305 = vrot.lane.b32.xlu0 %v986_v10, %s18145_s28  ;;  %s18150_s28 = smov 86   ;;  %v1012_v10 = vrot.slane %v998_v56, %v11428_v24  ;;  %v1027_v35 = vrot.slane %v1013_v38, %v11431_v25 }
 0x1a4   : > { %18144 = vst [vmem:[#allocation58_spill] sm:$0xff] %v11932_v48  ;;  %v997_v48 = vcombine.high %v993_v14, %v17830_v34  ;;  %v1043_v45 = vcombine.high %v1020_v37, %v17830_v34 }
 0x1a5   : > { %2309 = vrot.lane.b32.xlu1 %v996_v39, %s18146_s9  ;;  %v11938_v40 = vpop.permute.xlu0 %2081  ;;  %s18153_s9 = smov 96   ;;  %v1035_v56 = vrot.slane %v1012_v10, %v11431_v25 }
 0x1a6   : > { %18147 = vst [vmem:[#allocation59_spill] sm:$0xff] %v11938_v40 }
 0x1a7   : > { %v11944_v5 = vpop.permute.xlu1 %2085  ;;  %2313 = vrot.lane.b32.xlu0 %v993_v14, %s18149_s24  ;;  %v1028_v14 = vcombine.high %v1012_v10, %v17830_v34  ;;  %s18158_s24 = smov 126   ;;  %v1047_v10 = vcombine.high %v11586_v49, %v17830_v34 }
 0x1a8   : > { %18148 = vst [vmem:[#allocation60_spill] sm:$0xff] %v11944_v5 }
 0x1a9   : > { %2317 = vrot.lane.b32.xlu1 %v997_v48, %s18150_s28  ;;  %v11949_v17 = vpop.permute.xlu0 %2089  ;;  %s18157_s28 = smov 116   ;;  %v1044_v48 = vcombine.high %v1027_v35, %v17830_v34 }
 0x1aa   : > { %18151 = vst [vmem:[#allocation61_spill] sm:$0xff] %v11949_v17 }
 0x1ab   : > { %v11952_v39 = vpop.permute.xlu1 %2093  ;;  %2321 = vrot.lane.b32.xlu0 %v1020_v37, %s18153_s9  ;;  %v1054_v37 = vrot.slane %v11586_v49, %v11428_v24  ;;  %s18170_s9 = smov 58  }
 0x1ac   : > { %18152 = vst [vmem:[#allocation62_spill] sm:$0xff] %v11952_v39 }
 0x1ad   : > { %2325 = vrot.lane.b32.xlu1 %v1043_v45, %s18154_s19  ;;  %v11958_v40 = vpop.permute.xlu0 %2097  ;;  %s18161_s19 = smov 8   ;;  %v1045_v45 = vcombine.high %v1035_v56, %v17830_v34 }
 0x1ae   : > { %18155 = vst [vmem:[#allocation63_spill] sm:$0xff] %v11958_v40 }
 0x1af   : > { %v11961_v5 = vpop.permute.xlu1 %2101  ;;  %2329 = vrot.lane.b32.xlu0 %v1027_v35, %s18157_s28  ;;  %s18162_s28 = smov 18  }
 0x1b0   : > { %18156 = vst [vmem:[#allocation64_spill] sm:$0xff] %v11961_v5  ;;  %v1042_v5 = vrot.slane %v1028_v14, %v11431_v25 }
 0x1b1   : > { %2333 = vrot.lane.b32.xlu1 %v1044_v48, %s18158_s24  ;;  %v11967_v39 = vpop.permute.xlu0 %2105  ;;  %v1062_v48 = vcombine.high %v1054_v37, %v17830_v34  ;;  %s18165_s24 = smov 28  }
 0x1b2   : > { %18159 = vst [vmem:[#allocation65_spill] sm:$0xff] %v11967_v39  ;;  %v1069_v39 = vrot.slane %v1054_v37, %v11431_v25 }
 0x1b3   : > { %v11971_v38 = vpop.permute.xlu1 %2109  ;;  %2337 = vrot.lane.b32.xlu0 %v1035_v56, %s18161_s19  ;;  %s18166_s19 = smov 38   ;;  %v1061_v56 = vrot.slane %v1047_v10, %v11428_v24  ;;  %v1076_v37 = vrot.slane %v1062_v48, %v11431_v25 }
 0x1b4   : > { %18160 = vst [vmem:[#allocation66_spill] sm:$0xff] %v11971_v38  ;;  %v1046_v38 = vcombine.high %v1042_v5, %v17830_v34  ;;  %v1092_v49 = vcombine.high %v1069_v39, %v17830_v34 }
 0x1b5   : > { %2341 = vrot.lane.b32.xlu1 %v1045_v45, %s18162_s28  ;;  %v11977_v35 = vpop.permute.xlu0 %2113  ;;  %s18169_s28 = smov 48   ;;  %v1084_v10 = vrot.slane %v1061_v56, %v11431_v25 }
 0x1b6   : > { %18163 = vst [vmem:[#allocation67_spill] sm:$0xff] %v11977_v35 }
 0x1b7   : > { %v11983_v40 = vpop.permute.xlu1 %2117  ;;  %2345 = vrot.lane.b32.xlu0 %v1042_v5, %s18165_s24  ;;  %v1077_v5 = vcombine.high %v1061_v56, %v17830_v34  ;;  %s18191_s24 = smov 40  }
 0x1b8   : > { %18164 = vst [vmem:[#allocation68_spill] sm:$0xff] %v11983_v40 }
 0x1b9   : > { %2349 = vrot.lane.b32.xlu1 %v1046_v38, %s18166_s19  ;;  %v11988_v14 = vpop.permute.xlu0 %2121  ;;  %s18173_s19 = smov 68   ;;  %v1093_v38 = vcombine.high %v1076_v37, %v17830_v34 }
 0x1ba   : > { %18167 = vst [vmem:[#allocation69_spill] sm:$0xff] %v11988_v14 }
 0x1bb   : > { %v11991_v45 = vpop.permute.xlu1 %2125  ;;  %2353 = vrot.lane.b32.xlu0 %v1069_v39, %s18169_s28  ;;  %s18174_s28 = smov 78  }
 0x1bc   : > { %18168 = vst [vmem:[#allocation70_spill] sm:$0xff] %v11991_v45  ;;  %v1103_v45 = vrot.slane %v11593_v53, %v11428_v24 }
 0x1bd   : > { %2357 = vrot.lane.b32.xlu1 %v1092_v49, %s18170_s9  ;;  %v11997_v40 = vpop.permute.xlu0 %2129  ;;  %s18177_s9 = smov 88   ;;  %v1094_v49 = vcombine.high %v1084_v10, %v17830_v34 }
 0x1be   : > { %18171 = vst [vmem:[#allocation71_spill] sm:$0xff] %v11997_v40  ;;  %v1091_v40 = vrot.slane %v1077_v5, %v11431_v25  ;;  %v1111_v56 = vcombine.high %v1103_v45, %v17830_v34  ;;  %v12019_v14 = vrot.slane %v1103_v45, %v11431_v25 }
 0x1bf   : > { %v12000_v35 = vpop.permute.xlu1 %2133  ;;  %2361 = vrot.lane.b32.xlu0 %v1076_v37, %s18173_s19  ;;  %v1096_v37 = vcombine.high %v11593_v53, %v17830_v34  ;;  %s18179_s19 = smov 98  }
 0x1c0   : > { %18172 = vst [vmem:[#allocation72_spill] sm:$0xff] %v12000_v35  ;;  %18178 = vst [vmem:[#allocation75_spill] sm:$0xff] %v12019_v14  ;;  %v1141_v45 = vcombine.high %v12019_v14, %v17830_v34 }
 0x1c1   : > { %2365 = vrot.lane.b32.xlu1 %v1093_v38, %s18174_s28  ;;  %v12008_v39 = vpop.permute.xlu0 %2137  ;;  %s18182_s28 = smov 108   ;;  %v1110_v5 = vrot.slane %v1096_v37, %v11428_v24 }
 0x1c2   : > { %18175 = vst [vmem:[#allocation73_spill] sm:$0xff] %v12008_v39 }
 0x1c3   : > { %v12010_v48 = vpop.permute.xlu1 %2141  ;;  %2369 = vrot.lane.b32.xlu0 %v1084_v10, %s18177_s9  ;;  %v1095_v10 = vcombine.high %v1091_v40, %v17830_v34  ;;  %s18183_s9 = smov 118  }
 0x1c4   : > { %18176 = vst [vmem:[#allocation74_spill] sm:$0xff] %v12010_v48  ;;  %v1125_v48 = vrot.slane %v1111_v56, %v11431_v25  ;;  %v1152_v56 = vrot.slane %v11596_v54, %v11428_v24 }
 0x1c5   : > { %2373 = vrot.lane.b32.xlu1 %v1094_v49, %s18179_s19  ;;  %v12022_v38 = vpop.permute.xlu0 %2145  ;;  %s18186_s19 = smov 10  }
 0x1c6   : > { %18180 = vst [vmem:[#allocation76_spill] sm:$0xff] %v12022_v38  ;;  %v1142_v37 = vcombine.high %v1125_v48, %v17830_v34 }
 0x1c7   : > { %v12024_v39 = vpop.permute.xlu1 %2149  ;;  %2377 = vrot.lane.b32.xlu0 %v1091_v40, %s18182_s28  ;;  %s18187_s28 = smov 20  }
 0x1c8   : > { %18181 = vst [vmem:[#allocation77_spill] sm:$0xff] %v12024_v39  ;;  %v1126_v39 = vcombine.high %v1110_v5, %v17830_v34 }
 0x1c9   : > { %2381 = vrot.lane.b32.xlu1 %v1095_v10, %s18183_s9  ;;  %v12030_v53 = vpop.permute.xlu0 %2153  ;;  %v1133_v10 = vrot.slane %v1110_v5, %v11431_v25  ;;  %s18190_s9 = smov 30   ;;  %v1160_v5 = vcombine.high %v1152_v56, %v17830_v34 }
 0x1ca   : > { %18184 = vst [vmem:[#allocation78_spill] sm:$0xff] %v12030_v53 }
 0x1cb   : > { %v12035_v49 = vpop.permute.xlu1 %2157  ;;  %2385 = vrot.lane.b32.xlu0 %v1141_v45, %s18186_s19  ;;  %v1143_v14 = vcombine.high %v1133_v10, %v17830_v34  ;;  %s18203_s19 = smov 100  }
 0x1cc   : > { %18185 = vst [vmem:[#allocation79_spill] sm:$0xff] %v12035_v49  ;;  %v1140_v49 = vrot.slane %v1126_v39, %v11431_v25 }
 0x1cd   : > { %2389 = vrot.lane.b32.xlu1 %v1125_v48, %s18187_s28  ;;  %v12040_v40 = vpop.permute.xlu0 %2161  ;;  %s18194_s28 = smov 50   ;;  %v1145_v48 = vcombine.high %v11596_v54, %v17830_v34 }
 0x1ce   : > { %18188 = vst [vmem:[#allocation80_spill] sm:$0xff] %v12040_v40 }
 0x1cf   : > { %v12044_v53 = vpop.permute.xlu1 %2165  ;;  %2393 = vrot.lane.b32.xlu0 %v1142_v37, %s18190_s9  ;;  %v1167_v37 = vrot.slane %v1152_v56, %v11431_v25  ;;  %s18195_s9 = smov 60   ;;  %v1159_v39 = vrot.slane %v1145_v48, %v11428_v24  ;;  %v1174_v56 = vrot.slane %v1160_v5, %v11431_v25  ;;  %v1201_v5 = vrot.slane %v11603_v58, %v11428_v24 }
 0x1d0   : > { %18189 = vst [vmem:[#allocation81_spill] sm:$0xff] %v12044_v53 }
 0x1d1   : > { %2397 = vrot.lane.b32.xlu1 %v1133_v10, %s18191_s24  ;;  %v12050_v45 = vpop.permute.xlu0 %2169  ;;  %s18198_s24 = smov 70   ;;  %v1190_v54 = vcombine.high %v1167_v37, %v17830_v34  ;;  %v1182_v48 = vrot.slane %v1159_v39, %v11431_v25 }
 0x1d2   : > { %18192 = vst [vmem:[#allocation82_spill] sm:$0xff] %v12050_v45  ;;  %v1144_v45 = vcombine.high %v1140_v49, %v17830_v34 }
 0x1d3   : > { %v12054_v40 = vpop.permute.xlu1 %2173  ;;  %2401 = vrot.lane.b32.xlu0 %v1143_v14, %s18194_s28  ;;  %s18199_s28 = smov 80  }
 0x1d4   : > { %18193 = vst [vmem:[#allocation83_spill] sm:$0xff] %v12054_v40 }
 0x1d5   : > { %2405 = vrot.lane.b32.xlu1 %v1140_v49, %s18195_s9  ;;  %v12062_v53 = vpop.permute.xlu0 %2177  ;;  %s18202_s9 = smov 90   ;;  %v1175_v49 = vcombine.high %v1159_v39, %v17830_v34  ;;  %v1194_v39 = vcombine.high %v11603_v58, %v17830_v34 }
 0x1d6   : > { %18196 = vst [vmem:[#allocation84_spill] sm:$0xff] %v12062_v53 }
 0x1d7   : > { %v12065_v10 = vpop.permute.xlu1 %2181  ;;  %2409 = vrot.lane.b32.xlu0 %v1144_v45, %s18198_s24  ;;  %v1191_v45 = vcombine.high %v1174_v56, %v17830_v34  ;;  %s18207_s24 = smov 120  }
 0x1d8   : > { %18197 = vst [vmem:[#allocation85_spill] sm:$0xff] %v12065_v10 }
 0x1d9   : > { %2413 = vrot.lane.b32.xlu1 %v1167_v37, %s18199_s28  ;;  %v12070_v14 = vpop.permute.xlu0 %2185  ;;  %s18206_s28 = smov 110  }
 0x1da   : > { %18200 = vst [vmem:[#allocation86_spill] sm:$0xff] %v12070_v14 }
 0x1db   : > { %v12074_v40 = vpop.permute.xlu1 %2189  ;;  %2417 = vrot.lane.b32.xlu0 %v1190_v54, %s18202_s9  ;;  %v1192_v54 = vcombine.high %v1182_v48, %v17830_v34 }
 0x1dc   : > { %18201 = vst [vmem:[#allocation87_spill] sm:$0xff] %v12074_v40  ;;  %v1189_v40 = vrot.slane %v1175_v49, %v11431_v25  ;;  %v1208_v49 = vrot.slane %v1194_v39, %v11428_v24 }
 0x1dd   : > { %2421 = vrot.lane.b32.xlu1 %v1174_v56, %s18203_s19  ;;  %v12079_v53 = vpop.permute.xlu0 %2193  ;;  %s18210_s19 = smov 2   ;;  %v1209_v56 = vcombine.high %v1201_v5, %v17830_v34 }
 0x1de   : > { %18204 = vst [vmem:[#allocation88_spill] sm:$0xff] %v12079_v53  ;;  %v1231_v39 = vrot.slane %v1208_v49, %v11431_v25 }
 0x1df   : > { %v12083_v10 = vpop.permute.xlu1 %2197  ;;  %2425 = vrot.lane.b32.xlu0 %v1191_v45, %s18206_s28  ;;  %v1216_v45 = vrot.slane %v1201_v5, %v11431_v25  ;;  %v1223_v5 = vrot.slane %v1209_v56, %v11431_v25  ;;  %v1250_v56 = vrot.slane %v11610_v62, %v11428_v24 }
 0x1e0   : > { %18205 = vst [vmem:[#allocation89_spill] sm:$0xff] %v12083_v10 }
 0x1e1   : > { %2429 = vrot.lane.b32.xlu1 %v1182_v48, %s18207_s24  ;;  %v12089_v37 = vpop.permute.xlu0 %2201  ;;  %v1239_v58 = vcombine.high %v1216_v45, %v17830_v34 }
 0x1e2   : > { %18208 = vst [vmem:[#allocation90_spill] sm:$0xff] %v12089_v37  ;;  %v1193_v37 = vcombine.high %v1189_v40, %v17830_v34 }
 0x1e3   : > { %v12093_v53 = vpop.permute.xlu1 %2205  ;;  %2433 = vrot.lane.b32.xlu0 %v1192_v54, %s18210_s19 }
 0x1e4   : > { %18209 = vst [vmem:[#allocation91_spill] sm:$0xff] %v12093_v53 }
 0x1e5   : > { %2437 = vrot.lane.b32.xlu1 %v1189_v40, %s18088_s26  ;;  %v12101_v10 = vpop.permute.xlu0 %2209  ;;  %v1224_v40 = vcombine.high %v1208_v49, %v17830_v34  ;;  %v1243_v49 = vcombine.high %v11610_v62, %v17830_v34 }
 0x1e6   : > { %18211 = vst [vmem:[#allocation92_spill] sm:$0xff] %v12101_v10 }
 0x1e7   : > { %v12104_v48 = vpop.permute.xlu1 %2213  ;;  %2441 = vrot.lane.b32.xlu0 %v1193_v37, %s18089_s15  ;;  %v1240_v37 = vcombine.high %v1223_v5, %v17830_v34 }
 0x1e8   : > { %18212 = vst [vmem:[#allocation93_spill] sm:$0xff] %v12104_v48 }
 0x1e9   : > { %2445 = vrot.lane.b32.xlu1 %v1216_v45, %s18092_s13  ;;  %v12109_v54 = vpop.permute.xlu0 %2217 }
 0x1ea   : > { %18213 = vst [vmem:[#allocation94_spill] sm:$0xff] %v12109_v54 }
 0x1eb   : > { %v12113_v53 = vpop.permute.xlu1 %2221  ;;  %2449 = vrot.lane.b32.xlu0 %v1239_v58, %s18093_s25  ;;  %v1241_v58 = vcombine.high %v1231_v39, %v17830_v34 }
 0x1ec   : > { %18214 = vst [vmem:[#allocation95_spill] sm:$0xff] %v12113_v53  ;;  %v1238_v53 = vrot.slane %v1224_v40, %v11431_v25  ;;  %v1257_v40 = vrot.slane %v1243_v49, %v11428_v24 }
 0x1ed   : > { %2453 = vrot.lane.b32.xlu1 %v1223_v5, %s18095_s29  ;;  %v12118_v48 = vpop.permute.xlu0 %2225  ;;  %v1258_v5 = vcombine.high %v1250_v56, %v17830_v34 }
 0x1ee   : > { %18215 = vst [vmem:[#allocation96_spill] sm:$0xff] %v12118_v48  ;;  %v1280_v49 = vrot.slane %v1257_v40, %v11431_v25 }
 0x1ef   : > { %v12122_v10 = vpop.permute.xlu1 %2229  ;;  %2457 = vrot.lane.b32.xlu0 %v1240_v37, %s18096_s27  ;;  %v1265_v37 = vrot.slane %v1250_v56, %v11431_v25  ;;  %v1272_v56 = vrot.slane %v1258_v5, %v11431_v25  ;;  %v1299_v5 = vrot.slane %v11616_v44, %v11428_v24 }
 0x1f0   : > { %18216 = vst [vmem:[#allocation97_spill] sm:$0xff] %v12122_v10  ;;  %v1242_v10 = vcombine.high %v1238_v53, %v17830_v34 }
 0x1f1   : > { %2461 = vrot.lane.b32.xlu1 %v1231_v39, %s18099_s5  ;;  %v12128_v45 = vpop.permute.xlu0 %2233  ;;  %v1288_v62 = vcombine.high %v1265_v37, %v17830_v34 }
 0x1f2   : > { %18217 = vst [vmem:[#allocation98_spill] sm:$0xff] %v12128_v45 }
 0x1f3   : > { %v12132_v48 = vpop.permute.xlu1 %2237  ;;  %2465 = vrot.lane.b32.xlu0 %v1241_v58, %s18100_s4 }
 0x1f4   : > { %18218 = vst [vmem:[#allocation99_spill] sm:$0xff] %v12132_v48 }
 0x1f5   : > { %2469 = vrot.lane.b32.xlu1 %v1238_v53, %s18103_s23  ;;  %v12140_v54 = vpop.permute.xlu0 %2241  ;;  %v1273_v53 = vcombine.high %v1257_v40, %v17830_v34  ;;  %v1292_v40 = vcombine.high %v11616_v44, %v17830_v34 }
 0x1f6   : > { %18219 = vst [vmem:[#allocation100_spill] sm:$0xff] %v12140_v54 }
 0x1f7   : > { %v12143_v39 = vpop.permute.xlu1 %2245  ;;  %2473 = vrot.lane.b32.xlu0 %v1242_v10, %s18104_s22  ;;  %v1289_v10 = vcombine.high %v1272_v56, %v17830_v34 }
 0x1f8   : > { %18220 = vst [vmem:[#allocation101_spill] sm:$0xff] %v12143_v39 }
 0x1f9   : > { %2477 = vrot.lane.b32.xlu1 %v1265_v37, %s18107_s17  ;;  %v12148_v58 = vpop.permute.xlu0 %2249 }
 0x1fa   : > { %18221 = vst [vmem:[#allocation102_spill] sm:$0xff] %v12148_v58 }
 0x1fb   : > { %v12152_v48 = vpop.permute.xlu1 %2253  ;;  %2481 = vrot.lane.b32.xlu0 %v1288_v62, %s18108_s16  ;;  %v1290_v62 = vcombine.high %v1280_v49, %v17830_v34 }
 0x1fc   : > { %18222 = vst [vmem:[#allocation103_spill] sm:$0xff] %v12152_v48  ;;  %v1287_v48 = vrot.slane %v1273_v53, %v11431_v25  ;;  %v1306_v53 = vrot.slane %v1292_v40, %v11428_v24 }
 0x1fd   : > { %2485 = vrot.lane.b32.xlu1 %v1272_v56, %s18111_s18  ;;  %v12157_v39 = vpop.permute.xlu0 %2257  ;;  %v1307_v56 = vcombine.high %v1299_v5, %v17830_v34 }
 0x1fe   : > { %18223 = vst [vmem:[#allocation104_spill] sm:$0xff] %v12157_v39  ;;  %v1329_v40 = vrot.slane %v1306_v53, %v11431_v25 }
 0x1ff   : > { %v12161_v54 = vpop.permute.xlu1 %2261  ;;  %2489 = vrot.lane.b32.xlu0 %v1289_v10, %s18112_s12  ;;  %v1314_v10 = vrot.slane %v1299_v5, %v11431_v25  ;;  %v1321_v5 = vrot.slane %v1307_v56, %v11431_v25  ;;  %v1348_v56 = vrot.slane %v11619_v1, %v11428_v24 }
 0x200   : > { %18224 = vst [vmem:[#allocation105_spill] sm:$0xff] %v12161_v54 }
 0x201   : > { %2493 = vrot.lane.b32.xlu1 %v1280_v49, %s18115_s30  ;;  %v12167_v37 = vpop.permute.xlu0 %2265  ;;  %v1337_v44 = vcombine.high %v1314_v10, %v17830_v34 }
 0x202   : > { %18225 = vst [vmem:[#allocation106_spill] sm:$0xff] %v12167_v37  ;;  %v1291_v37 = vcombine.high %v1287_v48, %v17830_v34 }
 0x203   : > { %v12171_v39 = vpop.permute.xlu1 %2269  ;;  %2497 = vrot.lane.b32.xlu0 %v1290_v62, %s18116_s2 }
 0x204   : > { %18226 = vst [vmem:[#allocation107_spill] sm:$0xff] %v12171_v39 }
 0x205   : > { %2501 = vrot.lane.b32.xlu1 %v1287_v48, %s18117_s3  ;;  %v12179_v54 = vpop.permute.xlu0 %2273  ;;  %v1322_v48 = vcombine.high %v1306_v53, %v17830_v34  ;;  %v1341_v53 = vcombine.high %v11619_v1, %v17830_v34 }
 0x206   : > { %18227 = vst [vmem:[#allocation108_spill] sm:$0xff] %v12179_v54 }
 0x207   : > { %v12182_v49 = vpop.permute.xlu1 %2277  ;;  %2505 = vrot.lane.b32.xlu0 %v1291_v37, %s18118_s0  ;;  %v1338_v37 = vcombine.high %v1321_v5, %v17830_v34 }
 0x208   : > { %18228 = vst [vmem:[#allocation109_spill] sm:$0xff] %v12182_v49 }
 0x209   : > { %2509 = vrot.lane.b32.xlu1 %v1314_v10, %s18121_s14  ;;  %v12187_v62 = vpop.permute.xlu0 %2281 }
 0x20a   : > { %18229 = vst [vmem:[#allocation110_spill] sm:$0xff] %v12187_v62  ;;  %v1336_v62 = vrot.slane %v1322_v48, %v11431_v25  ;;  %v1355_v48 = vrot.slane %v1341_v53, %v11428_v24 }
 0x20b   : > { %v12191_v39 = vpop.permute.xlu1 %2285  ;;  %2513 = vrot.lane.b32.xlu0 %v1337_v44, %s18122_s10  ;;  %v1339_v44 = vcombine.high %v1329_v40, %v17830_v34 }
 0x20c   : > { %18230 = vst [vmem:[#allocation111_spill] sm:$0xff] %v12191_v39  ;;  %v1378_v53 = vrot.slane %v1355_v48, %v11431_v25 }
 0x20d   : > { %2517 = vrot.lane.b32.xlu1 %v1321_v5, %s18125_s20  ;;  %v12196_v49 = vpop.permute.xlu0 %2289  ;;  %v1356_v5 = vcombine.high %v1348_v56, %v17830_v34 }
 0x20e   : > { %18231 = vst [vmem:[#allocation112_spill] sm:$0xff] %v12196_v49 }
 0x20f   : > { %v12200_v54 = vpop.permute.xlu1 %2293  ;;  %2521 = vrot.lane.b32.xlu0 %v1338_v37, %s18126_s8  ;;  %v1363_v37 = vrot.slane %v1348_v56, %v11431_v25  ;;  %v1370_v56 = vrot.slane %v1356_v5, %v11431_v25  ;;  %v1397_v5 = vrot.slane %v11626_v6, %v11428_v24 }
 0x210   : > { %18232 = vst [vmem:[#allocation113_spill] sm:$0xff] %v12200_v54 }
 0x211   : > { %2525 = vrot.lane.b32.xlu1 %v1329_v40, %s18129_s7  ;;  %v12206_v10 = vpop.permute.xlu0 %2297  ;;  %v1386_v1 = vcombine.high %v1363_v37, %v17830_v34 }
 0x212   : > { %18233 = vst [vmem:[#allocation114_spill] sm:$0xff] %v12206_v10  ;;  %v1340_v10 = vcombine.high %v1336_v62, %v17830_v34 }
 0x213   : > { %v12210_v49 = vpop.permute.xlu1 %2301  ;;  %2529 = vrot.lane.b32.xlu0 %v1339_v44, %s18130_s11  ;;  %s18240_s11 = smov 36  }
 0x214   : > { %18234 = vst [vmem:[#allocation115_spill] sm:$0xff] %v12210_v49 }
 0x215   : > { %2533 = vrot.lane.b32.xlu1 %v1336_v62, %s18133_s21  ;;  %v12218_v54 = vpop.permute.xlu0 %2305  ;;  %s18239_s21 = smov 26   ;;  %v1371_v62 = vcombine.high %v1355_v48, %v17830_v34  ;;  %v1390_v48 = vcombine.high %v11626_v6, %v17830_v34 }
 0x216   : > { %18235 = vst [vmem:[#allocation116_spill] sm:$0xff] %v12218_v54 }
 0x217   : > { %v12221_v40 = vpop.permute.xlu1 %2309  ;;  %2537 = vrot.lane.b32.xlu0 %v1340_v10, %s18134_s6  ;;  %v1387_v10 = vcombine.high %v1370_v56, %v17830_v34  ;;  %s18244_s6 = smov 56  }
 0x218   : > { %18236 = vst [vmem:[#allocation117_spill] sm:$0xff] %v12221_v40 }
 0x219   : > { %2541 = vrot.lane.b32.xlu1 %v1363_v37, %s18137_s1  ;;  %v12226_v44 = vpop.permute.xlu0 %2313  ;;  %s18243_s1 = smov 46  }
 0x21a   : > { %18237 = vst [vmem:[#allocation118_spill] sm:$0xff] %v12226_v44 }
 0x21b   : > { %v12230_v49 = vpop.permute.xlu1 %2317  ;;  %2545 = vrot.lane.b32.xlu0 %v1386_v1, %s18239_s21  ;;  %v1388_v1 = vcombine.high %v1378_v53, %v17830_v34  ;;  %s18256_s21 = smov 116  }
 0x21c   : > { %18238 = vst [vmem:[#allocation119_spill] sm:$0xff] %v12230_v49  ;;  %v1385_v49 = vrot.slane %v1371_v62, %v11431_v25  ;;  %v1404_v62 = vrot.slane %v1390_v48, %v11428_v24 }
 0x21d   : > { %2549 = vrot.lane.b32.xlu1 %v1370_v56, %s18240_s11  ;;  %v12235_v40 = vpop.permute.xlu0 %2321  ;;  %s18247_s11 = smov 66   ;;  %v1405_v56 = vcombine.high %v1397_v5, %v17830_v34 }
 0x21e   : > { %18241 = vst [vmem:[#allocation120_spill] sm:$0xff] %v12235_v40  ;;  %v1427_v48 = vrot.slane %v1404_v62, %v11431_v25 }
 0x21f   : > { %v12239_v54 = vpop.permute.xlu1 %2325  ;;  %2553 = vrot.lane.b32.xlu0 %v1387_v10, %s18243_s1  ;;  %v1412_v10 = vrot.slane %v1397_v5, %v11431_v25  ;;  %s18248_s1 = smov 76   ;;  %v1419_v5 = vrot.slane %v1405_v56, %v11431_v25  ;;  %v1446_v56 = vrot.slane %v11633_v13, %v11428_v24 }
 0x220   : > { %18242 = vst [vmem:[#allocation121_spill] sm:$0xff] %v12239_v54 }
 0x221   : > { %2557 = vrot.lane.b32.xlu1 %v1378_v53, %s18244_s6  ;;  %v12245_v37 = vpop.permute.xlu0 %2329  ;;  %s18251_s6 = smov 86   ;;  %v1435_v6 = vcombine.high %v1412_v10, %v17830_v34 }
 0x222   : > { %18245 = vst [vmem:[#allocation122_spill] sm:$0xff] %v12245_v37  ;;  %v1389_v37 = vcombine.high %v1385_v49, %v17830_v34 }
 0x223   : > { %v12249_v40 = vpop.permute.xlu1 %2333  ;;  %2561 = vrot.lane.b32.xlu0 %v1388_v1, %s18247_s11  ;;  %s18252_s11 = smov 96  }
 0x224   : > { %18246 = vst [vmem:[#allocation123_spill] sm:$0xff] %v12249_v40 }
 0x225   : > { %2565 = vrot.lane.b32.xlu1 %v1385_v49, %s18248_s1  ;;  %v12257_v54 = vpop.permute.xlu0 %2337  ;;  %s18255_s1 = smov 106   ;;  %v1420_v49 = vcombine.high %v1404_v62, %v17830_v34  ;;  %v1439_v62 = vcombine.high %v11633_v13, %v17830_v34 }
 0x226   : > { %18249 = vst [vmem:[#allocation124_spill] sm:$0xff] %v12257_v54 }
 0x227   : > { %v12260_v53 = vpop.permute.xlu1 %2341  ;;  %2569 = vrot.lane.b32.xlu0 %v1389_v37, %s18251_s6  ;;  %v1436_v37 = vcombine.high %v1419_v5, %v17830_v34  ;;  %s18260_s6 = smov 8  }
 0x228   : > { %18250 = vst [vmem:[#allocation125_spill] sm:$0xff] %v12260_v53 }
 0x229   : > { %2573 = vrot.lane.b32.xlu1 %v1412_v10, %s18252_s11  ;;  %v12265_v1 = vpop.permute.xlu0 %2345  ;;  %s18259_s11 = smov 126  }
 0x22a   : > { %18253 = vst [vmem:[#allocation126_spill] sm:$0xff] %v12265_v1 }
 0x22b   : > { %v12269_v44 = vpop.permute.xlu1 %2349  ;;  %2577 = vrot.lane.b32.xlu0 %v1435_v6, %s18255_s1  ;;  %v1437_v6 = vcombine.high %v1427_v48, %v17830_v34  ;;  %s18272_s1 = smov 68  }
 0x22c   : > { %18254 = vst [vmem:[#allocation127_spill] sm:$0xff] %v12269_v44  ;;  %v1434_v44 = vrot.slane %v1420_v49, %v11431_v25  ;;  %v1453_v49 = vrot.slane %v1439_v62, %v11428_v24 }
 0x22d   : > { %2581 = vrot.lane.b32.xlu1 %v1419_v5, %s18256_s21  ;;  %v12274_v53 = vpop.permute.xlu0 %2353  ;;  %s18263_s21 = smov 18   ;;  %v1454_v5 = vcombine.high %v1446_v56, %v17830_v34 }
 0x22e   : > { %18257 = vst [vmem:[#allocation128_spill] sm:$0xff] %v12274_v53  ;;  %v1476_v62 = vrot.slane %v1453_v49, %v11431_v25 }
 0x22f   : > { %v12278_v40 = vpop.permute.xlu1 %2357  ;;  %2585 = vrot.lane.b32.xlu0 %v1436_v37, %s18259_s11  ;;  %v1461_v37 = vrot.slane %v1446_v56, %v11431_v25  ;;  %s18264_s11 = smov 28   ;;  %v1468_v56 = vrot.slane %v1454_v5, %v11431_v25 }
 0x230   : > { %18258 = vst [vmem:[#allocation129_spill] sm:$0xff] %v12278_v40 }
 0x231   : > { %2589 = vrot.lane.b32.xlu1 %v1427_v48, %s18260_s6  ;;  %v12284_v10 = vpop.permute.xlu0 %2361  ;;  %s18267_s6 = smov 38   ;;  %v1484_v13 = vcombine.high %v1461_v37, %v17830_v34 }
 0x232   : > { %18261 = vst [vmem:[#allocation130_spill] sm:$0xff] %v12284_v10  ;;  %v1438_v10 = vcombine.high %v1434_v44, %v17830_v34 }
 0x233   : > { %v12288_v53 = vpop.permute.xlu1 %2365  ;;  %2593 = vrot.lane.b32.xlu0 %v1437_v6, %s18263_s21  ;;  %s18268_s21 = smov 48  }
 0x234   : > { %18262 = vst [vmem:[#allocation131_spill] sm:$0xff] %v12288_v53 }
 0x235   : > { %2597 = vrot.lane.b32.xlu1 %v1434_v44, %s18264_s11  ;;  %v12296_v40 = vpop.permute.xlu0 %2369  ;;  %s18271_s11 = smov 58   ;;  %v1469_v44 = vcombine.high %v1453_v49, %v17830_v34 }
 0x236   : > { %18265 = vst [vmem:[#allocation132_spill] sm:$0xff] %v12296_v40 }
 0x237   : > { %v12299_v48 = vpop.permute.xlu1 %2373  ;;  %2601 = vrot.lane.b32.xlu0 %v1438_v10, %s18267_s6  ;;  %v1485_v10 = vcombine.high %v1468_v56, %v17830_v34  ;;  %s18276_s6 = smov 88  }
 0x238   : > { %18266 = vst [vmem:[#allocation133_spill] sm:$0xff] %v12299_v48 }
 0x239   : > { %2605 = vrot.lane.b32.xlu1 %v1461_v37, %s18268_s21  ;;  %v12304_v6 = vpop.permute.xlu0 %2377  ;;  %s18275_s21 = smov 78  }
 0x23a   : > { %18269 = vst [vmem:[#allocation134_spill] sm:$0xff] %v12304_v6  ;;  %v1495_v6 = vrot.slane %v11642_v23, %v11428_v24 }
 0x23b   : > { %v12308_v53 = vpop.permute.xlu1 %2381  ;;  %2609 = vrot.lane.b32.xlu0 %v1484_v13, %s18271_s11  ;;  %v1486_v13 = vcombine.high %v1476_v62, %v17830_v34  ;;  %s18285_s11 = smov 10  }
 0x23c   : > { %18270 = vst [vmem:[#allocation135_spill] sm:$0xff] %v12308_v53  ;;  %v1483_v53 = vrot.slane %v1469_v44, %v11431_v25  ;;  %v1503_v49 = vcombine.high %v1495_v6, %v17830_v34 }
 0x23d   : > { %2613 = vrot.lane.b32.xlu1 %v1468_v56, %s18272_s1  ;;  %v12313_v48 = vpop.permute.xlu0 %2385  ;;  %v1488_v56 = vcombine.high %v11642_v23, %v17830_v34  ;;  %s18280_s1 = smov 98  }
 0x23e   : > { %18273 = vst [vmem:[#allocation136_spill] sm:$0xff] %v12313_v48  ;;  %v12331_v48 = vrot.slane %v1495_v6, %v11431_v25  ;;  %v1517_v6 = vrot.slane %v1503_v49, %v11431_v25  ;;  %v1544_v49 = vrot.slane %v11645_v26, %v11428_v24 }
 0x23f   : > { %v12319_v37 = vpop.permute.xlu1 %2389  ;;  %2617 = vrot.lane.b32.xlu0 %v1485_v10, %s18275_s21  ;;  %s18281_s21 = smov 108   ;;  %v1502_v44 = vrot.slane %v1488_v56, %v11428_v24 }
 0x240   : > { %18274 = vst [vmem:[#allocation137_spill] sm:$0xff] %v12319_v37  ;;  %18278 = vst [vmem:[#allocation139_spill] sm:$0xff] %v12331_v48  ;;  %v1533_v23 = vcombine.high %v12331_v48, %v17830_v34 }
 0x241   : > { %2621 = vrot.lane.b32.xlu1 %v1476_v62, %s18276_s6  ;;  %v12323_v5 = vpop.permute.xlu0 %2393  ;;  %v1487_v62 = vcombine.high %v1483_v53, %v17830_v34  ;;  %s18284_s6 = smov 118   ;;  %v1525_v56 = vrot.slane %v1502_v44, %v11431_v25 }
 0x242   : > { %18277 = vst [vmem:[#allocation138_spill] sm:$0xff] %v12323_v5 }
 0x243   : > { %v12333_v40 = vpop.permute.xlu1 %2397  ;;  %2625 = vrot.lane.b32.xlu0 %v1486_v13, %s18280_s1  ;;  %v1535_v48 = vcombine.high %v1525_v56, %v17830_v34 }
 0x244   : > { %18279 = vst [vmem:[#allocation140_spill] sm:$0xff] %v12333_v40  ;;  %v1518_v40 = vcombine.high %v1502_v44, %v17830_v34  ;;  %v1537_v44 = vcombine.high %v11645_v26, %v17830_v34 }
 0x245   : > { %2629 = vrot.lane.b32.xlu1 %v1483_v53, %s18281_s21  ;;  %v12337_v10 = vpop.permute.xlu0 %2401  ;;  %s18288_s21 = smov 20   ;;  %v1534_v53 = vcombine.high %v1517_v6, %v17830_v34 }
 0x246   : > { %18282 = vst [vmem:[#allocation141_spill] sm:$0xff] %v12337_v10 }
 0x247   : > { %v12341_v5 = vpop.permute.xlu1 %2405  ;;  %2633 = vrot.lane.b32.xlu0 %v1487_v62, %s18284_s6  ;;  %s18289_s6 = smov 30  }
 0x248   : > { %18283 = vst [vmem:[#allocation142_spill] sm:$0xff] %v12341_v5 }
 0x249   : > { %2637 = vrot.lane.b32.xlu1 %v1533_v23, %s18285_s11  ;;  %v12348_v13 = vpop.permute.xlu0 %2409  ;;  %s18292_s11 = smov 40  }
 0x24a   : > { %18286 = vst [vmem:[#allocation143_spill] sm:$0xff] %v12348_v13 }
 0x24b   : > { %v12351_v10 = vpop.permute.xlu1 %2413  ;;  %2641 = vrot.lane.b32.xlu0 %v1517_v6, %s18288_s21  ;;  %s18293_s21 = smov 50  }
 0x24c   : > { %18287 = vst [vmem:[#allocation144_spill] sm:$0xff] %v12351_v10  ;;  %v1532_v10 = vrot.slane %v1518_v40, %v11431_v25 }
 0x24d   : > { %2645 = vrot.lane.b32.xlu1 %v1534_v53, %s18289_s6  ;;  %v12357_v62 = vpop.permute.xlu0 %2417  ;;  %v1552_v53 = vcombine.high %v1544_v49, %v17830_v34  ;;  %s18296_s6 = smov 60  }
 0x24e   : > { %18290 = vst [vmem:[#allocation145_spill] sm:$0xff] %v12357_v62  ;;  %v1559_v62 = vrot.slane %v1544_v49, %v11431_v25 }
 0x24f   : > { %v12361_v23 = vpop.permute.xlu1 %2421  ;;  %2649 = vrot.lane.b32.xlu0 %v1525_v56, %s18292_s11  ;;  %s18297_s11 = smov 70   ;;  %v1566_v49 = vrot.slane %v1552_v53, %v11431_v25 }
 0x250   : > { %18291 = vst [vmem:[#allocation146_spill] sm:$0xff] %v12361_v23  ;;  %v1536_v23 = vcombine.high %v1532_v10, %v17830_v34  ;;  %v1582_v26 = vcombine.high %v1559_v62, %v17830_v34 }
 0x251   : > { %2653 = vrot.lane.b32.xlu1 %v1535_v48, %s18293_s21  ;;  %v12367_v6 = vpop.permute.xlu0 %2425  ;;  %v1551_v48 = vrot.slane %v1537_v44, %v11428_v24  ;;  %s18300_s21 = smov 80  }
 0x252   : > { %18294 = vst [vmem:[#allocation147_spill] sm:$0xff] %v12367_v6 }
 0x253   : > { %v12373_v13 = vpop.permute.xlu1 %2429  ;;  %2657 = vrot.lane.b32.xlu0 %v1532_v10, %s18296_s6  ;;  %v1567_v10 = vcombine.high %v1551_v48, %v17830_v34  ;;  %v1574_v44 = vrot.slane %v1551_v48, %v11431_v25  ;;  %v1586_v48 = vcombine.high %v11652_v31, %v17830_v34 }
 0x254   : > { %18295 = vst [vmem:[#allocation148_spill] sm:$0xff] %v12373_v13 }
 0x255   : > { %2661 = vrot.lane.b32.xlu1 %v1536_v23, %s18297_s11  ;;  %v12378_v40 = vpop.permute.xlu0 %2433  ;;  %s18303_s11 = smov 100   ;;  %v1583_v23 = vcombine.high %v1566_v49, %v17830_v34 }
 0x256   : > { %18298 = vst [vmem:[#allocation149_spill] sm:$0xff] %v12378_v40 }
 0x257   : > { %v12381_v56 = vpop.permute.xlu1 %2437  ;;  %2665 = vrot.lane.b32.xlu0 %v1559_v62, %s18300_s21  ;;  %v1593_v62 = vrot.slane %v11652_v31, %v11428_v24 }
 0x258   : > { %18299 = vst [vmem:[#allocation150_spill] sm:$0xff] %v12381_v56 }
 0x259   : > { %2669 = vrot.lane.b32.xlu1 %v1582_v26, %s18202_s9  ;;  %v12387_v6 = vpop.permute.xlu0 %2441  ;;  %v1584_v26 = vcombine.high %v1574_v44, %v17830_v34 }
 0x25a   : > { %18301 = vst [vmem:[#allocation151_spill] sm:$0xff] %v12387_v6 }
 0x25b   : > { %v12390_v5 = vpop.permute.xlu1 %2445  ;;  %2673 = vrot.lane.b32.xlu0 %v1566_v49, %s18303_s11 }
 0x25c   : > { %18302 = vst [vmem:[#allocation152_spill] sm:$0xff] %v12390_v5  ;;  %v1581_v5 = vrot.slane %v1567_v10, %v11431_v25 }
 0x25d   : > { %2677 = vrot.lane.b32.xlu1 %v1583_v23, %s18206_s28  ;;  %v12396_v56 = vpop.permute.xlu0 %2449  ;;  %v1601_v23 = vcombine.high %v1593_v62, %v17830_v34 }
 0x25e   : > { %18304 = vst [vmem:[#allocation153_spill] sm:$0xff] %v12396_v56  ;;  %v1608_v56 = vrot.slane %v1593_v62, %v11431_v25 }
 0x25f   : > { %v12400_v53 = vpop.permute.xlu1 %2453  ;;  %2681 = vrot.lane.b32.xlu0 %v1574_v44, %s18207_s24  ;;  %v1600_v44 = vrot.slane %v1586_v48, %v11428_v24  ;;  %v1615_v62 = vrot.slane %v1601_v23, %v11431_v25 }
 0x260   : > { %18305 = vst [vmem:[#allocation154_spill] sm:$0xff] %v12400_v53  ;;  %v1585_v53 = vcombine.high %v1581_v5, %v17830_v34  ;;  %v1631_v31 = vcombine.high %v1608_v56, %v17830_v34 }
 0x261   : > { %2685 = vrot.lane.b32.xlu1 %v1584_v26, %s18210_s19  ;;  %v12406_v49 = vpop.permute.xlu0 %2457  ;;  %v1623_v48 = vrot.slane %v1600_v44, %v11431_v25 }
 0x262   : > { %18306 = vst [vmem:[#allocation155_spill] sm:$0xff] %v12406_v49 }
 0x263   : > { %v12412_v6 = vpop.permute.xlu1 %2461  ;;  %2689 = vrot.lane.b32.xlu0 %v1581_v5, %s18088_s26  ;;  %v1616_v5 = vcombine.high %v1600_v44, %v17830_v34  ;;  %v1635_v44 = vcombine.high %v11657_v36, %v17830_v34 }
 0x264   : > { %18307 = vst [vmem:[#allocation156_spill] sm:$0xff] %v12412_v6 }
 0x265   : > { %2693 = vrot.lane.b32.xlu1 %v1585_v53, %s18089_s15  ;;  %v12417_v10 = vpop.permute.xlu0 %2465  ;;  %v1632_v53 = vcombine.high %v1615_v62, %v17830_v34 }
 0x266   : > { %18308 = vst [vmem:[#allocation157_spill] sm:$0xff] %v12417_v10 }
 0x267   : > { %v12420_v26 = vpop.permute.xlu1 %2469  ;;  %2697 = vrot.lane.b32.xlu0 %v1608_v56, %s18092_s13  ;;  %v1642_v56 = vrot.slane %v11657_v36, %v11428_v24 }
 0x268   : > { %18309 = vst [vmem:[#allocation158_spill] sm:$0xff] %v12420_v26 }
 0x269   : > { %2701 = vrot.lane.b32.xlu1 %v1631_v31, %s18093_s25  ;;  %v12426_v6 = vpop.permute.xlu0 %2473  ;;  %v1633_v31 = vcombine.high %v1623_v48, %v17830_v34 }
 0x26a   : > { %18310 = vst [vmem:[#allocation159_spill] sm:$0xff] %v12426_v6 }
 0x26b   : > { %v12429_v49 = vpop.permute.xlu1 %2477  ;;  %2705 = vrot.lane.b32.xlu0 %v1615_v62, %s18095_s29 }
 0x26c   : > { %18311 = vst [vmem:[#allocation160_spill] sm:$0xff] %v12429_v49  ;;  %v1630_v49 = vrot.slane %v1616_v5, %v11431_v25 }
 0x26d   : > { %2709 = vrot.lane.b32.xlu1 %v1632_v53, %s18096_s27  ;;  %v12435_v26 = vpop.permute.xlu0 %2481  ;;  %v1650_v53 = vcombine.high %v1642_v56, %v17830_v34 }
 0x26e   : > { %18312 = vst [vmem:[#allocation161_spill] sm:$0xff] %v12435_v26  ;;  %v1657_v26 = vrot.slane %v1642_v56, %v11431_v25 }
 0x26f   : > { %v12439_v23 = vpop.permute.xlu1 %2485  ;;  %2713 = vrot.lane.b32.xlu0 %v1623_v48, %s18099_s5  ;;  %v1649_v48 = vrot.slane %v1635_v44, %v11428_v24  ;;  %v1664_v56 = vrot.slane %v1650_v53, %v11431_v25 }
 0x270   : > { %18313 = vst [vmem:[#allocation162_spill] sm:$0xff] %v12439_v23  ;;  %v1634_v23 = vcombine.high %v1630_v49, %v17830_v34  ;;  %v1680_v36 = vcombine.high %v1657_v26, %v17830_v34 }
 0x271   : > { %2717 = vrot.lane.b32.xlu1 %v1633_v31, %s18100_s4  ;;  %v12445_v62 = vpop.permute.xlu0 %2489  ;;  %v1672_v44 = vrot.slane %v1649_v48, %v11431_v25 }
 0x272   : > { %18314 = vst [vmem:[#allocation163_spill] sm:$0xff] %v12445_v62 }
 0x273   : > { %v12451_v6 = vpop.permute.xlu1 %2493  ;;  %2721 = vrot.lane.b32.xlu0 %v1630_v49, %s18103_s23  ;;  %v1665_v49 = vcombine.high %v1649_v48, %v17830_v34  ;;  %v1684_v48 = vcombine.high %v11666_v43, %v17830_v34 }
 0x274   : > { %18315 = vst [vmem:[#allocation164_spill] sm:$0xff] %v12451_v6 }
 0x275   : > { %2725 = vrot.lane.b32.xlu1 %v1634_v23, %s18104_s22  ;;  %v12456_v5 = vpop.permute.xlu0 %2497  ;;  %v1681_v23 = vcombine.high %v1664_v56, %v17830_v34 }
 0x276   : > { %18316 = vst [vmem:[#allocation165_spill] sm:$0xff] %v12456_v5 }
 0x277   : > { %v12459_v31 = vpop.permute.xlu1 %2501  ;;  %2729 = vrot.lane.b32.xlu0 %v1657_v26, %s18107_s17  ;;  %v1691_v26 = vrot.slane %v11666_v43, %v11428_v24 }
 0x278   : > { %18317 = vst [vmem:[#allocation166_spill] sm:$0xff] %v12459_v31 }
 0x279   : > { %2733 = vrot.lane.b32.xlu1 %v1680_v36, %s18108_s16  ;;  %v12465_v6 = vpop.permute.xlu0 %2505  ;;  %v1682_v36 = vcombine.high %v1672_v44, %v17830_v34 }
 0x27a   : > { %18318 = vst [vmem:[#allocation167_spill] sm:$0xff] %v12465_v6 }
 0x27b   : > { %v12468_v62 = vpop.permute.xlu1 %2509  ;;  %2737 = vrot.lane.b32.xlu0 %v1664_v56, %s18111_s18 }
 0x27c   : > { %18319 = vst [vmem:[#allocation168_spill] sm:$0xff] %v12468_v62  ;;  %v1679_v62 = vrot.slane %v1665_v49, %v11431_v25 }
 0x27d   : > { %2741 = vrot.lane.b32.xlu1 %v1681_v23, %s18112_s12  ;;  %v12474_v31 = vpop.permute.xlu0 %2513  ;;  %v1699_v23 = vcombine.high %v1691_v26, %v17830_v34 }
 0x27e   : > { %18320 = vst [vmem:[#allocation169_spill] sm:$0xff] %v12474_v31  ;;  %v1706_v31 = vrot.slane %v1691_v26, %v11431_v25 }
 0x27f   : > { %v12478_v53 = vpop.permute.xlu1 %2517  ;;  %2745 = vrot.lane.b32.xlu0 %v1672_v44, %s18115_s30  ;;  %v1698_v44 = vrot.slane %v1684_v48, %v11428_v24  ;;  %v1713_v26 = vrot.slane %v1699_v23, %v11431_v25 }
 0x280   : > { %18321 = vst [vmem:[#allocation170_spill] sm:$0xff] %v12478_v53  ;;  %v1683_v53 = vcombine.high %v1679_v62, %v17830_v34  ;;  %v1729_v43 = vcombine.high %v1706_v31, %v17830_v34 }
 0x281   : > { %2749 = vrot.lane.b32.xlu1 %v1682_v36, %s18116_s2  ;;  %v12484_v56 = vpop.permute.xlu0 %2521  ;;  %v1721_v48 = vrot.slane %v1698_v44, %v11431_v25 }
 0x282   : > { %18322 = vst [vmem:[#allocation171_spill] sm:$0xff] %v12484_v56 }
 0x283   : > { %v12490_v6 = vpop.permute.xlu1 %2525  ;;  %2753 = vrot.lane.b32.xlu0 %v1679_v62, %s18117_s3  ;;  %v1714_v62 = vcombine.high %v1698_v44, %v17830_v34  ;;  %v1733_v44 = vcombine.high %v11669_v46, %v17830_v34 }
 0x284   : > { %18323 = vst [vmem:[#allocation172_spill] sm:$0xff] %v12490_v6 }
 0x285   : > { %2757 = vrot.lane.b32.xlu1 %v1683_v53, %s18118_s0  ;;  %v12495_v49 = vpop.permute.xlu0 %2529  ;;  %v1730_v53 = vcombine.high %v1713_v26, %v17830_v34  ;;  %v1728_v5 = vrot.slane %v1714_v62, %v11431_v25 }
 0x286   : > { %18324 = vst [vmem:[#allocation173_spill] sm:$0xff] %v12495_v49 }
 0x287   : > { %v12498_v36 = vpop.permute.xlu1 %2533  ;;  %2761 = vrot.lane.b32.xlu0 %v1706_v31, %s18121_s14  ;;  %v1740_v31 = vrot.slane %v11669_v46, %v11428_v24 }
 0x288   : > { %18325 = vst [vmem:[#allocation174_spill] sm:$0xff] %v12498_v36 }
 0x289   : > { %2765 = vrot.lane.b32.xlu1 %v1729_v43, %s18122_s10  ;;  %v12504_v6 = vpop.permute.xlu0 %2537  ;;  %v1731_v43 = vcombine.high %v1721_v48, %v17830_v34  ;;  %s18330_s10 = smov 114  }
 0x28a   : > { %18326 = vst [vmem:[#allocation175_spill] sm:$0xff] %v12504_v6 }
 0x28b   : > { %v12507_v56 = vpop.permute.xlu1 %2541  ;;  %2769 = vrot.lane.b32.xlu0 %v1713_v26, %s18125_s20  ;;  %s18338_s20 = smov 26  }
 0x28c   : > { %18327 = vst [vmem:[#allocation176_spill] sm:$0xff] %v12507_v56 }
 0x28d   : > { %2773 = vrot.lane.b32.xlu1 %v1730_v53, %s18126_s8  ;;  %v12513_v49 = vpop.permute.xlu0 %2545  ;;  %v1748_v53 = vcombine.high %v1740_v31, %v17830_v34  ;;  %s18333_s8 = smov 124  }
 0x28e   : > { %18328 = vst [vmem:[#allocation177_spill] sm:$0xff] %v12513_v49  ;;  %v1755_v49 = vrot.slane %v1740_v31, %v11431_v25 }
 0x28f   : > { %v12517_v23 = vpop.permute.xlu1 %2549  ;;  %2777 = vrot.lane.b32.xlu0 %v1721_v48, %s18129_s7  ;;  %s18334_s7 = smov 6   ;;  %v1747_v48 = vrot.slane %v1733_v44, %v11428_v24  ;;  %v1762_v31 = vrot.slane %v1748_v53, %v11431_v25 }
 0x290   : > { %18329 = vst [vmem:[#allocation178_spill] sm:$0xff] %v12517_v23  ;;  %v1732_v23 = vcombine.high %v1728_v5, %v17830_v34  ;;  %v1778_v46 = vcombine.high %v1755_v49, %v17830_v34 }
 0x291   : > { %2781 = vrot.lane.b32.xlu1 %v1731_v43, %s18330_s10  ;;  %v12523_v26 = vpop.permute.xlu0 %2553  ;;  %s18337_s10 = smov 16   ;;  %v1770_v44 = vrot.slane %v1747_v48, %v11431_v25 }
 0x292   : > { %18331 = vst [vmem:[#allocation179_spill] sm:$0xff] %v12523_v26 }
 0x293   : > { %v12529_v56 = vpop.permute.xlu1 %2557  ;;  %2785 = vrot.lane.b32.xlu0 %v1728_v5, %s18333_s8  ;;  %v1763_v5 = vcombine.high %v1747_v48, %v17830_v34  ;;  %s18342_s8 = smov 46   ;;  %v1782_v48 = vcombine.high %v11678_v52, %v17830_v34 }
 0x294   : > { %18332 = vst [vmem:[#allocation180_spill] sm:$0xff] %v12529_v56 }
 0x295   : > { %2789 = vrot.lane.b32.xlu1 %v1732_v23, %s18334_s7  ;;  %v12534_v62 = vpop.permute.xlu0 %2561  ;;  %s18341_s7 = smov 36   ;;  %v1779_v23 = vcombine.high %v1762_v31, %v17830_v34 }
 0x296   : > { %18335 = vst [vmem:[#allocation181_spill] sm:$0xff] %v12534_v62 }
 0x297   : > { %v12537_v43 = vpop.permute.xlu1 %2565  ;;  %2793 = vrot.lane.b32.xlu0 %v1755_v49, %s18337_s10  ;;  %v1789_v49 = vrot.slane %v11678_v52, %v11428_v24  ;;  %s18347_s10 = sld [smem:[#allocation19_spill]] }
 0x298   : > { %18336 = vst [vmem:[#allocation182_spill] sm:$0xff] %v12537_v43 }
 0x299   : > { %2797 = vrot.lane.b32.xlu1 %v1778_v46, %s18338_s20  ;;  %v12543_v56 = vpop.permute.xlu0 %2569  ;;  %s18345_s20 = smov 56   ;;  %v1780_v46 = vcombine.high %v1770_v44, %v17830_v34 }
 0x29a   : > { %18339 = vst [vmem:[#allocation183_spill] sm:$0xff] %v12543_v56 }
 0x29b   : > { %v12546_v26 = vpop.permute.xlu1 %2573  ;;  %2801 = vrot.lane.b32.xlu0 %v1762_v31, %s18341_s7  ;;  %s18346_s7 = smov 66  }
 0x29c   : > { %18340 = vst [vmem:[#allocation184_spill] sm:$0xff] %v12546_v26  ;;  %v1777_v26 = vrot.slane %v1763_v5, %v11431_v25 }
 0x29d   : > { %2805 = vrot.lane.b32.xlu1 %v1779_v23, %s18342_s8  ;;  %v12552_v43 = vpop.permute.xlu0 %2577  ;;  %v1797_v23 = vcombine.high %v1789_v49, %v17830_v34  ;;  %s18350_s8 = smov 76  }
 0x29e   : > { %18343 = vst [vmem:[#allocation185_spill] sm:$0xff] %v12552_v43  ;;  %v1804_v43 = vrot.slane %v1789_v49, %v11431_v25 }
 0x29f   : > { %v12556_v53 = vpop.permute.xlu1 %2581  ;;  %2809 = vrot.lane.b32.xlu0 %v1770_v44, %s18345_s20  ;;  %v1781_v44 = vcombine.high %v1777_v26, %v17830_v34  ;;  %s18351_s20 = smov 86   ;;  %v1811_v49 = vrot.slane %v1797_v23, %v11431_v25 }
 0x2a0   : > { %18344 = vst [vmem:[#allocation186_spill] sm:$0xff] %v12556_v53  ;;  %v1827_v52 = vcombine.high %v1804_v43, %v17830_v34  ;;  %v11067_v53 = vld [vmem:[%s18347_s10] sm:$0xff]  ;;  %s18362_s10 = smov 8  }
 0x2a1   : > { %2813 = vrot.lane.b32.xlu1 %v1780_v46, %s18346_s7  ;;  %v12562_v31 = vpop.permute.xlu0 %2585  ;;  %v1796_v46 = vrot.slane %v1782_v48, %v11428_v24  ;;  %s18354_s7 = smov 96   ;;  %v1828_v48 = vcombine.high %v1811_v49, %v17830_v34 }
 0x2a2   : > { %18348 = vst [vmem:[#allocation187_spill] sm:$0xff] %v12562_v31 }
 0x2a3   : > { %v12568_v56 = vpop.permute.xlu1 %2589  ;;  %2817 = vrot.lane.b32.xlu0 %v1777_v26, %s18350_s8  ;;  %s18355_s8 = smov 106  }
 0x2a4   : > { %18349 = vst [vmem:[#allocation188_spill] sm:$0xff] %v12568_v56  ;;  %v172_v56 = vsel %vm157_vm0, %v11067_v53, -inf  ;;  %v1838_v53 = vrot.slane %v11682_v12, %v11428_v24 }
 0x2a5   : > { %2821 = vrot.lane.b32.xlu1 %v1781_v44, %s18351_s20  ;;  %v12573_v5 = vpop.permute.xlu0 %2593  ;;  %v1812_v44 = vcombine.high %v1796_v46, %v17830_v34  ;;  %s18358_s20 = smov 116  }
 0x2a6   : > { %18352 = vst [vmem:[#allocation189_spill] sm:$0xff] %v12573_v5 }
 0x2a7   : > { %v12576_v31 = vpop.permute.xlu1 %2597  ;;  %2825 = vrot.lane.b32.xlu0 %v1804_v43, %s18354_s7  ;;  %v173_v43 = vrot.slane %v172_v56, 4  ;;  %s18359_s7 = smov 126  }
 0x2a8   : > { %18353 = vst [vmem:[#allocation190_spill] sm:$0xff] %v12576_v31  ;;  %v1819_v31 = vrot.slane %v1796_v46, %v11431_v25 }
 0x2a9   : > { %2829 = vrot.lane.b32.xlu1 %v1827_v52, %s18355_s8  ;;  %v12584_v26 = vpop.permute.xlu0 %2601  ;;  %v174_v62 = vmax.f32 %v172_v56, %v173_v43  ;;  %s18363_s8 = smov 18  }
 0x2aa   : > { %18356 = vst [vmem:[#allocation191_spill] sm:$0xff] %v12584_v26  ;;  %v1826_v26 = vrot.slane %v1812_v44, %v11431_v25 }
 0x2ab   : > { %v12587_v5 = vpop.permute.xlu1 %2605  ;;  %2833 = vrot.lane.b32.xlu0 %v1811_v49, %s18358_s20  ;;  %v1831_v49 = vcombine.high %v11682_v12, %v17830_v34  ;;  %s18371_s20 = smov 58  }
 0x2ac   : > { %18357 = vst [vmem:[#allocation192_spill] sm:$0xff] %v12587_v5  ;;  %v1829_v5 = vcombine.high %v1819_v31, %v17830_v34 }
 0x2ad   : > { %2837 = vrot.lane.b32.xlu1 %v1828_v48, %s18359_s7  ;;  %v12593_v23 = vpop.permute.xlu0 %2609  ;;  %v1846_v48 = vcombine.high %v1838_v53, %v17830_v34  ;;  %s18366_s7 = smov 28  }
 0x2ae   : > { %18360 = vst [vmem:[#allocation193_spill] sm:$0xff] %v12593_v23  ;;  %v1853_v23 = vrot.slane %v1838_v53, %v11431_v25 }
 0x2af   : > { %v12597_v52 = vpop.permute.xlu1 %2613  ;;  %2841 = vrot.lane.b32.xlu0 %v1819_v31, %s18362_s10  ;;  %v1830_v31 = vcombine.high %v1826_v26, %v17830_v34  ;;  %s18367_s10 = smov 38   ;;  %v1860_v43 = vrot.slane %v1846_v48, %v11431_v25 }
 0x2b0   : > { %18361 = vst [vmem:[#allocation194_spill] sm:$0xff] %v12597_v52  ;;  %v175_v52 = vrot.slane %v174_v62, 2  ;;  %v1876_v12 = vcombine.high %v1853_v23, %v17830_v34 }
 0x2b1   : > { %2845 = vrot.lane.b32.xlu1 %v1829_v5, %s18363_s8  ;;  %v12603_v46 = vpop.permute.xlu0 %2617  ;;  %v1845_v5 = vrot.slane %v1831_v49, %v11428_v24  ;;  %s18370_s8 = smov 48   ;;  %v1877_v49 = vcombine.high %v1860_v43, %v17830_v34 }
 0x2b2   : > { %18364 = vst [vmem:[#allocation195_spill] sm:$0xff] %v12603_v46  ;;  %v176_v53 = vmax.f32 %v174_v62, %v175_v52 }
 0x2b3   : > { %v12609_v36 = vpop.permute.xlu1 %2621  ;;  %2849 = vrot.lane.b32.xlu0 %v1826_v26, %s18366_s7  ;;  %v1861_v26 = vcombine.high %v1845_v5, %v17830_v34 }
 0x2b4   : > { %18365 = vst [vmem:[#allocation196_spill] sm:$0xff] %v12609_v36 }
 0x2b5   : > { %2853 = vrot.lane.b32.xlu1 %v1830_v31, %s18367_s10  ;;  %v12614_v56 = vpop.permute.xlu0 %2625  ;;  %s18374_s10 = smov 68   ;;  %v1875_v48 = vrot.slane %v1861_v26, %v11431_v25 }
 0x2b6   : > { %18368 = vst [vmem:[#allocation197_spill] sm:$0xff] %v12614_v56  ;;  %v177_v56 = vrot.slane %v176_v53, 1 }
 0x2b7   : > { %v12617_v44 = vpop.permute.xlu1 %2629  ;;  %2857 = vrot.lane.b32.xlu0 %v1853_v23, %s18370_s8  ;;  %s18375_s8 = smov 78  }
 0x2b8   : > { %18369 = vst [vmem:[#allocation198_spill] sm:$0xff] %v12617_v44  ;;  %v1868_v44 = vrot.slane %v1845_v5, %v11431_v25  ;;  %v1879_v5 = vcombine.high %v1875_v48, %v17830_v34 }
 0x2b9   : > { %2861 = vrot.lane.b32.xlu1 %v1876_v12, %s18371_s20  ;;  %v12623_v36 = vpop.permute.xlu0 %2633  ;;  %s18378_s20 = smov 88   ;;  %v178_v12 = vmax.f32 %v176_v53, %v177_v56  ;;  %v179_v56 = vsel %vm157_vm0, %v11388_v8, -inf  ;;  %vm17987_vm0 = vcmask 195584  }
 0x2ba   : > { %18372 = vst [vmem:[#allocation199_spill] sm:$0xff] %v12623_v36  ;;  %v1878_v52 = vcombine.high %v1868_v44, %v17830_v34 }
 0x2bb   : > { %v12626_v31 = vpop.permute.xlu1 %2637  ;;  %2865 = vrot.lane.b32.xlu0 %v1860_v43, %s18374_s10  ;;  %s18381_s10 = smov 108  }
 0x2bc   : > { %18373 = vst [vmem:[#allocation200_spill] sm:$0xff] %v12626_v31 }
 0x2bd   : > { %2869 = vrot.lane.b32.xlu1 %v1877_v49, %s18375_s8  ;;  %v12632_v23 = vpop.permute.xlu0 %2641  ;;  %v3203_v49 = vsub.f32 %v178_v12, %v11384_v7  ;;  %s18382_s8 = smov 118  }
 0x2be   : > { %18376 = vst [vmem:[#allocation201_spill] sm:$0xff] %v12632_v23 }
 0x2bf   : > { %v12634_v62 = vpop.permute.xlu1 %2645  ;;  %2873 = vrot.lane.b32.xlu0 %v1868_v44, %s18378_s20  ;;  %s18445_s20 = smov 30  }
 0x2c0   : > { %18377 = vst [vmem:[#allocation202_spill] sm:$0xff] %v12634_v62 }
 0x2c1   : > { %2877 = vrot.lane.b32.xlu1 %v1878_v52, %s18280_s1  ;;  %v12640_v36 = vpop.permute.xlu0 %2649  ;;  %v180_v52 = vrot.slane %v179_v56, 4  ;;  %s18443_s1 = smov 10  }
 0x2c2   : > { %18379 = vst [vmem:[#allocation203_spill] sm:$0xff] %v12640_v36 }
 0x2c3   : > { %v12642_v43 = vpop.permute.xlu1 %2653  ;;  %2881 = vrot.lane.b32.xlu0 %v1875_v48, %s18381_s10  ;;  %v181_v12 = vmax.f32 %v179_v56, %v180_v52  ;;  %s18444_s10 = smov 40  }
 0x2c4   : > { %18380 = vst [vmem:[#allocation204_spill] sm:$0xff] %v12642_v43 }
 0x2c5   : > { %2885 = vrot.lane.b32.xlu1 %v1879_v5, %s18382_s8  ;;  %v12648_v46 = vpop.permute.xlu0 %2657  ;;  %s18442_s8 = smov 20  }
 0x2c6   : > { %18383 = vst [vmem:[#allocation205_spill] sm:$0xff] %v12648_v46 }
 0x2c7   : > { %v12650_v44 = vpop.permute.xlu1 %2661  ;;  %3206 = vbcast.lane.b32.xlu0 %v3203_v49, 256 }
 0x2c8   : > { %18384 = vst [vmem:[#allocation206_spill] sm:$0xff] %v12650_v44  ;;  %v182_v44 = vrot.slane %v181_v12, 2 }
 0x2c9   : > { %v12654_v53 = vpop.permute.xlu0 %2665  ;;  %3210 = vbcast.lane.b32.xlu1 %v3203_v49, 264 }
 0x2ca   : > { %18385 = vst [vmem:[#allocation207_spill] sm:$0xff] %v12654_v53  ;;  %v183_v46 = vmax.f32 %v181_v12, %v182_v44 }
 0x2cb   : > { %v12656_v26 = vpop.permute.xlu1 %2669  ;;  %3214 = vbcast.lane.b32.xlu0 %v3203_v49, 272 }
 0x2cc   : > { %18386 = vst [vmem:[#allocation208_spill] sm:$0xff] %v12656_v26  ;;  %v184_v56 = vrot.slane %v183_v46, 1 }
 0x2cd   : > { %v12658_v48 = vpop.permute.xlu0 %2673  ;;  %3218 = vbcast.lane.b32.xlu1 %v3203_v49, 280 }
 0x2ce   : > { %18387 = vst [vmem:[#allocation209_spill] sm:$0xff] %v12658_v48 }
 0x2cf   : > { %v12660_v7 = vpop.permute.xlu1 %2677  ;;  %3222 = vbcast.lane.b32.xlu0 %v3203_v49, 288 }
 0x2d0   : > { %18388 = vst [vmem:[#allocation210_spill] sm:$0xff] %v12660_v7 }
 0x2d1   : > { %v12662_v5 = vpop.permute.xlu0 %2681  ;;  %3226 = vbcast.lane.b32.xlu1 %v3203_v49, 296 }
 0x2d2   : > { %18389 = vst [vmem:[#allocation211_spill] sm:$0xff] %v12662_v5  ;;  %v185_v5 = vmax.f32 %v183_v46, %v184_v56 }
 0x2d3   : > { %v12664_v34 = vpop.permute.xlu1 %2685  ;;  %3230 = vbcast.lane.b32.xlu0 %v3203_v49, 304 }
 0x2d4   : > { %18390 = vst [vmem:[#allocation212_spill] sm:$0xff] %v12664_v34  ;;  %v3204_v44 = vsub.f32 %v185_v5, %v11406_v15 }
 0x2d5   : > { %v12666_v53 = vpop.permute.xlu0 %2689  ;;  %3234 = vbcast.lane.b32.xlu1 %v3203_v49, 312 }
 0x2d6   : > { %18391 = vst [vmem:[#allocation213_spill] sm:$0xff] %v12666_v53 }
 0x2d7   : > { %v12668_v26 = vpop.permute.xlu1 %2693  ;;  %3238 = vbcast.lane.b32.xlu0 %v3203_v49, 320 }
 0x2d8   : > { %18392 = vst [vmem:[#allocation214_spill] sm:$0xff] %v12668_v26 }
 0x2d9   : > { %v12670_v48 = vpop.permute.xlu0 %2697  ;;  %3242 = vbcast.lane.b32.xlu1 %v3203_v49, 328 }
 0x2da   : > { %18393 = vst [vmem:[#allocation215_spill] sm:$0xff] %v12670_v48 }
 0x2db   : > { %v12672_v7 = vpop.permute.xlu1 %2701  ;;  %3246 = vbcast.lane.b32.xlu0 %v3203_v49, 336 }
 0x2dc   : > { %18394 = vst [vmem:[#allocation216_spill] sm:$0xff] %v12672_v7 }
 0x2dd   : > { %v12674_v52 = vpop.permute.xlu0 %2705  ;;  %3250 = vbcast.lane.b32.xlu1 %v3203_v49, 344 }
 0x2de   : > { %18395 = vst [vmem:[#allocation217_spill] sm:$0xff] %v12674_v52 }
 0x2df   : > { %v12676_v34 = vpop.permute.xlu1 %2709  ;;  %3254 = vbcast.lane.b32.xlu0 %v3203_v49, 352 }
 0x2e0   : > { %18396 = vst [vmem:[#allocation218_spill] sm:$0xff] %v12676_v34 }
 0x2e1   : > { %v12678_v53 = vpop.permute.xlu0 %2713  ;;  %3258 = vbcast.lane.b32.xlu1 %v3203_v49, 360 }
 0x2e2   : > { %18397 = vst [vmem:[#allocation219_spill] sm:$0xff] %v12678_v53 }
 0x2e3   : > { %v12680_v26 = vpop.permute.xlu1 %2717  ;;  %3262 = vbcast.lane.b32.xlu0 %v3203_v49, 368 }
 0x2e4   : > { %18398 = vst [vmem:[#allocation220_spill] sm:$0xff] %v12680_v26 }
 0x2e5   : > { %v12683_v12 = vpop.permute.xlu0 %2721  ;;  %3266 = vbcast.lane.b32.xlu1 %v3203_v49, 376 }
 0x2e6   : > { %18399 = vst [vmem:[#allocation221_spill] sm:$0xff] %v12683_v12 }
 0x2e7   : > { %v12685_v7 = vpop.permute.xlu1 %2725  ;;  %3269 = vbcast.lane.b32.xlu0 %v3204_v44, 256 }
 0x2e8   : > { %18400 = vst [vmem:[#allocation222_spill] sm:$0xff] %v12685_v7 }
 0x2e9   : > { %v12687_v52 = vpop.permute.xlu0 %2729  ;;  %3273 = vbcast.lane.b32.xlu1 %v3204_v44, 264 }
 0x2ea   : > { %18401 = vst [vmem:[#allocation223_spill] sm:$0xff] %v12687_v52 }
 0x2eb   : > { %v12689_v34 = vpop.permute.xlu1 %2733  ;;  %3277 = vbcast.lane.b32.xlu0 %v3204_v44, 272 }
 0x2ec   : > { %18402 = vst [vmem:[#allocation224_spill] sm:$0xff] %v12689_v34 }
 0x2ed   : > { %v12691_v46 = vpop.permute.xlu0 %2737  ;;  %3281 = vbcast.lane.b32.xlu1 %v3204_v44, 280 }
 0x2ee   : > { %18403 = vst [vmem:[#allocation225_spill] sm:$0xff] %v12691_v46 }
 0x2ef   : > { %v12693_v56 = vpop.permute.xlu1 %2741  ;;  %3285 = vbcast.lane.b32.xlu0 %v3204_v44, 288 }
 0x2f0   : > { %18404 = vst [vmem:[#allocation226_spill] sm:$0xff] %v12693_v56 }
 0x2f1   : > { %v12695_v26 = vpop.permute.xlu0 %2745  ;;  %3289 = vbcast.lane.b32.xlu1 %v3204_v44, 296 }
 0x2f2   : > { %18405 = vst [vmem:[#allocation227_spill] sm:$0xff] %v12695_v26 }
 0x2f3   : > { %v12697_v15 = vpop.permute.xlu1 %2749  ;;  %3293 = vbcast.lane.b32.xlu0 %v3204_v44, 304 }
 0x2f4   : > { %18406 = vst [vmem:[#allocation228_spill] sm:$0xff] %v12697_v15 }
 0x2f5   : > { %v12699_v49 = vpop.permute.xlu0 %2753  ;;  %3297 = vbcast.lane.b32.xlu1 %v3204_v44, 312 }
 0x2f6   : > { %18407 = vst [vmem:[#allocation229_spill] sm:$0xff] %v12699_v49 }
 0x2f7   : > { %v12701_v5 = vpop.permute.xlu1 %2757  ;;  %3301 = vbcast.lane.b32.xlu0 %v3204_v44, 320 }
 0x2f8   : > { %18408 = vst [vmem:[#allocation230_spill] sm:$0xff] %v12701_v5 }
 0x2f9   : > { %v12703_v52 = vpop.permute.xlu0 %2761  ;;  %3305 = vbcast.lane.b32.xlu1 %v3204_v44, 328 }
 0x2fa   : > { %18409 = vst [vmem:[#allocation231_spill] sm:$0xff] %v12703_v52 }
 0x2fb   : > { %v12705_v7 = vpop.permute.xlu1 %2765  ;;  %3309 = vbcast.lane.b32.xlu0 %v3204_v44, 336 }
 0x2fc   : > { %18410 = vst [vmem:[#allocation232_spill] sm:$0xff] %v12705_v7 }
 0x2fd   : > { %v12707_v12 = vpop.permute.xlu0 %2769  ;;  %3313 = vbcast.lane.b32.xlu1 %v3204_v44, 344 }
 0x2fe   : > { %18411 = vst [vmem:[#allocation233_spill] sm:$0xff] %v12707_v12 }
 0x2ff   : > { %v12709_v53 = vpop.permute.xlu1 %2773  ;;  %3317 = vbcast.lane.b32.xlu0 %v3204_v44, 352 }
 0x300   : > { %18412 = vst [vmem:[#allocation234_spill] sm:$0xff] %v12709_v53 }
 0x301   : > { %v12711_v15 = vpop.permute.xlu0 %2777  ;;  %3321 = vbcast.lane.b32.xlu1 %v3204_v44, 360 }
 0x302   : > { %18413 = vst [vmem:[#allocation235_spill] sm:$0xff] %v12711_v15 }
 0x303   : > { %v12713_v49 = vpop.permute.xlu1 %2781  ;;  %3325 = vbcast.lane.b32.xlu0 %v3204_v44, 368 }
 0x304   : > { %18414 = vst [vmem:[#allocation236_spill] sm:$0xff] %v12713_v49 }
 0x305   : > { %v12715_v5 = vpop.permute.xlu0 %2785  ;;  %3329 = vbcast.lane.b32.xlu1 %v3204_v44, 376 }
 0x306   : > { %18415 = vst [vmem:[#allocation237_spill] sm:$0xff] %v12715_v5 }
 0x307   : > { %v12717_v52 = vpop.permute.xlu1 %2789 }
 0x308   : > { %18416 = vst [vmem:[#allocation238_spill] sm:$0xff] %v12717_v52 }
 0x309   : > { %v12719_v26 = vpop.permute.xlu0 %2793 }
 0x30a   : > { %18417 = vst [vmem:[#allocation239_spill] sm:$0xff] %v12719_v26 }
 0x30b   : > { %v12721_v7 = vpop.permute.xlu1 %2797 }
 0x30c   : > { %18418 = vst [vmem:[#allocation240_spill] sm:$0xff] %v12721_v7 }
 0x30d   : > { %v12723_v12 = vpop.permute.xlu0 %2801 }
 0x30e   : > { %18419 = vst [vmem:[#allocation241_spill] sm:$0xff] %v12723_v12 }
 0x30f   : > { %v12725_v48 = vpop.permute.xlu1 %2805 }
 0x310   : > { %18420 = vst [vmem:[#allocation242_spill] sm:$0xff] %v12725_v48 }
 0x311   : > { %v12727_v53 = vpop.permute.xlu0 %2809 }
 0x312   : > { %18421 = vst [vmem:[#allocation243_spill] sm:$0xff] %v12727_v53 }
 0x313   : > { %v12729_v15 = vpop.permute.xlu1 %2813 }
 0x314   : > { %18422 = vst [vmem:[#allocation244_spill] sm:$0xff] %v12729_v15 }
 0x315   : > { %v12731_v56 = vpop.permute.xlu0 %2817 }
 0x316   : > { %18423 = vst [vmem:[#allocation245_spill] sm:$0xff] %v12731_v56 }
 0x317   : > { %v12733_v49 = vpop.permute.xlu1 %2821 }
 0x318   : > { %18424 = vst [vmem:[#allocation246_spill] sm:$0xff] %v12733_v49 }
 0x319   : > { %v12735_v5 = vpop.permute.xlu0 %2825 }
 0x31a   : > { %18425 = vst [vmem:[#allocation247_spill] sm:$0xff] %v12735_v5 }
 0x31b   : > { %v12737_v44 = vpop.permute.xlu1 %2829 }
 0x31c   : > { %18426 = vst [vmem:[#allocation248_spill] sm:$0xff] %v12737_v44 }
 0x31d   : > { %v12739_v52 = vpop.permute.xlu0 %2833 }
 0x31e   : > { %18427 = vst [vmem:[#allocation249_spill] sm:$0xff] %v12739_v52 }
 0x31f   : > { %v12741_v26 = vpop.permute.xlu1 %2837 }
 0x320   : > { %18428 = vst [vmem:[#allocation250_spill] sm:$0xff] %v12741_v26 }
 0x321   : > { %v12743_v7 = vpop.permute.xlu0 %2841 }
 0x322   : > { %18429 = vst [vmem:[#allocation251_spill] sm:$0xff] %v12743_v7 }
 0x323   : > { %v12745_v12 = vpop.permute.xlu1 %2845 }
 0x324   : > { %18430 = vst [vmem:[#allocation252_spill] sm:$0xff] %v12745_v12  ;;  %v18440_v12 = vmov 0.0  }
 0x325   : > { %v12747_v48 = vpop.permute.xlu0 %2849 }
 0x326   : > { %18431 = vst [vmem:[#allocation253_spill] sm:$0xff] %v12747_v48 }
 0x327   : > { %v12749_v53 = vpop.permute.xlu1 %2853 }
 0x328   : > { %18432 = vst [vmem:[#allocation254_spill] sm:$0xff] %v12749_v53 }
 0x329   : > { %v12751_v15 = vpop.permute.xlu0 %2857 }
 0x32a   : > { %18433 = vst [vmem:[#allocation255_spill] sm:$0xff] %v12751_v15 }
 0x32b   : > { %v12753_v56 = vpop.permute.xlu1 %2861 }
 0x32c   : > { %18434 = vst [vmem:[#allocation256_spill] sm:$0xff] %v12753_v56 }
 0x32d   : > { %v12755_v49 = vpop.permute.xlu0 %2865 }
 0x32e   : > { %18435 = vst [vmem:[#allocation257_spill] sm:$0xff] %v12755_v49 }
 0x32f   : > { %v12757_v5 = vpop.permute.xlu1 %2869 }
 0x330   : > { %18436 = vst [vmem:[#allocation258_spill] sm:$0xff] %v12757_v5 }
 0x331   : > { %v12759_v44 = vpop.permute.xlu0 %2873 }
 0x332   : > { %18437 = vst [vmem:[#allocation259_spill] sm:$0xff] %v12759_v44 }
 0x333   : > { %v12763_v26 = vpop.permute.xlu1 %2877 }
 0x334   : > { %18439 = vst [vmem:[#allocation261_spill] sm:$0xff] %v12763_v26 }
 0x335   : > { %v12761_v52 = vpop.permute.xlu0 %2881 }
 0x336   : > { %18438 = vst [vmem:[#allocation260_spill] sm:$0xff] %v12761_v52 }
 0x337   : > { %v12771_v56 = vpop.permute.xlu1 %2885 }
 0x338   : > { %18441 = vst [vmem:[#allocation262_spill] sm:$0xff] %v12771_v56 }
 0x339   : > { %v3207_v7 = vpop.permute.xlu0 %3206 }
 0x33a   : > { %v3331_v34 = vcombine.high %v3207_v7, %v18440_v12  ;;  %v3338_v48 = vrot.slane %v3207_v7, %v11428_v24 }
 0x33b   : > { %v3211_v26 = vpop.permute.xlu1 %3210 }
 0x33c   : > { %v3346_v53 = vcombine.high %v3338_v48, %v18440_v12  ;;  %v12769_v15 = vrot.slane %v3338_v48, %v11431_v25  ;;  %v3345_v5 = vrot.slane %v3331_v34, %v11428_v24  ;;  %v3387_v34 = vrot.slane %v3211_v26, %v11428_v24 }
 0x33e   : > { %v3360_v44 = vrot.slane %v3346_v53, %v11431_v25  ;;  %v3376_v52 = vcombine.high %v12769_v15, %v18440_v12  ;;  %v3361_v7 = vcombine.high %v3345_v5, %v18440_v12  ;;  %v3368_v49 = vrot.slane %v3345_v5, %v11431_v25 }
 0x33f   : > { %v3395_v46 = vcombine.high %v3387_v34, %v18440_v12  ;;  %v3380_v5 = vcombine.high %v3211_v26, %v18440_v12  ;;  %v3219_v43 = vpop.permute.xlu1 %3218 }
 0x340   : > { %4904 = vrot.lane.b32.xlu1 %v3360_v44, %s18442_s8  ;;  %4900 = vrot.lane.b32.xlu0 %v3376_v52, %s18443_s1  ;;  %v3377_v48 = vcombine.high %v3360_v44, %v18440_v12  ;;  %v3375_v53 = vrot.slane %v3361_v7, %v11431_v25  ;;  %v3378_v56 = vcombine.high %v3368_v49, %v18440_v12  ;;  %s18446_s8 = smov 50  }
 0x341   : > { %v3402_v52 = vrot.slane %v3387_v34, %v11431_v25  ;;  %v3409_v7 = vrot.slane %v3395_v46, %v11431_v25  ;;  %v3215_v34 = vpop.permute.xlu0 %3214 }
 0x342   : > { %v3379_v44 = vcombine.high %v3375_v53, %v18440_v12  ;;  %v3436_v46 = vrot.slane %v3215_v34, %v11428_v24 }
 0x344   : > { %4912 = vrot.lane.b32.xlu1 %v3368_v49, %s18444_s10  ;;  %4908 = vrot.lane.b32.xlu0 %v3377_v48, %s18445_s20  ;;  %s18447_s10 = smov 70   ;;  %v3425_v49 = vcombine.high %v3402_v52, %v18440_v12  ;;  %v3394_v48 = vrot.slane %v3380_v5, %v11428_v24 }
 0x346   : > { %v3417_v26 = vrot.slane %v3394_v48, %v11431_v25 }
 0x348   : > { %4920 = vrot.lane.b32.xlu1 %v3375_v53, %s18296_s6  ;;  %4916 = vrot.lane.b32.xlu0 %v3378_v56, %s18446_s8  ;;  %v3410_v56 = vcombine.high %v3394_v48, %v18440_v12  ;;  %v3426_v53 = vcombine.high %v3409_v7, %v18440_v12  ;;  %v3427_v5 = vcombine.high %v3417_v26, %v18440_v12 }
 0x34c   : > { %4928 = vrot.lane.b32.xlu1 %v3402_v52, %s18300_s21  ;;  %4924 = vrot.lane.b32.xlu0 %v3379_v44, %s18447_s10  ;;  %v3424_v52 = vrot.slane %v3410_v56, %v11431_v25  ;;  %v3444_v44 = vcombine.high %v3436_v46, %v18440_v12 }
 0x34e   : > { %v3428_v48 = vcombine.high %v3424_v52, %v18440_v12  ;;  %v3458_v56 = vrot.slane %v3444_v44, %v11431_v25  ;;  %v3485_v44 = vrot.slane %v3219_v43, %v11428_v24 }
 0x350   : > { %4936 = vrot.lane.b32.xlu1 %v3409_v7, %s18303_s11  ;;  %4932 = vrot.lane.b32.xlu0 %v3425_v49, %s18202_s9  ;;  %v3451_v49 = vrot.slane %v3436_v46, %v11431_v25  ;;  %v3429_v7 = vcombine.high %v3215_v34, %v18440_v12  ;;  %v12819_v46 = vpop.permute.xlu1 %3226  ;;  %v3223_v34 = vpop.permute.xlu0 %3222  ;;  %v3475_v36 = vcombine.high %v3458_v56, %v18440_v12 }
 0x351   : > { %v3493_v62 = vcombine.high %v3485_v44, %v18440_v12  ;;  %v3576_v39 = vcombine.high %v12819_v46, %v18440_v12 }
 0x354   : > { %4944 = vrot.lane.b32.xlu1 %v3417_v26, %s18207_s24  ;;  %4940 = vrot.lane.b32.xlu0 %v3426_v53, %s18206_s28  ;;  %v3474_v26 = vcombine.high %v3451_v49, %v18440_v12  ;;  %v3443_v53 = vrot.slane %v3429_v7, %v11428_v24  ;;  %v12831_v7 = vpop.permute.xlu0 %3230 }
 0x358   : > { %4952 = vrot.lane.b32.xlu1 %v3424_v52, %s18088_s26  ;;  %4948 = vrot.lane.b32.xlu0 %v3427_v5, %s18210_s19  ;;  %v3459_v52 = vcombine.high %v3443_v53, %v18440_v12  ;;  %v3466_v5 = vrot.slane %v3443_v53, %v11431_v25  ;;  %v3500_v53 = vrot.slane %v3485_v44, %v11431_v25  ;;  %v12843_v31 = vpop.permute.xlu0 %3238 }
 0x35c   : > { %4960 = vrot.lane.b32.xlu1 %v3451_v49, %s18092_s13  ;;  %4956 = vrot.lane.b32.xlu0 %v3428_v48, %s18089_s15  ;;  %v12829_v49 = vpop.permute.xlu1 %3234  ;;  %v3473_v48 = vrot.slane %v3459_v52, %v11431_v25  ;;  %v3507_v52 = vrot.slane %v3493_v62, %v11431_v25  ;;  %v3534_v62 = vrot.slane %v3223_v34, %v11428_v24 }
 0x35e   : > { %v3542_v13 = vcombine.high %v3534_v62, %v18440_v12 }
 0x360   : > { %4968 = vrot.lane.b32.xlu1 %v3458_v56, %s18095_s29  ;;  %4964 = vrot.lane.b32.xlu0 %v3474_v26, %s18093_s25  ;;  %v3476_v26 = vcombine.high %v3466_v5, %v18440_v12  ;;  %v3477_v56 = vcombine.high %v3473_v48, %v18440_v12  ;;  %v12841_v23 = vpop.permute.xlu1 %3242 }
 0x364   : > { %4976 = vrot.lane.b32.xlu1 %v3466_v5, %s18099_s5  ;;  %4972 = vrot.lane.b32.xlu0 %v3475_v36, %s18096_s27  ;;  %v3478_v36 = vcombine.high %v3219_v43, %v18440_v12  ;;  %v3523_v5 = vcombine.high %v3500_v53, %v18440_v12  ;;  %v12852_v43 = vpop.permute.xlu1 %3250 }
 0x366   : > { %v3492_v44 = vrot.slane %v3478_v36, %v11428_v24 }
 0x368   : > { %4984 = vrot.lane.b32.xlu1 %v3473_v48, %s18103_s23  ;;  %4980 = vrot.lane.b32.xlu0 %v3476_v26, %s18100_s4  ;;  %v12854_v48 = vpop.permute.xlu0 %3246  ;;  %v3508_v26 = vcombine.high %v3492_v44, %v18440_v12  ;;  %v3515_v6 = vrot.slane %v3492_v44, %v11431_v25  ;;  %v3549_v44 = vrot.slane %v3534_v62, %v11431_v25 }
 0x36a   : > { %v3525_v36 = vcombine.high %v3515_v6, %v18440_v12 }
 0x36c   : > { %4992 = vrot.lane.b32.xlu1 %v3500_v53, %s18107_s17  ;;  %4988 = vrot.lane.b32.xlu0 %v3477_v56, %s18104_s22  ;;  %v3524_v56 = vcombine.high %v3507_v52, %v18440_v12  ;;  %v3522_v53 = vrot.slane %v3508_v26, %v11431_v25  ;;  %v12866_v10 = vpop.permute.xlu0 %3254  ;;  %v3572_v26 = vcombine.high %v3549_v44, %v18440_v12 }
 0x370   : > { %5000 = vrot.lane.b32.xlu1 %v3507_v52, %s18111_s18  ;;  %4996 = vrot.lane.b32.xlu0 %v3523_v5, %s18108_s16  ;;  %v12864_v5 = vpop.permute.xlu1 %3258  ;;  %v3527_v52 = vcombine.high %v3223_v34, %v18440_v12  ;;  %v12880_v37 = vpop.permute.xlu0 %3262 }
 0x372   : > { %v3541_v62 = vrot.slane %v3527_v52, %v11428_v24 }
 0x374   : > { %5008 = vrot.lane.b32.xlu1 %v3515_v6, %s18115_s30  ;;  %5004 = vrot.lane.b32.xlu0 %v3524_v56, %s18112_s12  ;;  %v3526_v56 = vcombine.high %v3522_v53, %v18440_v12  ;;  %v3556_v6 = vrot.slane %v3542_v13, %v11431_v25  ;;  %v12878_v40 = vpop.permute.xlu1 %3266  ;;  %s18449_s30 = smov 74   ;;  %v3557_v34 = vcombine.high %v3541_v62, %v18440_v12  ;;  %v12890_v13 = vpop.permute.xlu0 %3269 }
 0x376   : > { %v3571_v52 = vrot.slane %v3557_v34, %v11431_v25 }
 0x378   : > { %5016 = vrot.lane.b32.xlu1 %v3522_v53, %s18117_s3  ;;  %5012 = vrot.lane.b32.xlu0 %v3525_v36, %s18116_s2  ;;  %s18448_s3 = smov 84   ;;  %v3564_v53 = vrot.slane %v3541_v62, %v11431_v25  ;;  %v3573_v36 = vcombine.high %v3556_v6, %v18440_v12  ;;  %v12904_v54 = vpop.permute.xlu0 %3277 }
 0x37c   : > { %5024 = vrot.lane.b32.xlu1 %v3549_v44, %s18121_s14  ;;  %5020 = vrot.lane.b32.xlu0 %v3526_v56, %s18118_s0  ;;  %v12888_v56 = vpop.permute.xlu1 %3273  ;;  %v3583_v44 = vrot.slane %v12819_v46, %v11428_v24  ;;  %s18450_s14 = smov 104   ;;  %s18451_s0 = smov 94   ;;  %v12916_v58 = vpop.permute.xlu0 %3285 }
 0x37e   : > { %v3591_v1 = vcombine.high %v3583_v44, %v18440_v12  ;;  %v3598_v62 = vrot.slane %v3583_v44, %v11431_v25  ;;  %v3590_v44 = vrot.slane %v3576_v39, %v11428_v24 }
 0x380   : > { %5032 = vrot.lane.b32.xlu1 %v3556_v6, %s18448_s3  ;;  %5028 = vrot.lane.b32.xlu0 %v3572_v26, %s18449_s30  ;;  %v3574_v26 = vcombine.high %v3564_v53, %v18440_v12  ;;  %s18452_s3 = smov 124   ;;  %s18453_s30 = smov 114   ;;  %v12902_v6 = vpop.permute.xlu1 %3281  ;;  %v3605_v34 = vrot.slane %v3591_v1, %v11431_v25  ;;  %v3606_v46 = vcombine.high %v3590_v44, %v18440_v12  ;;  %v12927_v39 = vpop.permute.xlu0 %3293 }
 0x382   : > { %v3620_v45 = vrot.slane %v3606_v46, %v11431_v25 }
 0x384   : > { %5040 = vrot.lane.b32.xlu1 %v3564_v53, %s18450_s14  ;;  %5036 = vrot.lane.b32.xlu0 %v3573_v36, %s18451_s0  ;;  %v3575_v36 = vcombine.high %v3571_v52, %v18440_v12  ;;  %s18454_s14 = smov 16   ;;  %s18455_s0 = smov 6   ;;  %v3621_v53 = vcombine.high %v3598_v62, %v18440_v12  ;;  %v3624_v14 = vcombine.high %v3620_v45, %v18440_v12  ;;  %v12942_v35 = vpop.permute.xlu0 %3301 }
 0x388   : > { %5048 = vrot.lane.b32.xlu1 %v3571_v52, %s18452_s3  ;;  %5044 = vrot.lane.b32.xlu0 %v3574_v26, %s18453_s30  ;;  %v12914_v26 = vpop.permute.xlu1 %3289  ;;  %s18456_s3 = smov 36   ;;  %s18457_s30 = smov 26   ;;  %v3613_v52 = vrot.slane %v3590_v44, %v11431_v25 }
 0x38c   : > { %5056 = vrot.lane.b32.xlu1 %v3598_v62, %s18454_s14  ;;  %5052 = vrot.lane.b32.xlu0 %v3575_v36, %s18455_s0  ;;  %v3622_v36 = vcombine.high %v3605_v34, %v18440_v12  ;;  %s18458_s14 = smov 56   ;;  %s18459_s0 = smov 46   ;;  %v12925_v1 = vpop.permute.xlu1 %3297  ;;  %v3632_v62 = vrot.slane %v12831_v7, %v11428_v24 }
 0x38e   : > { %v3640_v44 = vcombine.high %v3632_v62, %v18440_v12 }
 0x390   : > { %5064 = vrot.lane.b32.xlu1 %v3605_v34, %s18456_s3  ;;  %5060 = vrot.lane.b32.xlu0 %v3621_v53, %s18457_s30  ;;  %v3623_v53 = vcombine.high %v3613_v52, %v18440_v12  ;;  %s18460_s3 = smov 76   ;;  %s18461_s30 = smov 66   ;;  %v3625_v34 = vcombine.high %v12831_v7, %v18440_v12  ;;  %v12940_v38 = vpop.permute.xlu1 %3305 }
 0x392   : > { %v3639_v46 = vrot.slane %v3625_v34, %v11428_v24  ;;  %v3681_v34 = vrot.slane %v12829_v49, %v11428_v24 }
 0x394   : > { %5072 = vrot.lane.b32.xlu1 %v3613_v52, %s18458_s14  ;;  %5068 = vrot.lane.b32.xlu0 %v3622_v36, %s18459_s0  ;;  %v3647_v36 = vrot.slane %v3632_v62, %v11431_v25  ;;  %s18462_s14 = smov 96   ;;  %s18463_s0 = smov 86   ;;  %v3654_v52 = vrot.slane %v3640_v44, %v11431_v25  ;;  %v12951_v62 = vpop.permute.xlu1 %3313  ;;  %v3662_v17 = vrot.slane %v3639_v46, %v11431_v25 }
 0x396   : > { %v3670_v7 = vcombine.high %v3647_v36, %v18440_v12 }
 0x398   : > { %5080 = vrot.lane.b32.xlu1 %v3620_v45, %s18460_s3  ;;  %5076 = vrot.lane.b32.xlu0 %v3623_v53, %s18461_s30  ;;  %s18464_s3 = smov 116   ;;  %s18465_s30 = smov 106   ;;  %v12953_v45 = vpop.permute.xlu0 %3309  ;;  %v3655_v53 = vcombine.high %v3639_v46, %v18440_v12  ;;  %v3674_v46 = vcombine.high %v12829_v49, %v18440_v12 }
 0x39a   : > { %v3669_v44 = vrot.slane %v3655_v53, %v11431_v25  ;;  %v3688_v28 = vrot.slane %v3674_v46, %v11428_v24 }
 0x39c   : > { %5088 = vrot.lane.b32.xlu1 %v3647_v36, %s18462_s14  ;;  %5084 = vrot.lane.b32.xlu0 %v3624_v14, %s18463_s0  ;;  %v3671_v14 = vcombine.high %v3654_v52, %v18440_v12  ;;  %s18466_s14 = smov 8   ;;  %s18467_s0 = smov 126   ;;  %v3672_v36 = vcombine.high %v3662_v17, %v18440_v12  ;;  %v12966_v42 = vpop.permute.xlu0 %3317  ;;  %v3673_v18 = vcombine.high %v3669_v44, %v18440_v12 }
 0x39d   : > { %v3711_v3 = vrot.slane %v3688_v28, %v11431_v25 }
 0x3a0   : > { %5096 = vrot.lane.b32.xlu1 %v3654_v52, %s18464_s3  ;;  %5092 = vrot.lane.b32.xlu0 %v3670_v7, %s18465_s30  ;;  %v12964_v7 = vpop.permute.xlu1 %3321  ;;  %s18468_s3 = smov 18   ;;  %v3689_v52 = vcombine.high %v3681_v34, %v18440_v12  ;;  %v12979_v53 = vpop.permute.xlu0 %3325 }
 0x3a4   : > { %5104 = vrot.lane.b32.xlu1 %v3662_v17, %s18466_s14  ;;  %5100 = vrot.lane.b32.xlu0 %v3671_v14, %s18467_s0  ;;  %v3696_v14 = vrot.slane %v3681_v34, %v11431_v25  ;;  %s18469_s14 = smov 48   ;;  %s18470_s0 = smov 38   ;;  %v12977_v17 = vpop.permute.xlu1 %3329  ;;  %v3704_v34 = vcombine.high %v3688_v28, %v18440_v12 }
 0x3a6   : > { %v3719_v49 = vcombine.high %v3696_v14, %v18440_v12  ;;  %v3718_v28 = vrot.slane %v3704_v34, %v11431_v25 }
 0x3a8   : > { %5112 = vrot.lane.b32.xlu1 %v3669_v44, %s18366_s7  ;;  %5108 = vrot.lane.b32.xlu0 %v3672_v36, %s18468_s3  ;;  %v3703_v36 = vrot.slane %v3689_v52, %v11431_v25  ;;  %s18471_s7 = smov 68   ;;  %s18472_s3 = smov 58   ;;  %v3730_v44 = vrot.slane %v12843_v31, %v11428_v24  ;;  %v3723_v52 = vcombine.high %v12843_v31, %v18440_v12 }
 0x3a9   : > { %v3722_v19 = vcombine.high %v3718_v28, %v18440_v12 }
 0x3aa   : > { %v3720_v46 = vcombine.high %v3703_v36, %v18440_v12 }
 0x3ac   : > { %5120 = vrot.lane.b32.xlu1 %v3696_v14, %s18469_s14  ;;  %5116 = vrot.lane.b32.xlu0 %v3673_v18, %s18470_s0  ;;  %s18473_s14 = smov 88   ;;  %s18474_s0 = smov 78   ;;  %v3738_v14 = vcombine.high %v3730_v44, %v18440_v12 }
 0x3ae   : > { %v3752_v31 = vrot.slane %v3738_v14, %v11431_v25 }
 0x3b0   : > { %5128 = vrot.lane.b32.xlu1 %v3703_v36, %s18471_s7  ;;  %5124 = vrot.lane.b32.xlu0 %v3719_v49, %s18472_s3  ;;  %v13001_v49 = vrot.slane %v3730_v44, %v11431_v25  ;;  %v3721_v36 = vcombine.high %v3711_v3, %v18440_v12  ;;  %s18478_s7 = smov 108  }
 0x3b2   : > { %v12989_v18 = vpop.permute.xlu1 %4904  ;;  %v12991_v32 = vpop.permute.xlu0 %4900  ;;  %18475 = vst [vmem:[#allocation263_spill] sm:$0xff] %v13001_v49  ;;  %v3768_v60 = vcombine.high %v13001_v49, %v18440_v12 }
 0x3b4   : > { %5136 = vrot.lane.b32.xlu1 %v3711_v3, %s18473_s14  ;;  %5132 = vrot.lane.b32.xlu0 %v3720_v46, %s18474_s0  ;;  %s18479_s14 = smov 98   ;;  %v3737_v46 = vrot.slane %v3723_v52, %v11428_v24  ;;  %s18482_s0 = smov 118  }
 0x3b6   : > { %v13003_v30 = vpop.permute.xlu1 %4912  ;;  %v13005_v21 = vpop.permute.xlu0 %4908  ;;  %v3753_v3 = vcombine.high %v3737_v46, %v18440_v12  ;;  %v3760_v34 = vrot.slane %v3737_v46, %v11431_v25 }
 0x3b7   : > { %18476 = vst [vmem:[#allocation264_spill] sm:$0xff] %v13003_v30  ;;  %18477 = vst [vmem:[#allocation265_spill] sm:$0xff] %v13005_v21 }
 0x3b8   : > { %5144 = vrot.lane.b32.xlu1 %v3718_v28, %s18478_s7  ;;  %5140 = vrot.lane.b32.xlu0 %v3721_v36, %s18479_s14  ;;  %v3769_v36 = vcombine.high %v3752_v31, %v18440_v12  ;;  %s18485_s7 = smov 20   ;;  %v3779_v28 = vrot.slane %v12841_v23, %v11428_v24  ;;  %v3770_v49 = vcombine.high %v3760_v34, %v18440_v12 }
 0x3b9   : > { %v3767_v46 = vrot.slane %v3753_v3, %v11431_v25 }
 0x3ba   : > { %v13013_v2 = vpop.permute.xlu1 %4920  ;;  %v13015_v44 = vpop.permute.xlu0 %4916 }
 0x3bb   : > { %18480 = vst [vmem:[#allocation266_spill] sm:$0xff] %v13013_v2  ;;  %18481 = vst [vmem:[#allocation267_spill] sm:$0xff] %v13015_v44 }
 0x3bc   : > { %5152 = vrot.lane.b32.xlu1 %v3768_v60, %s18443_s1  ;;  %5148 = vrot.lane.b32.xlu0 %v3722_v19, %s18482_s0  ;;  %s18488_s1 = smov 40  }
 0x3be   : > { %v13024_v52 = vpop.permute.xlu1 %4928  ;;  %v13026_v14 = vpop.permute.xlu0 %4924 }
 0x3bf   : > { %18483 = vst [vmem:[#allocation268_spill] sm:$0xff] %v13024_v52  ;;  %18484 = vst [vmem:[#allocation269_spill] sm:$0xff] %v13026_v14  ;;  %v3794_v52 = vrot.slane %v3779_v28, %v11431_v25 }
 0x3c0   : > { %5160 = vrot.lane.b32.xlu1 %v3769_v36, %s18445_s20  ;;  %5156 = vrot.lane.b32.xlu0 %v3752_v31, %s18485_s7  ;;  %v3772_v36 = vcombine.high %v12841_v23, %v18440_v12  ;;  %v3787_v31 = vcombine.high %v3779_v28, %v18440_v12 }
 0x3c1   : > { %v3817_v28 = vcombine.high %v3794_v52, %v18440_v12 }
 0x3c2   : > { %v13033_v60 = vpop.permute.xlu1 %4936  ;;  %v13035_v19 = vpop.permute.xlu0 %4932  ;;  %v3801_v3 = vrot.slane %v3787_v31, %v11431_v25  ;;  %v3828_v31 = vrot.slane %v12854_v48, %v11428_v24 }
 0x3c3   : > { %18486 = vst [vmem:[#allocation270_spill] sm:$0xff] %v13033_v60  ;;  %18487 = vst [vmem:[#allocation271_spill] sm:$0xff] %v13035_v19  ;;  %v3771_v19 = vcombine.high %v3767_v46, %v18440_v12 }
 0x3c4   : > { %5168 = vrot.lane.b32.xlu1 %v3770_v49, %s18446_s8  ;;  %5164 = vrot.lane.b32.xlu0 %v3760_v34, %s18488_s1  ;;  %v3786_v49 = vrot.slane %v3772_v36, %v11428_v24  ;;  %v3818_v36 = vcombine.high %v3801_v3, %v18440_v12 }
 0x3c6   : > { %v13045_v14 = vpop.permute.xlu1 %4944  ;;  %v13047_v60 = vpop.permute.xlu0 %4940 }
 0x3c7   : > { %18489 = vst [vmem:[#allocation272_spill] sm:$0xff] %v13045_v14  ;;  %18490 = vst [vmem:[#allocation273_spill] sm:$0xff] %v13047_v60  ;;  %v3802_v60 = vcombine.high %v3786_v49, %v18440_v12 }
 0x3c8   : > { %5176 = vrot.lane.b32.xlu1 %v3771_v19, %s18447_s10  ;;  %5172 = vrot.lane.b32.xlu0 %v3767_v46, %s18296_s6  ;;  %v3809_v19 = vrot.slane %v3786_v49, %v11431_v25 }
 0x3c9   : > { %v3816_v49 = vrot.slane %v3802_v60, %v11431_v25 }
 0x3ca   : > { %v13054_v34 = vpop.permute.xlu1 %4952  ;;  %v13056_v23 = vpop.permute.xlu0 %4948  ;;  %v3819_v27 = vcombine.high %v3809_v19, %v18440_v12 }
 0x3cb   : > { %18491 = vst [vmem:[#allocation274_spill] sm:$0xff] %v13054_v34  ;;  %18492 = vst [vmem:[#allocation275_spill] sm:$0xff] %v13056_v23 }
 0x3cc   : > { %5184 = vrot.lane.b32.xlu1 %v3817_v28, %s18202_s9  ;;  %5180 = vrot.lane.b32.xlu0 %v3794_v52, %s18300_s21 }
 0x3ce   : > { %v13063_v2 = vpop.permute.xlu1 %4960  ;;  %v13065_v46 = vpop.permute.xlu0 %4956 }
 0x3cf   : > { %18493 = vst [vmem:[#allocation276_spill] sm:$0xff] %v13063_v2  ;;  %18494 = vst [vmem:[#allocation277_spill] sm:$0xff] %v13065_v46  ;;  %v3843_v2 = vrot.slane %v3828_v31, %v11431_v25 }
 0x3d0   : > { %5192 = vrot.lane.b32.xlu1 %v3818_v36, %s18206_s28  ;;  %5188 = vrot.lane.b32.xlu0 %v3801_v3, %s18303_s11  ;;  %v3821_v36 = vcombine.high %v12854_v48, %v18440_v12  ;;  %v3836_v3 = vcombine.high %v3828_v31, %v18440_v12 }
 0x3d1   : > { %v3866_v31 = vcombine.high %v3843_v2, %v18440_v12 }
 0x3d2   : > { %v13072_v28 = vpop.permute.xlu1 %4968  ;;  %v13074_v52 = vpop.permute.xlu0 %4964  ;;  %v3850_v60 = vrot.slane %v3836_v3, %v11431_v25  ;;  %v3877_v3 = vrot.slane %v12852_v43, %v11428_v24 }
 0x3d3   : > { %18495 = vst [vmem:[#allocation278_spill] sm:$0xff] %v13072_v28  ;;  %18496 = vst [vmem:[#allocation279_spill] sm:$0xff] %v13074_v52  ;;  %v3820_v52 = vcombine.high %v3816_v49, %v18440_v12 }
 0x3d4   : > { %5200 = vrot.lane.b32.xlu1 %v3819_v27, %s18210_s19  ;;  %5196 = vrot.lane.b32.xlu0 %v3809_v19, %s18207_s24  ;;  %v3835_v27 = vrot.slane %v3821_v36, %v11428_v24  ;;  %v3867_v36 = vcombine.high %v3850_v60, %v18440_v12 }
 0x3d6   : > { %v13084_v46 = vpop.permute.xlu1 %4976  ;;  %v13086_v28 = vpop.permute.xlu0 %4972 }
 0x3d7   : > { %18497 = vst [vmem:[#allocation280_spill] sm:$0xff] %v13084_v46  ;;  %18498 = vst [vmem:[#allocation281_spill] sm:$0xff] %v13086_v28  ;;  %v3851_v46 = vcombine.high %v3835_v27, %v18440_v12 }
 0x3d8   : > { %5208 = vrot.lane.b32.xlu1 %v3820_v52, %s18089_s15  ;;  %5204 = vrot.lane.b32.xlu0 %v3816_v49, %s18088_s26  ;;  %v3858_v52 = vrot.slane %v3835_v27, %v11431_v25 }
 0x3d9   : > { %v3865_v27 = vrot.slane %v3851_v46, %v11431_v25 }
 0x3da   : > { %v13093_v19 = vpop.permute.xlu1 %4984  ;;  %v13095_v48 = vpop.permute.xlu0 %4980 }
 0x3db   : > { %18499 = vst [vmem:[#allocation282_spill] sm:$0xff] %v13093_v19  ;;  %18500 = vst [vmem:[#allocation283_spill] sm:$0xff] %v13095_v48  ;;  %v3868_v19 = vcombine.high %v3858_v52, %v18440_v12 }
 0x3dc   : > { %5216 = vrot.lane.b32.xlu1 %v3866_v31, %s18093_s25  ;;  %5212 = vrot.lane.b32.xlu0 %v3843_v2, %s18092_s13 }
 0x3de   : > { %v13102_v28 = vpop.permute.xlu1 %4992  ;;  %v13104_v49 = vpop.permute.xlu0 %4988 }
 0x3df   : > { %18501 = vst [vmem:[#allocation284_spill] sm:$0xff] %v13102_v28  ;;  %18502 = vst [vmem:[#allocation285_spill] sm:$0xff] %v13104_v49  ;;  %v3892_v28 = vrot.slane %v3877_v3, %v11431_v25 }
 0x3e0   : > { %5224 = vrot.lane.b32.xlu1 %v3867_v36, %s18096_s27  ;;  %5220 = vrot.lane.b32.xlu0 %v3850_v60, %s18095_s29  ;;  %v3870_v36 = vcombine.high %v12852_v43, %v18440_v12  ;;  %v3885_v60 = vcombine.high %v3877_v3, %v18440_v12 }
 0x3e1   : > { %v3915_v3 = vcombine.high %v3892_v28, %v18440_v12 }
 0x3e2   : > { %v13111_v31 = vpop.permute.xlu1 %5000  ;;  %v13113_v2 = vpop.permute.xlu0 %4996  ;;  %v3884_v46 = vrot.slane %v3870_v36, %v11428_v24 }
 0x3e3   : > { %18503 = vst [vmem:[#allocation286_spill] sm:$0xff] %v13111_v31  ;;  %18504 = vst [vmem:[#allocation287_spill] sm:$0xff] %v13113_v2  ;;  %v3869_v2 = vcombine.high %v3865_v27, %v18440_v12 }
 0x3e4   : > { %5232 = vrot.lane.b32.xlu1 %v3868_v19, %s18100_s4  ;;  %5228 = vrot.lane.b32.xlu0 %v3858_v52, %s18099_s5  ;;  %v3899_v19 = vrot.slane %v3885_v60, %v11431_v25  ;;  %v3926_v60 = vrot.slane %v12866_v10, %v11428_v24 }
 0x3e6   : > { %v13123_v49 = vpop.permute.xlu1 %5008  ;;  %v13125_v31 = vpop.permute.xlu0 %5004  ;;  %v3916_v36 = vcombine.high %v3899_v19, %v18440_v12 }
 0x3e7   : > { %18505 = vst [vmem:[#allocation288_spill] sm:$0xff] %v13123_v49  ;;  %18506 = vst [vmem:[#allocation289_spill] sm:$0xff] %v13125_v31  ;;  %v3900_v49 = vcombine.high %v3884_v46, %v18440_v12 }
 0x3e8   : > { %5240 = vrot.lane.b32.xlu1 %v3869_v2, %s18104_s22  ;;  %5236 = vrot.lane.b32.xlu0 %v3865_v27, %s18103_s23  ;;  %v3907_v2 = vrot.slane %v3884_v46, %v11431_v25 }
 0x3e9   : > { %v3914_v46 = vrot.slane %v3900_v49, %v11431_v25 }
 0x3ea   : > { %v13132_v52 = vpop.permute.xlu1 %5016  ;;  %v13134_v43 = vpop.permute.xlu0 %5012 }
 0x3eb   : > { %18507 = vst [vmem:[#allocation290_spill] sm:$0xff] %v13132_v52  ;;  %18508 = vst [vmem:[#allocation291_spill] sm:$0xff] %v13134_v43  ;;  %v3917_v52 = vcombine.high %v3907_v2, %v18440_v12 }
 0x3ec   : > { %5248 = vrot.lane.b32.xlu1 %v3915_v3, %s18108_s16  ;;  %5244 = vrot.lane.b32.xlu0 %v3892_v28, %s18107_s17  ;;  %s18513_s16 = smov 24  }
 0x3ee   : > { %v13141_v31 = vpop.permute.xlu1 %5024  ;;  %v13143_v27 = vpop.permute.xlu0 %5020 }
 0x3ef   : > { %18509 = vst [vmem:[#allocation292_spill] sm:$0xff] %v13141_v31  ;;  %18510 = vst [vmem:[#allocation293_spill] sm:$0xff] %v13143_v27  ;;  %v3941_v31 = vrot.slane %v3926_v60, %v11431_v25 }
 0x3f0   : > { %5256 = vrot.lane.b32.xlu1 %v3916_v36, %s18112_s12  ;;  %5252 = vrot.lane.b32.xlu0 %v3899_v19, %s18111_s18  ;;  %v3919_v36 = vcombine.high %v12866_v10, %v18440_v12  ;;  %v3934_v19 = vcombine.high %v3926_v60, %v18440_v12  ;;  %s18516_s12 = smov 54   ;;  %s18517_s18 = smov 44  }
 0x3f1   : > { %v3964_v60 = vcombine.high %v3941_v31, %v18440_v12 }
 0x3f2   : > { %v13150_v3 = vpop.permute.xlu1 %5032  ;;  %v13152_v28 = vpop.permute.xlu0 %5028  ;;  %v3933_v49 = vrot.slane %v3919_v36, %v11428_v24 }
 0x3f3   : > { %18511 = vst [vmem:[#allocation294_spill] sm:$0xff] %v13150_v3  ;;  %18512 = vst [vmem:[#allocation295_spill] sm:$0xff] %v13152_v28  ;;  %v3918_v28 = vcombine.high %v3914_v46, %v18440_v12 }
 0x3f4   : > { %5264 = vrot.lane.b32.xlu1 %v3917_v52, %s18116_s2  ;;  %5260 = vrot.lane.b32.xlu0 %v3907_v2, %s18513_s16  ;;  %v3948_v52 = vrot.slane %v3934_v19, %v11431_v25  ;;  %s18520_s2 = smov 74   ;;  %s18521_s16 = smov 64   ;;  %v3975_v19 = vrot.slane %v12864_v5, %v11428_v24 }
 0x3f6   : > { %v13162_v27 = vpop.permute.xlu1 %5040  ;;  %v13164_v3 = vpop.permute.xlu0 %5036  ;;  %v3965_v36 = vcombine.high %v3948_v52, %v18440_v12 }
 0x3f7   : > { %18514 = vst [vmem:[#allocation296_spill] sm:$0xff] %v13162_v27  ;;  %18515 = vst [vmem:[#allocation297_spill] sm:$0xff] %v13164_v3  ;;  %v3949_v27 = vcombine.high %v3933_v49, %v18440_v12 }
 0x3f8   : > { %5272 = vrot.lane.b32.xlu1 %v3918_v28, %s18516_s12  ;;  %5268 = vrot.lane.b32.xlu0 %v3914_v46, %s18517_s18  ;;  %v3956_v28 = vrot.slane %v3933_v49, %v11431_v25  ;;  %s18524_s12 = smov 94   ;;  %s18525_s18 = smov 84  }
 0x3f9   : > { %v3963_v49 = vrot.slane %v3949_v27, %v11431_v25 }
 0x3fa   : > { %v13171_v2 = vpop.permute.xlu1 %5048  ;;  %v13173_v10 = vpop.permute.xlu0 %5044 }
 0x3fb   : > { %18518 = vst [vmem:[#allocation298_spill] sm:$0xff] %v13171_v2  ;;  %18519 = vst [vmem:[#allocation299_spill] sm:$0xff] %v13173_v10  ;;  %v3966_v10 = vcombine.high %v3956_v28, %v18440_v12 }
 0x3fc   : > { %5280 = vrot.lane.b32.xlu1 %v3964_v60, %s18520_s2  ;;  %5276 = vrot.lane.b32.xlu0 %v3941_v31, %s18521_s16  ;;  %s18528_s2 = smov 114   ;;  %s18529_s16 = smov 104  }
 0x3fe   : > { %v13180_v3 = vpop.permute.xlu1 %5056  ;;  %v13182_v46 = vpop.permute.xlu0 %5052 }
 0x3ff   : > { %18522 = vst [vmem:[#allocation300_spill] sm:$0xff] %v13180_v3  ;;  %18523 = vst [vmem:[#allocation301_spill] sm:$0xff] %v13182_v46  ;;  %v3990_v3 = vrot.slane %v3975_v19, %v11431_v25 }
 0x400   : > { %5288 = vrot.lane.b32.xlu1 %v3965_v36, %s18524_s12  ;;  %5284 = vrot.lane.b32.xlu0 %v3948_v52, %s18525_s18  ;;  %v3968_v36 = vcombine.high %v12864_v5, %v18440_v12  ;;  %v3983_v52 = vcombine.high %v3975_v19, %v18440_v12  ;;  %s18532_s12 = smov 6   ;;  %s18533_s18 = smov 124  }
 0x401   : > { %v4013_v19 = vcombine.high %v3990_v3, %v18440_v12 }
 0x402   : > { %v13189_v60 = vpop.permute.xlu1 %5064  ;;  %v13191_v31 = vpop.permute.xlu0 %5060  ;;  %v3982_v27 = vrot.slane %v3968_v36, %v11428_v24 }
 0x403   : > { %18526 = vst [vmem:[#allocation302_spill] sm:$0xff] %v13189_v60  ;;  %18527 = vst [vmem:[#allocation303_spill] sm:$0xff] %v13191_v31  ;;  %v3967_v31 = vcombine.high %v3963_v49, %v18440_v12 }
 0x404   : > { %5296 = vrot.lane.b32.xlu1 %v3966_v10, %s18528_s2  ;;  %5292 = vrot.lane.b32.xlu0 %v3956_v28, %s18529_s16  ;;  %v3997_v10 = vrot.slane %v3983_v52, %v11431_v25  ;;  %s18536_s2 = smov 26   ;;  %s18537_s16 = smov 16   ;;  %v4024_v52 = vrot.slane %v12880_v37, %v11428_v24 }
 0x406   : > { %v13201_v2 = vpop.permute.xlu1 %5072  ;;  %v13203_v60 = vpop.permute.xlu0 %5068  ;;  %v4014_v36 = vcombine.high %v3997_v10, %v18440_v12 }
 0x407   : > { %18530 = vst [vmem:[#allocation304_spill] sm:$0xff] %v13201_v2  ;;  %18531 = vst [vmem:[#allocation305_spill] sm:$0xff] %v13203_v60  ;;  %v3998_v2 = vcombine.high %v3982_v27, %v18440_v12 }
 0x408   : > { %5304 = vrot.lane.b32.xlu1 %v3967_v31, %s18532_s12  ;;  %5300 = vrot.lane.b32.xlu0 %v3963_v49, %s18533_s18  ;;  %v4005_v31 = vrot.slane %v3982_v27, %v11431_v25  ;;  %s18540_s12 = smov 46   ;;  %s18541_s18 = smov 36  }
 0x409   : > { %v4012_v27 = vrot.slane %v3998_v2, %v11431_v25 }
 0x40a   : > { %v13210_v28 = vpop.permute.xlu1 %5080  ;;  %v13212_v5 = vpop.permute.xlu0 %5076 }
 0x40b   : > { %18534 = vst [vmem:[#allocation306_spill] sm:$0xff] %v13210_v28  ;;  %18535 = vst [vmem:[#allocation307_spill] sm:$0xff] %v13212_v5  ;;  %v4015_v28 = vcombine.high %v4005_v31, %v18440_v12 }
 0x40c   : > { %5312 = vrot.lane.b32.xlu1 %v4013_v19, %s18536_s2  ;;  %5308 = vrot.lane.b32.xlu0 %v3990_v3, %s18537_s16  ;;  %s18544_s2 = smov 66   ;;  %s18545_s16 = smov 56  }
 0x40e   : > { %v13219_v60 = vpop.permute.xlu1 %5088  ;;  %v13221_v49 = vpop.permute.xlu0 %5084 }
 0x40f   : > { %18538 = vst [vmem:[#allocation308_spill] sm:$0xff] %v13219_v60  ;;  %18539 = vst [vmem:[#allocation309_spill] sm:$0xff] %v13221_v49  ;;  %v4039_v60 = vrot.slane %v4024_v52, %v11431_v25 }
 0x410   : > { %5320 = vrot.lane.b32.xlu1 %v4014_v36, %s18540_s12  ;;  %5316 = vrot.lane.b32.xlu0 %v3997_v10, %s18541_s18  ;;  %v4017_v36 = vcombine.high %v12880_v37, %v18440_v12  ;;  %v4032_v10 = vcombine.high %v4024_v52, %v18440_v12  ;;  %s18548_s12 = smov 86   ;;  %s18549_s18 = smov 76  }
 0x411   : > { %v4062_v52 = vcombine.high %v4039_v60, %v18440_v12 }
 0x412   : > { %v13228_v19 = vpop.permute.xlu1 %5096  ;;  %v13230_v3 = vpop.permute.xlu0 %5092  ;;  %v4031_v2 = vrot.slane %v4017_v36, %v11428_v24 }
 0x413   : > { %18542 = vst [vmem:[#allocation310_spill] sm:$0xff] %v13228_v19  ;;  %18543 = vst [vmem:[#allocation311_spill] sm:$0xff] %v13230_v3  ;;  %v4016_v3 = vcombine.high %v4012_v27, %v18440_v12 }
 0x414   : > { %5328 = vrot.lane.b32.xlu1 %v4015_v28, %s18544_s2  ;;  %5324 = vrot.lane.b32.xlu0 %v4005_v31, %s18545_s16  ;;  %v4046_v28 = vrot.slane %v4032_v10, %v11431_v25  ;;  %s18552_s2 = smov 96   ;;  %v4073_v10 = vrot.slane %v12878_v40, %v11428_v24 }
 0x416   : > { %v13240_v49 = vpop.permute.xlu1 %5104  ;;  %v13242_v19 = vpop.permute.xlu0 %5100  ;;  %v4063_v36 = vcombine.high %v4046_v28, %v18440_v12 }
 0x417   : > { %18546 = vst [vmem:[#allocation312_spill] sm:$0xff] %v13240_v49  ;;  %18547 = vst [vmem:[#allocation313_spill] sm:$0xff] %v13242_v19  ;;  %v4047_v49 = vcombine.high %v4031_v2, %v18440_v12 }
 0x418   : > { %5336 = vrot.lane.b32.xlu1 %v4016_v3, %s18548_s12  ;;  %5332 = vrot.lane.b32.xlu0 %v4012_v27, %s18549_s18  ;;  %v4054_v3 = vrot.slane %v4031_v2, %v11431_v25  ;;  %s18555_s12 = smov 126   ;;  %s18556_s18 = smov 116  }
 0x419   : > { %v4061_v2 = vrot.slane %v4047_v49, %v11431_v25 }
 0x41a   : > { %v13249_v31 = vpop.permute.xlu1 %5112  ;;  %v13251_v37 = vpop.permute.xlu0 %5108 }
 0x41b   : > { %18550 = vst [vmem:[#allocation314_spill] sm:$0xff] %v13249_v31  ;;  %18551 = vst [vmem:[#allocation315_spill] sm:$0xff] %v13251_v37  ;;  %v4064_v31 = vcombine.high %v4054_v3, %v18440_v12 }
 0x41c   : > { %5344 = vrot.lane.b32.xlu1 %v4062_v52, %s18465_s30  ;;  %5340 = vrot.lane.b32.xlu0 %v4039_v60, %s18552_s2  ;;  %s18559_s30 = smov 18   ;;  %s18560_s2 = smov 8  }
 0x41e   : > { %v13258_v19 = vpop.permute.xlu1 %5120  ;;  %v13260_v27 = vpop.permute.xlu0 %5116 }
 0x41f   : > { %18553 = vst [vmem:[#allocation316_spill] sm:$0xff] %v13258_v19  ;;  %18554 = vst [vmem:[#allocation317_spill] sm:$0xff] %v13260_v27  ;;  %v4088_v19 = vrot.slane %v4073_v10, %v11431_v25 }
 0x420   : > { %5352 = vrot.lane.b32.xlu1 %v4063_v36, %s18555_s12  ;;  %5348 = vrot.lane.b32.xlu0 %v4046_v28, %s18556_s18  ;;  %v4066_v36 = vcombine.high %v12878_v40, %v18440_v12  ;;  %v4081_v28 = vcombine.high %v4073_v10, %v18440_v12  ;;  %s18563_s12 = smov 38   ;;  %s18564_s18 = smov 28  }
 0x421   : > { %v4111_v10 = vcombine.high %v4088_v19, %v18440_v12 }
 0x422   : > { %v13267_v52 = vpop.permute.xlu1 %5128  ;;  %v13269_v60 = vpop.permute.xlu0 %5124  ;;  %v4080_v49 = vrot.slane %v4066_v36, %v11428_v24 }
 0x423   : > { %18557 = vst [vmem:[#allocation318_spill] sm:$0xff] %v13267_v52  ;;  %18558 = vst [vmem:[#allocation319_spill] sm:$0xff] %v13269_v60  ;;  %v4065_v60 = vcombine.high %v4061_v2, %v18440_v12 }
 0x424   : > { %5360 = vrot.lane.b32.xlu1 %v4064_v31, %s18559_s30  ;;  %5356 = vrot.lane.b32.xlu0 %v4054_v3, %s18560_s2  ;;  %v4095_v31 = vrot.slane %v4081_v28, %v11431_v25  ;;  %s18567_s30 = smov 48   ;;  %v4122_v28 = vrot.slane %v12890_v13, %v11428_v24 }
 0x426   : > { %v13279_v27 = vpop.permute.xlu1 %5136  ;;  %v13281_v52 = vpop.permute.xlu0 %5132  ;;  %v4112_v36 = vcombine.high %v4095_v31, %v18440_v12 }
 0x427   : > { %18561 = vst [vmem:[#allocation320_spill] sm:$0xff] %v13279_v27  ;;  %18562 = vst [vmem:[#allocation321_spill] sm:$0xff] %v13281_v52  ;;  %v4096_v27 = vcombine.high %v4080_v49, %v18440_v12 }
 0x428   : > { %5368 = vrot.lane.b32.xlu1 %v4065_v60, %s18563_s12  ;;  %5364 = vrot.lane.b32.xlu0 %v4061_v2, %s18564_s18  ;;  %v4103_v60 = vrot.slane %v4080_v49, %v11431_v25  ;;  %s18570_s12 = smov 78   ;;  %s18571_s18 = smov 68  }
 0x429   : > { %v4110_v49 = vrot.slane %v4096_v27, %v11431_v25 }
 0x42a   : > { %v13288_v3 = vpop.permute.xlu1 %5144  ;;  %v13290_v40 = vpop.permute.xlu0 %5140 }
 0x42b   : > { %18565 = vst [vmem:[#allocation322_spill] sm:$0xff] %v13288_v3  ;;  %18566 = vst [vmem:[#allocation323_spill] sm:$0xff] %v13290_v40  ;;  %v4113_v3 = vcombine.high %v4103_v60, %v18440_v12 }
 0x42c   : > { %5376 = vrot.lane.b32.xlu1 %v4111_v10, %s18472_s3  ;;  %5372 = vrot.lane.b32.xlu0 %v4088_v19, %s18567_s30  ;;  %s18574_s3 = smov 88  }
 0x42e   : > { %v13297_v52 = vpop.permute.xlu1 %5152  ;;  %v13299_v2 = vpop.permute.xlu0 %5148 }
 0x42f   : > { %18568 = vst [vmem:[#allocation324_spill] sm:$0xff] %v13297_v52  ;;  %18569 = vst [vmem:[#allocation325_spill] sm:$0xff] %v13299_v2  ;;  %v13318_v2 = vrot.slane %v4122_v28, %v11431_v25 }
 0x430   : > { %5384 = vrot.lane.b32.xlu1 %v4112_v36, %s18570_s12  ;;  %5380 = vrot.lane.b32.xlu0 %v4095_v31, %s18571_s18  ;;  %v4115_v36 = vcombine.high %v12890_v13, %v18440_v12  ;;  %v4130_v31 = vcombine.high %v4122_v28, %v18440_v12  ;;  %s18578_s12 = smov 108  }
 0x431   : > { %18575 = vst [vmem:[#allocation328_spill] sm:$0xff] %v13318_v2  ;;  %v4160_v28 = vcombine.high %v13318_v2, %v18440_v12 }
 0x432   : > { %v13306_v10 = vpop.permute.xlu1 %5160  ;;  %v13308_v19 = vpop.permute.xlu0 %5156  ;;  %v4129_v27 = vrot.slane %v4115_v36, %v11428_v24 }
 0x433   : > { %18572 = vst [vmem:[#allocation326_spill] sm:$0xff] %v13306_v10  ;;  %18573 = vst [vmem:[#allocation327_spill] sm:$0xff] %v13308_v19  ;;  %v4114_v19 = vcombine.high %v4110_v49, %v18440_v12 }
 0x434   : > { %5392 = vrot.lane.b32.xlu1 %v4113_v3, %s18479_s14  ;;  %5388 = vrot.lane.b32.xlu0 %v4103_v60, %s18574_s3  ;;  %v4144_v60 = vrot.slane %v4130_v31, %v11431_v25  ;;  %s18581_s14 = smov 10   ;;  %v4152_v36 = vrot.slane %v4129_v27, %v11431_v25  ;;  %v4171_v31 = vrot.slane %v12888_v56, %v11428_v24 }
 0x436   : > { %v13320_v40 = vpop.permute.xlu1 %5168  ;;  %v13322_v10 = vpop.permute.xlu0 %5164 }
 0x437   : > { %18576 = vst [vmem:[#allocation329_spill] sm:$0xff] %v13320_v40  ;;  %18577 = vst [vmem:[#allocation330_spill] sm:$0xff] %v13322_v10  ;;  %v4145_v40 = vcombine.high %v4129_v27, %v18440_v12  ;;  %v4164_v27 = vcombine.high %v12888_v56, %v18440_v12 }
 0x438   : > { %5400 = vrot.lane.b32.xlu1 %v4114_v19, %s18482_s0  ;;  %5396 = vrot.lane.b32.xlu0 %v4110_v49, %s18578_s12 }
 0x43a   : > { %v13328_v3 = vpop.permute.xlu1 %5176  ;;  %v13330_v13 = vpop.permute.xlu0 %5172 }
 0x43b   : > { %18579 = vst [vmem:[#allocation331_spill] sm:$0xff] %v13328_v3  ;;  %18580 = vst [vmem:[#allocation332_spill] sm:$0xff] %v13330_v13  ;;  %v4161_v3 = vcombine.high %v4144_v60, %v18440_v12  ;;  %v4159_v13 = vrot.slane %v4145_v40, %v11431_v25  ;;  %v4178_v40 = vrot.slane %v4164_v27, %v11428_v24 }
 0x43c   : > { %5408 = vrot.lane.b32.xlu1 %v4144_v60, %s18485_s7  ;;  %5404 = vrot.lane.b32.xlu0 %v4160_v28, %s18581_s14  ;;  %v4186_v60 = vrot.slane %v4171_v31, %v11431_v25 }
 0x43e   : > { %v13338_v19 = vpop.permute.xlu1 %5184  ;;  %v13340_v49 = vpop.permute.xlu0 %5180 }
 0x43f   : > { %18582 = vst [vmem:[#allocation333_spill] sm:$0xff] %v13338_v19  ;;  %18583 = vst [vmem:[#allocation334_spill] sm:$0xff] %v13340_v49  ;;  %v4162_v19 = vcombine.high %v4152_v36, %v18440_v12 }
 0x440   : > { %5416 = vrot.lane.b32.xlu1 %v4152_v36, %s18488_s1  ;;  %5412 = vrot.lane.b32.xlu0 %v4161_v3, %s18445_s20  ;;  %v4179_v3 = vcombine.high %v4171_v31, %v18440_v12  ;;  %v4209_v31 = vcombine.high %v4186_v60, %v18440_v12 }
 0x442   : > { %v13348_v2 = vpop.permute.xlu1 %5192  ;;  %v13350_v28 = vpop.permute.xlu0 %5188  ;;  %v4193_v56 = vrot.slane %v4179_v3, %v11431_v25  ;;  %v4220_v3 = vrot.slane %v12904_v54, %v11428_v24 }
 0x443   : > { %18584 = vst [vmem:[#allocation335_spill] sm:$0xff] %v13348_v2  ;;  %18585 = vst [vmem:[#allocation336_spill] sm:$0xff] %v13350_v28  ;;  %v4163_v28 = vcombine.high %v4159_v13, %v18440_v12 }
 0x444   : > { %5424 = vrot.lane.b32.xlu1 %v4159_v13, %s18296_s6  ;;  %5420 = vrot.lane.b32.xlu0 %v4162_v19, %s18446_s8  ;;  %v4194_v13 = vcombine.high %v4178_v40, %v18440_v12  ;;  %v4210_v27 = vcombine.high %v4193_v56, %v18440_v12 }
 0x446   : > { %v13360_v49 = vpop.permute.xlu1 %5200  ;;  %v13362_v2 = vpop.permute.xlu0 %5196 }
 0x447   : > { %18586 = vst [vmem:[#allocation337_spill] sm:$0xff] %v13360_v49  ;;  %18587 = vst [vmem:[#allocation338_spill] sm:$0xff] %v13362_v2 }
 0x448   : > { %5432 = vrot.lane.b32.xlu1 %v4186_v60, %s18300_s21  ;;  %5428 = vrot.lane.b32.xlu0 %v4163_v28, %s18447_s10  ;;  %v4201_v28 = vrot.slane %v4178_v40, %v11431_v25  ;;  %v4213_v40 = vcombine.high %v12904_v54, %v18440_v12 }
 0x44a   : > { %v13368_v19 = vpop.permute.xlu1 %5208  ;;  %v13370_v36 = vpop.permute.xlu0 %5204 }
 0x44b   : > { %18588 = vst [vmem:[#allocation339_spill] sm:$0xff] %v13368_v19  ;;  %18589 = vst [vmem:[#allocation340_spill] sm:$0xff] %v13370_v36  ;;  %v4208_v19 = vrot.slane %v4194_v13, %v11431_v25  ;;  %v4227_v13 = vrot.slane %v4213_v40, %v11428_v24 }
 0x44c   : > { %5440 = vrot.lane.b32.xlu1 %v4193_v56, %s18303_s11  ;;  %5436 = vrot.lane.b32.xlu0 %v4209_v31, %s18202_s9  ;;  %v4228_v56 = vcombine.high %v4220_v3, %v18440_v12 }
 0x44e   : > { %v13377_v49 = vpop.permute.xlu1 %5216  ;;  %v13379_v2 = vpop.permute.xlu0 %5212  ;;  %v4242_v54 = vrot.slane %v4228_v56, %v11431_v25  ;;  %v4269_v56 = vrot.slane %v12902_v6, %v11428_v24 }
 0x44f   : > { %18590 = vst [vmem:[#allocation341_spill] sm:$0xff] %v13377_v49  ;;  %18591 = vst [vmem:[#allocation342_spill] sm:$0xff] %v13379_v2  ;;  %v4211_v49 = vcombine.high %v4201_v28, %v18440_v12 }
 0x450   : > { %5448 = vrot.lane.b32.xlu1 %v4201_v28, %s18207_s24  ;;  %5444 = vrot.lane.b32.xlu0 %v4210_v27, %s18206_s28  ;;  %v4235_v27 = vrot.slane %v4220_v3, %v11431_v25  ;;  %v4259_v40 = vcombine.high %v4242_v54, %v18440_v12 }
 0x452   : > { %v13387_v60 = vpop.permute.xlu1 %5224  ;;  %v13389_v31 = vpop.permute.xlu0 %5220  ;;  %v4258_v3 = vcombine.high %v4235_v27, %v18440_v12 }
 0x453   : > { %18592 = vst [vmem:[#allocation343_spill] sm:$0xff] %v13387_v60  ;;  %18593 = vst [vmem:[#allocation344_spill] sm:$0xff] %v13389_v31  ;;  %v4212_v31 = vcombine.high %v4208_v19, %v18440_v12 }
 0x454   : > { %5456 = vrot.lane.b32.xlu1 %v4208_v19, %s18088_s26  ;;  %5452 = vrot.lane.b32.xlu0 %v4211_v49, %s18210_s19  ;;  %v4243_v19 = vcombine.high %v4227_v13, %v18440_v12 }
 0x456   : > { %v13399_v2 = vpop.permute.xlu1 %5232  ;;  %v13401_v60 = vpop.permute.xlu0 %5228 }
 0x457   : > { %18594 = vst [vmem:[#allocation345_spill] sm:$0xff] %v13399_v2  ;;  %18595 = vst [vmem:[#allocation346_spill] sm:$0xff] %v13401_v60 }
 0x458   : > { %5464 = vrot.lane.b32.xlu1 %v4235_v27, %s18092_s13  ;;  %5460 = vrot.lane.b32.xlu0 %v4212_v31, %s18089_s15  ;;  %v4250_v31 = vrot.slane %v4227_v13, %v11431_v25  ;;  %v4262_v13 = vcombine.high %v12902_v6, %v18440_v12 }
 0x45a   : > { %v13407_v49 = vpop.permute.xlu1 %5240  ;;  %v13409_v28 = vpop.permute.xlu0 %5236 }
 0x45b   : > { %18596 = vst [vmem:[#allocation347_spill] sm:$0xff] %v13407_v49  ;;  %18597 = vst [vmem:[#allocation348_spill] sm:$0xff] %v13409_v28  ;;  %v4257_v49 = vrot.slane %v4243_v19, %v11431_v25  ;;  %v4260_v28 = vcombine.high %v4250_v31, %v18440_v12  ;;  %v4276_v19 = vrot.slane %v4262_v13, %v11428_v24 }
 0x45c   : > { %5472 = vrot.lane.b32.xlu1 %v4242_v54, %s18095_s29  ;;  %5468 = vrot.lane.b32.xlu0 %v4258_v3, %s18093_s25  ;;  %v4277_v54 = vcombine.high %v4269_v56, %v18440_v12 }
 0x45e   : > { %v13416_v2 = vpop.permute.xlu1 %5248  ;;  %v13418_v60 = vpop.permute.xlu0 %5244  ;;  %v4291_v6 = vrot.slane %v4277_v54, %v11431_v25  ;;  %v4318_v54 = vrot.slane %v12916_v58, %v11428_v24 }
 0x45f   : > { %18598 = vst [vmem:[#allocation349_spill] sm:$0xff] %v13416_v2  ;;  %18599 = vst [vmem:[#allocation350_spill] sm:$0xff] %v13418_v60  ;;  %v4261_v2 = vcombine.high %v4257_v49, %v18440_v12 }
 0x460   : > { %5480 = vrot.lane.b32.xlu1 %v4250_v31, %s18099_s5  ;;  %5476 = vrot.lane.b32.xlu0 %v4259_v40, %s18096_s27  ;;  %v4284_v40 = vrot.slane %v4269_v56, %v11431_v25  ;;  %s18607_s5 = smov 122   ;;  %v4308_v13 = vcombine.high %v4291_v6, %v18440_v12 }
 0x462   : > { %v13426_v27 = vpop.permute.xlu1 %5256  ;;  %v13428_v3 = vpop.permute.xlu0 %5252  ;;  %v4307_v56 = vcombine.high %v4284_v40, %v18440_v12 }
 0x463   : > { %18600 = vst [vmem:[#allocation351_spill] sm:$0xff] %v13426_v27  ;;  %18601 = vst [vmem:[#allocation352_spill] sm:$0xff] %v13428_v3 }
 0x464   : > { %5488 = vrot.lane.b32.xlu1 %v4257_v49, %s18103_s23  ;;  %5484 = vrot.lane.b32.xlu0 %v4260_v28, %s18100_s4  ;;  %s18606_s23 = smov 4   ;;  %v4292_v49 = vcombine.high %v4276_v19, %v18440_v12 }
 0x466   : > { %v13438_v60 = vpop.permute.xlu1 %5264  ;;  %v13440_v27 = vpop.permute.xlu0 %5260 }
 0x467   : > { %18602 = vst [vmem:[#allocation353_spill] sm:$0xff] %v13438_v60  ;;  %18603 = vst [vmem:[#allocation354_spill] sm:$0xff] %v13440_v27 }
 0x468   : > { %5496 = vrot.lane.b32.xlu1 %v4284_v40, %s18107_s17  ;;  %5492 = vrot.lane.b32.xlu0 %v4261_v2, %s18104_s22  ;;  %v4299_v2 = vrot.slane %v4276_v19, %v11431_v25  ;;  %s18610_s17 = smov 24   ;;  %s18611_s22 = smov 14   ;;  %v4311_v19 = vcombine.high %v12916_v58, %v18440_v12 }
 0x46a   : > { %v13446_v28 = vpop.permute.xlu1 %5272  ;;  %v13448_v31 = vpop.permute.xlu0 %5268 }
 0x46b   : > { %18604 = vst [vmem:[#allocation355_spill] sm:$0xff] %v13446_v28  ;;  %18605 = vst [vmem:[#allocation356_spill] sm:$0xff] %v13448_v31  ;;  %v4306_v28 = vrot.slane %v4292_v49, %v11431_v25  ;;  %v4325_v49 = vrot.slane %v4311_v19, %v11428_v24 }
 0x46c   : > { %5504 = vrot.lane.b32.xlu1 %v4291_v6, %s18606_s23  ;;  %5500 = vrot.lane.b32.xlu0 %v4307_v56, %s18607_s5  ;;  %s18614_s23 = smov 44   ;;  %s18615_s5 = smov 34   ;;  %v4326_v6 = vcombine.high %v4318_v54, %v18440_v12 }
 0x46e   : > { %v13455_v60 = vpop.permute.xlu1 %5280  ;;  %v13457_v27 = vpop.permute.xlu0 %5276  ;;  %v4340_v58 = vrot.slane %v4326_v6, %v11431_v25  ;;  %v4367_v6 = vrot.slane %v12914_v26, %v11428_v24 }
 0x46f   : > { %18608 = vst [vmem:[#allocation357_spill] sm:$0xff] %v13455_v60  ;;  %18609 = vst [vmem:[#allocation358_spill] sm:$0xff] %v13457_v27  ;;  %v4309_v60 = vcombine.high %v4299_v2, %v18440_v12 }
 0x470   : > { %5512 = vrot.lane.b32.xlu1 %v4299_v2, %s18610_s17  ;;  %5508 = vrot.lane.b32.xlu0 %v4308_v13, %s18611_s22  ;;  %v4333_v13 = vrot.slane %v4318_v54, %v11431_v25  ;;  %s18618_s17 = smov 64   ;;  %s18619_s22 = smov 54   ;;  %v4357_v19 = vcombine.high %v4340_v58, %v18440_v12 }
 0x472   : > { %v13465_v40 = vpop.permute.xlu1 %5288  ;;  %v13467_v56 = vpop.permute.xlu0 %5284  ;;  %v4356_v54 = vcombine.high %v4333_v13, %v18440_v12 }
 0x473   : > { %18612 = vst [vmem:[#allocation359_spill] sm:$0xff] %v13465_v40  ;;  %18613 = vst [vmem:[#allocation360_spill] sm:$0xff] %v13467_v56  ;;  %v4310_v56 = vcombine.high %v4306_v28, %v18440_v12 }
 0x474   : > { %5520 = vrot.lane.b32.xlu1 %v4306_v28, %s18614_s23  ;;  %5516 = vrot.lane.b32.xlu0 %v4309_v60, %s18615_s5  ;;  %s18622_s23 = smov 84   ;;  %s18623_s5 = smov 74   ;;  %v4341_v28 = vcombine.high %v4325_v49, %v18440_v12 }
 0x476   : > { %v13477_v27 = vpop.permute.xlu1 %5296  ;;  %v13479_v40 = vpop.permute.xlu0 %5292 }
 0x477   : > { %18616 = vst [vmem:[#allocation361_spill] sm:$0xff] %v13477_v27  ;;  %18617 = vst [vmem:[#allocation362_spill] sm:$0xff] %v13479_v40 }
 0x478   : > { %5528 = vrot.lane.b32.xlu1 %v4333_v13, %s18618_s17  ;;  %5524 = vrot.lane.b32.xlu0 %v4310_v56, %s18619_s22  ;;  %v4348_v56 = vrot.slane %v4325_v49, %v11431_v25  ;;  %s18626_s17 = smov 104   ;;  %s18627_s22 = smov 94   ;;  %v4360_v49 = vcombine.high %v12914_v26, %v18440_v12 }
 0x47a   : > { %v13485_v60 = vpop.permute.xlu1 %5304  ;;  %v13487_v2 = vpop.permute.xlu0 %5300 }
 0x47b   : > { %18620 = vst [vmem:[#allocation363_spill] sm:$0xff] %v13485_v60  ;;  %18621 = vst [vmem:[#allocation364_spill] sm:$0xff] %v13487_v2  ;;  %v4355_v60 = vrot.slane %v4341_v28, %v11431_v25  ;;  %v4374_v28 = vrot.slane %v4360_v49, %v11428_v24 }
 0x47c   : > { %5536 = vrot.lane.b32.xlu1 %v4340_v58, %s18622_s23  ;;  %5532 = vrot.lane.b32.xlu0 %v4356_v54, %s18623_s5  ;;  %s18630_s23 = smov 124   ;;  %s18631_s5 = smov 114   ;;  %v4375_v58 = vcombine.high %v4367_v6, %v18440_v12 }
 0x47e   : > { %v13494_v27 = vpop.permute.xlu1 %5312  ;;  %v13496_v40 = vpop.permute.xlu0 %5308  ;;  %v4389_v26 = vrot.slane %v4375_v58, %v11431_v25  ;;  %v4416_v58 = vrot.slane %v12927_v39, %v11428_v24 }
 0x47f   : > { %18624 = vst [vmem:[#allocation365_spill] sm:$0xff] %v13494_v27  ;;  %18625 = vst [vmem:[#allocation366_spill] sm:$0xff] %v13496_v40  ;;  %v4358_v27 = vcombine.high %v4348_v56, %v18440_v12 }
 0x480   : > { %5544 = vrot.lane.b32.xlu1 %v4348_v56, %s18626_s17  ;;  %5540 = vrot.lane.b32.xlu0 %v4357_v19, %s18627_s22  ;;  %v4382_v19 = vrot.slane %v4367_v6, %v11431_v25  ;;  %s18634_s17 = smov 16   ;;  %s18635_s22 = smov 6   ;;  %v4406_v49 = vcombine.high %v4389_v26, %v18440_v12 }
 0x482   : > { %v13504_v13 = vpop.permute.xlu1 %5320  ;;  %v13506_v54 = vpop.permute.xlu0 %5316  ;;  %v4405_v6 = vcombine.high %v4382_v19, %v18440_v12 }
 0x483   : > { %18628 = vst [vmem:[#allocation367_spill] sm:$0xff] %v13504_v13  ;;  %18629 = vst [vmem:[#allocation368_spill] sm:$0xff] %v13506_v54  ;;  %v4359_v54 = vcombine.high %v4355_v60, %v18440_v12 }
 0x484   : > { %5552 = vrot.lane.b32.xlu1 %v4355_v60, %s18630_s23  ;;  %5548 = vrot.lane.b32.xlu0 %v4358_v27, %s18631_s5  ;;  %s18638_s23 = smov 36   ;;  %s18639_s5 = smov 26   ;;  %v4390_v60 = vcombine.high %v4374_v28, %v18440_v12 }
 0x486   : > { %v13516_v40 = vpop.permute.xlu1 %5328  ;;  %v13518_v13 = vpop.permute.xlu0 %5324 }
 0x487   : > { %18632 = vst [vmem:[#allocation369_spill] sm:$0xff] %v13516_v40  ;;  %18633 = vst [vmem:[#allocation370_spill] sm:$0xff] %v13518_v13 }
 0x488   : > { %5560 = vrot.lane.b32.xlu1 %v4382_v19, %s18634_s17  ;;  %5556 = vrot.lane.b32.xlu0 %v4359_v54, %s18635_s22  ;;  %v4397_v54 = vrot.slane %v4374_v28, %v11431_v25  ;;  %s18642_s17 = smov 46   ;;  %v4409_v28 = vcombine.high %v12927_v39, %v18440_v12 }
 0x48a   : > { %v13524_v27 = vpop.permute.xlu1 %5336  ;;  %v13526_v56 = vpop.permute.xlu0 %5332 }
 0x48b   : > { %18636 = vst [vmem:[#allocation371_spill] sm:$0xff] %v13524_v27  ;;  %18637 = vst [vmem:[#allocation372_spill] sm:$0xff] %v13526_v56  ;;  %v4404_v27 = vrot.slane %v4390_v60, %v11431_v25  ;;  %v4423_v60 = vrot.slane %v4409_v28, %v11428_v24 }
 0x48c   : > { %5568 = vrot.lane.b32.xlu1 %v4389_v26, %s18638_s23  ;;  %5564 = vrot.lane.b32.xlu0 %v4405_v6, %s18639_s5  ;;  %s18645_s23 = smov 76   ;;  %s18646_s5 = smov 66   ;;  %v4424_v26 = vcombine.high %v4416_v58, %v18440_v12 }
 0x48e   : > { %v13533_v40 = vpop.permute.xlu1 %5344  ;;  %v13535_v13 = vpop.permute.xlu0 %5340  ;;  %v4438_v39 = vrot.slane %v4424_v26, %v11431_v25  ;;  %v4465_v26 = vrot.slane %v12925_v1, %v11428_v24 }
 0x48f   : > { %18640 = vst [vmem:[#allocation373_spill] sm:$0xff] %v13533_v40  ;;  %18641 = vst [vmem:[#allocation374_spill] sm:$0xff] %v13535_v13  ;;  %v4407_v40 = vcombine.high %v4397_v54, %v18440_v12 }
 0x490   : > { %5576 = vrot.lane.b32.xlu1 %v4397_v54, %s18545_s16  ;;  %5572 = vrot.lane.b32.xlu0 %v4406_v49, %s18642_s17  ;;  %v4431_v49 = vrot.slane %v4416_v58, %v11431_v25  ;;  %s18649_s16 = smov 96   ;;  %s18650_s17 = smov 86   ;;  %v4455_v28 = vcombine.high %v4438_v39, %v18440_v12 }
 0x492   : > { %v13543_v19 = vpop.permute.xlu1 %5352  ;;  %v13545_v6 = vpop.permute.xlu0 %5348  ;;  %v4454_v58 = vcombine.high %v4431_v49, %v18440_v12 }
 0x493   : > { %18643 = vst [vmem:[#allocation375_spill] sm:$0xff] %v13543_v19  ;;  %18644 = vst [vmem:[#allocation376_spill] sm:$0xff] %v13545_v6  ;;  %v4408_v6 = vcombine.high %v4404_v27, %v18440_v12 }
 0x494   : > { %5584 = vrot.lane.b32.xlu1 %v4404_v27, %s18645_s23  ;;  %5580 = vrot.lane.b32.xlu0 %v4407_v40, %s18646_s5  ;;  %s18653_s23 = smov 116   ;;  %s18654_s5 = smov 106   ;;  %v4439_v27 = vcombine.high %v4423_v60, %v18440_v12 }
 0x496   : > { %v13555_v13 = vpop.permute.xlu1 %5360  ;;  %v13557_v56 = vpop.permute.xlu0 %5356 }
 0x497   : > { %18647 = vst [vmem:[#allocation377_spill] sm:$0xff] %v13555_v13  ;;  %18648 = vst [vmem:[#allocation378_spill] sm:$0xff] %v13557_v56 }
 0x498   : > { %5592 = vrot.lane.b32.xlu1 %v4431_v49, %s18649_s16  ;;  %5588 = vrot.lane.b32.xlu0 %v4408_v6, %s18650_s17  ;;  %v4446_v6 = vrot.slane %v4423_v60, %v11431_v25  ;;  %s18657_s16 = smov 126   ;;  %v4458_v60 = vcombine.high %v12925_v1, %v18440_v12 }
 0x49a   : > { %v13563_v40 = vpop.permute.xlu1 %5368  ;;  %v13565_v54 = vpop.permute.xlu0 %5364 }
 0x49b   : > { %18651 = vst [vmem:[#allocation379_spill] sm:$0xff] %v13563_v40  ;;  %18652 = vst [vmem:[#allocation380_spill] sm:$0xff] %v13565_v54  ;;  %v4453_v40 = vrot.slane %v4439_v27, %v11431_v25  ;;  %v4472_v27 = vrot.slane %v4458_v60, %v11428_v24 }
 0x49c   : > { %5600 = vrot.lane.b32.xlu1 %v4438_v39, %s18653_s23  ;;  %5596 = vrot.lane.b32.xlu0 %v4454_v58, %s18654_s5  ;;  %s18660_s23 = smov 28   ;;  %s18661_s5 = smov 18   ;;  %v4473_v39 = vcombine.high %v4465_v26, %v18440_v12 }
 0x49e   : > { %v13572_v13 = vpop.permute.xlu1 %5376  ;;  %v13574_v19 = vpop.permute.xlu0 %5372  ;;  %v4487_v1 = vrot.slane %v4473_v39, %v11431_v25  ;;  %v4507_v39 = vcombine.high %v12942_v35, %v18440_v12 }
 0x49f   : > { %18655 = vst [vmem:[#allocation381_spill] sm:$0xff] %v13572_v13  ;;  %18656 = vst [vmem:[#allocation382_spill] sm:$0xff] %v13574_v19  ;;  %v4456_v13 = vcombine.high %v4446_v6, %v18440_v12 }
 0x4a0   : > { %5608 = vrot.lane.b32.xlu1 %v4446_v6, %s18560_s2  ;;  %5604 = vrot.lane.b32.xlu0 %v4455_v28, %s18657_s16  ;;  %v4480_v28 = vrot.slane %v4465_v26, %v11431_v25  ;;  %s18664_s2 = smov 38  }
 0x4a2   : > { %v13582_v49 = vpop.permute.xlu1 %5384  ;;  %v13584_v58 = vpop.permute.xlu0 %5380  ;;  %v4503_v26 = vcombine.high %v4480_v28, %v18440_v12 }
 0x4a3   : > { %18658 = vst [vmem:[#allocation383_spill] sm:$0xff] %v13582_v49  ;;  %18659 = vst [vmem:[#allocation384_spill] sm:$0xff] %v13584_v58  ;;  %v4457_v58 = vcombine.high %v4453_v40, %v18440_v12 }
 0x4a4   : > { %5616 = vrot.lane.b32.xlu1 %v4453_v40, %s18660_s23  ;;  %5612 = vrot.lane.b32.xlu0 %v4456_v13, %s18661_s5  ;;  %s18667_s23 = smov 58   ;;  %v4488_v40 = vcombine.high %v4472_v27, %v18440_v12 }
 0x4a6   : > { %v13594_v19 = vpop.permute.xlu1 %5392  ;;  %v13596_v49 = vpop.permute.xlu0 %5388 }
 0x4a7   : > { %18662 = vst [vmem:[#allocation385_spill] sm:$0xff] %v13594_v19  ;;  %18663 = vst [vmem:[#allocation386_spill] sm:$0xff] %v13596_v49  ;;  %v4514_v19 = vrot.slane %v12942_v35, %v11428_v24 }
 0x4a8   : > { %5624 = vrot.lane.b32.xlu1 %v4480_v28, %s18567_s30  ;;  %5620 = vrot.lane.b32.xlu0 %v4457_v58, %s18664_s2  ;;  %s18670_s30 = smov 78  }
 0x4a9   : > { %v4522_v28 = vcombine.high %v4514_v19, %v18440_v12 }
 0x4aa   : > { %v13602_v13 = vpop.permute.xlu1 %5400  ;;  %v13604_v6 = vpop.permute.xlu0 %5396 }
 0x4ab   : > { %18665 = vst [vmem:[#allocation387_spill] sm:$0xff] %v13602_v13  ;;  %18666 = vst [vmem:[#allocation388_spill] sm:$0xff] %v13604_v6  ;;  %v4495_v13 = vrot.slane %v4472_v27, %v11431_v25  ;;  %v4504_v6 = vcombine.high %v4487_v1, %v18440_v12  ;;  %v4502_v27 = vrot.slane %v4488_v40, %v11431_v25 }
 0x4ac   : > { %5632 = vrot.lane.b32.xlu1 %v4487_v1, %s18571_s18  ;;  %5628 = vrot.lane.b32.xlu0 %v4503_v26, %s18667_s23  ;;  %v13625_v26 = vrot.slane %v4514_v19, %v11431_v25  ;;  %v4536_v35 = vrot.slane %v4522_v28, %v11431_v25 }
 0x4ad   : > { %v4505_v1 = vcombine.high %v4495_v13, %v18440_v12 }
 0x4ae   : > { %v13613_v58 = vpop.permute.xlu1 %5408  ;;  %v13615_v60 = vpop.permute.xlu0 %5404  ;;  %18671 = vst [vmem:[#allocation391_spill] sm:$0xff] %v13625_v26 }
 0x4af   : > { %18668 = vst [vmem:[#allocation389_spill] sm:$0xff] %v13613_v58  ;;  %18669 = vst [vmem:[#allocation390_spill] sm:$0xff] %v13615_v60 }
 0x4b0   : > { %5640 = vrot.lane.b32.xlu1 %v4495_v13, %s18574_s3  ;;  %5636 = vrot.lane.b32.xlu0 %v4504_v6, %s18670_s30  ;;  %s18674_s3 = smov 98   ;;  %v4521_v6 = vrot.slane %v4507_v39, %v11428_v24 }
 0x4b2   : > { %v13627_v49 = vpop.permute.xlu1 %5416  ;;  %v13629_v58 = vpop.permute.xlu0 %5412  ;;  %v4537_v13 = vcombine.high %v4521_v6, %v18440_v12  ;;  %v4544_v40 = vrot.slane %v4521_v6, %v11431_v25 }
 0x4b3   : > { %18672 = vst [vmem:[#allocation392_spill] sm:$0xff] %v13627_v49  ;;  %18673 = vst [vmem:[#allocation393_spill] sm:$0xff] %v13629_v58  ;;  %v4552_v49 = vcombine.high %v13625_v26, %v18440_v12  ;;  %v4506_v58 = vcombine.high %v4502_v27, %v18440_v12 }
 0x4b4   : > { %5648 = vrot.lane.b32.xlu1 %v4502_v27, %s18578_s12  ;;  %5644 = vrot.lane.b32.xlu0 %v4505_v1, %s18674_s3  ;;  %v4553_v1 = vcombine.high %v4536_v35, %v18440_v12  ;;  %v4563_v27 = vrot.slane %v12940_v38, %v11428_v24  ;;  %v4554_v26 = vcombine.high %v4544_v40, %v18440_v12 }
 0x4b5   : > { %v4551_v6 = vrot.slane %v4537_v13, %v11431_v25 }
 0x4b6   : > { %v13637_v60 = vpop.permute.xlu1 %5424  ;;  %v13639_v19 = vpop.permute.xlu0 %5420 }
 0x4b7   : > { %18675 = vst [vmem:[#allocation394_spill] sm:$0xff] %v13637_v60  ;;  %18676 = vst [vmem:[#allocation395_spill] sm:$0xff] %v13639_v19 }
 0x4b8   : > { %5656 = vrot.lane.b32.xlu1 %v4552_v49, %s18581_s14  ;;  %5652 = vrot.lane.b32.xlu0 %v4506_v58, %s18482_s0 }
 0x4ba   : > { %v13648_v39 = vpop.permute.xlu1 %5432  ;;  %v13650_v28 = vpop.permute.xlu0 %5428 }
 0x4bb   : > { %18677 = vst [vmem:[#allocation396_spill] sm:$0xff] %v13648_v39  ;;  %18678 = vst [vmem:[#allocation397_spill] sm:$0xff] %v13650_v28  ;;  %v4578_v39 = vrot.slane %v4563_v27, %v11431_v25 }
 0x4bc   : > { %5664 = vrot.lane.b32.xlu1 %v4553_v1, %s18445_s20  ;;  %5660 = vrot.lane.b32.xlu0 %v4536_v35, %s18485_s7  ;;  %v4556_v1 = vcombine.high %v12940_v38, %v18440_v12  ;;  %v4571_v35 = vcombine.high %v4563_v27, %v18440_v12 }
 0x4bd   : > { %v4601_v27 = vcombine.high %v4578_v39, %v18440_v12 }
 0x4be   : > { %v13657_v49 = vpop.permute.xlu1 %5440  ;;  %v13659_v58 = vpop.permute.xlu0 %5436  ;;  %v4585_v13 = vrot.slane %v4571_v35, %v11431_v25  ;;  %v4612_v35 = vrot.slane %v12953_v45, %v11428_v24 }
 0x4bf   : > { %18679 = vst [vmem:[#allocation398_spill] sm:$0xff] %v13657_v49  ;;  %18680 = vst [vmem:[#allocation399_spill] sm:$0xff] %v13659_v58  ;;  %v4555_v58 = vcombine.high %v4551_v6, %v18440_v12 }
 0x4c0   : > { %5672 = vrot.lane.b32.xlu1 %v4554_v26, %s18446_s8  ;;  %5668 = vrot.lane.b32.xlu0 %v4544_v40, %s18488_s1  ;;  %v4570_v26 = vrot.slane %v4556_v1, %v11428_v24  ;;  %v4602_v1 = vcombine.high %v4585_v13, %v18440_v12 }
 0x4c2   : > { %v13669_v28 = vpop.permute.xlu1 %5448  ;;  %v13671_v49 = vpop.permute.xlu0 %5444 }
 0x4c3   : > { %18681 = vst [vmem:[#allocation400_spill] sm:$0xff] %v13669_v28  ;;  %18682 = vst [vmem:[#allocation401_spill] sm:$0xff] %v13671_v49  ;;  %v4586_v49 = vcombine.high %v4570_v26, %v18440_v12 }
 0x4c4   : > { %5680 = vrot.lane.b32.xlu1 %v4555_v58, %s18447_s10  ;;  %5676 = vrot.lane.b32.xlu0 %v4551_v6, %s18296_s6  ;;  %v4593_v58 = vrot.slane %v4570_v26, %v11431_v25 }
 0x4c5   : > { %v4600_v26 = vrot.slane %v4586_v49, %v11431_v25 }
 0x4c6   : > { %v13678_v40 = vpop.permute.xlu1 %5456  ;;  %v13680_v38 = vpop.permute.xlu0 %5452  ;;  %v4603_v19 = vcombine.high %v4593_v58, %v18440_v12 }
 0x4c7   : > { %18683 = vst [vmem:[#allocation402_spill] sm:$0xff] %v13678_v40  ;;  %18684 = vst [vmem:[#allocation403_spill] sm:$0xff] %v13680_v38 }
 0x4c8   : > { %5688 = vrot.lane.b32.xlu1 %v4601_v27, %s18202_s9  ;;  %5684 = vrot.lane.b32.xlu0 %v4578_v39, %s18300_s21 }
 0x4ca   : > { %v13687_v60 = vpop.permute.xlu1 %5464  ;;  %v13689_v6 = vpop.permute.xlu0 %5460 }
 0x4cb   : > { %18685 = vst [vmem:[#allocation404_spill] sm:$0xff] %v13687_v60  ;;  %18686 = vst [vmem:[#allocation405_spill] sm:$0xff] %v13689_v6  ;;  %v4627_v60 = vrot.slane %v4612_v35, %v11431_v25 }
 0x4cc   : > { %5696 = vrot.lane.b32.xlu1 %v4602_v1, %s18206_s28  ;;  %5692 = vrot.lane.b32.xlu0 %v4585_v13, %s18303_s11  ;;  %v4605_v1 = vcombine.high %v12953_v45, %v18440_v12  ;;  %v4620_v13 = vcombine.high %v4612_v35, %v18440_v12 }
 0x4cd   : > { %v4650_v35 = vcombine.high %v4627_v60, %v18440_v12 }
 0x4ce   : > { %v13696_v27 = vpop.permute.xlu1 %5472  ;;  %v13698_v39 = vpop.permute.xlu0 %5468  ;;  %v4634_v49 = vrot.slane %v4620_v13, %v11431_v25  ;;  %v4661_v13 = vrot.slane %v12951_v62, %v11428_v24 }
 0x4cf   : > { %18687 = vst [vmem:[#allocation406_spill] sm:$0xff] %v13696_v27  ;;  %18688 = vst [vmem:[#allocation407_spill] sm:$0xff] %v13698_v39  ;;  %v4604_v39 = vcombine.high %v4600_v26, %v18440_v12 }
 0x4d0   : > { %5704 = vrot.lane.b32.xlu1 %v4603_v19, %s18210_s19  ;;  %5700 = vrot.lane.b32.xlu0 %v4593_v58, %s18207_s24  ;;  %v4619_v19 = vrot.slane %v4605_v1, %v11428_v24  ;;  %v4651_v1 = vcombine.high %v4634_v49, %v18440_v12 }
 0x4d2   : > { %v13708_v6 = vpop.permute.xlu1 %5480  ;;  %v13710_v27 = vpop.permute.xlu0 %5476 }
 0x4d3   : > { %18689 = vst [vmem:[#allocation408_spill] sm:$0xff] %v13708_v6  ;;  %18690 = vst [vmem:[#allocation409_spill] sm:$0xff] %v13710_v27  ;;  %v4635_v6 = vcombine.high %v4619_v19, %v18440_v12 }
 0x4d4   : > { %5712 = vrot.lane.b32.xlu1 %v4604_v39, %s18089_s15  ;;  %5708 = vrot.lane.b32.xlu0 %v4600_v26, %s18088_s26  ;;  %v4642_v39 = vrot.slane %v4619_v19, %v11431_v25 }
 0x4d5   : > { %v4649_v19 = vrot.slane %v4635_v6, %v11431_v25 }
 0x4d6   : > { %v13717_v58 = vpop.permute.xlu1 %5488  ;;  %v13719_v45 = vpop.permute.xlu0 %5484 }
 0x4d7   : > { %18691 = vst [vmem:[#allocation410_spill] sm:$0xff] %v13717_v58  ;;  %18692 = vst [vmem:[#allocation411_spill] sm:$0xff] %v13719_v45  ;;  %v4652_v58 = vcombine.high %v4642_v39, %v18440_v12 }
 0x4d8   : > { %5720 = vrot.lane.b32.xlu1 %v4650_v35, %s18093_s25  ;;  %5716 = vrot.lane.b32.xlu0 %v4627_v60, %s18092_s13  ;;  %s18697_s25 = smov 72  }
 0x4da   : > { %v13726_v27 = vpop.permute.xlu1 %5496  ;;  %v13728_v26 = vpop.permute.xlu0 %5492 }
 0x4db   : > { %18693 = vst [vmem:[#allocation412_spill] sm:$0xff] %v13726_v27  ;;  %18694 = vst [vmem:[#allocation413_spill] sm:$0xff] %v13728_v26  ;;  %v4676_v27 = vrot.slane %v4661_v13, %v11431_v25 }
 0x4dc   : > { %5728 = vrot.lane.b32.xlu1 %v4651_v1, %s18096_s27  ;;  %5724 = vrot.lane.b32.xlu0 %v4634_v49, %s18095_s29  ;;  %v4654_v1 = vcombine.high %v12951_v62, %v18440_v12  ;;  %v4669_v49 = vcombine.high %v4661_v13, %v18440_v12  ;;  %s18700_s27 = smov 102   ;;  %s18701_s29 = smov 92  }
 0x4dd   : > { %v4699_v13 = vcombine.high %v4676_v27, %v18440_v12 }
 0x4de   : > { %v13735_v35 = vpop.permute.xlu1 %5504  ;;  %v13737_v60 = vpop.permute.xlu0 %5500  ;;  %v4668_v6 = vrot.slane %v4654_v1, %v11428_v24 }
 0x4df   : > { %18695 = vst [vmem:[#allocation414_spill] sm:$0xff] %v13735_v35  ;;  %18696 = vst [vmem:[#allocation415_spill] sm:$0xff] %v13737_v60  ;;  %v4653_v60 = vcombine.high %v4649_v19, %v18440_v12 }
 0x4e0   : > { %5736 = vrot.lane.b32.xlu1 %v4652_v58, %s18100_s4  ;;  %5732 = vrot.lane.b32.xlu0 %v4642_v39, %s18697_s25  ;;  %v4683_v58 = vrot.slane %v4669_v49, %v11431_v25  ;;  %s18704_s4 = smov 122   ;;  %s18705_s25 = smov 112   ;;  %v4710_v49 = vrot.slane %v12966_v42, %v11428_v24 }
 0x4e2   : > { %v13747_v26 = vpop.permute.xlu1 %5512  ;;  %v13749_v35 = vpop.permute.xlu0 %5508  ;;  %v4700_v1 = vcombine.high %v4683_v58, %v18440_v12 }
 0x4e3   : > { %18698 = vst [vmem:[#allocation416_spill] sm:$0xff] %v13747_v26  ;;  %18699 = vst [vmem:[#allocation417_spill] sm:$0xff] %v13749_v35  ;;  %v4684_v26 = vcombine.high %v4668_v6, %v18440_v12 }
 0x4e4   : > { %5744 = vrot.lane.b32.xlu1 %v4653_v60, %s18700_s27  ;;  %5740 = vrot.lane.b32.xlu0 %v4649_v19, %s18701_s29  ;;  %v4691_v60 = vrot.slane %v4668_v6, %v11431_v25  ;;  %s18708_s27 = smov 14   ;;  %s18709_s29 = smov 4  }
 0x4e5   : > { %v4698_v6 = vrot.slane %v4684_v26, %v11431_v25 }
 0x4e6   : > { %v13756_v39 = vpop.permute.xlu1 %5520  ;;  %v13758_v62 = vpop.permute.xlu0 %5516 }
 0x4e7   : > { %18702 = vst [vmem:[#allocation418_spill] sm:$0xff] %v13756_v39  ;;  %18703 = vst [vmem:[#allocation419_spill] sm:$0xff] %v13758_v62  ;;  %v4701_v39 = vcombine.high %v4691_v60, %v18440_v12 }
 0x4e8   : > { %5752 = vrot.lane.b32.xlu1 %v4699_v13, %s18704_s4  ;;  %5748 = vrot.lane.b32.xlu0 %v4676_v27, %s18705_s25  ;;  %s18712_s4 = smov 34   ;;  %s18713_s25 = smov 24  }
 0x4ea   : > { %v13765_v35 = vpop.permute.xlu1 %5528  ;;  %v13767_v19 = vpop.permute.xlu0 %5524 }
 0x4eb   : > { %18706 = vst [vmem:[#allocation420_spill] sm:$0xff] %v13765_v35  ;;  %18707 = vst [vmem:[#allocation421_spill] sm:$0xff] %v13767_v19  ;;  %v4725_v35 = vrot.slane %v4710_v49, %v11431_v25 }
 0x4ec   : > { %5760 = vrot.lane.b32.xlu1 %v4700_v1, %s18708_s27  ;;  %5756 = vrot.lane.b32.xlu0 %v4683_v58, %s18709_s29  ;;  %v4703_v1 = vcombine.high %v12966_v42, %v18440_v12  ;;  %v4718_v58 = vcombine.high %v4710_v49, %v18440_v12  ;;  %s18716_s27 = smov 54   ;;  %s18717_s29 = smov 44  }
 0x4ed   : > { %v4748_v49 = vcombine.high %v4725_v35, %v18440_v12 }
 0x4ee   : > { %v13774_v13 = vpop.permute.xlu1 %5536  ;;  %v13776_v27 = vpop.permute.xlu0 %5532  ;;  %v4717_v26 = vrot.slane %v4703_v1, %v11428_v24 }
 0x4ef   : > { %18710 = vst [vmem:[#allocation422_spill] sm:$0xff] %v13774_v13  ;;  %18711 = vst [vmem:[#allocation423_spill] sm:$0xff] %v13776_v27  ;;  %v4702_v27 = vcombine.high %v4698_v6, %v18440_v12 }
 0x4f0   : > { %5768 = vrot.lane.b32.xlu1 %v4701_v39, %s18712_s4  ;;  %5764 = vrot.lane.b32.xlu0 %v4691_v60, %s18713_s25  ;;  %v4732_v39 = vrot.slane %v4718_v58, %v11431_v25  ;;  %s18720_s4 = smov 74   ;;  %s18721_s25 = smov 64   ;;  %v4759_v58 = vrot.slane %v12964_v7, %v11428_v24 }
 0x4f2   : > { %v13786_v19 = vpop.permute.xlu1 %5544  ;;  %v13788_v13 = vpop.permute.xlu0 %5540  ;;  %v4749_v1 = vcombine.high %v4732_v39, %v18440_v12  ;;  %v4774_v62 = vrot.slane %v4759_v58, %v11431_v25 }
 0x4f3   : > { %18714 = vst [vmem:[#allocation424_spill] sm:$0xff] %v13786_v19  ;;  %18715 = vst [vmem:[#allocation425_spill] sm:$0xff] %v13788_v13  ;;  %v4733_v19 = vcombine.high %v4717_v26, %v18440_v12 }
 0x4f4   : > { %5776 = vrot.lane.b32.xlu1 %v4702_v27, %s18716_s27  ;;  %5772 = vrot.lane.b32.xlu0 %v4698_v6, %s18717_s29  ;;  %v4740_v27 = vrot.slane %v4717_v26, %v11431_v25  ;;  %s18724_s27 = smov 94   ;;  %s18725_s29 = smov 84  }
 0x4f5   : > { %v4747_v26 = vrot.slane %v4733_v19, %v11431_v25 }
 0x4f6   : > { %v13795_v60 = vpop.permute.xlu1 %5552  ;;  %v13797_v42 = vpop.permute.xlu0 %5548 }
 0x4f7   : > { %18718 = vst [vmem:[#allocation426_spill] sm:$0xff] %v13795_v60  ;;  %18719 = vst [vmem:[#allocation427_spill] sm:$0xff] %v13797_v42  ;;  %v4750_v42 = vcombine.high %v4740_v27, %v18440_v12 }
 0x4f8   : > { %5784 = vrot.lane.b32.xlu1 %v4748_v49, %s18720_s4  ;;  %5780 = vrot.lane.b32.xlu0 %v4725_v35, %s18721_s25  ;;  %s18728_s4 = smov 114   ;;  %s18729_s25 = smov 104  }
 0x4fa   : > { %v13804_v13 = vpop.permute.xlu1 %5560  ;;  %v13806_v6 = vpop.permute.xlu0 %5556 }
 0x4fb   : > { %18722 = vst [vmem:[#allocation428_spill] sm:$0xff] %v13804_v13  ;;  %18723 = vst [vmem:[#allocation429_spill] sm:$0xff] %v13806_v6 }
 0x4fc   : > { %5792 = vrot.lane.b32.xlu1 %v4749_v1, %s18724_s27  ;;  %5788 = vrot.lane.b32.xlu0 %v4732_v39, %s18725_s29  ;;  %v4752_v1 = vcombine.high %v12964_v7, %v18440_v12  ;;  %v4767_v39 = vcombine.high %v4759_v58, %v18440_v12  ;;  %s18732_s27 = smov 124   ;;  %v4797_v58 = vcombine.high %v4774_v62, %v18440_v12 }
 0x4fe   : > { %v13813_v49 = vpop.permute.xlu1 %5568  ;;  %v13815_v35 = vpop.permute.xlu0 %5564  ;;  %v4766_v19 = vrot.slane %v4752_v1, %v11428_v24 }
 0x4ff   : > { %18726 = vst [vmem:[#allocation430_spill] sm:$0xff] %v13813_v49  ;;  %18727 = vst [vmem:[#allocation431_spill] sm:$0xff] %v13815_v35  ;;  %v4751_v35 = vcombine.high %v4747_v26, %v18440_v12 }
 0x500   : > { %5800 = vrot.lane.b32.xlu1 %v4750_v42, %s18728_s4  ;;  %5796 = vrot.lane.b32.xlu0 %v4740_v27, %s18729_s25  ;;  %v4781_v42 = vrot.slane %v4767_v39, %v11431_v25  ;;  %s18735_s4 = smov 26   ;;  %s18736_s25 = smov 16   ;;  %v4808_v39 = vrot.slane %v12979_v53, %v11428_v24 }
 0x502   : > { %v13825_v13 = vpop.permute.xlu1 %5576  ;;  %v13827_v49 = vpop.permute.xlu0 %5572  ;;  %v4798_v1 = vcombine.high %v4781_v42, %v18440_v12 }
 0x503   : > { %18730 = vst [vmem:[#allocation432_spill] sm:$0xff] %v13825_v13  ;;  %18731 = vst [vmem:[#allocation433_spill] sm:$0xff] %v13827_v49  ;;  %v4782_v13 = vcombine.high %v4766_v19, %v18440_v12 }
 0x504   : > { %5808 = vrot.lane.b32.xlu1 %v4751_v35, %s18635_s22  ;;  %5804 = vrot.lane.b32.xlu0 %v4747_v26, %s18732_s27  ;;  %v4789_v35 = vrot.slane %v4766_v19, %v11431_v25  ;;  %s18739_s22 = smov 46   ;;  %s18740_s27 = smov 36  }
 0x505   : > { %v4796_v19 = vrot.slane %v4782_v13, %v11431_v25 }
 0x506   : > { %v13834_v27 = vpop.permute.xlu1 %5584  ;;  %v13836_v7 = vpop.permute.xlu0 %5580 }
 0x507   : > { %18733 = vst [vmem:[#allocation434_spill] sm:$0xff] %v13834_v27  ;;  %18734 = vst [vmem:[#allocation435_spill] sm:$0xff] %v13836_v7  ;;  %v4799_v27 = vcombine.high %v4789_v35, %v18440_v12 }
 0x508   : > { %5816 = vrot.lane.b32.xlu1 %v4797_v58, %s18735_s4  ;;  %5812 = vrot.lane.b32.xlu0 %v4774_v62, %s18736_s25  ;;  %s18743_s4 = smov 66   ;;  %s18744_s25 = smov 56  }
 0x50a   : > { %v13843_v49 = vpop.permute.xlu1 %5592  ;;  %v13845_v26 = vpop.permute.xlu0 %5588 }
 0x50b   : > { %18737 = vst [vmem:[#allocation436_spill] sm:$0xff] %v13843_v49  ;;  %18738 = vst [vmem:[#allocation437_spill] sm:$0xff] %v13845_v26  ;;  %v4823_v49 = vrot.slane %v4808_v39, %v11431_v25 }
 0x50c   : > { %5824 = vrot.lane.b32.xlu1 %v4798_v1, %s18739_s22  ;;  %5820 = vrot.lane.b32.xlu0 %v4781_v42, %s18740_s27  ;;  %v4801_v1 = vcombine.high %v12979_v53, %v18440_v12  ;;  %v4816_v42 = vcombine.high %v4808_v39, %v18440_v12  ;;  %s18747_s22 = smov 76  }
 0x50d   : > { %v4846_v39 = vcombine.high %v4823_v49, %v18440_v12 }
 0x50e   : > { %v13852_v58 = vpop.permute.xlu1 %5600  ;;  %v13854_v62 = vpop.permute.xlu0 %5596  ;;  %v4815_v13 = vrot.slane %v4801_v1, %v11428_v24 }
 0x50f   : > { %18741 = vst [vmem:[#allocation438_spill] sm:$0xff] %v13852_v58  ;;  %18742 = vst [vmem:[#allocation439_spill] sm:$0xff] %v13854_v62  ;;  %v4800_v62 = vcombine.high %v4796_v19, %v18440_v12 }
 0x510   : > { %5832 = vrot.lane.b32.xlu1 %v4799_v27, %s18743_s4  ;;  %5828 = vrot.lane.b32.xlu0 %v4789_v35, %s18744_s25  ;;  %v4830_v27 = vrot.slane %v4816_v42, %v11431_v25  ;;  %s18750_s4 = smov 106   ;;  %s18751_s25 = smov 96   ;;  %v4857_v42 = vrot.slane %v12977_v17, %v11428_v24 }
 0x512   : > { %v13864_v26 = vpop.permute.xlu1 %5608  ;;  %v13866_v58 = vpop.permute.xlu0 %5604  ;;  %v4847_v1 = vcombine.high %v4830_v27, %v18440_v12 }
 0x513   : > { %18745 = vst [vmem:[#allocation440_spill] sm:$0xff] %v13864_v26  ;;  %18746 = vst [vmem:[#allocation441_spill] sm:$0xff] %v13866_v58  ;;  %v4831_v26 = vcombine.high %v4815_v13, %v18440_v12 }
 0x514   : > { %5840 = vrot.lane.b32.xlu1 %v4800_v62, %s18650_s17  ;;  %5836 = vrot.lane.b32.xlu0 %v4796_v19, %s18747_s22  ;;  %v4838_v62 = vrot.slane %v4815_v13, %v11431_v25  ;;  %s18754_s17 = smov 116  }
 0x515   : > { %v4845_v13 = vrot.slane %v4831_v26, %v11431_v25 }
 0x516   : > { %v13873_v35 = vpop.permute.xlu1 %5616  ;;  %v13875_v53 = vpop.permute.xlu0 %5612 }
 0x517   : > { %18748 = vst [vmem:[#allocation442_spill] sm:$0xff] %v13873_v35  ;;  %18749 = vst [vmem:[#allocation443_spill] sm:$0xff] %v13875_v53  ;;  %v4848_v35 = vcombine.high %v4838_v62, %v18440_v12 }
 0x518   : > { %5848 = vrot.lane.b32.xlu1 %v4846_v39, %s18750_s4  ;;  %5844 = vrot.lane.b32.xlu0 %v4823_v49, %s18751_s25  ;;  %s18757_s4 = smov 8  }
 0x51a   : > { %v13882_v58 = vpop.permute.xlu1 %5624  ;;  %v13884_v19 = vpop.permute.xlu0 %5620 }
 0x51b   : > { %18752 = vst [vmem:[#allocation444_spill] sm:$0xff] %v13882_v58  ;;  %18753 = vst [vmem:[#allocation445_spill] sm:$0xff] %v13884_v19  ;;  %v4872_v58 = vrot.slane %v4857_v42, %v11431_v25 }
 0x51c   : > { %5856 = vrot.lane.b32.xlu1 %v4847_v1, %s18657_s16  ;;  %5852 = vrot.lane.b32.xlu0 %v4830_v27, %s18754_s17  ;;  %v4850_v1 = vcombine.high %v12977_v17, %v18440_v12  ;;  %v4865_v27 = vcombine.high %v4857_v42, %v18440_v12  ;;  %s18760_s16 = smov 28  }
 0x51d   : > { %v4895_v42 = vcombine.high %v4872_v58, %v18440_v12 }
 0x51e   : > { %v13891_v39 = vpop.permute.xlu1 %5632  ;;  %v13893_v49 = vpop.permute.xlu0 %5628  ;;  %v4864_v26 = vrot.slane %v4850_v1, %v11428_v24 }
 0x51f   : > { %18755 = vst [vmem:[#allocation446_spill] sm:$0xff] %v13891_v39  ;;  %18756 = vst [vmem:[#allocation447_spill] sm:$0xff] %v13893_v49  ;;  %v4849_v49 = vcombine.high %v4845_v13, %v18440_v12 }
 0x520   : > { %5864 = vrot.lane.b32.xlu1 %v4848_v35, %s18661_s5  ;;  %5860 = vrot.lane.b32.xlu0 %v4838_v62, %s18757_s4  ;;  %v4879_v35 = vrot.slane %v4865_v27, %v11431_v25  ;;  %s18763_s5 = smov 48  }
 0x522   : > { %v13903_v19 = vpop.permute.xlu1 %5640  ;;  %v13905_v39 = vpop.permute.xlu0 %5636  ;;  %v4896_v1 = vcombine.high %v4879_v35, %v18440_v12 }
 0x523   : > { %18758 = vst [vmem:[#allocation448_spill] sm:$0xff] %v13903_v19  ;;  %18759 = vst [vmem:[#allocation449_spill] sm:$0xff] %v13905_v39  ;;  %v4880_v19 = vcombine.high %v4864_v26, %v18440_v12 }
 0x524   : > { %5872 = vrot.lane.b32.xlu1 %v4849_v49, %s18664_s2  ;;  %5868 = vrot.lane.b32.xlu0 %v4845_v13, %s18760_s16  ;;  %v4887_v49 = vrot.slane %v4864_v26, %v11431_v25  ;;  %s18766_s2 = sld [smem:[#allocation19_spill]] }
 0x526   : > { %v13912_v62 = vpop.permute.xlu1 %5648  ;;  %v13914_v17 = vpop.permute.xlu0 %5644 }
 0x527   : > { %18761 = vst [vmem:[#allocation450_spill] sm:$0xff] %v13912_v62  ;;  %18762 = vst [vmem:[#allocation451_spill] sm:$0xff] %v13914_v17  ;;  %v4894_v62 = vrot.slane %v4880_v19, %v11431_v25 }
 0x528   : > { %5880 = vrot.lane.b32.xlu1 %v4895_v42, %s18667_s23  ;;  %5876 = vrot.lane.b32.xlu0 %v4872_v58, %s18763_s5  ;;  %v4897_v58 = vcombine.high %v4887_v49, %v18440_v12  ;;  %s18769_s23 = smov 88  }
 0x52a   : > { %v13921_v39 = vpop.permute.xlu1 %5656  ;;  %v13923_v13 = vpop.permute.xlu0 %5652  ;;  %v13947_v17 = vld [vmem:[%s18766_s2] sm:$0xff]  ;;  %s18897_s2 = smov 52  }
 0x52b   : > { %18764 = vst [vmem:[#allocation452_spill] sm:$0xff] %v13921_v39  ;;  %18765 = vst [vmem:[#allocation453_spill] sm:$0xff] %v13923_v13 }
 0x52c   : > { %5888 = vrot.lane.b32.xlu1 %v4896_v1, %s18670_s30  ;;  %5884 = vrot.lane.b32.xlu0 %v4879_v35, %s18571_s18  ;;  %v4898_v1 = vcombine.high %v4894_v62, %v18440_v12  ;;  %v13942_v35 = vsub.s32 0, %v11425_v22 }
 0x52e   : > { %v13928_v27 = vpop.permute.xlu1 %5664  ;;  %v13930_v42 = vpop.permute.xlu0 %5660  ;;  %18772 = vst [vmem:[#allocation458_spill] sm:$0xff] %v13942_v35  ;;  %v6603_v19 = vrot.slane %v13947_v17, %v13942_v35 }
 0x52f   : > { %18767 = vst [vmem:[#allocation454_spill] sm:$0xff] %v13928_v27  ;;  %18768 = vst [vmem:[#allocation455_spill] sm:$0xff] %v13930_v42 }
 0x530   : > { %5896 = vrot.lane.b32.xlu1 %v4897_v58, %s18674_s3  ;;  %5892 = vrot.lane.b32.xlu0 %v4887_v49, %s18769_s23 }
 0x532   : > { %v13936_v26 = vpop.permute.xlu1 %5672  ;;  %v13938_v13 = vpop.permute.xlu0 %5668 }
 0x533   : > { %18770 = vst [vmem:[#allocation456_spill] sm:$0xff] %v13936_v26  ;;  %18771 = vst [vmem:[#allocation457_spill] sm:$0xff] %v13938_v13 }
 0x534   : > { %5904 = vrot.lane.b32.xlu1 %v4898_v1, %s18482_s0  ;;  %5900 = vrot.lane.b32.xlu0 %v4894_v62, %s18578_s12 }
 0x536   : > { %v13951_v58 = vpop.permute.xlu1 %5680  ;;  %v13953_v49 = vpop.permute.xlu0 %5676 }
 0x537   : > { %18773 = vst [vmem:[#allocation459_spill] sm:$0xff] %v13951_v58  ;;  %18774 = vst [vmem:[#allocation460_spill] sm:$0xff] %v13953_v49 }
 0x538   : > { %6609 = vbcast.lane.b32.xlu1 %v6603_v19, 264  ;;  %6605 = vbcast.lane.b32.xlu0 %v6603_v19, 256 }
 0x53a   : > { %v13955_v26 = vpop.permute.xlu1 %5688  ;;  %v13957_v13 = vpop.permute.xlu0 %5684 }
 0x53b   : > { %18775 = vst [vmem:[#allocation461_spill] sm:$0xff] %v13955_v26  ;;  %18776 = vst [vmem:[#allocation462_spill] sm:$0xff] %v13957_v13 }
 0x53c   : > { %6617 = vbcast.lane.b32.xlu1 %v6603_v19, 280  ;;  %6613 = vbcast.lane.b32.xlu0 %v6603_v19, 272 }
 0x53e   : > { %v13959_v1 = vpop.permute.xlu1 %5696  ;;  %v13961_v62 = vpop.permute.xlu0 %5692 }
 0x53f   : > { %18777 = vst [vmem:[#allocation463_spill] sm:$0xff] %v13959_v1  ;;  %18778 = vst [vmem:[#allocation464_spill] sm:$0xff] %v13961_v62 }
 0x540   : > { %6625 = vbcast.lane.b32.xlu1 %v6603_v19, 296  ;;  %6621 = vbcast.lane.b32.xlu0 %v6603_v19, 288 }
 0x542   : > { %v13963_v27 = vpop.permute.xlu1 %5704  ;;  %v13965_v42 = vpop.permute.xlu0 %5700 }
 0x543   : > { %18779 = vst [vmem:[#allocation465_spill] sm:$0xff] %v13963_v27  ;;  %18780 = vst [vmem:[#allocation466_spill] sm:$0xff] %v13965_v42 }
 0x544   : > { %6633 = vbcast.lane.b32.xlu1 %v6603_v19, 312  ;;  %6629 = vbcast.lane.b32.xlu0 %v6603_v19, 304 }
 0x546   : > { %v13967_v58 = vpop.permute.xlu1 %5712  ;;  %v13969_v49 = vpop.permute.xlu0 %5708 }
 0x547   : > { %18781 = vst [vmem:[#allocation467_spill] sm:$0xff] %v13967_v58  ;;  %18782 = vst [vmem:[#allocation468_spill] sm:$0xff] %v13969_v49  ;;  %v6670_v58 = vrot.slane %v11388_v8, %v13942_v35 }
 0x548   : > { %6641 = vbcast.lane.b32.xlu1 %v6603_v19, 328  ;;  %6637 = vbcast.lane.b32.xlu0 %v6603_v19, 320 }
 0x54a   : > { %v13971_v26 = vpop.permute.xlu1 %5720  ;;  %v13973_v13 = vpop.permute.xlu0 %5716 }
 0x54b   : > { %18783 = vst [vmem:[#allocation469_spill] sm:$0xff] %v13971_v26  ;;  %18784 = vst [vmem:[#allocation470_spill] sm:$0xff] %v13973_v13 }
 0x54c   : > { %6649 = vbcast.lane.b32.xlu1 %v6603_v19, 344  ;;  %6645 = vbcast.lane.b32.xlu0 %v6603_v19, 336 }
 0x54e   : > { %v13975_v1 = vpop.permute.xlu1 %5728  ;;  %v13977_v62 = vpop.permute.xlu0 %5724 }
 0x54f   : > { %18785 = vst [vmem:[#allocation471_spill] sm:$0xff] %v13975_v1  ;;  %18786 = vst [vmem:[#allocation472_spill] sm:$0xff] %v13977_v62 }
 0x550   : > { %6657 = vbcast.lane.b32.xlu1 %v6603_v19, 360  ;;  %6653 = vbcast.lane.b32.xlu0 %v6603_v19, 352 }
 0x552   : > { %v13979_v27 = vpop.permute.xlu1 %5736  ;;  %v13981_v42 = vpop.permute.xlu0 %5732 }
 0x553   : > { %18787 = vst [vmem:[#allocation473_spill] sm:$0xff] %v13979_v27  ;;  %18788 = vst [vmem:[#allocation474_spill] sm:$0xff] %v13981_v42 }
 0x554   : > { %6665 = vbcast.lane.b32.xlu1 %v6603_v19, 376  ;;  %6661 = vbcast.lane.b32.xlu0 %v6603_v19, 368 }
 0x556   : > { %v13985_v26 = vpop.permute.xlu1 %5744  ;;  %v13987_v13 = vpop.permute.xlu0 %5740 }
 0x557   : > { %18789 = vst [vmem:[#allocation475_spill] sm:$0xff] %v13985_v26  ;;  %18790 = vst [vmem:[#allocation476_spill] sm:$0xff] %v13987_v13 }
 0x558   : > { %6676 = vbcast.lane.b32.xlu1 %v6670_v58, 264  ;;  %6672 = vbcast.lane.b32.xlu0 %v6670_v58, 256 }
 0x55a   : > { %v13989_v1 = vpop.permute.xlu1 %5752  ;;  %v13991_v62 = vpop.permute.xlu0 %5748 }
 0x55b   : > { %18791 = vst [vmem:[#allocation477_spill] sm:$0xff] %v13989_v1  ;;  %18792 = vst [vmem:[#allocation478_spill] sm:$0xff] %v13991_v62 }
 0x55c   : > { %6684 = vbcast.lane.b32.xlu1 %v6670_v58, 280  ;;  %6680 = vbcast.lane.b32.xlu0 %v6670_v58, 272 }
 0x55e   : > { %v13993_v27 = vpop.permute.xlu1 %5760  ;;  %v13995_v42 = vpop.permute.xlu0 %5756 }
 0x55f   : > { %18793 = vst [vmem:[#allocation479_spill] sm:$0xff] %v13993_v27  ;;  %18794 = vst [vmem:[#allocation480_spill] sm:$0xff] %v13995_v42 }
 0x560   : > { %6692 = vbcast.lane.b32.xlu1 %v6670_v58, 296  ;;  %6688 = vbcast.lane.b32.xlu0 %v6670_v58, 288 }
 0x562   : > { %v13997_v19 = vpop.permute.xlu1 %5768  ;;  %v13999_v49 = vpop.permute.xlu0 %5764 }
 0x563   : > { %18795 = vst [vmem:[#allocation481_spill] sm:$0xff] %v13997_v19  ;;  %18796 = vst [vmem:[#allocation482_spill] sm:$0xff] %v13999_v49  ;;  %v6736_v19 = vsub.s32 1, %v11425_v22 }
 0x564   : > { %6700 = vbcast.lane.b32.xlu1 %v6670_v58, 312  ;;  %6696 = vbcast.lane.b32.xlu0 %v6670_v58, 304 }
 0x566   : > { %v14001_v26 = vpop.permute.xlu1 %5776  ;;  %v14003_v13 = vpop.permute.xlu0 %5772 }
 0x567   : > { %18797 = vst [vmem:[#allocation483_spill] sm:$0xff] %v14001_v26  ;;  %18798 = vst [vmem:[#allocation484_spill] sm:$0xff] %v14003_v13 }
 0x568   : > { %6708 = vbcast.lane.b32.xlu1 %v6670_v58, 328  ;;  %6704 = vbcast.lane.b32.xlu0 %v6670_v58, 320 }
 0x56a   : > { %v14005_v62 = vpop.permute.xlu1 %5784  ;;  %v14007_v1 = vpop.permute.xlu0 %5780 }
 0x56b   : > { %18799 = vst [vmem:[#allocation485_spill] sm:$0xff] %v14005_v62  ;;  %18800 = vst [vmem:[#allocation486_spill] sm:$0xff] %v14007_v1  ;;  %v6737_v62 = vrot.slane %v13947_v17, %v6736_v19 }
 0x56c   : > { %6716 = vbcast.lane.b32.xlu1 %v6670_v58, 344  ;;  %6712 = vbcast.lane.b32.xlu0 %v6670_v58, 336 }
 0x56e   : > { %v14009_v27 = vpop.permute.xlu1 %5792  ;;  %v14011_v42 = vpop.permute.xlu0 %5788 }
 0x56f   : > { %18801 = vst [vmem:[#allocation487_spill] sm:$0xff] %v14009_v27  ;;  %18802 = vst [vmem:[#allocation488_spill] sm:$0xff] %v14011_v42 }
 0x570   : > { %6724 = vbcast.lane.b32.xlu1 %v6670_v58, 360  ;;  %6720 = vbcast.lane.b32.xlu0 %v6670_v58, 352 }
 0x572   : > { %v14014_v49 = vpop.permute.xlu1 %5800  ;;  %v14016_v26 = vpop.permute.xlu0 %5796 }
 0x573   : > { %18803 = vst [vmem:[#allocation489_spill] sm:$0xff] %v14014_v49  ;;  %18804 = vst [vmem:[#allocation490_spill] sm:$0xff] %v14016_v26 }
 0x574   : > { %6732 = vbcast.lane.b32.xlu1 %v6670_v58, 376  ;;  %6728 = vbcast.lane.b32.xlu0 %v6670_v58, 368 }
 0x576   : > { %v14019_v13 = vpop.permute.xlu1 %5808  ;;  %v14021_v1 = vpop.permute.xlu0 %5804 }
 0x577   : > { %18805 = vst [vmem:[#allocation491_spill] sm:$0xff] %v14019_v13  ;;  %18806 = vst [vmem:[#allocation492_spill] sm:$0xff] %v14021_v1 }
 0x578   : > { %6743 = vbcast.lane.b32.xlu1 %v6737_v62, 264  ;;  %6739 = vbcast.lane.b32.xlu0 %v6737_v62, 256 }
 0x57a   : > { %v14023_v27 = vpop.permute.xlu1 %5816  ;;  %v14025_v42 = vpop.permute.xlu0 %5812 }
 0x57b   : > { %18807 = vst [vmem:[#allocation493_spill] sm:$0xff] %v14023_v27  ;;  %18808 = vst [vmem:[#allocation494_spill] sm:$0xff] %v14025_v42 }
 0x57c   : > { %6751 = vbcast.lane.b32.xlu1 %v6737_v62, 280  ;;  %6747 = vbcast.lane.b32.xlu0 %v6737_v62, 272 }
 0x57e   : > { %v14027_v53 = vpop.permute.xlu1 %5824  ;;  %v14029_v49 = vpop.permute.xlu0 %5820 }
 0x57f   : > { %18809 = vst [vmem:[#allocation495_spill] sm:$0xff] %v14027_v53  ;;  %18810 = vst [vmem:[#allocation496_spill] sm:$0xff] %v14029_v49 }
 0x580   : > { %6759 = vbcast.lane.b32.xlu1 %v6737_v62, 296  ;;  %6755 = vbcast.lane.b32.xlu0 %v6737_v62, 288 }
 0x582   : > { %v14031_v58 = vpop.permute.xlu1 %5832  ;;  %v14033_v26 = vpop.permute.xlu0 %5828 }
 0x583   : > { %18811 = vst [vmem:[#allocation497_spill] sm:$0xff] %v14031_v58  ;;  %18812 = vst [vmem:[#allocation498_spill] sm:$0xff] %v14033_v26 }
 0x584   : > { %6767 = vbcast.lane.b32.xlu1 %v6737_v62, 312  ;;  %6763 = vbcast.lane.b32.xlu0 %v6737_v62, 304 }
 0x586   : > { %v14035_v1 = vpop.permute.xlu1 %5840  ;;  %v14037_v13 = vpop.permute.xlu0 %5836 }
 0x587   : > { %18813 = vst [vmem:[#allocation499_spill] sm:$0xff] %v14035_v1  ;;  %18814 = vst [vmem:[#allocation500_spill] sm:$0xff] %v14037_v13  ;;  %v6804_v1 = vrot.slane %v11388_v8, %v6736_v19 }
 0x588   : > { %6775 = vbcast.lane.b32.xlu1 %v6737_v62, 328  ;;  %6771 = vbcast.lane.b32.xlu0 %v6737_v62, 320 }
 0x58a   : > { %v14039_v27 = vpop.permute.xlu1 %5848  ;;  %v14041_v42 = vpop.permute.xlu0 %5844 }
 0x58b   : > { %18815 = vst [vmem:[#allocation501_spill] sm:$0xff] %v14039_v27  ;;  %18816 = vst [vmem:[#allocation502_spill] sm:$0xff] %v14041_v42 }
 0x58c   : > { %6783 = vbcast.lane.b32.xlu1 %v6737_v62, 344  ;;  %6779 = vbcast.lane.b32.xlu0 %v6737_v62, 336 }
 0x58e   : > { %v14043_v53 = vpop.permute.xlu1 %5856  ;;  %v14045_v49 = vpop.permute.xlu0 %5852 }
 0x58f   : > { %18817 = vst [vmem:[#allocation503_spill] sm:$0xff] %v14043_v53  ;;  %18818 = vst [vmem:[#allocation504_spill] sm:$0xff] %v14045_v49 }
 0x590   : > { %6791 = vbcast.lane.b32.xlu1 %v6737_v62, 360  ;;  %6787 = vbcast.lane.b32.xlu0 %v6737_v62, 352 }
 0x592   : > { %v14047_v58 = vpop.permute.xlu1 %5864  ;;  %v14049_v26 = vpop.permute.xlu0 %5860 }
 0x593   : > { %18819 = vst [vmem:[#allocation505_spill] sm:$0xff] %v14047_v58  ;;  %18820 = vst [vmem:[#allocation506_spill] sm:$0xff] %v14049_v26 }
 0x594   : > { %6799 = vbcast.lane.b32.xlu1 %v6737_v62, 376  ;;  %6795 = vbcast.lane.b32.xlu0 %v6737_v62, 368 }
 0x596   : > { %v14052_v13 = vpop.permute.xlu1 %5872  ;;  %v14054_v27 = vpop.permute.xlu0 %5868 }
 0x597   : > { %18821 = vst [vmem:[#allocation507_spill] sm:$0xff] %v14052_v13  ;;  %18822 = vst [vmem:[#allocation508_spill] sm:$0xff] %v14054_v27 }
 0x598   : > { %6810 = vbcast.lane.b32.xlu1 %v6804_v1, 264  ;;  %6806 = vbcast.lane.b32.xlu0 %v6804_v1, 256 }
 0x59a   : > { %v14056_v42 = vpop.permute.xlu1 %5880  ;;  %v14058_v53 = vpop.permute.xlu0 %5876 }
 0x59b   : > { %18823 = vst [vmem:[#allocation509_spill] sm:$0xff] %v14056_v42  ;;  %18824 = vst [vmem:[#allocation510_spill] sm:$0xff] %v14058_v53 }
 0x59c   : > { %6818 = vbcast.lane.b32.xlu1 %v6804_v1, 280  ;;  %6814 = vbcast.lane.b32.xlu0 %v6804_v1, 272 }
 0x59e   : > { %v14060_v49 = vpop.permute.xlu1 %5888  ;;  %v14062_v58 = vpop.permute.xlu0 %5884 }
 0x59f   : > { %18825 = vst [vmem:[#allocation511_spill] sm:$0xff] %v14060_v49  ;;  %18826 = vst [vmem:[#allocation512_spill] sm:$0xff] %v14062_v58 }
 0x5a0   : > { %6826 = vbcast.lane.b32.xlu1 %v6804_v1, 296  ;;  %6822 = vbcast.lane.b32.xlu0 %v6804_v1, 288 }
 0x5a2   : > { %v14064_v62 = vpop.permute.xlu1 %5896  ;;  %v14066_v19 = vpop.permute.xlu0 %5892 }
 0x5a3   : > { %18827 = vst [vmem:[#allocation513_spill] sm:$0xff] %v14064_v62  ;;  %18828 = vst [vmem:[#allocation514_spill] sm:$0xff] %v14066_v19  ;;  %v6870_v62 = vsub.s32 2, %v11425_v22 }
 0x5a4   : > { %6834 = vbcast.lane.b32.xlu1 %v6804_v1, 312  ;;  %6830 = vbcast.lane.b32.xlu0 %v6804_v1, 304 }
 0x5a5   : > { %v6938_v10 = vrot.slane %v11388_v8, %v6870_v62 }
 0x5a6   : > { %v14068_v13 = vpop.permute.xlu1 %5904  ;;  %v14070_v27 = vpop.permute.xlu0 %5900 }
 0x5a7   : > { %18829 = vst [vmem:[#allocation515_spill] sm:$0xff] %v14068_v13  ;;  %18830 = vst [vmem:[#allocation516_spill] sm:$0xff] %v14070_v27  ;;  %v6871_v27 = vrot.slane %v13947_v17, %v6870_v62 }
 0x5a8   : > { %6842 = vbcast.lane.b32.xlu1 %v6804_v1, 328  ;;  %6838 = vbcast.lane.b32.xlu0 %v6804_v1, 320 }
 0x5aa   : > { %v14072_v42 = vpop.permute.xlu1 %6609  ;;  %v14074_v53 = vpop.permute.xlu0 %6605 }
 0x5ac   : > { %6850 = vbcast.lane.b32.xlu1 %v6804_v1, 344  ;;  %6846 = vbcast.lane.b32.xlu0 %v6804_v1, 336 }
 0x5ae   : > { %v14076_v49 = vpop.permute.xlu1 %6617  ;;  %v14078_v58 = vpop.permute.xlu0 %6613 }
 0x5b0   : > { %6858 = vbcast.lane.b32.xlu1 %v6804_v1, 360  ;;  %6854 = vbcast.lane.b32.xlu0 %v6804_v1, 352 }
 0x5b2   : > { %v14081_v19 = vpop.permute.xlu1 %6625  ;;  %v14083_v13 = vpop.permute.xlu0 %6621 }
 0x5b4   : > { %6866 = vbcast.lane.b32.xlu1 %v6804_v1, 376  ;;  %6862 = vbcast.lane.b32.xlu0 %v6804_v1, 368 }
 0x5b6   : > { %v14086_v26 = vpop.permute.xlu1 %6633  ;;  %v14088_v39 = vpop.permute.xlu0 %6629 }
 0x5b8   : > { %6877 = vbcast.lane.b32.xlu1 %v6871_v27, 264  ;;  %6873 = vbcast.lane.b32.xlu0 %v6871_v27, 256 }
 0x5ba   : > { %v14090_v7 = vpop.permute.xlu1 %6641  ;;  %v14092_v60 = vpop.permute.xlu0 %6637 }
 0x5bc   : > { %6885 = vbcast.lane.b32.xlu1 %v6871_v27, 280  ;;  %6881 = vbcast.lane.b32.xlu0 %v6871_v27, 272 }
 0x5be   : > { %v14094_v6 = vpop.permute.xlu1 %6649  ;;  %v14096_v45 = vpop.permute.xlu0 %6645 }
 0x5bf   : > { %18831 = vst [vmem:[#allocation517_spill] sm:$0xff] %v14094_v6  ;;  %18832 = vst [vmem:[#allocation518_spill] sm:$0xff] %v14096_v45 }
 0x5c0   : > { %6893 = vbcast.lane.b32.xlu1 %v6871_v27, 296  ;;  %6889 = vbcast.lane.b32.xlu0 %v6871_v27, 288 }
 0x5c2   : > { %v14098_v1 = vpop.permute.xlu1 %6657  ;;  %v14100_v40 = vpop.permute.xlu0 %6653 }
 0x5c3   : > { %18833 = vst [vmem:[#allocation519_spill] sm:$0xff] %v14098_v1  ;;  %18834 = vst [vmem:[#allocation520_spill] sm:$0xff] %v14100_v40 }
 0x5c4   : > { %6901 = vbcast.lane.b32.xlu1 %v6871_v27, 312  ;;  %6897 = vbcast.lane.b32.xlu0 %v6871_v27, 304 }
 0x5c6   : > { %v14102_v28 = vpop.permute.xlu1 %6665  ;;  %v14104_v38 = vpop.permute.xlu0 %6661 }
 0x5c7   : > { %18835 = vst [vmem:[#allocation521_spill] sm:$0xff] %v14102_v28  ;;  %18836 = vst [vmem:[#allocation522_spill] sm:$0xff] %v14104_v38 }
 0x5c8   : > { %6909 = vbcast.lane.b32.xlu1 %v6871_v27, 328  ;;  %6905 = vbcast.lane.b32.xlu0 %v6871_v27, 320 }
 0x5ca   : > { %v14106_v54 = vpop.permute.xlu1 %6676  ;;  %v14108_v56 = vpop.permute.xlu0 %6672 }
 0x5cb   : > { %18837 = vst [vmem:[#allocation523_spill] sm:$0xff] %v14106_v54  ;;  %18838 = vst [vmem:[#allocation524_spill] sm:$0xff] %v14108_v56 }
 0x5cc   : > { %6917 = vbcast.lane.b32.xlu1 %v6871_v27, 344  ;;  %6913 = vbcast.lane.b32.xlu0 %v6871_v27, 336 }
 0x5ce   : > { %v14110_v2 = vpop.permute.xlu1 %6684  ;;  %v14112_v31 = vpop.permute.xlu0 %6680 }
 0x5cf   : > { %18839 = vst [vmem:[#allocation525_spill] sm:$0xff] %v14110_v2  ;;  %18840 = vst [vmem:[#allocation526_spill] sm:$0xff] %v14112_v31 }
 0x5d0   : > { %6925 = vbcast.lane.b32.xlu1 %v6871_v27, 360  ;;  %6921 = vbcast.lane.b32.xlu0 %v6871_v27, 352 }
 0x5d2   : > { %v14114_v3 = vpop.permute.xlu1 %6692  ;;  %v14116_v36 = vpop.permute.xlu0 %6688 }
 0x5d3   : > { %18841 = vst [vmem:[#allocation527_spill] sm:$0xff] %v14114_v3  ;;  %18842 = vst [vmem:[#allocation528_spill] sm:$0xff] %v14116_v36 }
 0x5d4   : > { %6933 = vbcast.lane.b32.xlu1 %v6871_v27, 376  ;;  %6929 = vbcast.lane.b32.xlu0 %v6871_v27, 368 }
 0x5d6   : > { %v14119_v37 = vpop.permute.xlu1 %6700  ;;  %v14121_v54 = vpop.permute.xlu0 %6696 }
 0x5d7   : > { %18843 = vst [vmem:[#allocation529_spill] sm:$0xff] %v14119_v37  ;;  %18844 = vst [vmem:[#allocation530_spill] sm:$0xff] %v14121_v54 }
 0x5d8   : > { %6944 = vbcast.lane.b32.xlu1 %v6938_v10, 264  ;;  %6940 = vbcast.lane.b32.xlu0 %v6938_v10, 256 }
 0x5da   : > { %v14123_v56 = vpop.permute.xlu1 %6708  ;;  %v14125_v2 = vpop.permute.xlu0 %6704 }
 0x5db   : > { %18845 = vst [vmem:[#allocation531_spill] sm:$0xff] %v14123_v56  ;;  %18846 = vst [vmem:[#allocation532_spill] sm:$0xff] %v14125_v2 }
 0x5dc   : > { %6952 = vbcast.lane.b32.xlu1 %v6938_v10, 280  ;;  %6948 = vbcast.lane.b32.xlu0 %v6938_v10, 272 }
 0x5de   : > { %v14127_v31 = vpop.permute.xlu1 %6716  ;;  %v14129_v3 = vpop.permute.xlu0 %6712 }
 0x5df   : > { %18847 = vst [vmem:[#allocation533_spill] sm:$0xff] %v14127_v31  ;;  %18848 = vst [vmem:[#allocation534_spill] sm:$0xff] %v14129_v3 }
 0x5e0   : > { %6960 = vbcast.lane.b32.xlu1 %v6938_v10, 296  ;;  %6956 = vbcast.lane.b32.xlu0 %v6938_v10, 288 }
 0x5e2   : > { %v14131_v27 = vpop.permute.xlu1 %6724  ;;  %v14133_v62 = vpop.permute.xlu0 %6720 }
 0x5e3   : > { %18849 = vst [vmem:[#allocation535_spill] sm:$0xff] %v14131_v27  ;;  %18850 = vst [vmem:[#allocation536_spill] sm:$0xff] %v14133_v62  ;;  %v7004_v27 = vsub.s32 3, %v11425_v22 }
 0x5e4   : > { %6968 = vbcast.lane.b32.xlu1 %v6938_v10, 312  ;;  %6964 = vbcast.lane.b32.xlu0 %v6938_v10, 304 }
 0x5e6   : > { %v14135_v37 = vpop.permute.xlu1 %6732  ;;  %v14137_v54 = vpop.permute.xlu0 %6728 }
 0x5e7   : > { %18851 = vst [vmem:[#allocation537_spill] sm:$0xff] %v14135_v37  ;;  %18852 = vst [vmem:[#allocation538_spill] sm:$0xff] %v14137_v54  ;;  %v7005_v54 = vrot.slane %v13947_v17, %v7004_v27 }
 0x5e8   : > { %6976 = vbcast.lane.b32.xlu1 %v6938_v10, 328  ;;  %6972 = vbcast.lane.b32.xlu0 %v6938_v10, 320 }
 0x5ea   : > { %v14139_v56 = vpop.permute.xlu1 %6743  ;;  %v14141_v2 = vpop.permute.xlu0 %6739 }
 0x5ec   : > { %6984 = vbcast.lane.b32.xlu1 %v6938_v10, 344  ;;  %6980 = vbcast.lane.b32.xlu0 %v6938_v10, 336 }
 0x5ee   : > { %v14143_v31 = vpop.permute.xlu1 %6751  ;;  %v14145_v3 = vpop.permute.xlu0 %6747 }
 0x5f0   : > { %6992 = vbcast.lane.b32.xlu1 %v6938_v10, 360  ;;  %6988 = vbcast.lane.b32.xlu0 %v6938_v10, 352 }
 0x5f2   : > { %v14148_v62 = vpop.permute.xlu1 %6759  ;;  %v14150_v37 = vpop.permute.xlu0 %6755 }
 0x5f4   : > { %7000 = vbcast.lane.b32.xlu1 %v6938_v10, 376  ;;  %6996 = vbcast.lane.b32.xlu0 %v6938_v10, 368 }
 0x5f6   : > { %v14153_v36 = vpop.permute.xlu1 %6767  ;;  %v14155_v52 = vpop.permute.xlu0 %6763 }
 0x5f8   : > { %7011 = vbcast.lane.b32.xlu1 %v7005_v54, 264  ;;  %7007 = vbcast.lane.b32.xlu0 %v7005_v54, 256 }
 0x5fa   : > { %v14157_v28 = vpop.permute.xlu1 %6775  ;;  %v14159_v38 = vpop.permute.xlu0 %6771 }
 0x5fc   : > { %7019 = vbcast.lane.b32.xlu1 %v7005_v54, 280  ;;  %7015 = vbcast.lane.b32.xlu0 %v7005_v54, 272 }
 0x5fe   : > { %v14161_v22 = vpop.permute.xlu1 %6783  ;;  %v14163_v5 = vpop.permute.xlu0 %6779 }
 0x5ff   : > { %18853 = vst [vmem:[#allocation539_spill] sm:$0xff] %v14161_v22  ;;  %18854 = vst [vmem:[#allocation540_spill] sm:$0xff] %v14163_v5 }
 0x600   : > { %7027 = vbcast.lane.b32.xlu1 %v7005_v54, 296  ;;  %7023 = vbcast.lane.b32.xlu0 %v7005_v54, 288 }
 0x602   : > { %v14165_v10 = vpop.permute.xlu1 %6791  ;;  %v14167_v17 = vpop.permute.xlu0 %6787 }
 0x603   : > { %18855 = vst [vmem:[#allocation541_spill] sm:$0xff] %v14165_v10  ;;  %18856 = vst [vmem:[#allocation542_spill] sm:$0xff] %v14167_v17 }
 0x604   : > { %7035 = vbcast.lane.b32.xlu1 %v7005_v54, 312  ;;  %7031 = vbcast.lane.b32.xlu0 %v7005_v54, 304 }
 0x606   : > { %v14169_v1 = vpop.permute.xlu1 %6799  ;;  %v14171_v46 = vpop.permute.xlu0 %6795 }
 0x607   : > { %18857 = vst [vmem:[#allocation543_spill] sm:$0xff] %v14169_v1  ;;  %18858 = vst [vmem:[#allocation544_spill] sm:$0xff] %v14171_v46  ;;  %v7072_v1 = vrot.slane %v11388_v8, %v7004_v27 }
 0x608   : > { %7043 = vbcast.lane.b32.xlu1 %v7005_v54, 328  ;;  %7039 = vbcast.lane.b32.xlu0 %v7005_v54, 320 }
 0x60a   : > { %v14173_v43 = vpop.permute.xlu1 %6810  ;;  %v14175_v40 = vpop.permute.xlu0 %6806 }
 0x60b   : > { %18859 = vst [vmem:[#allocation545_spill] sm:$0xff] %v14173_v43  ;;  %18860 = vst [vmem:[#allocation546_spill] sm:$0xff] %v14175_v40 }
 0x60c   : > { %7051 = vbcast.lane.b32.xlu1 %v7005_v54, 344  ;;  %7047 = vbcast.lane.b32.xlu0 %v7005_v54, 336 }
 0x60e   : > { %v14177_v35 = vpop.permute.xlu1 %6818  ;;  %v14179_v6 = vpop.permute.xlu0 %6814 }
 0x60f   : > { %18861 = vst [vmem:[#allocation547_spill] sm:$0xff] %v14177_v35  ;;  %18862 = vst [vmem:[#allocation548_spill] sm:$0xff] %v14179_v6 }
 0x610   : > { %7059 = vbcast.lane.b32.xlu1 %v7005_v54, 360  ;;  %7055 = vbcast.lane.b32.xlu0 %v7005_v54, 352 }
 0x612   : > { %v14181_v10 = vpop.permute.xlu1 %6826  ;;  %v14183_v17 = vpop.permute.xlu0 %6822 }
 0x613   : > { %18863 = vst [vmem:[#allocation549_spill] sm:$0xff] %v14181_v10  ;;  %18864 = vst [vmem:[#allocation550_spill] sm:$0xff] %v14183_v17 }
 0x614   : > { %7067 = vbcast.lane.b32.xlu1 %v7005_v54, 376  ;;  %7063 = vbcast.lane.b32.xlu0 %v7005_v54, 368 }
 0x616   : > { %v14186_v46 = vpop.permute.xlu1 %6834  ;;  %v14188_v43 = vpop.permute.xlu0 %6830 }
 0x617   : > { %18865 = vst [vmem:[#allocation551_spill] sm:$0xff] %v14186_v46  ;;  %18866 = vst [vmem:[#allocation552_spill] sm:$0xff] %v14188_v43 }
 0x618   : > { %7078 = vbcast.lane.b32.xlu1 %v7072_v1, 264  ;;  %7074 = vbcast.lane.b32.xlu0 %v7072_v1, 256 }
 0x61a   : > { %v14190_v40 = vpop.permute.xlu1 %6842  ;;  %v14192_v35 = vpop.permute.xlu0 %6838 }
 0x61b   : > { %18867 = vst [vmem:[#allocation553_spill] sm:$0xff] %v14190_v40  ;;  %18868 = vst [vmem:[#allocation554_spill] sm:$0xff] %v14192_v35 }
 0x61c   : > { %7086 = vbcast.lane.b32.xlu1 %v7072_v1, 280  ;;  %7082 = vbcast.lane.b32.xlu0 %v7072_v1, 272 }
 0x61e   : > { %v14194_v6 = vpop.permute.xlu1 %6850  ;;  %v14196_v10 = vpop.permute.xlu0 %6846 }
 0x61f   : > { %18869 = vst [vmem:[#allocation555_spill] sm:$0xff] %v14194_v6  ;;  %18870 = vst [vmem:[#allocation556_spill] sm:$0xff] %v14196_v10 }
 0x620   : > { %7094 = vbcast.lane.b32.xlu1 %v7072_v1, 296  ;;  %7090 = vbcast.lane.b32.xlu0 %v7072_v1, 288 }
 0x622   : > { %v14198_v54 = vpop.permute.xlu1 %6858  ;;  %v14200_v8 = vpop.permute.xlu0 %6854 }
 0x623   : > { %18871 = vst [vmem:[#allocation557_spill] sm:$0xff] %v14198_v54  ;;  %18872 = vst [vmem:[#allocation558_spill] sm:$0xff] %v14200_v8 }
 0x624   : > { %7102 = vbcast.lane.b32.xlu1 %v7072_v1, 312  ;;  %7098 = vbcast.lane.b32.xlu0 %v7072_v1, 304 }
 0x626   : > { %v14202_v27 = vpop.permute.xlu1 %6866  ;;  %v14204_v46 = vpop.permute.xlu0 %6862 }
 0x627   : > { %18873 = vst [vmem:[#allocation559_spill] sm:$0xff] %v14202_v27  ;;  %18874 = vst [vmem:[#allocation560_spill] sm:$0xff] %v14204_v46 }
 0x628   : > { %7110 = vbcast.lane.b32.xlu1 %v7072_v1, 328  ;;  %7106 = vbcast.lane.b32.xlu0 %v7072_v1, 320 }
 0x62a   : > { %v14206_v40 = vpop.permute.xlu1 %6877  ;;  %v6874_v35 = vpop.permute.xlu0 %6873 }
 0x62c   : > { %7118 = vbcast.lane.b32.xlu1 %v7072_v1, 344  ;;  %7114 = vbcast.lane.b32.xlu0 %v7072_v1, 336 }
 0x62e   : > { %v14208_v6 = vpop.permute.xlu1 %6885  ;;  %v14210_v10 = vpop.permute.xlu0 %6881 }
 0x630   : > { %7126 = vbcast.lane.b32.xlu1 %v7072_v1, 360  ;;  %7122 = vbcast.lane.b32.xlu0 %v7072_v1, 352 }
 0x632   : > { %v14212_v54 = vpop.permute.xlu1 %6893  ;;  %v14214_v8 = vpop.permute.xlu0 %6889 }
 0x634   : > { %7134 = vbcast.lane.b32.xlu1 %v7072_v1, 376  ;;  %7130 = vbcast.lane.b32.xlu0 %v7072_v1, 368 }
 0x636   : > { %v14216_v27 = vpop.permute.xlu1 %6901  ;;  %v14218_v46 = vpop.permute.xlu0 %6897 }
 0x63a   : > { %v14220_v43 = vpop.permute.xlu1 %6909  ;;  %v14222_v17 = vpop.permute.xlu0 %6905 }
 0x63e   : > { %v14224_v22 = vpop.permute.xlu1 %6917  ;;  %v14226_v48 = vpop.permute.xlu0 %6913 }
 0x63f   : > { %18875 = vst [vmem:[#allocation561_spill] sm:$0xff] %v14224_v22  ;;  %18876 = vst [vmem:[#allocation562_spill] sm:$0xff] %v14226_v48 }
 0x642   : > { %v14228_v45 = vpop.permute.xlu1 %6925  ;;  %v14230_v5 = vpop.permute.xlu0 %6921 }
 0x643   : > { %18877 = vst [vmem:[#allocation563_spill] sm:$0xff] %v14228_v45  ;;  %18878 = vst [vmem:[#allocation564_spill] sm:$0xff] %v14230_v5 }
 0x646   : > { %v14232_v44 = vpop.permute.xlu1 %6933  ;;  %v14234_v34 = vpop.permute.xlu0 %6929 }
 0x647   : > { %18879 = vst [vmem:[#allocation565_spill] sm:$0xff] %v14232_v44  ;;  %18880 = vst [vmem:[#allocation566_spill] sm:$0xff] %v14234_v34 }
 0x64a   : > { %v14236_v1 = vpop.permute.xlu1 %6944  ;;  %v14238_v30 = vpop.permute.xlu0 %6940 }
 0x64b   : > { %18881 = vst [vmem:[#allocation567_spill] sm:$0xff] %v14236_v1  ;;  %18882 = vst [vmem:[#allocation568_spill] sm:$0xff] %v14238_v30 }
 0x64e   : > { %v14240_v63 = vpop.permute.xlu1 %6952  ;;  %v14242_v50 = vpop.permute.xlu0 %6948 }
 0x64f   : > { %18883 = vst [vmem:[#allocation569_spill] sm:$0xff] %v14240_v63  ;;  %18884 = vst [vmem:[#allocation570_spill] sm:$0xff] %v14242_v50 }
 0x652   : > { %v14244_v4 = vpop.permute.xlu1 %6960  ;;  %v14246_v22 = vpop.permute.xlu0 %6956 }
 0x653   : > { %18885 = vst [vmem:[#allocation571_spill] sm:$0xff] %v14244_v4  ;;  %18886 = vst [vmem:[#allocation572_spill] sm:$0xff] %v14246_v22  ;;  %v7136_v4 = vcombine.low %v14074_v53, %v6874_v35 }
 0x656   : > { %v14248_v48 = vpop.permute.xlu1 %6968  ;;  %v14250_v45 = vpop.permute.xlu0 %6964 }
 0x657   : > { %18887 = vst [vmem:[#allocation573_spill] sm:$0xff] %v14248_v48  ;;  %18888 = vst [vmem:[#allocation574_spill] sm:$0xff] %v14250_v45 }
 0x65a   : > { %v14252_v5 = vpop.permute.xlu0 %6972  ;;  %v14254_v44 = vpop.permute.xlu1 %6976 }
 0x65b   : > { %18889 = vst [vmem:[#allocation575_spill] sm:$0xff] %v14252_v5  ;;  %18890 = vst [vmem:[#allocation576_spill] sm:$0xff] %v14254_v44  ;;  %v7137_v5 = vcombine.high %v14074_v53, %v6874_v35  ;;  %v7205_v35 = vcombine.high %v14072_v42, %v14206_v40 }
 0x65e   : > { %v14256_v34 = vpop.permute.xlu0 %6980  ;;  %v14258_v1 = vpop.permute.xlu1 %6984 }
 0x65f   : > { %18891 = vst [vmem:[#allocation577_spill] sm:$0xff] %v14256_v34  ;;  %18892 = vst [vmem:[#allocation578_spill] sm:$0xff] %v14258_v1  ;;  %v7144_v34 = vrot.slane %v7136_v4, %v11428_v24 }
 0x662   : > { %v14260_v30 = vpop.permute.xlu0 %6988  ;;  %v14264_v50 = vpop.permute.xlu1 %6992 }
 0x663   : > { %18893 = vst [vmem:[#allocation579_spill] sm:$0xff] %v14260_v30  ;;  %18895 = vst [vmem:[#allocation581_spill] sm:$0xff] %v14264_v50 }
 0x666   : > { %v14262_v63 = vpop.permute.xlu0 %6996  ;;  %v14272_v1 = vpop.permute.xlu1 %7000 }
 0x667   : > { %18894 = vst [vmem:[#allocation580_spill] sm:$0xff] %v14262_v63  ;;  %18896 = vst [vmem:[#allocation582_spill] sm:$0xff] %v14272_v1  ;;  %v7151_v63 = vrot.slane %v7137_v5, %v11428_v24 }
 0x66a   : > { %v7008_v22 = vpop.permute.xlu0 %7007  ;;  %v7012_v11 = vpop.permute.xlu1 %7011 }
 0x66b   : > { %v7152_v48 = vcombine.low %v14141_v2, %v7008_v22  ;;  %v7153_v45 = vcombine.high %v14141_v2, %v7008_v22  ;;  %v7220_v53 = vcombine.low %v14139_v56, %v7012_v11  ;;  %v7221_v5 = vcombine.high %v14139_v56, %v7012_v11 }
 0x66d   : > { %v7160_v44 = vrot.slane %v7152_v48, %v11428_v24  ;;  %v7167_v30 = vrot.slane %v7153_v45, %v11428_v24 }
 0x66f   : > { %v7168_v50 = vcombine.low %v7144_v34, %v7160_v44  ;;  %v7169_v14 = vcombine.high %v7144_v34, %v7160_v44  ;;  %v7184_v23 = vcombine.low %v7151_v63, %v7167_v30  ;;  %v7185_v48 = vcombine.high %v7151_v63, %v7167_v30 }
 0x670   : > { %v7204_v44 = vcombine.low %v14072_v42, %v14206_v40  ;;  %v7272_v42 = vcombine.low %v14078_v58, %v14210_v10 }
 0x671   : > { %v7183_v21 = vrot.slane %v7169_v14, %v11431_v25  ;;  %v14279_v2 = vrot.slane %v7168_v50, %v11431_v25  ;;  %v7192_v4 = vrot.slane %v7184_v23, %v11431_v25  ;;  %v7199_v14 = vrot.slane %v7185_v48, %v11431_v25 }
 0x672   : > { %v7228_v50 = vrot.slane %v7220_v53, %v11428_v24  ;;  %v7212_v30 = vrot.slane %v7204_v44, %v11428_v24  ;;  %v7235_v48 = vrot.slane %v7221_v5, %v11428_v24 }
 0x673   : > { %9317 = vrot.lane.b32.xlu1 %v7183_v21, %s18485_s7  ;;  %v7200_v45 = vcombine.high %v14279_v2, %v18440_v12  ;;  %v7201_v63 = vcombine.high %v7183_v21, %v18440_v12  ;;  %v7202_v23 = vcombine.high %v7192_v4, %v18440_v12  ;;  %v7203_v21 = vcombine.high %v7199_v14, %v18440_v12 }
 0x674   : > { %v7236_v34 = vcombine.low %v7212_v30, %v7228_v50  ;;  %v7237_v53 = vcombine.high %v7212_v30, %v7228_v50  ;;  %v7020_v30 = vpop.permute.xlu1 %7019 }
 0x675   : > { %9313 = vrot.lane.b32.xlu0 %v7200_v45, %s18581_s14  ;;  %v7016_v45 = vpop.permute.xlu0 %7015 }
 0x676   : > { %v7244_v22 = vrot.slane %v7236_v34, %v11431_v25  ;;  %v7251_v56 = vrot.slane %v7237_v53, %v11431_v25  ;;  %v7288_v40 = vcombine.low %v14145_v3, %v7016_v45  ;;  %v7273_v53 = vcombine.high %v14078_v58, %v14210_v10 }
 0x677   : > { %9325 = vrot.lane.b32.xlu1 %v7192_v4, %s18488_s1  ;;  %v7219_v4 = vrot.slane %v7205_v35, %v11428_v24  ;;  %v7289_v35 = vcombine.high %v14145_v3, %v7016_v45 }
 0x678   : > { %v7268_v44 = vcombine.high %v7244_v22, %v18440_v12  ;;  %v7296_v34 = vrot.slane %v7288_v40, %v11428_v24  ;;  %v7287_v3 = vrot.slane %v7273_v53, %v11428_v24 }
 0x679   : > { %9321 = vrot.lane.b32.xlu0 %v7201_v63, %s18445_s20  ;;  %v7252_v11 = vcombine.low %v7219_v4, %v7235_v48  ;;  %v7269_v63 = vcombine.high %v7251_v56, %v18440_v12  ;;  %v7024_v45 = vpop.permute.xlu0 %7023 }
 0x67b   : > { %9333 = vrot.lane.b32.xlu1 %v7199_v14, %s18296_s6  ;;  %v7253_v14 = vcombine.high %v7219_v4, %v7235_v48  ;;  %v7260_v50 = vrot.slane %v7252_v11, %v11431_v25  ;;  %v14323_v48 = vpop.permute.xlu1 %7027  ;;  %v7303_v4 = vrot.slane %v7289_v35, %v11428_v24 }
 0x67d   : > { %9329 = vrot.lane.b32.xlu0 %v7202_v23, %s18446_s8  ;;  %v7280_v23 = vrot.slane %v7272_v42, %v11428_v24  ;;  %v7267_v5 = vrot.slane %v7253_v14, %v11431_v25  ;;  %v7320_v42 = vcombine.low %v7287_v3, %v7303_v4  ;;  %v7356_v14 = vcombine.low %v14143_v31, %v7020_v30 }
 0x67e   : > { %v7321_v35 = vcombine.high %v7287_v3, %v7303_v4  ;;  %v7341_v4 = vcombine.high %v14076_v49, %v14208_v6 }
 0x67f   : > { %9341 = vrot.lane.b32.xlu1 %v7244_v22, %s18300_s21  ;;  %v7304_v22 = vcombine.low %v7280_v23, %v7296_v34  ;;  %v7305_v11 = vcombine.high %v7280_v23, %v7296_v34  ;;  %v14334_v40 = vpop.permute.xlu1 %7035  ;;  %v14344_v34 = vpop.permute.xlu0 %7031 }
 0x681   : > { %9337 = vrot.lane.b32.xlu0 %v7203_v21, %s18447_s10  ;;  %v7270_v21 = vcombine.high %v7260_v50, %v18440_v12  ;;  %v7319_v58 = vrot.slane %v7305_v11, %v11431_v25  ;;  %v7335_v11 = vrot.slane %v7321_v35, %v11431_v25 }
 0x683   : > { %9349 = vrot.lane.b32.xlu1 %v7251_v56, %s18303_s11  ;;  %v7312_v56 = vrot.slane %v7304_v22, %v11431_v25  ;;  %v14346_v23 = vpop.permute.xlu1 %7043  ;;  %v7337_v22 = vcombine.high %v7319_v58, %v18440_v12 }
 0x685   : > { %9345 = vrot.lane.b32.xlu0 %v7268_v44, %s18202_s9  ;;  %v7271_v44 = vcombine.high %v7267_v5, %v18440_v12  ;;  %v7336_v10 = vcombine.high %v7312_v56, %v18440_v12 }
 0x687   : > { %9357 = vrot.lane.b32.xlu1 %v7260_v50, %s18207_s24  ;;  %v7340_v50 = vcombine.low %v14076_v49, %v14208_v6  ;;  %v7424_v49 = vcombine.low %v14150_v37, %v7024_v45 }
 0x689   : > { %9353 = vrot.lane.b32.xlu0 %v7269_v63, %s18206_s28  ;;  %v7328_v63 = vrot.slane %v7320_v42, %v11431_v25  ;;  %v14357_v42 = vpop.permute.xlu1 %7051 }
 0x68b   : > { %9365 = vrot.lane.b32.xlu1 %v7267_v5, %s18088_s26  ;;  %s18898_s26 = smov 42   ;;  %v7364_v5 = vrot.slane %v7356_v14, %v11428_v24  ;;  %v7339_v14 = vcombine.high %v7335_v11, %v18440_v12 }
 0x68d   : > { %9361 = vrot.lane.b32.xlu0 %v7270_v21, %s18210_s19  ;;  %v7348_v21 = vrot.slane %v7340_v50, %v11428_v24 }
 0x68f   : > { %9373 = vrot.lane.b32.xlu1 %v7312_v56, %s18092_s13  ;;  %s18899_s13 = smov 72   ;;  %v7372_v53 = vcombine.low %v7348_v21, %v7364_v5  ;;  %v7338_v56 = vcombine.high %v7328_v63, %v18440_v12  ;;  %v7373_v3 = vcombine.high %v7348_v21, %v7364_v5 }
 0x691   : > { %9369 = vrot.lane.b32.xlu0 %v7271_v44, %s18089_s15  ;;  %v14355_v44 = vpop.permute.xlu0 %7039  ;;  %s18904_s15 = smov 102   ;;  %v7387_v35 = vrot.slane %v7373_v3, %v11431_v25 }
 0x693   : > { %9381 = vrot.lane.b32.xlu1 %v7319_v58, %s18897_s2  ;;  %s18900_s2 = smov 62   ;;  %v7380_v58 = vrot.slane %v7372_v53, %v11431_v25 }
 0x695   : > { %9377 = vrot.lane.b32.xlu0 %v7336_v10, %s18898_s26  ;;  %v7357_v10 = vcombine.high %v14143_v31, %v7020_v30  ;;  %s18901_s26 = smov 92   ;;  %v14371_v31 = vpop.permute.xlu1 %7059  ;;  %v7355_v30 = vrot.slane %v7341_v4, %v11428_v24  ;;  %v7404_v5 = vcombine.high %v7380_v58, %v18440_v12  ;;  %v7405_v4 = vcombine.high %v7387_v35, %v18440_v12 }
 0x697   : > { %9389 = vrot.lane.b32.xlu1 %v7328_v63, %s18899_s13  ;;  %s18902_s13 = smov 82   ;;  %v7371_v50 = vrot.slane %v7357_v10, %v11428_v24  ;;  %v14369_v63 = vpop.permute.xlu0 %7047 }
 0x699   : > { %9385 = vrot.lane.b32.xlu0 %v7337_v22, %s18900_s2  ;;  %s18903_s2 = smov 112   ;;  %v7388_v6 = vcombine.low %v7355_v30, %v7371_v50  ;;  %v7408_v22 = vcombine.low %v14083_v13, %v14214_v8  ;;  %v14383_v53 = vpop.permute.xlu1 %7067 }
 0x69b   : > { %9397 = vrot.lane.b32.xlu1 %v7335_v11, %s18901_s26  ;;  %s18905_s26 = smov 4   ;;  %v14381_v21 = vpop.permute.xlu0 %7055  ;;  %v7389_v11 = vcombine.high %v7355_v30, %v7371_v50  ;;  %v7396_v10 = vrot.slane %v7388_v6, %v11431_v25  ;;  %v7416_v3 = vrot.slane %v7408_v22, %v11428_v24 }
 0x69d   : > { %9393 = vrot.lane.b32.xlu0 %v7338_v56, %s18902_s13  ;;  %v7432_v56 = vrot.slane %v7424_v49, %v11428_v24  ;;  %v7406_v1 = vcombine.high %v7396_v10, %v18440_v12  ;;  %v14396_v30 = vpop.permute.xlu1 %7078  ;;  %s18910_s13 = smov 34  }
 0x69f   : > { %9405 = vrot.lane.b32.xlu1 %v7380_v58, %s18903_s2  ;;  %s18906_s2 = smov 122   ;;  %v7425_v58 = vcombine.high %v14150_v37, %v7024_v45  ;;  %v14394_v50 = vpop.permute.xlu0 %7063  ;;  %v7441_v49 = vcombine.high %v7416_v3, %v7432_v56 }
 0x6a1   : > { %9401 = vrot.lane.b32.xlu0 %v7339_v14, %s18904_s15  ;;  %s18908_s15 = smov 14   ;;  %v7440_v14 = vcombine.low %v7416_v3, %v7432_v56  ;;  %v7439_v6 = vrot.slane %v7425_v58, %v11428_v24  ;;  %v7455_v56 = vrot.slane %v7441_v49, %v11431_v25 }
 0x6a3   : > { %9413 = vrot.lane.b32.xlu1 %v7387_v35, %s18905_s26  ;;  %s18907_s26 = smov 24   ;;  %v7409_v35 = vcombine.high %v14083_v13, %v14214_v8  ;;  %v7448_v37 = vrot.slane %v7440_v14, %v11431_v25  ;;  %v14410_v13 = vpop.permute.xlu1 %7086  ;;  %v7492_v8 = vcombine.low %v14148_v62, %v14323_v48 }
 0x6a5   : > { %9409 = vrot.lane.b32.xlu0 %v7404_v5, %s18906_s2  ;;  %v7403_v5 = vrot.slane %v7389_v11, %v11431_v25  ;;  %s18909_s2 = smov 44   ;;  %v7423_v22 = vrot.slane %v7409_v35, %v11428_v24  ;;  %v14408_v11 = vpop.permute.xlu0 %7074  ;;  %v7500_v3 = vrot.slane %v7492_v8, %v11428_v24  ;;  %v7477_v8 = vcombine.high %v14081_v19, %v14212_v54 }
 0x6a7   : > { %9421 = vrot.lane.b32.xlu1 %v7396_v10, %s18907_s26  ;;  %v7407_v45 = vcombine.high %v7403_v5, %v18440_v12  ;;  %s18911_s26 = smov 64   ;;  %v7472_v10 = vcombine.high %v7448_v37, %v18440_v12  ;;  %v7457_v58 = vcombine.high %v7423_v22, %v7439_v6 }
 0x6a9   : > { %9417 = vrot.lane.b32.xlu0 %v7405_v4, %s18908_s15  ;;  %s18912_s15 = smov 54   ;;  %v7476_v4 = vcombine.low %v14081_v19, %v14212_v54  ;;  %v14423_v35 = vpop.permute.xlu0 %7082  ;;  %v7560_v54 = vcombine.low %v14155_v52, %v14344_v34 }
 0x6ab   : > { %9429 = vrot.lane.b32.xlu1 %v7403_v5, %s18909_s2  ;;  %v7473_v5 = vcombine.high %v7455_v56, %v18440_v12  ;;  %v7484_v49 = vrot.slane %v7476_v4, %v11428_v24  ;;  %s18914_s2 = smov 104  }
 0x6ad   : > { %9425 = vrot.lane.b32.xlu0 %v7406_v1, %s18910_s13  ;;  %v7456_v1 = vcombine.low %v7423_v22, %v7439_v6  ;;  %v7471_v6 = vrot.slane %v7457_v58, %v11431_v25  ;;  %v7491_v58 = vrot.slane %v7477_v8, %v11428_v24 }
 0x6af   : > { %9437 = vrot.lane.b32.xlu1 %v7448_v37, %s18911_s26  ;;  %s18913_s26 = smov 74   ;;  %v7464_v14 = vrot.slane %v7456_v1, %v11431_v25  ;;  %v7493_v37 = vcombine.high %v14148_v62, %v14323_v48  ;;  %v14438_v1 = vpop.permute.xlu0 %7090  ;;  %v7475_v48 = vcombine.high %v7471_v6, %v18440_v12 }
 0x6b1   : > { %9433 = vrot.lane.b32.xlu0 %v7407_v45, %s18912_s15  ;;  %v14425_v45 = vpop.permute.xlu1 %7094  ;;  %s18915_s15 = smov 94   ;;  %v7474_v22 = vcombine.high %v7464_v14, %v18440_v12  ;;  %v7507_v4 = vrot.slane %v7493_v37, %v11428_v24 }
 0x6b3   : > { %9445 = vrot.lane.b32.xlu1 %v7455_v56, %s18725_s29  ;;  %s18916_s29 = smov 124   ;;  %v7524_v19 = vcombine.low %v7491_v58, %v7507_v4  ;;  %v14452_v37 = vpop.permute.xlu0 %7098 }
 0x6b5   : > { %9441 = vrot.lane.b32.xlu0 %v7472_v10, %s18913_s26  ;;  %v7508_v10 = vcombine.low %v7484_v49, %v7500_v3  ;;  %s18917_s26 = smov 114   ;;  %v14440_v56 = vpop.permute.xlu1 %7102  ;;  %v7532_v8 = vrot.slane %v7524_v19, %v11431_v25 }
 0x6b6   : > { %18918 = vst [vmem:[#allocation583_spill] sm:$0xff] %v14440_v56 }
 0x6b7   : > { %9453 = vrot.lane.b32.xlu1 %v7464_v14, %s18914_s2  ;;  %v7516_v62 = vrot.slane %v7508_v10, %v11431_v25  ;;  %s18919_s2 = smov 16   ;;  %v7525_v10 = vcombine.high %v7491_v58, %v7507_v4  ;;  %v7542_v19 = vcombine.high %v7532_v8, %v18440_v12 }
 0x6b9   : > { %9449 = vrot.lane.b32.xlu0 %v7473_v5, %s18915_s15  ;;  %v7509_v5 = vcombine.high %v7484_v49, %v7500_v3  ;;  %s18920_s15 = smov 6   ;;  %v14454_v3 = vpop.permute.xlu1 %7110  ;;  %v7544_v49 = vcombine.low %v14088_v39, %v14218_v46  ;;  %v7539_v58 = vrot.slane %v7525_v10, %v11431_v25 }
 0x6ba   : > { %18921 = vst [vmem:[#allocation584_spill] sm:$0xff] %v14454_v3 }
 0x6bb   : > { %9461 = vrot.lane.b32.xlu1 %v7471_v6, %s18916_s29  ;;  %v7523_v14 = vrot.slane %v7509_v5, %v11431_v25  ;;  %v7568_v6 = vrot.slane %v7560_v54, %v11428_v24  ;;  %s18923_s29 = smov 56   ;;  %v7545_v54 = vcombine.high %v14088_v39, %v14218_v46  ;;  %v7628_v46 = vcombine.low %v14153_v36, %v14334_v40 }
 0x6bd   : > { %9457 = vrot.lane.b32.xlu0 %v7474_v22, %s18917_s26  ;;  %v7540_v22 = vcombine.high %v7516_v62, %v18440_v12  ;;  %v7541_v5 = vcombine.high %v7523_v14, %v18440_v12  ;;  %v14468_v3 = vpop.permute.xlu1 %7118  ;;  %v7559_v10 = vrot.slane %v7545_v54, %v11428_v24 }
 0x6be   : > { %18926 = vst [vmem:[#allocation586_spill] sm:$0xff] %v14468_v3  ;;  %v7543_v3 = vcombine.high %v7539_v58, %v18440_v12 }
 0x6bf   : > { %9469 = vrot.lane.b32.xlu1 %v7516_v62, %s18919_s2  ;;  %s18922_s2 = smov 26   ;;  %v7552_v62 = vrot.slane %v7544_v49, %v11428_v24 }
 0x6c1   : > { %9465 = vrot.lane.b32.xlu0 %v7475_v48, %s18920_s15  ;;  %s18924_s15 = smov 46   ;;  %v14466_v48 = vpop.permute.xlu0 %7106  ;;  %v7576_v4 = vcombine.low %v7552_v62, %v7568_v6  ;;  %v7577_v49 = vcombine.high %v7552_v62, %v7568_v6  ;;  %v7612_v62 = vcombine.low %v14086_v26, %v14216_v27 }
 0x6c2   : > { %18925 = vst [vmem:[#allocation585_spill] sm:$0xff] %v14466_v48 }
 0x6c3   : > { %9477 = vrot.lane.b32.xlu1 %v7523_v14, %s18740_s27  ;;  %s18930_s27 = smov 86   ;;  %v7591_v6 = vrot.slane %v7577_v49, %v11431_v25  ;;  %v7620_v49 = vrot.slane %v7612_v62, %v11428_v24  ;;  %v7696_v62 = vcombine.low %v14159_v38, %v14355_v44 }
 0x6c5   : > { %9473 = vrot.lane.b32.xlu0 %v7540_v22, %s18922_s2  ;;  %v7561_v22 = vcombine.high %v14155_v52, %v14344_v34  ;;  %v14481_v52 = vpop.permute.xlu0 %7114  ;;  %v14483_v34 = vpop.permute.xlu1 %7126  ;;  %v7609_v54 = vcombine.high %v7591_v6, %v18440_v12 }
 0x6c6   : > { %18928 = vst [vmem:[#allocation587_spill] sm:$0xff] %v14481_v52  ;;  %18929 = vst [vmem:[#allocation588_spill] sm:$0xff] %v14483_v34 }
 0x6c7   : > { %9485 = vrot.lane.b32.xlu1 %v7532_v8, %s18923_s29  ;;  %s18927_s29 = smov 66   ;;  %v7575_v14 = vrot.slane %v7561_v22, %v11428_v24 }
 0x6c9   : > { %9481 = vrot.lane.b32.xlu0 %v7541_v5, %s18924_s15  ;;  %v7584_v5 = vrot.slane %v7576_v4, %v11431_v25  ;;  %v7592_v39 = vcombine.low %v7559_v10, %v7575_v14  ;;  %v14496_v22 = vpop.permute.xlu0 %7122  ;;  %v14498_v4 = vpop.permute.xlu1 %7134 }
 0x6ca   : > { %18932 = vst [vmem:[#allocation589_spill] sm:$0xff] %v14496_v22  ;;  %18933 = vst [vmem:[#allocation590_spill] sm:$0xff] %v14498_v4 }
 0x6cb   : > { %9493 = vrot.lane.b32.xlu1 %v7539_v58, %s18747_s22  ;;  %v7608_v8 = vcombine.high %v7584_v5, %v18440_v12  ;;  %s18931_s22 = smov 106   ;;  %v7593_v58 = vcombine.high %v7559_v10, %v7575_v14 }
 0x6cd   : > { %9489 = vrot.lane.b32.xlu0 %v7542_v19, %s18927_s29  ;;  %v7600_v19 = vrot.slane %v7592_v39, %v11431_v25  ;;  %v7607_v4 = vrot.slane %v7593_v58, %v11431_v25  ;;  %v14512_v10 = vpop.permute.xlu0 %7130  ;;  %v18937_v39 = vlaneseq }
 0x6ce   : > { %18935 = vst [vmem:[#allocation591_spill] sm:$0xff] %v14512_v10 }
 0x6cf   : > { %9501 = vrot.lane.b32.xlu1 %v7584_v5, %s18751_s25  ;;  %s18934_s25 = smov 126   ;;  %v7629_v5 = vcombine.high %v14153_v36, %v14334_v40  ;;  %v7610_v14 = vcombine.high %v7600_v19, %v18440_v12 }
 0x6d1   : > { %9497 = vrot.lane.b32.xlu0 %v7543_v3, %s18930_s27  ;;  %v7636_v3 = vrot.slane %v7628_v46, %v11428_v24  ;;  %v7613_v46 = vcombine.high %v14086_v26, %v14216_v27  ;;  %v7643_v36 = vrot.slane %v7629_v5, %v11428_v24  ;;  %v7704_v5 = vrot.slane %v7696_v62, %v11428_v24 }
 0x6d3   : > { %9509 = vrot.lane.b32.xlu1 %v7591_v6, %s18754_s17  ;;  %v7644_v34 = vcombine.low %v7620_v49, %v7636_v3  ;;  %v14519_v6 = vand.u32 127, %v18937_v39  ;;  %v7645_v40 = vcombine.high %v7620_v49, %v7636_v3  ;;  %v7680_v3 = vcombine.low %v14092_v60, %v14222_v17 }
 0x6d5   : > { %9505 = vrot.lane.b32.xlu0 %v7608_v8, %s18931_s22  ;;  %v7652_v58 = vrot.slane %v7644_v34, %v11431_v25  ;;  %v14529_v26 = vadd.s32 128, %v14519_v6  ;;  %v7659_v39 = vrot.slane %v7645_v40, %v11431_v25  ;;  %v7688_v62 = vrot.slane %v7680_v3, %v11428_v24 }
 0x6d7   : > { %9517 = vrot.lane.b32.xlu1 %v7600_v19, %s18757_s4  ;;  %s18936_s4 = smov 18   ;;  %v7611_v19 = vcombine.high %v7607_v4, %v18440_v12  ;;  %v14546_v10 = vmul.u32.u64.low 3435973837, %v14529_v26  ;;  %v14547_v22 = vmul.u32.u64.high 3435973837, %v14529_v26, %v14546_v10  ;;  %v7677_v48 = vcombine.high %v7659_v39, %v18440_v12 }
 0x6d9   : > { %9513 = vrot.lane.b32.xlu0 %v7609_v54, %s18934_s25 }
 0x6db   : > { %9525 = vrot.lane.b32.xlu1 %v7607_v4, %s18760_s16  ;;  %s18938_s16 = smov 38   ;;  %v14539_v34 = vmul.u32.u64.low 3435973837, %v14519_v6  ;;  %v14540_v4 = vmul.u32.u64.high 3435973837, %v14519_v6, %v14539_v34 }
 0x6dc   : > { %v2913_v34 = vsel %vm17984_vm3, %v11776_v41, %v11782_v51  ;;  %v7712_v51 = vcombine.low %v7688_v62, %v7704_v5 }
 0x6dd   : > { %9521 = vrot.lane.b32.xlu0 %v7610_v14, %s18936_s4  ;;  %v7627_v14 = vrot.slane %v7613_v46, %v11428_v24  ;;  %v7676_v46 = vcombine.high %v7652_v58, %v18440_v12 }
 0x6df   : > { %9533 = vrot.lane.b32.xlu1 %v7652_v58, %s18763_s5  ;;  %v7660_v49 = vcombine.low %v7627_v14, %v7643_v36  ;;  %s18939_s5 = smov 58   ;;  %v7661_v58 = vcombine.high %v7627_v14, %v7643_v36  ;;  %v7713_v14 = vcombine.high %v7688_v62, %v7704_v5 }
 0x6e1   : > { %9529 = vrot.lane.b32.xlu0 %v7611_v19, %s18938_s16  ;;  %v2889_v19 = vsel %vm17975_vm1, %v11437_v29, %v11688_v59  ;;  %v2915_v29 = vsel %vm17980_vm4, %v2913_v34, %v11866_v55  ;;  %v7697_v59 = vcombine.high %v14159_v38, %v14355_v44  ;;  %v7668_v3 = vrot.slane %v7660_v49, %v11431_v25 }
 0x6e2   : > { %v2891_v10 = vsel %vm17985_vm2, %v2889_v19, %v11749_v61  ;;  %v7681_v61 = vcombine.high %v14092_v60, %v14222_v17  ;;  %v2917_v38 = vsel %vm17982_vm6, %v2915_v29, %v11860_v57  ;;  %v6186_v44 = vshrl.u32 %v14540_v4, 3 }
 0x6e3   : > { %9541 = vrot.lane.b32.xlu1 %v7659_v39, %s18571_s18  ;;  %v2893_v55 = vsel %vm17983_vm5, %v2891_v10, %v11754_v0  ;;  %v14582_v36 = vrot.slane %v7697_v59, %v11428_v24  ;;  %v7675_v49 = vrot.slane %v7661_v58, %v11431_v25  ;;  %v7678_v60 = vcombine.high %v7668_v3, %v18440_v12 }
 0x6e4   : > { %v14587_v17 = vrot.slane %v7712_v51, %v11431_v25  ;;  %v6197_v0 = vshrl.u32 %v14547_v22, 3  ;;  %v2895_v4 = vsel %vm17979_vm7, %v2893_v55, %v11757_v9  ;;  %v7695_v5 = vrot.slane %v7681_v61, %v11428_v24  ;;  %v18940_v51 = vld [vmem:[#allocation28_spill] sm:$0xff]  ;;  %v18941_v61 = vld [vmem:[#allocation265_spill] sm:$0xff] }
 0x6e5   : > { %v14508_v8 = vpop.permute.xlu1 %9317  ;;  %9537 = vrot.lane.b32.xlu0 %v7676_v46, %s18939_s5  ;;  %v2919_v39 = vsel %vm17976_vm8, %v2917_v38, %v11709_v16  ;;  %v5907_v22 = vsel %vm17975_vm1, %v12769_v15, %v12991_v32  ;;  %v6187_v46 = vmul.u32 10, %v6186_v44  ;;  %v7764_v19 = vcombine.low %v14157_v28, %v14346_v23  ;;  %v18943_v38 = vld [vmem:[#allocation272_spill] sm:$0xff] }
 0x6e6   : > { %v7728_v9 = vcombine.low %v7695_v5, %v14582_v36  ;;  %v7744_v34 = vcombine.high %v14587_v17, %v18440_v12  ;;  %v7679_v62 = vcombine.high %v7675_v49, %v18440_v12  ;;  %v7727_v10 = vrot.slane %v7713_v14, %v11431_v25 }
 0x6e7   : > { %v14531_v27 = vpop.permute.xlu0 %9313  ;;  %9549 = vrot.lane.b32.xlu1 %v7668_v3, %s18769_s23  ;;  %v2939_v16 = vsel %vm17977_vm10, %v11724_v33, %v11805_v47  ;;  %v6198_v32 = vmul.u32 10, %v6197_v0  ;;  %vm17989_vm1 = vcmask 654336   ;;  %v2921_v15 = vsel %vm17993_vm13, %v2919_v39, %v11713_v20 }
 0x6e8   : > { %vm17988_vm8 = vcmask 506880   ;;  %v5908_v29 = vsel %vm17985_vm2, %v5907_v22, %v12989_v18  ;;  %v7748_v59 = vcombine.low %v14090_v7, %v14220_v43  ;;  %v2897_v3 = vsel %vm17981_vm9, %v2895_v4, %v18940_v51  ;;  %v18942_v18 = vld [vmem:[#allocation275_spill] sm:$0xff]  ;;  %v18945_v22 = vld [vmem:[#allocation44_spill] sm:$0xff] }
 0x6e9   : > { %v14526_v54 = vpop.permute.xlu1 %9325  ;;  %9545 = vrot.lane.b32.xlu0 %v7677_v48, %s18670_s30  ;;  %v5909_v20 = vsel %vm17983_vm5, %v5908_v29, %v18941_v61  ;;  %v14631_v55 = vsub.s32 %v14519_v6, %v6187_v46  ;;  %v5919_v44 = vsel %vm17984_vm3, %v18943_v38, %v18942_v18  ;;  %v14637_v14 = vrot.slane %v7764_v19, %v11428_v24  ;;  %v18944_v4 = vld [vmem:[#allocation35_spill] sm:$0xff]  ;;  %v18947_v19 = vld [vmem:[#allocation264_spill] sm:$0xff] }
 0x6ea   : > { %v7736_v0 = vrot.slane %v7728_v9, %v11431_v25  ;;  %v2941_v39 = vsel %vm17978_vm11, %v2939_v16, %v18944_v4  ;;  %v2899_v46 = vsel %vm17986_vm12, %v2897_v3, %v18945_v22  ;;  %v14649_v29 = vsub.s32 %v14529_v26, %v6198_v32  ;;  %v18950_v32 = vld [vmem:[#allocation277_spill] sm:$0xff]  ;;  %v18952_v4 = vld [vmem:[#allocation32_spill] sm:$0xff] }
 0x6eb   : > { %v14549_v52 = vpop.permute.xlu0 %9321  ;;  %9557 = vrot.lane.b32.xlu1 %v7675_v49, %s18578_s12  ;;  %v7729_v49 = vcombine.high %v7695_v5, %v14582_v36  ;;  %vm17998_vm10 = vcmask 588800   ;;  %v5910_v36 = vsel %vm17979_vm7, %v5909_v20, %v18947_v19  ;;  %v18948_v5 = vld [vmem:[#allocation274_spill] sm:$0xff]  ;;  %v7756_v9 = vrot.slane %v7748_v59, %v11428_v24 }
 0x6ec   : > { %v5920_v51 = vsel %vm17980_vm4, %v5919_v44, %v18948_v5  ;;  %vm6400_vm11 = vcmp.ne.s32.totalorder %v14631_v55, 0  ;;  %vm6420_vm7 = vcmp.lt.s32.totalorder %v14631_v55, 0  ;;  %vm18006_vm4 = vcmask 736256   ;;  %v18951_v44 = vld [vmem:[#allocation43_spill] sm:$0xff] }
 0x6ed   : > { %v14560_v40 = vpop.permute.xlu1 %9333  ;;  %9553 = vrot.lane.b32.xlu0 %v7678_v60, %s18674_s3  ;;  %v7745_v60 = vcombine.high %v7727_v10, %v18440_v12  ;;  %v5921_v61 = vsel %vm17982_vm6, %v5920_v51, %v18950_v32  ;;  %v7765_v59 = vcombine.high %v14157_v28, %v14346_v23  ;;  %v7746_v20 = vcombine.high %v7736_v0, %v18440_v12  ;;  %v18954_v23 = vld [vmem:[#allocation276_spill] sm:$0xff]  ;;  %vm14693_vm2 = vmand %vm6420_vm7, %vm6400_vm11 }
 0x6ee   : > { %v7743_v18 = vrot.slane %v7729_v49, %v11431_v25  ;;  %vm6421_vm6 = vcmp.lt.s32.totalorder %v14649_v29, 0  ;;  %vm17991_vm5 = vcmask 670720   ;;  %vm18955_vm3 = vcmask 261120  }
 0x6ef   : > { %v14570_v56 = vpop.permute.xlu0 %9329  ;;  %9565 = vrot.lane.b32.xlu1 %v7744_v34, %s18581_s14  ;;  %v18946_v34 = vld [vmem:[#allocation31_spill] sm:$0xff]  ;;  %v5922_v19 = vsel %vm18955_vm3, %v5921_v61, %v18954_v23  ;;  %v7749_v49 = vcombine.high %v14090_v7, %v14220_v43  ;;  %v6460_v51 = vadd.s32 10, %v14631_v55  ;;  %v6461_v7 = vadd.s32 10, %v14649_v29 }
 0x6f0   : > { %vm18005_vm3 = vcmask 818176   ;;  %v7781_v32 = vcombine.high %v7756_v9, %v14637_v14  ;;  %v7747_v61 = vcombine.high %v7743_v18, %v18440_v12  ;;  %vm18000_vm7 = vcmask 834560  }
 0x6f1   : > { %v14589_v48 = vpop.permute.xlu1 %9341  ;;  %9561 = vrot.lane.b32.xlu0 %v7679_v62, %s18482_s0  ;;  %v2923_v62 = vsel %vm17990_vm15, %v2921_v15, %v18946_v34  ;;  %v18949_v15 = vld [vmem:[#allocation267_spill] sm:$0xff]  ;;  %v18953_v34 = vld [vmem:[#allocation266_spill] sm:$0xff]  ;;  %vm18966_vm11 = vcmask 80896  }
 0x6f2   : > { %v5911_v26 = vsel %vm17981_vm9, %v5910_v36, %v18949_v15  ;;  %v2925_v22 = vsel %vm17988_vm8, %v2923_v62, %v18952_v4  ;;  %vm6401_vm9 = vcmp.ne.s32.totalorder %v14649_v29, 0  ;;  %v18956_v62 = vld [vmem:[#allocation269_spill] sm:$0xff]  ;;  %v18959_v15 = vld [vmem:[#allocation279_spill] sm:$0xff]  ;;  %v18962_v4 = vld [vmem:[#allocation36_spill] sm:$0xff] }
 0x6f3   : > { %v14592_v57 = vpop.permute.xlu0 %9337  ;;  %9573 = vrot.lane.b32.xlu1 %v7745_v60, %s18445_s20  ;;  %v2901_v60 = vsel %vm17994_vm14, %v2899_v46, %v18951_v44  ;;  %v5912_v28 = vsel %vm17986_vm12, %v5911_v26, %v18953_v34  ;;  %v5923_v43 = vsel %vm17993_vm13, %v5922_v19, %v18959_v15  ;;  %vm14703_vm12 = vmand %vm6421_vm6, %vm6401_vm9  ;;  %v14708_v26 = vrot.slane %v7765_v59, %v11428_v24  ;;  %v18964_v19 = vld [vmem:[#allocation33_spill] sm:$0xff]  ;;  %v18965_v59 = vld [vmem:[#allocation278_spill] sm:$0xff] }
 0x6f4   : > { %v5913_v36 = vsel %vm17994_vm14, %v5912_v28, %v18956_v62  ;;  %v14715_v34 = vsel %vm17987_vm0, %v2941_v39, %v18962_v4  ;;  %v18963_v28 = vld [vmem:[#allocation20_spill] sm:$0xff]  ;;  %vm17992_vm6 = vcmask 752640   ;;  %v2927_v62 = vsel %vm17998_vm10, %v2925_v22, %v18964_v19  ;;  %v18968_v15 = vld [vmem:[#allocation281_spill] sm:$0xff] }
 0x6f5   : > { %v14622_v47 = vpop.permute.xlu1 %9349  ;;  %9569 = vrot.lane.b32.xlu0 %v7727_v10, %s18485_s7  ;;  %v7780_v10 = vcombine.low %v7756_v9, %v14637_v14  ;;  %v2903_v23 = vsel %vm17989_vm1, %v2901_v60, %v18963_v28  ;;  %vm18004_vm9 = vcmask 900096   ;;  %v5924_v14 = vsel %vm17990_vm15, %v5923_v43, %v18965_v59  ;;  %v18967_v39 = vld [vmem:[#allocation268_spill] sm:$0xff] }
 0x6f6   : > { %v7763_v9 = vrot.slane %v7749_v49, %v11428_v24  ;;  %v5914_v60 = vsel %vm17989_vm1, %v5913_v36, %v18967_v39  ;;  %v6480_v22 = vsel %vm14693_vm2, %v6460_v51, %v14631_v55  ;;  %v5925_v43 = vsel %vm17988_vm8, %v5924_v14, %v18968_v15  ;;  %v18970_v55 = vld [vmem:[#allocation34_spill] sm:$0xff]  ;;  %v18971_v51 = vld [vmem:[#allocation271_spill] sm:$0xff]  ;;  %v18974_v59 = vld [vmem:[#allocation280_spill] sm:$0xff] }
 0x6f7   : > { %v14624_v58 = vpop.permute.xlu0 %9345  ;;  %9581 = vrot.lane.b32.xlu1 %v7746_v20, %s18446_s8  ;;  %v7788_v20 = vrot.slane %v7780_v10, %v11431_v25  ;;  %v10320_v10 = vsel %vm18966_vm11, %v14279_v2, %v14531_v27  ;;  %v6481_v49 = vsel %vm14703_vm12, %v6461_v7, %v14649_v29  ;;  %v18969_v27 = vld [vmem:[#allocation540_spill] sm:$0xff]  ;;  %v7795_v36 = vrot.slane %v7781_v32, %v11431_v25  ;;  %v18975_v14 = vld [vmem:[#allocation562_spill] sm:$0xff] }
 0x6f8   : > { %v7796_v2 = vcombine.low %v7763_v9, %v14708_v26  ;;  %vm18001_vm11 = vcmask 916480   ;;  %v2929_v5 = vsel %vm17991_vm5, %v2927_v62, %v18970_v55  ;;  %v5915_v19 = vsel %vm18006_vm4, %v5914_v60, %v18971_v51  ;;  %v18976_v39 = vld [vmem:[#allocation518_spill] sm:$0xff] }
 0x6f9   : > { %v14658_v16 = vpop.permute.xlu1 %9357  ;;  %9577 = vrot.lane.b32.xlu0 %v7736_v0, %s18488_s1  ;;  %vm18972_vm2 = vcmask 162816   ;;  %vm18973_vm12 = vcmask 15360   ;;  %vm18009_vm0 = vcmask 277504   ;;  %vm18003_vm8 = vcmask 982016  }
 0x6fa   : > { %v10321_v29 = vsel %vm18972_vm2, %v10320_v10, %v14508_v8  ;;  %vm18002_vm1 = vcmask 998400   ;;  %v6500_v0 = vcvt.s32.f32 %v6480_v22  ;;  %v5926_v32 = vsel %vm17998_vm10, %v5925_v43, %v18974_v59  ;;  %v18978_v8 = vld [vmem:[#allocation21_spill] sm:$0xff]  ;;  %v18979_v10 = vld [vmem:[#allocation283_spill] sm:$0xff]  ;;  %v18981_v59 = vld [vmem:[#allocation46_spill] sm:$0xff] }
 0x6fb   : > { %v14660_v3 = vpop.permute.xlu0 %9353  ;;  %9589 = vrot.lane.b32.xlu1 %v7747_v61, %s18447_s10  ;;  %v7832_v61 = vcombine.low %v18969_v27, %v14369_v63  ;;  %v7816_v15 = vcombine.low %v18976_v39, %v18975_v14  ;;  %vm18977_vm15 = vcmask 244736   ;;  %v5927_v60 = vsel %vm17991_vm5, %v5926_v32, %v18979_v10  ;;  %v18985_v32 = vld [vmem:[#allocation282_spill] sm:$0xff] }
 0x6fc   : > { %v10322_v62 = vsel %vm18977_vm15, %v10321_v29, %v14549_v52  ;;  %v6501_v22 = vcvt.s32.f32 %v6481_v49  ;;  %v7797_v55 = vcombine.high %v7763_v9, %v14708_v26  ;;  %vm18020_vm2 = vcmask 48128  }
 0x6fd   : > { %v9366_v46 = vpop.permute.xlu1 %9365  ;;  %9585 = vrot.lane.b32.xlu0 %v7743_v18, %s18296_s6  ;;  %v7812_v18 = vcombine.high %v7788_v20, %v18440_v12  ;;  %v14766_v43 = vrot.slane %v7832_v61, %v11428_v24  ;;  %v7813_v51 = vcombine.high %v7795_v36, %v18440_v12  ;;  %vm18980_vm15 = vcmask 97280  }
 0x6fe   : > { %vm18984_vm5 = vcmask 179200   ;;  %v6520_v61 = vmul.f32 0.1, %v6500_v0  ;;  %v5928_v10 = vsel %vm17992_vm6, %v5927_v60, %v18985_v32  ;;  %v7833_v0 = vcombine.high %v18969_v27, %v14369_v63  ;;  %v18996_v32 = vld [vmem:[#allocation37_spill] sm:$0xff] }
 0x6ff   : > { %v9362_v44 = vpop.permute.xlu0 %9361  ;;  %9597 = vrot.lane.b32.xlu1 %v7812_v18, %s18202_s9 }
 0x700   : > { %v10332_v7 = vsel %vm18973_vm12, %v14658_v16, %v9362_v44  ;;  %v2905_v44 = vsel %vm18006_vm4, %v2903_v23, %v18978_v8  ;;  %v2931_v23 = vsel %vm17992_vm6, %v2929_v5, %v18981_v59  ;;  %v18982_v8 = vld [vmem:[#allocation270_spill] sm:$0xff]  ;;  %vm18983_vm12 = vcmask 326656   ;;  %v18987_v5 = vld [vmem:[#allocation273_spill] sm:$0xff] }
 0x701   : > { %v9374_v4 = vpop.permute.xlu1 %9373  ;;  %9593 = vrot.lane.b32.xlu0 %v7788_v20, %s18300_s21  ;;  %v10333_v52 = vsel %vm18980_vm15, %v10332_v7, %v9366_v46  ;;  %v7804_v20 = vrot.slane %v7796_v2, %v11431_v25  ;;  %v5916_v49 = vsel %vm18005_vm3, %v5915_v19, %v18982_v8  ;;  %v10323_v26 = vsel %vm18983_vm12, %v10322_v62, %v14526_v54  ;;  %v18988_v7 = vld [vmem:[#allocation285_spill] sm:$0xff] }
 0x702   : > { %v7824_v46 = vrot.slane %v7816_v15, %v11428_v24  ;;  %vm18986_vm15 = vcmask 408576   ;;  %v5917_v19 = vsel %vm18004_vm9, %v5916_v49, %v18987_v5  ;;  %v5929_v54 = vsel %vm18000_vm7, %v5928_v10, %v18988_v7  ;;  %v18991_v59 = vld [vmem:[#allocation45_spill] sm:$0xff]  ;;  %v18993_v49 = vld [vmem:[#allocation284_spill] sm:$0xff] }
 0x703   : > { %v9370_v28 = vpop.permute.xlu0 %9369  ;;  %v10324_v2 = vsel %vm18986_vm15, %v10323_v26, %v14570_v56  ;;  %9605 = vrot.lane.b32.xlu1 %v7813_v51, %s18206_s28  ;;  %vm18013_vm12 = vcmask 130048   ;;  %v7814_v56 = vcombine.high %v7804_v20, %v18440_v12  ;;  %vm18989_vm15 = vcmask 261120   ;;  %v18990_v51 = vld [vmem:[#allocation29_spill] sm:$0xff]  ;;  %s19001_s28 = smov 12  }
 0x704   : > { %v10334_v9 = vsel %vm18984_vm5, %v10333_v52, %v9370_v28  ;;  %v6521_v28 = vmul.f32 0.1, %v6501_v22  ;;  %vm18011_vm5 = vcmask 359424   ;;  %v7848_v15 = vcombine.low %v7824_v46, %v14766_v43 }
 0x705   : > { %v9382_v18 = vpop.permute.xlu1 %9381  ;;  %9601 = vrot.lane.b32.xlu0 %v7795_v36, %s18303_s11  ;;  %v10335_v62 = vsel %vm18989_vm15, %v10334_v9, %v9374_v4  ;;  %v7811_v36 = vrot.slane %v7797_v55, %v11431_v25  ;;  %v2907_v52 = vsel %vm18005_vm3, %v2905_v44, %v18990_v51  ;;  %v2933_v22 = vsel %vm18000_vm7, %v2931_v23, %v18991_v59  ;;  %v18994_v23 = vld [vmem:[#allocation287_spill] sm:$0xff] }
 0x706   : > { %vm18992_vm6 = vcmask 490496   ;;  %v6540_v8 = vadd.f32 0.05, %v6520_v61  ;;  %v5930_v26 = vsel %vm18001_vm11, %v5929_v54, %v18993_v49  ;;  %v7817_v4 = vcombine.high %v18976_v39, %v18975_v14  ;;  %v19002_v54 = vld [vmem:[#allocation23_spill] sm:$0xff] }
 0x707   : > { %v9378_v29 = vpop.permute.xlu0 %9377  ;;  %v10325_v63 = vsel %vm18992_vm6, %v10324_v2, %v14560_v40  ;;  %9613 = vrot.lane.b32.xlu1 %v7814_v56, %s18210_s19  ;;  %v5918_v40 = vsel %vm18003_vm8, %v5917_v19, %v18943_v38  ;;  %v5931_v9 = vsel %vm18002_vm1, %v5930_v26, %v18994_v23  ;;  %v14815_v61 = vrot.slane %v7833_v0, %v11428_v24  ;;  %v18997_v38 = vld [vmem:[#allocation30_spill] sm:$0xff]  ;;  %s19000_s19 = smov 22  }
 0x708   : > { %v10336_v27 = vsel %vm17993_vm13, %v10335_v62, %v9378_v29  ;;  %v10326_v55 = vsel %vm17994_vm14, %v10325_v63, %v14592_v57  ;;  %v6541_v29 = vadd.f32 0.05, %v6521_v28  ;;  %v7849_v14 = vcombine.high %v7824_v46, %v14766_v43  ;;  %v19004_v0 = vld [vmem:[#allocation50_spill] sm:$0xff]  ;;  %v19005_v62 = vld [vmem:[#allocation539_spill] sm:$0xff]  ;;  %v19006_v63 = vld [vmem:[#allocation561_spill] sm:$0xff] }
 0x709   : > { %v9390_v60 = vpop.permute.xlu1 %9389  ;;  %9609 = vrot.lane.b32.xlu0 %v7804_v20, %s18207_s24  ;;  %v7815_v57 = vcombine.high %v7811_v36, %v18440_v12  ;;  %vm18995_vm6 = vcmask 424960   ;;  %v7856_v20 = vrot.slane %v7848_v15, %v11431_v25  ;;  %v2945_v10 = vsel %vm18009_vm0, %v14715_v34, %v18996_v32  ;;  %s19014_s24 = sld [smem:[#allocation18_spill]] }
 0x70a   : > { %v10337_v39 = vsel %vm18995_vm6, %v10336_v27, %v9382_v18  ;;  %v2909_v2 = vsel %vm18004_vm9, %v2907_v52, %v18997_v38  ;;  %vm18998_vm13 = vcmask 654336   ;;  %vm18999_vm14 = vcmask 506880   ;;  %v19007_v27 = vld [vmem:[#allocation517_spill] sm:$0xff] }
 0x70b   : > { %v9386_v44 = vpop.permute.xlu0 %9385  ;;  %v10327_v5 = vsel %vm18998_vm13, %v10326_v55, %v14589_v48  ;;  %vm18012_vm15 = vcmask 211968   ;;  %v6560_v43 = vmul.f32 %v6540_v8, %v5918_v40  ;;  %v7831_v46 = vrot.slane %v7817_v4, %v11428_v24  ;;  %9621 = vrot.lane.b32.xlu1 %v7815_v57, %s19000_s19  ;;  %v19003_v48 = vld [vmem:[#allocation49_spill] sm:$0xff]  ;;  %s19009_s19 = smov 42  }
 0x70c   : > { %v10338_v19 = vsel %vm18999_vm14, %v10337_v39, %v9386_v44  ;;  %v10328_v18 = vsel %vm18006_vm4, %v10327_v5, %v14624_v58  ;;  %v2935_v28 = vsel %vm18001_vm11, %v2933_v22, %v19002_v54  ;;  %vm18037_vm6 = vcmask 523264   ;;  %v19020_v54 = vld [vmem:[#allocation27_spill] sm:$0xff] }
 0x70d   : > { %v9398_v7 = vpop.permute.xlu1 %9397  ;;  %9617 = vrot.lane.b32.xlu0 %v7811_v36, %s19001_s28  ;;  %v2965_v15 = vsel %vm18020_vm2, %v19004_v0, %v19003_v48  ;;  %v6561_v56 = vmul.f32 %v6541_v29, %v5931_v9  ;;  %v7900_v51 = vcombine.low %v19005_v62, %v14357_v42  ;;  %vm18016_vm13 = vcmask 293888   ;;  %s19010_s28 = smov 32   ;;  %v19011_v29 = vld [vmem:[#allocation48_spill] sm:$0xff]  ;;  %v19012_v9 = vld [vmem:[#allocation26_spill] sm:$0xff] }
 0x70e   : > { %v7864_v58 = vcombine.low %v7831_v46, %v14815_v61  ;;  %v7880_v52 = vcombine.high %v7856_v20, %v18440_v12  ;;  %v10339_v36 = vsel %vm17998_vm10, %v10338_v19, %v9390_v60  ;;  %v7863_v59 = vrot.slane %v7849_v14, %v11431_v25  ;;  %v19015_v19 = vld [vmem:[#allocation47_spill] sm:$0xff] }
 0x70f   : > { %v9394_v34 = vpop.permute.xlu0 %9393  ;;  %v2911_v22 = vsel %vm18003_vm8, %v2909_v2, %v11776_v41  ;;  %v7884_v8 = vcombine.low %v19007_v27, %v19006_v63  ;;  %v10329_v49 = vsel %vm18005_vm3, %v10328_v18, %v14622_v47  ;;  %vm19008_vm14 = vcmask 670720   ;;  %v19017_v18 = vld [vmem:[#allocation458_spill] sm:$0xff]  ;;  %s10896_s9 = smul.u32 80, %s19014_s24  ;;  %s19024_s24 = smov 82  }
 0x710   : > { %v10340_v26 = vsel %vm19008_vm14, %v10339_v36, %v9394_v34  ;;  %v6580_v4 = vadd.f32 %v6560_v43, %v2911_v22  ;;  %v2937_v55 = vsel %vm18002_vm1, %v2935_v28, %v11724_v33  ;;  %v14855_v44 = vadd.s32 256, %v14519_v6  ;;  %9629 = vrot.lane.b32.xlu1 %v7880_v52, %s19009_s19  ;;  %s19018_s19 = smov 62   ;;  %v19023_v22 = vld [vmem:[#allocation24_spill] sm:$0xff] }
 0x711   : > { %v10330_v60 = vsel %vm18004_vm9, %v10329_v49, %v14660_v3  ;;  %v9406_v41 = vpop.permute.xlu1 %9405  ;;  %9625 = vrot.lane.b32.xlu0 %v7856_v20, %s19010_s28  ;;  %v2947_v47 = vsel %vm18011_vm5, %v2945_v10, %v19011_v29  ;;  %v2967_v14 = vsel %vm18013_vm12, %v2965_v15, %v19012_v9  ;;  %v6581_v57 = vadd.f32 %v6561_v56, %v2937_v55  ;;  %s19019_s28 = smov 52  }
 0x712   : > { %v7908_v33 = vrot.slane %v7900_v51, %v11428_v24  ;;  %v7865_v39 = vcombine.high %v7831_v46, %v14815_v61  ;;  %v7881_v32 = vcombine.high %v7863_v59, %v18440_v12  ;;  %vm19013_vm14 = vcmask 752640  }
 0x713   : > { %v9402_v40 = vpop.permute.xlu0 %9401  ;;  %v10341_v3 = vsel %vm19013_vm14, %v10340_v26, %v9398_v7  ;;  %v7872_v38 = vrot.slane %v7864_v58, %v11431_v25  ;;  %v14871_v20 = vadd.s32 384, %v14519_v6  ;;  %v7892_v10 = vrot.slane %v7884_v8, %v11428_v24  ;;  %v19026_v26 = vld [vmem:[#allocation42_spill] sm:$0xff] }
 0x714   : > { %v10331_v2 = vsel %vm18003_vm8, %v10330_v60, %v14658_v16  ;;  %v10342_v5 = vsel %vm18000_vm7, %v10341_v3, %v9402_v40  ;;  %vm19016_vm10 = vcmask 441344   ;;  %v10575_v7 = vrot.slane %v6580_v4, %v19017_v18  ;;  %9637 = vrot.lane.b32.xlu1 %v7881_v32, %s19018_s19  ;;  %s19025_s19 = smov 72  }
 0x715   : > { %v2949_v61 = vsel %vm19016_vm10, %v2947_v47, %v19015_v19  ;;  %v14880_v43 = vmul.u32.u64.low 3435973837, %v14855_v44  ;;  %v14881_v46 = vmul.u32.u64.high 3435973837, %v14855_v44, %v14880_v43  ;;  %v14885_v34 = vpop.permute.xlu1 %9413  ;;  %9633 = vrot.lane.b32.xlu0 %v7863_v59, %s19019_s28  ;;  %v2969_v16 = vsel %vm18012_vm15, %v2967_v14, %v19020_v54  ;;  %s19028_s28 = smov 92   ;;  %v19032_v54 = vld [vmem:[#allocation38_spill] sm:$0xff] }
 0x716   : > { %v7901_v28 = vcombine.high %v19005_v62, %v14357_v42  ;;  %v7916_v48 = vcombine.low %v7892_v10, %v7908_v33  ;;  %v10579_v15 = vrot.slane %v6581_v57, %v19017_v18  ;;  %vm14894_vm10 = vcmp.gt.f32.partialorder %v10331_v2, %v10575_v7  ;;  %v19029_v57 = vld [vmem:[#allocation25_spill] sm:$0xff] }
 0x717   : > { %v10343_v51 = vsel %vm18001_vm11, %v10342_v5, %v9406_v41  ;;  %v7882_v58 = vcombine.high %v7872_v38, %v18440_v12  ;;  %v14900_v52 = vpop.permute.xlu0 %9409  ;;  %v7879_v36 = vrot.slane %v7865_v39, %v11431_v25  ;;  %vm18035_vm14 = vcmask 605184   ;;  %v19030_v39 = vld [vmem:[#allocation51_spill] sm:$0xff] }
 0x718   : > { %v14904_v59 = vmul.u32.u64.low 3435973837, %v14871_v20  ;;  %v14905_v42 = vmul.u32.u64.high 3435973837, %v14871_v20, %v14904_v59  ;;  %v10344_v62 = vsel %vm18002_vm1, %v10343_v51, %v14900_v52  ;;  %v2951_v8 = vsel %vm18037_vm6, %v2949_v61, %v19023_v22  ;;  %v19039_v51 = vld [vmem:[#allocation52_spill] sm:$0xff] }
 0x719   : > { %vm18017_vm7 = vcmask 375808   ;;  %v7885_v49 = vcombine.high %v19007_v27, %v19006_v63  ;;  %9645 = vrot.lane.b32.xlu1 %v7882_v58, %s19024_s24  ;;  %vm10653_vm11 = vcmp.gt.f32.partialorder %v10344_v62, %v10579_v15  ;;  %9641 = vrot.lane.b32.xlu0 %v7872_v38, %s19025_s19  ;;  %v2971_v4 = vsel %vm18016_vm13, %v2969_v16, %v19026_v26  ;;  %v14922_v47 = vpop.permute.xlu1 %9421  ;;  %s14929_s24 = scalar_lea.vmem [#allocation5], %s10896_s9  ;;  %s19027_s19 = smov 102   ;;  %v19036_v15 = vld [vmem:[#allocation520_spill] sm:$0xff] }
 0x71a   : > { %v7915_v55 = vrot.slane %v7901_v28, %v11428_v24  ;;  %v10872_v60 = vsel %vm14894_vm10, 1.0, %v18440_v12  ;;  %v10873_v41 = vsel %vm10653_vm11, 1.0, %v18440_v12  ;;  %v7917_v40 = vcombine.high %v7892_v10, %v7908_v33  ;;  %v19031_v10 = vld [vmem:[#allocation542_spill] sm:$0xff]  ;;  %s19037_s9 = smov 122  }
 0x71b   : > { %v10732_v29 = vcombine.low %v10872_v60, %v10873_v41  ;;  %v7883_v63 = vcombine.high %v7879_v36, %v18440_v12  ;;  %v14925_v27 = vpop.permute.xlu0 %9417  ;;  %v7924_v9 = vrot.slane %v7916_v48, %v11431_v25  ;;  %vm18019_vm1 = vcmask 687104   ;;  %v19033_v28 = vld [vmem:[#allocation286_spill] sm:$0xff]  ;;  %v19035_v48 = vld [vmem:[#allocation564_spill] sm:$0xff] }
 0x71c   : > { %v7899_v14 = vrot.slane %v7885_v49, %v11428_v24  ;;  %v2953_v33 = vsel %vm18035_vm14, %v2951_v8, %v19029_v57  ;;  %v2973_v32 = vsel %vm18017_vm7, %v2971_v4, %v19030_v39  ;;  %vm18033_vm11 = vcmask 457728   ;;  %v19042_v4 = vld [vmem:[#allocation39_spill] sm:$0xff]  ;;  %v19049_v39 = vld [vmem:[#allocation301_spill] sm:$0xff] }
 0x71d   : > { %10752 = vst [vmem:[%s14929_s24] sm:$0xff] %v10732_v29  ;;  %9653 = vrot.lane.b32.xlu1 %v7883_v63, %s19027_s19  ;;  %9649 = vrot.lane.b32.xlu0 %v7879_v36, %s19028_s28  ;;  %v6208_v3 = vshrl.u32 %v14881_v46, 3  ;;  %v7968_v2 = vcombine.low %v19031_v10, %v14381_v21  ;;  %v14941_v5 = vpop.permute.xlu1 %9429  ;;  %v7948_v19 = vcombine.high %v7924_v9, %v18440_v12  ;;  %v6219_v7 = vshrl.u32 %v14905_v42, 3  ;;  %s19038_s19 = smov 112   ;;  %v19040_v36 = vld [vmem:[#allocation289_spill] sm:$0xff] }
 0x71e   : > { %v7932_v38 = vcombine.low %v7899_v14, %v7915_v55  ;;  %v7931_v43 = vrot.slane %v7917_v40, %v11431_v25  ;;  %v2955_v16 = vsel %vm18019_vm1, %v2953_v33, %v19032_v54  ;;  %vm18007_vm10 = vcmask 769024   ;;  %v19043_v40 = vld [vmem:[#allocation53_spill] sm:$0xff] }
 0x71f   : > { %v14944_v61 = vpop.permute.xlu0 %9425  ;;  %vm19034_vm8 = vcmask 31744   ;;  %v7952_v56 = vcombine.low %v19036_v15, %v19035_v48  ;;  %v2975_v58 = vsel %vm18033_vm11, %v2973_v32, %v19039_v51  ;;  %vm18018_vm9 = vcmask 539648   ;;  %v19050_v32 = vld [vmem:[#allocation298_spill] sm:$0xff]  ;;  %v19054_v51 = vld [vmem:[#allocation300_spill] sm:$0xff] }
 0x720   : > { %v5932_v46 = vsel %vm19034_vm8, %v18994_v23, %v19033_v28  ;;  %vm19041_vm3 = vcmask 113664   ;;  %v6209_v42 = vmul.u32 10, %v6208_v3  ;;  %v7933_v62 = vcombine.high %v7899_v14, %v7915_v55  ;;  %v19044_v55 = vld [vmem:[#allocation288_spill] sm:$0xff]  ;;  %v19048_v14 = vld [vmem:[#allocation291_spill] sm:$0xff]  ;;  %v19052_v28 = vld [vmem:[#allocation54_spill] sm:$0xff] }
 0x721   : > { %9661 = vrot.lane.b32.xlu1 %v7948_v19, %s19037_s9  ;;  %9657 = vrot.lane.b32.xlu0 %v7924_v9, %s19038_s19  ;;  %v5933_v59 = vsel %vm19041_vm3, %v5932_v46, %v19040_v36  ;;  %v14962_v22 = vrot.slane %v7968_v2, %v11428_v24  ;;  %v14964_v23 = vpop.permute.xlu1 %9437  ;;  %v7949_v8 = vcombine.high %v7931_v43, %v18440_v12  ;;  %vm18008_vm8 = vcmask 850944   ;;  %s19046_s9 = smov 14   ;;  %s19047_s19 = smov 4  }
 0x722   : > { %v7940_v26 = vrot.slane %v7932_v38, %v11431_v25  ;;  %v2957_v60 = vsel %vm18007_vm10, %v2955_v16, %v19042_v4  ;;  %v6220_v41 = vmul.u32 10, %v6219_v7  ;;  %v2977_v29 = vsel %vm18018_vm9, %v2975_v58, %v19043_v40 }
 0x723   : > { %v14967_v49 = vpop.permute.xlu0 %9433  ;;  %vm18010_vm3 = vcmask 621568   ;;  %vm19045_vm4 = vcmask 195584   ;;  %v7960_v9 = vrot.slane %v7952_v56, %v11428_v24  ;;  %v14982_v33 = vsub.s32 %v14855_v44, %v6209_v42  ;;  %v19051_v44 = vld [vmem:[#allocation40_spill] sm:$0xff] }
 0x724   : > { %v5934_v63 = vsel %vm19045_vm4, %v5933_v59, %v19044_v55  ;;  %v5945_v3 = vsel %vm18020_vm2, %v19050_v32, %v19049_v39  ;;  %v7969_v38 = vcombine.high %v19031_v10, %v14381_v21  ;;  %v7950_v7 = vcombine.high %v7940_v26, %v18440_v12  ;;  %v19053_v21 = vld [vmem:[#allocation290_spill] sm:$0xff]  ;;  %v19056_v59 = vld [vmem:[#allocation293_spill] sm:$0xff] }
 0x725   : > { %9669 = vrot.lane.b32.xlu1 %v7949_v8, %s19046_s9  ;;  %9665 = vrot.lane.b32.xlu0 %v7931_v43, %s19047_s19  ;;  %v5935_v57 = vsel %vm18009_vm0, %v5934_v63, %v19048_v14  ;;  %v7984_v2 = vcombine.low %v7960_v9, %v14962_v22  ;;  %v14990_v19 = vpop.permute.xlu1 %9445  ;;  %v7947_v54 = vrot.slane %v7933_v62, %v11431_v25  ;;  %vm18015_vm4 = vcmask 932864   ;;  %s19055_s9 = smov 24   ;;  %v19064_v14 = vld [vmem:[#allocation292_spill] sm:$0xff]  ;;  %v19081_v39 = vld [vmem:[#allocation57_spill] sm:$0xff] }
 0x726   : > { %v2959_v16 = vsel %vm18008_vm8, %v2957_v60, %v19051_v44  ;;  %v2979_v46 = vsel %vm18010_vm3, %v2977_v29, %v19052_v28  ;;  %v15001_v56 = vsub.s32 %v14871_v20, %v6220_v41  ;;  %vm18031_vm10 = vcmask 703488   ;;  %v19058_v20 = vld [vmem:[#allocation303_spill] sm:$0xff]  ;;  %v19059_v41 = vld [vmem:[#allocation41_spill] sm:$0xff] }
 0x727   : > { %v14993_v43 = vpop.permute.xlu0 %9441  ;;  %v5936_v10 = vsel %vm18011_vm5, %v5935_v57, %v19053_v21  ;;  %v5946_v58 = vsel %vm18013_vm12, %v5945_v3, %v19054_v51  ;;  %v7953_v36 = vcombine.high %v19036_v15, %v19035_v48  ;;  %vm19057_vm8 = vcmask 441344   ;;  %v19060_v29 = vld [vmem:[#allocation55_spill] sm:$0xff]  ;;  %v19070_v44 = vld [vmem:[#allocation541_spill] sm:$0xff] }
 0x728   : > { %v5937_v42 = vsel %vm19057_vm8, %v5936_v10, %v19056_v59  ;;  %vm6402_vm0 = vcmp.ne.s32.totalorder %v14982_v33, 0  ;;  %vm6422_vm3 = vcmp.lt.s32.totalorder %v14982_v33, 0  ;;  %v5947_v62 = vsel %vm18012_vm15, %v5946_v58, %v19058_v20  ;;  %v19071_v58 = vld [vmem:[#allocation56_spill] sm:$0xff]  ;;  %v19072_v59 = vld [vmem:[#allocation295_spill] sm:$0xff] }
 0x729   : > { %9677 = vrot.lane.b32.xlu1 %v7950_v7, %s18910_s13  ;;  %9673 = vrot.lane.b32.xlu0 %v7940_v26, %s19055_s9  ;;  %v15018_v8 = vrot.slane %v7969_v38, %v11428_v24  ;;  %v7985_v4 = vcombine.high %v7960_v9, %v14962_v22  ;;  %v15021_v48 = vpop.permute.xlu1 %9453  ;;  %v7951_v15 = vcombine.high %v7947_v54, %v18440_v12  ;;  %vm18034_vm8 = vcmask 1014784   ;;  %v19061_v22 = vld [vmem:[#allocation302_spill] sm:$0xff]  ;;  %s19062_s13 = smov 54   ;;  %s19063_s9 = smov 44   ;;  %v19067_v38 = vld [vmem:[#allocation305_spill] sm:$0xff] }
 0x72a   : > { %v7992_v60 = vrot.slane %v7984_v2, %v11431_v25  ;;  %v2961_v40 = vsel %vm18015_vm4, %v2959_v16, %v19059_v41  ;;  %vm6403_vm5 = vcmp.ne.s32.totalorder %v15001_v56, 0  ;;  %vm6423_vm15 = vcmp.lt.s32.totalorder %v15001_v56, 0  ;;  %vm15044_vm4 = vmand %vm6422_vm3, %vm6402_vm0  ;;  %v19075_v41 = vld [vmem:[#allocation563_spill] sm:$0xff] }
 0x72b   : > { %v15024_v26 = vpop.permute.xlu0 %9449  ;;  %v2981_v55 = vsel %vm18031_vm10, %v2979_v46, %v19060_v29  ;;  %vm18030_vm12 = vcmask 785408   ;;  %v5948_v63 = vsel %vm18016_vm13, %v5947_v62, %v19061_v22  ;;  %v7967_v9 = vrot.slane %v7953_v36, %v11428_v24  ;;  %vm15052_vm13 = vmand %vm6423_vm15, %vm6403_vm5  ;;  %v19074_v62 = vld [vmem:[#allocation304_spill] sm:$0xff]  ;;  %v19076_v29 = vld [vmem:[#allocation519_spill] sm:$0xff] }
 0x72c   : > { %v5938_v57 = vsel %vm18037_vm6, %v5937_v42, %v19064_v14  ;;  %v6462_v3 = vadd.s32 10, %v14982_v33  ;;  %v5949_v2 = vsel %vm18017_vm7, %v5948_v63, %v19067_v38  ;;  %v6463_v7 = vadd.s32 10, %v15001_v56 }
 0x72d   : > { %9685 = vrot.lane.b32.xlu1 %v7951_v15, %s19062_s13  ;;  %9681 = vrot.lane.b32.xlu0 %v7947_v54, %s19063_s9  ;;  %v8036_v16 = vcombine.low %v19070_v44, %v14371_v31  ;;  %v8000_v28 = vcombine.low %v7967_v9, %v15018_v8  ;;  %v15059_v46 = vpop.permute.xlu1 %9461  ;;  %v8016_v21 = vcombine.high %v7992_v60, %v18440_v12  ;;  %vm18029_vm0 = vcmask 867328   ;;  %s19078_s13 = smov 74   ;;  %s19079_s9 = smov 64  }
 0x72e   : > { %v7999_v51 = vrot.slane %v7985_v4, %v11431_v25  ;;  %v2983_v36 = vsel %vm18030_vm12, %v2981_v55, %v19071_v58  ;;  %v5939_v42 = vsel %vm18035_vm14, %v5938_v57, %v19072_v59  ;;  %vm19073_vm5 = vcmask 31744   ;;  %v19091_v58 = vld [vmem:[#allocation309_spill] sm:$0xff] }
 0x72f   : > { %v15062_v10 = vpop.permute.xlu0 %9457  ;;  %v10345_v20 = vsel %vm19073_vm5, %v14900_v52, %v14885_v34  ;;  %vm18025_vm15 = vcmask 949248   ;;  %vm18021_vm3 = vcmask 64512   ;;  %v5950_v15 = vsel %vm18033_vm11, %v5949_v2, %v19074_v62  ;;  %v19080_v52 = vld [vmem:[#allocation307_spill] sm:$0xff] }
 0x730   : > { %v8020_v22 = vcombine.low %v19076_v29, %v19075_v41  ;;  %vm19077_vm7 = vcmask 113664   ;;  %v15082_v55 = vsel %vm18034_vm8, %v2961_v40, %v19004_v0  ;;  %vm2992_vm5 = vcmask 146432  }
 0x731   : > { %v10346_v4 = vsel %vm19077_vm7, %v10345_v20, %v14925_v27  ;;  %9693 = vrot.lane.b32.xlu1 %v8016_v21, %s19078_s13  ;;  %9689 = vrot.lane.b32.xlu0 %v7992_v60, %s19079_s9  ;;  %v6482_v34 = vsel %vm15044_vm4, %v6462_v3, %v14982_v33  ;;  %v5951_v63 = vsel %vm18018_vm9, %v5950_v15, %v19080_v52  ;;  %v9470_v57 = vpop.permute.xlu1 %9469  ;;  %v19082_v3 = vld [vmem:[#allocation294_spill] sm:$0xff]  ;;  %vm19083_vm7 = vcmask 195584   ;;  %s19087_s13 = smov 94   ;;  %s19088_s9 = smov 84   ;;  %v19089_v21 = vld [vmem:[#allocation297_spill] sm:$0xff] }
 0x732   : > { %v6483_v27 = vsel %vm15052_vm13, %v6463_v7, %v15001_v56  ;;  %v15093_v14 = vrot.slane %v8036_v16, %v11428_v24  ;;  %v8001_v60 = vcombine.high %v7967_v9, %v15018_v8  ;;  %v8017_v0 = vcombine.high %v7999_v51, %v18440_v12  ;;  %v19084_v9 = vld [vmem:[#allocation306_spill] sm:$0xff] }
 0x733   : > { %v9466_v40 = vpop.permute.xlu0 %9465  ;;  %v8008_v38 = vrot.slane %v8000_v28, %v11431_v25  ;;  %v2985_v33 = vsel %vm18029_vm0, %v2983_v36, %v19081_v39  ;;  %v5940_v2 = vsel %vm18019_vm1, %v5939_v42, %v19082_v3  ;;  %v10347_v56 = vsel %vm19083_vm7, %v10346_v4, %v14922_v47  ;;  %v19093_v4 = vld [vmem:[#allocation60_spill] sm:$0xff] }
 0x734   : > { %v10358_v7 = vsel %vm18020_vm2, %v15059_v46, %v9466_v40  ;;  %vm18028_vm13 = vcmask 1031168   ;;  %v6502_v8 = vcvt.s32.f32 %v6482_v34  ;;  %vm19085_vm4 = vcmask 621568   ;;  %v19094_v34 = vld [vmem:[#allocation59_spill] sm:$0xff] }
 0x735   : > { %v5952_v54 = vsel %vm19085_vm4, %v5951_v63, %v19084_v9  ;;  %v8028_v16 = vrot.slane %v8020_v22, %v11428_v24  ;;  %vm19086_vm9 = vcmask 277504   ;;  %9701 = vrot.lane.b32.xlu1 %v8017_v0, %s19087_s13  ;;  %9697 = vrot.lane.b32.xlu0 %v7999_v51, %s19088_s9  ;;  %vm19090_vm1 = vcmask 769024   ;;  %v9478_v62 = vpop.permute.xlu1 %9477  ;;  %s19101_s13 = smov 104  }
 0x736   : > { %v10348_v28 = vsel %vm19086_vm9, %v10347_v56, %v14944_v61  ;;  %v5941_v47 = vsel %vm19090_vm1, %v5940_v2, %v19089_v21  ;;  %v5953_v36 = vsel %vm18031_vm10, %v5952_v54, %v19091_v58  ;;  %v6503_v59 = vcvt.s32.f32 %v6483_v27  ;;  %v19097_v27 = vld [vmem:[#allocation296_spill] sm:$0xff] }
 0x737   : > { %v8037_v42 = vcombine.high %v19070_v44, %v14371_v31  ;;  %vm18053_vm7 = vcmask 228352   ;;  %v8052_v20 = vcombine.low %v8028_v16, %v15093_v14  ;;  %v8018_v61 = vcombine.high %v8008_v38, %v18440_v12  ;;  %v9474_v22 = vpop.permute.xlu0 %9473 }
 0x738   : > { %vm19092_vm9 = vcmask 130048   ;;  %v8015_v51 = vrot.slane %v8001_v60, %v11431_v25  ;;  %v2991_v52 = vsel %vm18021_vm3, %v19094_v34, %v19093_v4  ;;  %v8021_v63 = vcombine.high %v19076_v29, %v19075_v41  ;;  %v19102_v41 = vld [vmem:[#allocation299_spill] sm:$0xff]  ;;  %v19113_v4 = vld [vmem:[#allocation544_spill] sm:$0xff] }
 0x739   : > { %v10359_v15 = vsel %vm19092_vm9, %v10358_v7, %v9470_v57  ;;  %vm19095_vm1 = vcmask 359424   ;;  %vm19096_vm4 = vcmask 211968   ;;  %vm19098_vm2 = vcmask 850944   ;;  %v19099_v57 = vld [vmem:[#allocation308_spill] sm:$0xff]  ;;  %9709 = vrot.lane.b32.xlu1 %v8018_v61, %s18917_s26  ;;  %9705 = vrot.lane.b32.xlu0 %v8008_v38, %s19101_s13  ;;  %s19110_s26 = smov 6   ;;  %s19111_s13 = smov 124  }
 0x73a   : > { %v10349_v31 = vsel %vm19095_vm1, %v10348_v28, %v14941_v5  ;;  %v10360_v44 = vsel %vm19096_vm4, %v10359_v15, %v9474_v22  ;;  %v5942_v0 = vsel %vm19098_vm2, %v5941_v47, %v19097_v27  ;;  %v6522_v40 = vmul.f32 0.1, %v6502_v8  ;;  %v19104_v5 = vld [vmem:[#allocation311_spill] sm:$0xff]  ;;  %v9486_v8 = vpop.permute.xlu1 %9485  ;;  %v19106_v28 = vld [vmem:[#allocation58_spill] sm:$0xff]  ;;  %v19112_v61 = vld [vmem:[#allocation313_spill] sm:$0xff] }
 0x73b   : > { %v5954_v39 = vsel %vm18030_vm12, %v5953_v36, %v19099_v57  ;;  %vm19100_vm9 = vcmask 441344   ;;  %vm19103_vm3 = vcmask 932864   ;;  %v6523_v2 = vmul.f32 0.1, %v6503_v59  ;;  %v9482_v54 = vpop.permute.xlu0 %9481  ;;  %v19108_v59 = vld [vmem:[#allocation61_spill] sm:$0xff]  ;;  %v19114_v27 = vld [vmem:[#allocation72_spill] sm:$0xff] }
 0x73c   : > { %v10350_v60 = vsel %vm19100_vm9, %v10349_v31, %v14967_v49  ;;  %v5943_v29 = vsel %vm19103_vm3, %v5942_v0, %v19102_v41  ;;  %v5955_v3 = vsel %vm18029_vm0, %v5954_v39, %v19104_v5  ;;  %v15144_v56 = vrot.slane %v8037_v42, %v11428_v24  ;;  %v19109_v42 = vld [vmem:[#allocation310_spill] sm:$0xff] }
 0x73d   : > { %v8053_v7 = vcombine.high %v8028_v16, %v15093_v14  ;;  %v8019_v9 = vcombine.high %v8015_v51, %v18440_v12  ;;  %vm19105_vm2 = vcmask 293888   ;;  %v8060_v38 = vrot.slane %v8052_v20, %v11431_v25  ;;  %9713 = vrot.lane.b32.xlu0 %v8015_v51, %s19111_s13  ;;  %v19115_v0 = vld [vmem:[#allocation22_spill] sm:$0xff] }
 0x73e   : > { %v10361_v49 = vsel %vm19105_vm2, %v10360_v44, %v9478_v62  ;;  %v2987_v21 = vsel %vm18025_vm15, %v2985_v33, %v19106_v28  ;;  %v8035_v47 = vrot.slane %v8021_v63, %v11428_v24  ;;  %v10351_v58 = vsel %vm18037_vm6, %v10350_v60, %v14964_v23  ;;  %v9494_v63 = vpop.permute.xlu1 %9493  ;;  %v19119_v41 = vld [vmem:[#allocation566_spill] sm:$0xff] }
 0x73f   : > { %vm19107_vm3 = vcmask 375808   ;;  %v2993_v14 = vsel %vm2992_vm5, %v2991_v52, %v19108_v59  ;;  %v6542_v16 = vadd.f32 0.05, %v6522_v40  ;;  %v5956_v62 = vsel %vm18025_vm15, %v5955_v3, %v19109_v42  ;;  %9717 = vrot.lane.b32.xlu1 %v8019_v9, %s19110_s26  ;;  %v9490_v44 = vpop.permute.xlu0 %9489  ;;  %s19122_s26 = smov 16  }
 0x740   : > { %v10362_v36 = vsel %vm19107_vm3, %v10361_v49, %v9482_v54  ;;  %v10352_v20 = vsel %vm18035_vm14, %v10351_v58, %v14993_v43  ;;  %v5944_v33 = vsel %vm18034_vm8, %v5943_v29, %v19050_v32  ;;  %v6543_v23 = vadd.f32 0.05, %v6523_v2  ;;  %v19120_v29 = vld [vmem:[#allocation522_spill] sm:$0xff] }
 0x741   : > { %v5957_v15 = vsel %vm18028_vm13, %v5956_v62, %v19112_v61  ;;  %v8068_v22 = vcombine.low %v8035_v47, %v15144_v56  ;;  %v8104_v52 = vcombine.low %v19113_v4, %v14394_v50  ;;  %v8084_v31 = vcombine.high %v8060_v38, %v18440_v12  ;;  %9721 = vrot.lane.b32.xlu0 %v8060_v38, %s19122_s26 }
 0x742   : > { %v10363_v43 = vsel %vm18033_vm11, %v10362_v36, %v9486_v8  ;;  %v8067_v51 = vrot.slane %v8053_v7, %v11431_v25  ;;  %v2989_v32 = vsel %vm18028_vm13, %v2987_v21, %v19094_v34  ;;  %vm19116_vm1 = vcmask 80896   ;;  %v19123_v34 = vld [vmem:[#allocation62_spill] sm:$0xff]  ;;  %v9502_v49 = vpop.permute.xlu1 %9501  ;;  %v19125_v21 = vld [vmem:[#allocation73_spill] sm:$0xff] }
 0x743   : > { %v3014_v40 = vsel %vm19116_vm1, %v19115_v0, %v19114_v27  ;;  %vm19117_vm4 = vcmask 687104   ;;  %vm19118_vm9 = vcmask 539648   ;;  %v6562_v60 = vmul.f32 %v6542_v16, %v5944_v33  ;;  %9725 = vrot.lane.b32.xlu1 %v8084_v31, %s18922_s2  ;;  %v9498_v28 = vpop.permute.xlu0 %9497  ;;  %s19129_s2 = smov 36  }
 0x744   : > { %v10353_v57 = vsel %vm19117_vm4, %v10352_v20, %v14990_v19  ;;  %v10364_v39 = vsel %vm19118_vm9, %v10363_v43, %v9490_v44  ;;  %v8088_v5 = vcombine.low %v19120_v29, %v19119_v41  ;;  %vm19121_vm2 = vcmask 769024  }
 0x745   : > { %v10354_v3 = vsel %vm19121_vm2, %v10353_v57, %v15024_v26  ;;  %v2995_v2 = vsel %vm18053_vm7, %v2993_v14, %v19123_v34  ;;  %v6563_v7 = vmul.f32 %v6543_v23, %v5957_v15  ;;  %v15191_v8 = vadd.s32 512, %v14519_v6  ;;  %9729 = vrot.lane.b32.xlu0 %v8067_v51, %s19129_s2 }
 0x746   : > { %v8069_v19 = vcombine.high %v8035_v47, %v15144_v56  ;;  %v15195_v9 = vrot.slane %v8104_v52, %v11428_v24  ;;  %v8085_v54 = vcombine.high %v8067_v51, %v18440_v12  ;;  %vm19124_vm3 = vcmask 621568  }
 0x747   : > { %v10365_v26 = vsel %vm19124_vm3, %v10364_v39, %v9494_v63  ;;  %v8076_v38 = vrot.slane %v8068_v22, %v11431_v25  ;;  %vm19126_vm1 = vcmask 162816   ;;  %v15203_v36 = vadd.s32 640, %v14519_v6 }
 0x748   : > { %v3015_v58 = vsel %vm19126_vm1, %v3014_v40, %v19125_v21  ;;  %vm19127_vm4 = vcmask 850944   ;;  %v10366_v47 = vsel %vm18031_vm10, %v10365_v26, %v9498_v28  ;;  %vm2996_vm9 = vcmask 310272   ;;  %9733 = vrot.lane.b32.xlu1 %v8085_v54, %s18924_s15  ;;  %s19131_s15 = smov 56   ;;  %v19140_v54 = vld [vmem:[#allocation543_spill] sm:$0xff] }
 0x749   : > { %v10355_v56 = vsel %vm19127_vm4, %v10354_v3, %v15021_v48  ;;  %v6582_v59 = vadd.f32 %v6562_v60, %v15082_v55  ;;  %v8096_v14 = vrot.slane %v8088_v5, %v11428_v24  ;;  %vm19128_vm2 = vcmask 932864   ;;  %v9510_v55 = vpop.permute.xlu1 %9509  ;;  %9737 = vrot.lane.b32.xlu0 %v8076_v38, %s19131_s15  ;;  %v19136_v3 = vld [vmem:[#allocation64_spill] sm:$0xff] }
 0x74a   : > { %v10356_v16 = vsel %vm19128_vm2, %v10355_v56, %v15062_v10  ;;  %v6583_v42 = vadd.f32 %v6563_v7, %v2989_v32  ;;  %v15215_v62 = vmul.u32.u64.low 3435973837, %v15191_v8  ;;  %v15216_v20 = vmul.u32.u64.high 3435973837, %v15191_v8, %v15215_v62  ;;  %v9506_v10 = vpop.permute.xlu0 %9505  ;;  %v19132_v32 = vld [vmem:[#allocation74_spill] sm:$0xff]  ;;  %v19137_v7 = vld [vmem:[#allocation76_spill] sm:$0xff] }
 0x74b   : > { %v8105_v48 = vcombine.high %v19113_v4, %v14394_v50  ;;  %v8120_v33 = vcombine.low %v8096_v14, %v15195_v9  ;;  %v8086_v23 = vcombine.high %v8076_v38, %v18440_v12  ;;  %v10367_v15 = vsel %vm18030_vm12, %v10366_v47, %v9502_v49  ;;  %v19130_v50 = vld [vmem:[#allocation63_spill] sm:$0xff]  ;;  %v19142_v62 = vld [vmem:[#allocation521_spill] sm:$0xff] }
 0x74c   : > { %v8083_v22 = vrot.slane %v8069_v19, %v11431_v25  ;;  %v15225_v52 = vmul.u32.u64.low 3435973837, %v15203_v36  ;;  %v15226_v63 = vmul.u32.u64.high 3435973837, %v15203_v36, %v15225_v52  ;;  %v10357_v31 = vsel %vm18034_vm8, %v10356_v16, %v15059_v46 }
 0x74d   : > { %v10368_v43 = vsel %vm18029_vm0, %v10367_v15, %v9506_v10  ;;  %v2997_v4 = vsel %vm2996_vm9, %v2995_v2, %v19130_v50  ;;  %vm2998_vm3 = vcmask 392192   ;;  %v8089_v44 = vcombine.high %v19120_v29, %v19119_v41  ;;  %9741 = vrot.lane.b32.xlu1 %v8086_v23, %s18927_s29  ;;  %v15248_v60 = vpop.permute.xlu1 %9517  ;;  %s19139_s29 = smov 76  }
 0x74e   : > { %v10583_v51 = vrot.slane %v6582_v59, %v19017_v18  ;;  %vm19133_vm1 = vcmask 244736   ;;  %v8119_v46 = vrot.slane %v8105_v48, %v11428_v24  ;;  %v8121_v0 = vcombine.high %v8096_v14, %v15195_v9  ;;  %v15251_v29 = vpop.permute.xlu0 %9513  ;;  %9745 = vrot.lane.b32.xlu0 %v8083_v22, %s19139_s29  ;;  %v19144_v48 = vld [vmem:[#allocation65_spill] sm:$0xff] }
 0x74f   : > { %v3016_v27 = vsel %vm19133_vm1, %v3015_v58, %v19132_v32  ;;  %v10587_v40 = vrot.slane %v6583_v42, %v19017_v18  ;;  %v10369_v39 = vsel %vm18025_vm15, %v10368_v43, %v9510_v55  ;;  %v8087_v41 = vcombine.high %v8083_v22, %v18440_v12  ;;  %v19141_v42 = vld [vmem:[#allocation565_spill] sm:$0xff] }
 0x750   : > { %vm15243_vm4 = vcmp.gt.f32.partialorder %v10357_v31, %v10583_v51  ;;  %v8128_v5 = vrot.slane %v8120_v33, %v11431_v25  ;;  %v2999_v34 = vsel %vm2998_vm3, %v2997_v4, %v19136_v3  ;;  %v10370_v2 = vsel %vm18028_vm13, %v10369_v39, %v15251_v29  ;;  %v19145_v55 = vld [vmem:[#allocation77_spill] sm:$0xff]  ;;  %v19147_v4 = vld [vmem:[#allocation66_spill] sm:$0xff]  ;;  %v19150_v3 = vld [vmem:[#allocation67_spill] sm:$0xff] }
 0x751   : > { %vm3000_vm2 = vcmask 474112   ;;  %vm19138_vm1 = vcmask 326656   ;;  %v8103_v9 = vrot.slane %v8089_v44, %v11428_v24  ;;  %9749 = vrot.lane.b32.xlu1 %v8087_v41, %s18930_s27  ;;  %vm10655_vm15 = vcmp.gt.f32.partialorder %v10370_v2, %v10587_v40  ;;  %v15270_v56 = vpop.permute.xlu1 %9525  ;;  %s19143_s27 = smov 96   ;;  %v19148_v51 = vld [vmem:[#allocation78_spill] sm:$0xff]  ;;  %v19151_v2 = vld [vmem:[#allocation79_spill] sm:$0xff] }
 0x752   : > { %v3017_v19 = vsel %vm19138_vm1, %v3016_v27, %v19137_v7  ;;  %v6230_v49 = vshrl.u32 %v15216_v20, 3  ;;  %v8172_v26 = vcombine.low %v19140_v54, %v14383_v53  ;;  %v10874_v28 = vsel %vm15243_vm4, 1.0, %v18440_v12  ;;  %v15273_v59 = vpop.permute.xlu0 %9521  ;;  %9753 = vrot.lane.b32.xlu0 %v8128_v5, %s19143_s27 }
 0x753   : > { %v10875_v38 = vsel %vm10655_vm15, 1.0, %v18440_v12  ;;  %v8136_v21 = vcombine.low %v8103_v9, %v8119_v46  ;;  %v8152_v47 = vcombine.high %v8128_v5, %v18440_v12  ;;  %v8135_v14 = vrot.slane %v8121_v0, %v11431_v25 }
 0x754   : > { %v10733_v58 = vcombine.low %v10874_v28, %v10875_v38  ;;  %v6241_v16 = vshrl.u32 %v15226_v63, 3  ;;  %v8156_v20 = vcombine.low %v19142_v62, %v19141_v42  ;;  %v3001_v33 = vsel %vm3000_vm2, %v2999_v34, %v19144_v48  ;;  %v19159_v28 = vld [vmem:[#allocation315_spill] sm:$0xff]  ;;  %v19163_v48 = vld [vmem:[#allocation80_spill] sm:$0xff] }
 0x755   : > { %9757 = vrot.lane.b32.xlu1 %v8152_v47, %s18931_s22  ;;  %vm18052_vm15 = vcmask 556032   ;;  %vm19146_vm4 = vcmask 408576   ;;  %v6231_v15 = vmul.u32 10, %v6230_v49  ;;  %v8180_v10 = vrot.slane %v8172_v26, %v11428_v24  ;;  %v15287_v52 = vpop.permute.xlu1 %9533  ;;  %v19156_v49 = vld [vmem:[#allocation263_spill] sm:$0xff] }
 0x756   : > { %10753 = vst [vmem:[%s14929_s24 + $0x8] sm:$0xff] %v10733_v58  ;;  %v3018_v23 = vsel %vm19146_vm4, %v3017_v19, %v19145_v55  ;;  %v8137_v22 = vcombine.high %v8103_v9, %v8119_v46  ;;  %v8153_v63 = vcombine.high %v8135_v14, %v18440_v12  ;;  %v15290_v31 = vpop.permute.xlu0 %9529  ;;  %v8144_v43 = vrot.slane %v8136_v21, %v11431_v25  ;;  %v19155_v9 = vld [vmem:[#allocation324_spill] sm:$0xff]  ;;  %v19160_v38 = vld [vmem:[#allocation327_spill] sm:$0xff]  ;;  %v19165_v55 = vld [vmem:[#allocation314_spill] sm:$0xff] }
 0x757   : > { %v6242_v50 = vmul.u32 10, %v6241_v16  ;;  %v3003_v44 = vsel %vm18052_vm15, %v3001_v33, %v19147_v4  ;;  %vm3004_vm1 = vcmask 637952   ;;  %vm19149_vm13 = vcmask 490496   ;;  %9761 = vrot.lane.b32.xlu0 %v8135_v14, %s18754_s17  ;;  %v19193_v4 = vld [vmem:[#allocation84_spill] sm:$0xff] }
 0x758   : > { %v3019_v32 = vsel %vm19149_vm13, %v3018_v23, %v19148_v51  ;;  %v8164_v27 = vrot.slane %v8156_v20, %v11428_v24  ;;  %v15301_v46 = vsub.s32 %v15191_v8, %v6231_v15  ;;  %v8173_v0 = vcombine.high %v19140_v54, %v14383_v53  ;;  %v19153_v53 = vld [vmem:[#allocation312_spill] sm:$0xff] }
 0x759   : > { %9765 = vrot.lane.b32.xlu1 %v8153_v63, %s18934_s25  ;;  %v15305_v57 = vpop.permute.xlu1 %9541  ;;  %v8154_v39 = vcombine.high %v8144_v43, %v18440_v12  ;;  %v8151_v5 = vrot.slane %v8137_v22, %v11431_v25  ;;  %v3005_v34 = vsel %vm3004_vm1, %v3003_v44, %v19150_v3  ;;  %vm3006_vm13 = vcmask 719872   ;;  %s19158_s25 = smov 8   ;;  %v19172_v44 = vld [vmem:[#allocation330_spill] sm:$0xff] }
 0x75a   : > { %v8188_v40 = vcombine.low %v8164_v27, %v8180_v10  ;;  %v15308_v41 = vpop.permute.xlu0 %9537  ;;  %vm19152_vm4 = vcmask 572416   ;;  %v15316_v7 = vsub.s32 %v15203_v36, %v6242_v50  ;;  %vm18043_vm0 = vcmask 801792  }
 0x75b   : > { %v3020_v8 = vsel %vm19152_vm4, %v3019_v32, %v19151_v2  ;;  %vm19154_vm12 = vcmask 64512   ;;  %vm19157_vm10 = vcmask 80896   ;;  %v8157_v26 = vcombine.high %v19142_v62, %v19141_v42  ;;  %9769 = vrot.lane.b32.xlu0 %v8144_v43, %s19158_s25  ;;  %v19162_v62 = vld [vmem:[#allocation68_spill] sm:$0xff]  ;;  %v19169_v43 = vld [vmem:[#allocation317_spill] sm:$0xff] }
 0x75c   : > { %v5958_v19 = vsel %vm19154_vm12, %v19112_v61, %v19153_v53  ;;  %v5970_v54 = vsel %vm19157_vm10, %v19156_v49, %v19155_v9  ;;  %vm6404_vm4 = vcmp.ne.s32.totalorder %v15301_v46, 0  ;;  %vm6424_vm11 = vcmp.lt.s32.totalorder %v15301_v46, 0  ;;  %v19180_v49 = vld [vmem:[#allocation568_spill] sm:$0xff] }
 0x75d   : > { %9773 = vrot.lane.b32.xlu1 %v8154_v39, %s18936_s4  ;;  %v5959_v36 = vsel %vm2992_vm5, %v5958_v19, %v19159_v28  ;;  %vm19161_vm12 = vcmask 162816   ;;  %v15335_v21 = vrot.slane %v8173_v0, %v11428_v24  ;;  %v8189_v58 = vcombine.high %v8164_v27, %v8180_v10  ;;  %v15337_v47 = vpop.permute.xlu1 %9549  ;;  %v19166_v10 = vld [vmem:[#allocation326_spill] sm:$0xff]  ;;  %s19168_s4 = smov 28   ;;  %v19178_v19 = vld [vmem:[#allocation81_spill] sm:$0xff]  ;;  %v19182_v28 = vld [vmem:[#allocation316_spill] sm:$0xff] }
 0x75e   : > { %v5971_v61 = vsel %vm19161_vm12, %v5970_v54, %v19160_v38  ;;  %v8155_v14 = vcombine.high %v8151_v5, %v18440_v12  ;;  %v15340_v16 = vpop.permute.xlu0 %9545  ;;  %v8196_v42 = vrot.slane %v8188_v40, %v11431_v25  ;;  %v3007_v20 = vsel %vm3006_vm13, %v3005_v34, %v19162_v62  ;;  %v19174_v27 = vld [vmem:[#allocation546_spill] sm:$0xff]  ;;  %v19181_v54 = vld [vmem:[#allocation524_spill] sm:$0xff] }
 0x75f   : > { %vm19164_vm10 = vcmask 654336   ;;  %vm6405_vm12 = vcmp.ne.s32.totalorder %v15316_v7, 0  ;;  %vm6425_vm8 = vcmp.lt.s32.totalorder %v15316_v7, 0  ;;  %v5960_v23 = vsel %vm18053_vm7, %v5959_v36, %v19165_v55  ;;  %9777 = vrot.lane.b32.xlu0 %v8151_v5, %s19168_s4 }
 0x760   : > { %v3021_v33 = vsel %vm19164_vm10, %v3020_v8, %v19163_v48  ;;  %v6464_v15 = vadd.s32 10, %v15301_v46  ;;  %vm19167_vm14 = vcmask 244736   ;;  %v8171_v63 = vrot.slane %v8157_v26, %v11428_v24  ;;  %vm15363_vm10 = vmand %vm6424_vm11, %vm6404_vm4  ;;  %v19177_v8 = vld [vmem:[#allocation69_spill] sm:$0xff] }
 0x761   : > { %v5972_v22 = vsel %vm19167_vm14, %v5971_v61, %v19166_v10  ;;  %9781 = vrot.lane.b32.xlu1 %v8155_v14, %s18938_s16  ;;  %v5961_v50 = vsel %vm2996_vm9, %v5960_v23, %v19169_v43  ;;  %vm19173_vm6 = vcmask 326656   ;;  %v6465_v32 = vadd.s32 10, %v15316_v7  ;;  %vm15372_vm14 = vmand %vm6425_vm8, %vm6405_vm12  ;;  %v15377_v5 = vpop.permute.xlu1 %9557  ;;  %v19183_v61 = vld [vmem:[#allocation329_spill] sm:$0xff]  ;;  %s19185_s16 = smov 48   ;;  %v19186_v14 = vld [vmem:[#allocation319_spill] sm:$0xff] }
 0x762   : > { %v5973_v51 = vsel %vm19173_vm6, %v5972_v22, %v19172_v44  ;;  %v8240_v0 = vcombine.low %v19174_v27, %v14408_v11  ;;  %v8204_v39 = vcombine.low %v8171_v63, %v15335_v21  ;;  %v8220_v3 = vcombine.high %v8196_v42, %v18440_v12  ;;  %v15380_v34 = vpop.permute.xlu0 %9553  ;;  %v19190_v43 = vld [vmem:[#allocation82_spill] sm:$0xff] }
 0x763   : > { %v8203_v2 = vrot.slane %v8189_v58, %v11431_v25  ;;  %v15385_v53 = vsel %vm18043_vm0, %v3007_v20, %v19177_v8  ;;  %vm19179_vm6 = vcmask 736256   ;;  %v8224_v26 = vcombine.low %v19181_v54, %v19180_v49  ;;  %9785 = vrot.lane.b32.xlu0 %v8196_v42, %s19185_s16  ;;  %v19187_v20 = vld [vmem:[#allocation332_spill] sm:$0xff]  ;;  %v19199_v8 = vld [vmem:[#allocation334_spill] sm:$0xff] }
 0x764   : > { %v3022_v9 = vsel %vm19179_vm6, %v3021_v33, %v19178_v19  ;;  %v5962_v36 = vsel %vm2998_vm3, %v5961_v50, %v19182_v28  ;;  %v6484_v38 = vsel %vm15363_vm10, %v6464_v15, %v15301_v46  ;;  %vm19184_vm11 = vcmask 408576   ;;  %v19192_v50 = vld [vmem:[#allocation85_spill] sm:$0xff] }
 0x765   : > { %v5974_v58 = vsel %vm19184_vm11, %v5973_v51, %v19183_v61  ;;  %9789 = vrot.lane.b32.xlu1 %v8220_v3, %s18939_s5  ;;  %v5963_v62 = vsel %vm3000_vm2, %v5962_v36, %v19186_v14  ;;  %vm19188_vm8 = vcmask 490496   ;;  %v6485_v33 = vsel %vm15372_vm14, %v6465_v32, %v15316_v7  ;;  %v9566_v42 = vpop.permute.xlu1 %9565  ;;  %v19196_v32 = vld [vmem:[#allocation331_spill] sm:$0xff] }
 0x766   : > { %v5975_v48 = vsel %vm19188_vm8, %v5974_v58, %v19187_v20  ;;  %v15408_v55 = vrot.slane %v8240_v0, %v11428_v24  ;;  %v8205_v46 = vcombine.high %v8171_v63, %v15335_v21  ;;  %vm19189_vm4 = vcmask 64512   ;;  %v15415_v10 = vpop.permute.xlu0 %9561  ;;  %v19202_v58 = vld [vmem:[#allocation86_spill] sm:$0xff] }
 0x767   : > { %v10371_v23 = vsel %vm19189_vm4, %v15251_v29, %v15248_v60  ;;  %v8221_v15 = vcombine.high %v8203_v2, %v18440_v12  ;;  %v8212_v22 = vrot.slane %v8204_v39, %v11431_v25  ;;  %vm18042_vm12 = vcmask 883712   ;;  %v19195_v29 = vld [vmem:[#allocation318_spill] sm:$0xff]  ;;  %9793 = vrot.lane.b32.xlu0 %v8203_v2, %s18571_s18  ;;  %v19198_v39 = vld [vmem:[#allocation321_spill] sm:$0xff] }
 0x768   : > { %vm19191_vm10 = vcmask 818176   ;;  %vm19194_vm14 = vcmask 15360   ;;  %v8232_v63 = vrot.slane %v8224_v26, %v11428_v24  ;;  %v10372_v60 = vsel %vm2992_vm5, %v10371_v23, %v15273_v59 }
 0x769   : > { %v15420_v7 = vsel %vm19191_vm10, %v3022_v9, %v19190_v43  ;;  %v3026_v21 = vsel %vm19194_vm14, %v19193_v4, %v19192_v50  ;;  %vm18041_vm6 = vcmask 965632   ;;  %v5964_v44 = vsel %vm18052_vm15, %v5963_v62, %v19195_v29  ;;  %9797 = vrot.lane.b32.xlu1 %v8221_v15, %s18670_s30  ;;  %v9574_v36 = vpop.permute.xlu1 %9573  ;;  %v19205_v62 = vld [vmem:[#allocation320_spill] sm:$0xff] }
 0x76a   : > { %v6504_v51 = vcvt.s32.f32 %v6484_v38  ;;  %vm19197_vm11 = vcmask 572416   ;;  %v6505_v40 = vcvt.s32.f32 %v6485_v33  ;;  %v5965_v3 = vsel %vm3004_vm1, %v5964_v44, %v19198_v39  ;;  %v9570_v38 = vpop.permute.xlu0 %9569  ;;  %v19212_v44 = vld [vmem:[#allocation87_spill] sm:$0xff] }
 0x76b   : > { %v5976_v0 = vsel %vm19197_vm11, %v5975_v48, %v19196_v32  ;;  %vm19200_vm8 = vcmask 654336   ;;  %v8241_v59 = vcombine.high %v19174_v27, %v14408_v11  ;;  %v8256_v9 = vcombine.low %v8232_v63, %v15408_v55  ;;  %v19206_v48 = vld [vmem:[#allocation333_spill] sm:$0xff]  ;;  %9801 = vrot.lane.b32.xlu0 %v8212_v22, %s18769_s23  ;;  %v19216_v39 = vld [vmem:[#allocation335_spill] sm:$0xff] }
 0x76c   : > { %v5977_v19 = vsel %vm19200_vm8, %v5976_v0, %v19199_v8  ;;  %v10373_v26 = vsel %vm18053_vm7, %v10372_v60, %v15270_v56  ;;  %vm19201_vm4 = vcmask 80896   ;;  %v8222_v2 = vcombine.high %v8212_v22, %v18440_v12 }
 0x76d   : > { %v10383_v28 = vsel %vm19201_vm4, %v14587_v17, %v9566_v42  ;;  %v8219_v61 = vrot.slane %v8205_v46, %v11431_v25  ;;  %vm19203_vm10 = vcmask 97280   ;;  %v8225_v11 = vcombine.high %v19181_v54, %v19180_v49  ;;  %v19208_v46 = vld [vmem:[#allocation323_spill] sm:$0xff]  ;;  %v19209_v54 = vld [vmem:[#allocation336_spill] sm:$0xff]  ;;  %v9582_v50 = vpop.permute.xlu1 %9581 }
 0x76e   : > { %v3027_v14 = vsel %vm19203_vm10, %v3026_v21, %v19202_v58  ;;  %v10374_v27 = vsel %vm2996_vm9, %v10373_v26, %v15290_v31  ;;  %vm19204_vm14 = vcmask 162816   ;;  %v5966_v17 = vsel %vm3006_vm13, %v5965_v3, %v19205_v62  ;;  %9805 = vrot.lane.b32.xlu1 %v8222_v2, %s18674_s3  ;;  %v9578_v22 = vpop.permute.xlu0 %9577  ;;  %v19221_v26 = vld [vmem:[#allocation545_spill] sm:$0xff]  ;;  %v19224_v62 = vld [vmem:[#allocation567_spill] sm:$0xff] }
 0x76f   : > { %v10384_v56 = vsel %vm19204_vm14, %v10383_v28, %v9570_v38  ;;  %v6524_v20 = vmul.f32 0.1, %v6504_v51  ;;  %vm19207_vm11 = vcmask 736256   ;;  %v6525_v23 = vmul.f32 0.1, %v6505_v40  ;;  %9809 = vrot.lane.b32.xlu0 %v8219_v61, %s18578_s12 }
 0x770   : > { %v5978_v33 = vsel %vm19207_vm11, %v5977_v19, %v19206_v48  ;;  %v5967_v49 = vsel %vm18043_vm0, %v5966_v17, %v19208_v46  ;;  %vm19210_vm8 = vcmask 818176   ;;  %v15465_v42 = vrot.slane %v8241_v59, %v11428_v24  ;;  %v19218_v19 = vld [vmem:[#allocation325_spill] sm:$0xff]  ;;  %v19225_v17 = vld [vmem:[#allocation523_spill] sm:$0xff]  ;;  %v19229_v46 = vld [vmem:[#allocation88_spill] sm:$0xff] }
 0x771   : > { %v5979_v31 = vsel %vm19210_vm8, %v5978_v33, %v19209_v54  ;;  %v8257_v15 = vcombine.high %v8232_v63, %v15408_v55  ;;  %v10375_v43 = vsel %vm2998_vm3, %v10374_v27, %v15287_v52  ;;  %v8223_v21 = vcombine.high %v8219_v61, %v18440_v12  ;;  %v19215_v52 = vld [vmem:[#allocation322_spill] sm:$0xff]  ;;  %v9590_v38 = vpop.permute.xlu1 %9589  ;;  %v19227_v33 = vld [vmem:[#allocation83_spill] sm:$0xff] }
 0x772   : > { %vm19211_vm4 = vcmask 244736   ;;  %v15473_v29 = vrot.slane %v8256_v9, %v11431_v25  ;;  %vm19213_vm10 = vcmask 179200   ;;  %v8239_v32 = vrot.slane %v8225_v11, %v11428_v24  ;;  %v19219_v9 = vld [vmem:[#allocation338_spill] sm:$0xff]  ;;  %v9586_v61 = vpop.permute.xlu0 %9585 }
 0x773   : > { %v10385_v60 = vsel %vm19211_vm4, %v10384_v56, %v9574_v36  ;;  %v3028_v51 = vsel %vm19213_vm10, %v3027_v14, %v19212_v44  ;;  %v10376_v55 = vsel %vm3000_vm2, %v10375_v43, %v15308_v41  ;;  %vm19214_vm14 = vcmask 326656   ;;  %9813 = vrot.lane.b32.xlu1 %v8223_v21, %s18482_s0  ;;  %v19223_v27 = vld [vmem:[#allocation70_spill] sm:$0xff] }
 0x774   : > { %v10386_v63 = vsel %vm19214_vm14, %v10385_v60, %v9578_v22  ;;  %v5968_v0 = vsel %vm18042_vm12, %v5967_v49, %v19215_v52  ;;  %v6544_v40 = vadd.f32 0.05, %v6524_v20  ;;  %vm19217_vm11 = vcmask 900096  }
 0x775   : > { %v5980_v3 = vsel %vm19217_vm11, %v5979_v31, %v19216_v39  ;;  %v6545_v8 = vadd.f32 0.05, %v6525_v23  ;;  %v5969_v59 = vsel %vm18041_vm6, %v5968_v0, %v19218_v19  ;;  %vm19220_vm8 = vcmask 982016   ;;  %vm19228_vm14 = vmmov %vm19217_vm11  ;;  %v19232_v31 = vld [vmem:[#allocation97_spill] sm:$0xff]  ;;  %v9598_v21 = vpop.permute.xlu1 %9597 }
 0x776   : > { %v5981_v41 = vsel %vm19220_vm8, %v5980_v3, %v19219_v9  ;;  %v8308_v28 = vcombine.low %v19221_v26, %v14396_v30  ;;  %v8272_v36 = vcombine.low %v8239_v32, %v15465_v42  ;;  %v10377_v2 = vsel %vm18052_vm15, %v10376_v55, %v15305_v57  ;;  %v9594_v44 = vpop.permute.xlu0 %9593  ;;  %v19235_v55 = vld [vmem:[#allocation71_spill] sm:$0xff] }
 0x777   : > { %v8271_v58 = vrot.slane %v8257_v15, %v11431_v25  ;;  %vm19222_vm4 = vcmask 408576   ;;  %v8288_v11 = vcombine.high %v15473_v29, %v18440_v12  ;;  %v3011_v56 = vsel %vm18042_vm12, %v15385_v53, %v19223_v27  ;;  %v19231_v53 = vld [vmem:[#allocation98_spill] sm:$0xff] }
 0x778   : > { %v10387_v14 = vsel %vm19222_vm4, %v10386_v63, %v9582_v50  ;;  %v8292_v20 = vcombine.low %v19225_v17, %v19224_v62  ;;  %v10378_v48 = vsel %vm3004_vm1, %v10377_v2, %v15340_v16  ;;  %vm19226_vm10 = vcmask 490496  }
 0x779   : > { %v10388_v57 = vsel %vm19226_vm10, %v10387_v14, %v9586_v61  ;;  %v3024_v23 = vsel %vm19228_vm14, %v15420_v7, %v19227_v33  ;;  %vm19230_vm11 = vcmask 261120   ;;  %v6564_v54 = vmul.f32 %v6544_v40, %v5969_v59  ;;  %9821 = vrot.lane.b32.xlu1 %v8271_v58, %s18485_s7  ;;  %9817 = vrot.lane.b32.xlu0 %v8288_v11, %s18581_s14  ;;  %v19243_v14 = vld [vmem:[#allocation90_spill] sm:$0xff] }
 0x77a   : > { %v3029_v49 = vsel %vm19230_vm11, %v3028_v51, %v19229_v46  ;;  %vm19233_vm8 = vcmask 31744   ;;  %v6565_v43 = vmul.f32 %v6545_v8, %v5981_v41  ;;  %v8316_v16 = vrot.slane %v8308_v28, %v11428_v24  ;;  %v19240_v8 = vld [vmem:[#allocation99_spill] sm:$0xff]  ;;  %v9606_v28 = vpop.permute.xlu1 %9605 }
 0x77b   : > { %v3039_v15 = vsel %vm19233_vm8, %v19232_v31, %v19231_v53  ;;  %v8273_v50 = vcombine.high %v8239_v32, %v15465_v42  ;;  %v10379_v7 = vsel %vm3006_vm13, %v10378_v48, %v15337_v47  ;;  %v8280_v60 = vrot.slane %v8272_v36, %v11431_v25  ;;  %v19238_v32 = vld [vmem:[#allocation89_spill] sm:$0xff]  ;;  %v19246_v48 = vld [vmem:[#allocation100_spill] sm:$0xff] }
 0x77c   : > { %vm19234_vm4 = vcmask 572416   ;;  %v8289_v51 = vcombine.high %v8271_v58, %v18440_v12  ;;  %v3013_v63 = vsel %vm18041_vm6, %v3011_v56, %v19235_v55  ;;  %v8300_v52 = vrot.slane %v8292_v20, %v11428_v24 }
 0x77d   : > { %v10389_v22 = vsel %vm19234_vm4, %v10388_v57, %v9590_v38  ;;  %v10380_v0 = vsel %vm18043_vm0, %v10379_v7, %v15380_v34  ;;  %vm19236_vm10 = vcmask 654336   ;;  %vm19237_vm14 = vcmask 982016   ;;  %9829 = vrot.lane.b32.xlu1 %v8280_v60, %s18488_s1  ;;  %v9602_v38 = vpop.permute.xlu0 %9601 }
 0x77e   : > { %v10390_v42 = vsel %vm19236_vm10, %v10389_v22, %v9594_v44  ;;  %v3025_v47 = vsel %vm19237_vm14, %v3024_v23, %v19193_v4  ;;  %vm19239_vm11 = vcmask 343040   ;;  %v6584_v39 = vadd.f32 %v6564_v54, %v3013_v63  ;;  %9825 = vrot.lane.b32.xlu0 %v8289_v51, %s18445_s20  ;;  %v19254_v22 = vld [vmem:[#allocation548_spill] sm:$0xff] }
 0x77f   : > { %v3030_v40 = vsel %vm19239_vm11, %v3029_v49, %v19238_v32  ;;  %v15536_v3 = vadd.s32 768, %v14519_v6  ;;  %vm19241_vm8 = vcmask 113664   ;;  %v6585_v34 = vadd.f32 %v6565_v43, %v3025_v47  ;;  %v15571_v49 = vpop.permute.xlu1 %9613 }
 0x780   : > { %v3040_v19 = vsel %vm19241_vm8, %v3039_v15, %v19240_v8  ;;  %v8309_v59 = vcombine.high %v19221_v26, %v14396_v30  ;;  %v8324_v41 = vcombine.low %v8300_v52, %v8316_v16  ;;  %v10381_v4 = vsel %vm18042_vm12, %v10380_v0, %v15377_v5 }
 0x781   : > { %v8287_v36 = vrot.slane %v8273_v50, %v11431_v25  ;;  %vm19242_vm4 = vcmask 736256   ;;  %v8290_v58 = vcombine.high %v8280_v60, %v18440_v12  ;;  %vm19244_vm10 = vcmask 424960  }
 0x782   : > { %v10391_v2 = vsel %vm19242_vm4, %v10390_v42, %v9598_v21  ;;  %v3031_v61 = vsel %vm19244_vm10, %v3030_v40, %v19243_v14  ;;  %v15552_v11 = vadd.s32 896, %v14519_v6  ;;  %v10382_v30 = vsel %vm18041_vm6, %v10381_v4, %v15415_v10  ;;  %v19252_v21 = vld [vmem:[#allocation101_spill] sm:$0xff]  ;;  %v19255_v40 = vld [vmem:[#allocation570_spill] sm:$0xff] }
 0x783   : > { %vm19245_vm14 = vcmask 818176   ;;  %v15558_v5 = vmul.u32.u64.low 3435973837, %v15536_v3  ;;  %v15559_v27 = vmul.u32.u64.high 3435973837, %v15536_v3, %v15558_v5  ;;  %v8293_v56 = vcombine.high %v19225_v17, %v19224_v62  ;;  %9837 = vrot.lane.b32.xlu1 %v8287_v36, %s18296_s6  ;;  %9833 = vrot.lane.b32.xlu0 %v8290_v58, %s18446_s8  ;;  %v15574_v17 = vpop.permute.xlu0 %9609  ;;  %v15594_v0 = vpop.permute.xlu1 %9621 }
 0x784   : > { %v10392_v26 = vsel %vm19245_vm14, %v10391_v2, %v9602_v38  ;;  %v10591_v20 = vrot.slane %v6584_v39, %v19017_v18  ;;  %vm19247_vm11 = vcmask 195584   ;;  %v8323_v10 = vrot.slane %v8309_v59, %v11428_v24  ;;  %v19256_v39 = vld [vmem:[#allocation526_spill] sm:$0xff] }
 0x785   : > { %v3041_v57 = vsel %vm19247_vm11, %v3040_v19, %v19246_v48  ;;  %v8325_v33 = vcombine.high %v8300_v52, %v8316_v16  ;;  %v10595_v23 = vrot.slane %v6585_v34, %v19017_v18  ;;  %vm19248_vm4 = vcmask 900096   ;;  %v19250_v16 = vld [vmem:[#allocation91_spill] sm:$0xff]  ;;  %v19258_v19 = vld [vmem:[#allocation92_spill] sm:$0xff]  ;;  %v19260_v59 = vld [vmem:[#allocation102_spill] sm:$0xff] }
 0x786   : > { %vm10656_vm8 = vcmp.gt.f32.partialorder %v10382_v30, %v10591_v20  ;;  %v10393_v46 = vsel %vm19248_vm4, %v10392_v26, %v9606_v28  ;;  %v8332_v62 = vrot.slane %v8324_v41, %v11431_v25  ;;  %v8291_v54 = vcombine.high %v8287_v36, %v18440_v12  ;;  %v19264_v26 = vld [vmem:[#allocation93_spill] sm:$0xff] }
 0x787   : > { %v15578_v53 = vmul.u32.u64.low 3435973837, %v15552_v11  ;;  %v15579_v15 = vmul.u32.u64.high 3435973837, %v15552_v11, %v15578_v53  ;;  %vm19249_vm10 = vcmask 982016   ;;  %vm19251_vm14 = vcmask 506880   ;;  %v15597_v47 = vpop.permute.xlu0 %9617  ;;  %v15610_v36 = vpop.permute.xlu1 %9629 }
 0x788   : > { %v10394_v43 = vsel %vm19249_vm10, %v10393_v46, %v15574_v17  ;;  %v3032_v50 = vsel %vm19251_vm14, %v3031_v61, %v19250_v16  ;;  %v8307_v7 = vrot.slane %v8293_v56, %v11428_v24  ;;  %9845 = vrot.lane.b32.xlu1 %v8332_v62, %s18300_s21  ;;  %9841 = vrot.lane.b32.xlu0 %v8291_v54, %s18447_s10  ;;  %vm19253_vm4 = vcmask 277504   ;;  %s19257_s21 = smov 90   ;;  %v19266_v56 = vld [vmem:[#allocation103_spill] sm:$0xff]  ;;  %v19268_v46 = vld [vmem:[#allocation337_spill] sm:$0xff]  ;;  %v19274_v16 = vld [vmem:[#allocation94_spill] sm:$0xff] }
 0x789   : > { %vm10657_vm11 = vcmp.gt.f32.partialorder %v10394_v43, %v10595_v23  ;;  %v3042_v60 = vsel %vm19253_vm4, %v3041_v57, %v19252_v21  ;;  %v8376_v44 = vcombine.low %v19254_v22, %v14423_v35  ;;  %v10876_v51 = vsel %vm10656_vm8, 1.0, %v18440_v12 }
 0x78a   : > { %v10877_v55 = vsel %vm10657_vm11, 1.0, %v18440_v12  ;;  %v8340_v63 = vcombine.low %v8307_v7, %v8323_v10  ;;  %v8339_v42 = vrot.slane %v8325_v33, %v11431_v25  ;;  %v8356_v32 = vcombine.high %v8332_v62, %v18440_v12 }
 0x78b   : > { %v10734_v52 = vcombine.low %v10876_v51, %v10877_v55  ;;  %v8360_v8 = vcombine.low %v19256_v39, %v19255_v40  ;;  %vm19259_vm8 = vcmask 588800   ;;  %vm19261_vm10 = vcmask 359424   ;;  %v15613_v38 = vpop.permute.xlu0 %9625 }
 0x78c   : > { %9853 = vrot.lane.b32.xlu1 %v8339_v42, %s18303_s11  ;;  %9849 = vrot.lane.b32.xlu0 %v8356_v32, %s19257_s21  ;;  %v3033_v34 = vsel %vm19259_vm8, %v3032_v50, %v19258_v19  ;;  %v3043_v41 = vsel %vm19261_vm10, %v3042_v60, %v19260_v59  ;;  %v8341_v4 = vcombine.high %v8307_v7, %v8323_v10  ;;  %v6252_v14 = vshrl.u32 %v15559_v27, 3  ;;  %s19262_s11 = smov 120   ;;  %s19263_s21 = smov 110   ;;  %v15627_v10 = vpop.permute.xlu1 %9637  ;;  %v19276_v7 = vld [vmem:[#allocation104_spill] sm:$0xff]  ;;  %v19281_v32 = vld [vmem:[#allocation339_spill] sm:$0xff]  ;;  %v19283_v19 = vld [vmem:[#allocation342_spill] sm:$0xff] }
 0x78d   : > { %10754 = vst [vmem:[%s14929_s24 + $0x10] sm:$0xff] %v10734_v52  ;;  %v8384_v28 = vrot.slane %v8376_v44, %v11428_v24  ;;  %v8348_v2 = vrot.slane %v8340_v63, %v11431_v25  ;;  %v8357_v58 = vcombine.high %v8339_v42, %v18440_v12  ;;  %v6263_v61 = vshrl.u32 %v15579_v15, 3  ;;  %v19270_v15 = vld [vmem:[#allocation340_spill] sm:$0xff]  ;;  %v19285_v59 = vld [vmem:[#allocation351_spill] sm:$0xff] }
 0x78e   : > { %v8368_v30 = vrot.slane %v8360_v8, %v11428_v24  ;;  %vm19265_vm14 = vcmask 670720   ;;  %vm19267_vm11 = vcmask 441344   ;;  %v8377_v48 = vcombine.high %v19254_v22, %v14423_v35  ;;  %v19278_v60 = vld [vmem:[#allocation352_spill] sm:$0xff] }
 0x78f   : > { %v3034_v5 = vsel %vm19265_vm14, %v3033_v34, %v19264_v26  ;;  %v3044_v20 = vsel %vm19267_vm11, %v3043_v41, %v19266_v56  ;;  %v8355_v27 = vrot.slane %v8341_v4, %v11431_v25  ;;  %v15630_v33 = vpop.permute.xlu0 %9633  ;;  %v8358_v23 = vcombine.high %v8348_v2, %v18440_v12 }
 0x790   : > { %9861 = vrot.lane.b32.xlu1 %v8348_v2, %s19262_s11  ;;  %9857 = vrot.lane.b32.xlu0 %v8357_v58, %s19263_s21  ;;  %v8392_v57 = vcombine.low %v8368_v30, %v8384_v28  ;;  %vm19269_vm4 = vcmask 15360   ;;  %v6253_v54 = vmul.u32 10, %v6252_v14  ;;  %v6264_v53 = vmul.u32 10, %v6263_v61  ;;  %s19272_s11 = smov 12   ;;  %s19273_s21 = smov 2   ;;  %v15650_v55 = vpop.permute.xlu1 %9645  ;;  %v19291_v58 = vld [vmem:[#allocation105_spill] sm:$0xff] }
 0x791   : > { %v5982_v62 = vsel %vm19269_vm4, %v19219_v9, %v19268_v46  ;;  %vm19271_vm8 = vcmask 97280   ;;  %v8361_v35 = vcombine.high %v19256_v39, %v19255_v40  ;;  %vm19275_vm10 = vcmask 752640   ;;  %v19279_v9 = vld [vmem:[#allocation349_spill] sm:$0xff]  ;;  %v19295_v61 = vld [vmem:[#allocation547_spill] sm:$0xff] }
 0x792   : > { %v5983_v43 = vsel %vm19271_vm8, %v5982_v62, %v19270_v15  ;;  %v3035_v50 = vsel %vm19275_vm10, %v3034_v5, %v19274_v16  ;;  %vm19277_vm14 = vcmask 523264   ;;  %vm19280_vm11 = vcmask 31744   ;;  %v19300_v62 = vld [vmem:[#allocation353_spill] sm:$0xff]  ;;  %v19306_v16 = vld [vmem:[#allocation356_spill] sm:$0xff] }
 0x793   : > { %v3045_v21 = vsel %vm19277_vm14, %v3044_v20, %v19276_v7  ;;  %v5995_v22 = vsel %vm19280_vm11, %v19279_v9, %v19278_v60  ;;  %v8391_v44 = vrot.slane %v8377_v48, %v11428_v24  ;;  %v8393_v51 = vcombine.high %v8368_v30, %v8384_v28  ;;  %v15653_v52 = vpop.permute.xlu0 %9641  ;;  %v19289_v28 = vld [vmem:[#allocation95_spill] sm:$0xff]  ;;  %v19303_v15 = vld [vmem:[#allocation525_spill] sm:$0xff] }
 0x794   : > { %9869 = vrot.lane.b32.xlu1 %v8355_v27, %s19272_s11  ;;  %9865 = vrot.lane.b32.xlu0 %v8358_v23, %s19273_s21  ;;  %v8400_v63 = vrot.slane %v8392_v57, %v11431_v25  ;;  %v8359_v42 = vcombine.high %v8355_v27, %v18440_v12  ;;  %vm19282_vm4 = vcmask 179200   ;;  %v6254_v39 = vsub.s32 %v15536_v3, %v6253_v54  ;;  %s19287_s11 = smov 32   ;;  %s19288_s21 = smov 22   ;;  %v15677_v5 = vpop.permute.xlu1 %9653  ;;  %v19296_v57 = vld [vmem:[#allocation341_spill] sm:$0xff]  ;;  %v19298_v23 = vld [vmem:[#allocation344_spill] sm:$0xff] }
 0x795   : > { %v5984_v40 = vsel %vm19282_vm4, %v5983_v43, %v19281_v32  ;;  %v15660_v8 = vsub.s32 %v15552_v11, %v6264_v53  ;;  %vm19284_vm8 = vcmask 261120   ;;  %vm19286_vm10 = vcmask 113664   ;;  %v19293_v11 = vld [vmem:[#allocation354_spill] sm:$0xff]  ;;  %v19302_v53 = vld [vmem:[#allocation569_spill] sm:$0xff] }
 0x796   : > { %v5985_v34 = vsel %vm19284_vm8, %v5984_v40, %v19283_v19  ;;  %v5996_v41 = vsel %vm19286_vm10, %v5995_v22, %v19285_v59  ;;  %v8375_v4 = vrot.slane %v8361_v35, %v11428_v24  ;;  %vm19290_vm14 = vcmask 834560   ;;  %v19310_v40 = vld [vmem:[#allocation96_spill] sm:$0xff] }
 0x797   : > { %v3036_v2 = vsel %vm19290_vm14, %v3035_v50, %v19289_v28  ;;  %vm19292_vm11 = vcmask 605184   ;;  %vm19294_vm4 = vcmask 195584   ;;  %v8444_v30 = vcombine.low %v19295_v61, %v14410_v13  ;;  %v15680_v20 = vpop.permute.xlu0 %9649 }
 0x798   : > { %9877 = vrot.lane.b32.xlu1 %v8400_v63, %s19287_s11  ;;  %9873 = vrot.lane.b32.xlu0 %v8359_v42, %s19288_s21  ;;  %v3046_v3 = vsel %vm19292_vm11, %v3045_v21, %v19291_v58  ;;  %v5997_v14 = vsel %vm19294_vm4, %v5996_v41, %v19293_v11  ;;  %v8408_v26 = vcombine.low %v8375_v4, %v8391_v44  ;;  %vm19297_vm8 = vcmask 343040   ;;  %s19304_s11 = smov 52   ;;  %s19305_s21 = smov 42   ;;  %v19314_v41 = vld [vmem:[#allocation343_spill] sm:$0xff] }
 0x799   : > { %v8407_v56 = vrot.slane %v8393_v51, %v11431_v25  ;;  %v8424_v48 = vcombine.high %v8400_v63, %v18440_v12  ;;  %v5986_v27 = vsel %vm19297_vm8, %v5985_v34, %v19296_v57  ;;  %vm6406_vm10 = vcmp.ne.s32.totalorder %v6254_v39, 0  ;;  %v15705_v51 = vpop.permute.xlu1 %9661  ;;  %v19312_v34 = vld [vmem:[#allocation106_spill] sm:$0xff] }
 0x79a   : > { %vm6426_vm14 = vcmp.lt.s32.totalorder %v6254_v39, 0  ;;  %vm6407_vm11 = vcmp.ne.s32.totalorder %v15660_v8, 0  ;;  %vm19299_vm4 = vcmask 424960   ;;  %vm19301_vm6 = vcmask 277504  }
 0x79b   : > { %v5987_v46 = vsel %vm19299_vm4, %v5986_v27, %v19298_v23  ;;  %v5998_v54 = vsel %vm19301_vm6, %v5997_v14, %v19300_v62  ;;  %vm6427_vm12 = vcmp.lt.s32.totalorder %v15660_v8, 0  ;;  %v8428_v43 = vcombine.low %v19303_v15, %v19302_v53  ;;  %vm15698_vm0 = vmand %vm6426_vm14, %vm6406_vm10  ;;  %v15708_v42 = vpop.permute.xlu0 %9657  ;;  %v19324_v14 = vld [vmem:[#allocation346_spill] sm:$0xff]  ;;  %v19328_v62 = vld [vmem:[#allocation107_spill] sm:$0xff] }
 0x79c   : > { %9885 = vrot.lane.b32.xlu1 %v8407_v56, %s19304_s11  ;;  %9881 = vrot.lane.b32.xlu0 %v8424_v48, %s19305_s21  ;;  %v6466_v35 = vadd.s32 10, %v6254_v39  ;;  %vm19307_vm8 = vcmask 359424   ;;  %v6467_v7 = vadd.s32 10, %v15660_v8  ;;  %v15703_v60 = vrot.slane %v8444_v30, %v11428_v24  ;;  %vm15723_vm4 = vmand %vm6427_vm12, %vm6407_vm11  ;;  %s19322_s11 = smov 72   ;;  %s19323_s21 = smov 62  }
 0x79d   : > { %v5999_v50 = vsel %vm19307_vm8, %v5998_v54, %v19306_v16  ;;  %v8409_v22 = vcombine.high %v8375_v4, %v8391_v44  ;;  %v8416_v63 = vrot.slane %v8408_v26, %v11431_v25  ;;  %v8425_v32 = vcombine.high %v8407_v56, %v18440_v12  ;;  %v19326_v56 = vld [vmem:[#allocation358_spill] sm:$0xff]  ;;  %v9670_v57 = vpop.permute.xlu1 %9669  ;;  %v19334_v16 = vld [vmem:[#allocation357_spill] sm:$0xff] }
 0x79e   : > { %vm19311_vm6 = vcmask 916480   ;;  %vm19313_vm10 = vcmask 687104   ;;  %vm19315_vm14 = vcmask 506880   ;;  %vm19318_vm8 = vcmask 15360   ;;  %v19344_v44 = vld [vmem:[#allocation110_spill] sm:$0xff] }
 0x79f   : > { %v15713_v19 = vsel %vm19311_vm6, %v3036_v2, %v19310_v40  ;;  %v3047_v59 = vsel %vm19313_vm10, %v3046_v3, %v19312_v34  ;;  %v5988_v28 = vsel %vm19315_vm14, %v5987_v46, %v19314_v41  ;;  %v10395_v4 = vsel %vm19318_vm8, %v15574_v17, %v15571_v49  ;;  %v19319_v2 = vld [vmem:[#allocation355_spill] sm:$0xff]  ;;  %v9666_v23 = vpop.permute.xlu0 %9665 }
 0x7a0   : > { %vm19320_vm6 = vcmask 441344   ;;  %v8436_v3 = vrot.slane %v8428_v43, %v11428_v24  ;;  %vm19321_vm10 = vcmask 97280   ;;  %9893 = vrot.lane.b32.xlu1 %v8416_v63, %s19322_s11  ;;  %9889 = vrot.lane.b32.xlu0 %v8425_v32, %s19323_s21  ;;  %vm19325_vm12 = vcmask 588800   ;;  %s19337_s11 = smov 82  }
 0x7a1   : > { %v6000_v58 = vsel %vm19320_vm6, %v5999_v50, %v19319_v2  ;;  %v10396_v11 = vsel %vm19321_vm10, %v10395_v4, %v15597_v47  ;;  %v5989_v30 = vsel %vm19325_vm12, %v5988_v28, %v19324_v14  ;;  %v6486_v26 = vsel %vm15698_vm0, %v6466_v35, %v6254_v39  ;;  %v9678_v40 = vpop.permute.xlu1 %9677  ;;  %v19343_v28 = vld [vmem:[#allocation111_spill] sm:$0xff] }
 0x7a2   : > { %vm19327_vm11 = vcmask 523264   ;;  %v8445_v17 = vcombine.high %v19295_v61, %v14410_v13  ;;  %v6487_v47 = vsel %vm15723_vm4, %v6467_v7, %v15660_v8  ;;  %v8460_v48 = vcombine.low %v8436_v3, %v15703_v60  ;;  %v19332_v61 = vld [vmem:[#allocation345_spill] sm:$0xff] }
 0x7a3   : > { %v6001_v49 = vsel %vm19327_vm11, %v6000_v58, %v19326_v56  ;;  %v8423_v27 = vrot.slane %v8409_v22, %v11431_v25  ;;  %v8426_v46 = vcombine.high %v8416_v63, %v18440_v12  ;;  %vm19329_vm0 = vcmask 769024  }
 0x7a4   : > { %v3048_v39 = vsel %vm19329_vm0, %v3047_v59, %v19328_v62  ;;  %v8429_v54 = vcombine.high %v19303_v15, %v19302_v53  ;;  %vm19330_vm14 = vcmask 179200   ;;  %vm19331_vm8 = vcmask 31744   ;;  %v19338_v53 = vld [vmem:[#allocation348_spill] sm:$0xff]  ;;  %v9674_v59 = vpop.permute.xlu0 %9673 }
 0x7a5   : > { %v10397_v13 = vsel %vm19330_vm14, %v10396_v11, %v15594_v0  ;;  %v10408_v8 = vsel %vm19331_vm8, %v15705_v51, %v9666_v23  ;;  %vm19333_vm4 = vcmask 670720   ;;  %v6506_v35 = vcvt.s32.f32 %v6486_v26  ;;  %9901 = vrot.lane.b32.xlu1 %v8423_v27, %s19028_s28  ;;  %9897 = vrot.lane.b32.xlu0 %v8426_v46, %s19337_s11  ;;  %v19340_v15 = vld [vmem:[#allocation360_spill] sm:$0xff]  ;;  %s19353_s28 = smov 112   ;;  %s19354_s11 = smov 102   ;;  %v9686_v46 = vpop.permute.xlu1 %9685 }
 0x7a6   : > { %v5990_v43 = vsel %vm19333_vm4, %v5989_v30, %v19332_v61  ;;  %vm19335_vm6 = vcmask 605184   ;;  %vm19336_vm10 = vcmask 261120   ;;  %vm19339_vm12 = vcmask 752640   ;;  %v19350_v30 = vld [vmem:[#allocation359_spill] sm:$0xff] }
 0x7a7   : > { %v6002_v50 = vsel %vm19335_vm6, %v6001_v49, %v19334_v16  ;;  %v10398_v7 = vsel %vm19336_vm10, %v10397_v13, %v15613_v38  ;;  %v5991_v0 = vsel %vm19339_vm12, %v5990_v43, %v19338_v53  ;;  %vm19341_vm11 = vcmask 687104   ;;  %v19355_v49 = vld [vmem:[#allocation350_spill] sm:$0xff]  ;;  %v19363_v43 = vld [vmem:[#allocation112_spill] sm:$0xff]  ;;  %v19367_v53 = vld [vmem:[#allocation361_spill] sm:$0xff] }
 0x7a8   : > { %v6003_v21 = vsel %vm19341_vm11, %v6002_v50, %v19340_v15  ;;  %v6507_v22 = vcvt.s32.f32 %v6487_v47  ;;  %v15772_v63 = vrot.slane %v8445_v17, %v11428_v24  ;;  %v8461_v32 = vcombine.high %v8436_v3, %v15703_v60  ;;  %v19348_v60 = vld [vmem:[#allocation347_spill] sm:$0xff]  ;;  %v19369_v15 = vld [vmem:[#allocation572_spill] sm:$0xff] }
 0x7a9   : > { %v8468_v34 = vrot.slane %v8460_v48, %v11431_v25  ;;  %vm19342_vm0 = vcmask 113664   ;;  %v8427_v41 = vcombine.high %v8423_v27, %v18440_v12  ;;  %vm19345_vm14 = vcmask 48128   ;;  %v19359_v27 = vld [vmem:[#allocation550_spill] sm:$0xff] }
 0x7aa   : > { %v10409_v38 = vsel %vm19342_vm0, %v10408_v8, %v9670_v57  ;;  %v3052_v4 = vsel %vm19345_vm14, %v19344_v44, %v19343_v28  ;;  %v8443_v2 = vrot.slane %v8429_v54, %v11428_v24  ;;  %vm19346_vm8 = vcmask 343040   ;;  %v9682_v54 = vpop.permute.xlu0 %9681  ;;  %v19361_v8 = vld [vmem:[#allocation108_spill] sm:$0xff] }
 0x7ab   : > { %v10399_v58 = vsel %vm19346_vm8, %v10398_v7, %v15610_v36  ;;  %vm19347_vm4 = vcmask 195584   ;;  %vm19349_vm6 = vcmask 834560   ;;  %v6526_v14 = vmul.f32 0.1, %v6506_v35  ;;  %9909 = vrot.lane.b32.xlu1 %v8468_v34, %s19353_s28  ;;  %9905 = vrot.lane.b32.xlu0 %v8427_v41, %s19354_s11  ;;  %v19357_v36 = vld [vmem:[#allocation362_spill] sm:$0xff]  ;;  %s19372_s28 = smov 122   ;;  %v9694_v41 = vpop.permute.xlu1 %9693 }
 0x7ac   : > { %v10410_v11 = vsel %vm19347_vm4, %v10409_v38, %v9674_v59  ;;  %v5992_v3 = vsel %vm19349_vm6, %v5991_v0, %v19348_v60  ;;  %vm19351_vm10 = vcmask 769024   ;;  %vm19352_vm12 = vcmask 424960  }
 0x7ad   : > { %v6004_v26 = vsel %vm19351_vm10, %v6003_v21, %v19350_v30  ;;  %v10400_v56 = vsel %vm19352_vm12, %v10399_v58, %v15630_v33  ;;  %vm19356_vm11 = vcmask 916480   ;;  %vm19358_vm0 = vcmask 850944   ;;  %v19370_v21 = vld [vmem:[#allocation528_spill] sm:$0xff] }
 0x7ae   : > { %v5993_v17 = vsel %vm19356_vm11, %v5992_v3, %v19355_v49  ;;  %v6005_v47 = vsel %vm19358_vm0, %v6004_v26, %v19357_v36  ;;  %v6527_v48 = vmul.f32 0.1, %v6507_v22  ;;  %v8476_v57 = vcombine.low %v8443_v2, %v15772_v63  ;;  %vm19362_vm8 = vmmov %vm19358_vm0  ;;  %v19385_v26 = vld [vmem:[#allocation113_spill] sm:$0xff] }
 0x7af   : > { %v8512_v23 = vcombine.low %v19359_v27, %v14438_v1  ;;  %v8475_v62 = vrot.slane %v8461_v32, %v11431_v25  ;;  %vm19360_vm14 = vcmask 277504   ;;  %v8492_v13 = vcombine.high %v8468_v34, %v18440_v12 }
 0x7b0   : > { %v10411_v33 = vsel %vm19360_vm14, %v10410_v11, %v9678_v40  ;;  %v3049_v61 = vsel %vm19362_vm8, %v3048_v39, %v19361_v8  ;;  %vm19364_vm4 = vcmask 130048   ;;  %vm19365_vm6 = vcmask 506880   ;;  %v19374_v40 = vld [vmem:[#allocation364_spill] sm:$0xff]  ;;  %v19378_v11 = vld [vmem:[#allocation109_spill] sm:$0xff] }
 0x7b1   : > { %v3053_v35 = vsel %vm19364_vm4, %v3052_v4, %v19363_v43  ;;  %v10401_v16 = vsel %vm19365_vm6, %v10400_v56, %v15627_v10  ;;  %vm19366_vm10 = vcmask 359424   ;;  %v6546_v7 = vadd.f32 0.05, %v6526_v14  ;;  %9917 = vrot.lane.b32.xlu1 %v8475_v62, %s19047_s19  ;;  %9913 = vrot.lane.b32.xlu0 %v8492_v13, %s19372_s28  ;;  %v9690_v4 = vpop.permute.xlu0 %9689  ;;  %s19383_s19 = smov 24   ;;  %s19384_s28 = smov 14  }
 0x7b2   : > { %v10412_v50 = vsel %vm19366_vm10, %v10411_v33, %v9682_v54  ;;  %vm19368_vm12 = vcmask 932864   ;;  %v8496_v22 = vcombine.low %v19370_v21, %v19369_v15  ;;  %vm19371_vm11 = vcmask 588800  }
 0x7b3   : > { %v6006_v0 = vsel %vm19368_vm12, %v6005_v47, %v19367_v53  ;;  %v10402_v32 = vsel %vm19371_vm11, %v10401_v16, %v15653_v52  ;;  %vm19373_vm0 = vcmask 998400   ;;  %v6547_v10 = vadd.f32 0.05, %v6527_v48  ;;  %vm19379_vm6 = vmmov %vm19368_vm12 }
 0x7b4   : > { %v5994_v39 = vsel %vm19373_vm0, %v5993_v17, %v19279_v9  ;;  %vm19375_vm14 = vcmask 1014784   ;;  %v8477_v38 = vcombine.high %v8443_v2, %v15772_v63  ;;  %v8520_v59 = vrot.slane %v8512_v23, %v11428_v24  ;;  %vm19377_vm4 = vmmov %vm19373_vm0  ;;  %v9702_v17 = vpop.permute.xlu1 %9701 }
 0x7b5   : > { %v6007_v34 = vsel %vm19375_vm14, %v6006_v0, %v19374_v40  ;;  %v8484_v28 = vrot.slane %v8476_v57, %v11431_v25  ;;  %vm19376_vm8 = vcmask 441344   ;;  %v8493_v58 = vcombine.high %v8475_v62, %v18440_v12  ;;  %v9698_v47 = vpop.permute.xlu0 %9697 }
 0x7b6   : > { %v10413_v52 = vsel %vm19376_vm8, %v10412_v50, %v9686_v46  ;;  %v3038_v9 = vsel %vm19377_vm4, %v15713_v19, %v19232_v31  ;;  %v3050_v60 = vsel %vm19379_vm6, %v3049_v61, %v19378_v11  ;;  %vm19380_vm10 = vcmask 670720  }
 0x7b7   : > { %v10403_v63 = vsel %vm19380_vm10, %v10402_v32, %v15650_v55  ;;  %vm19381_vm12 = vcmask 523264   ;;  %v6566_v3 = vmul.f32 %v6546_v7, %v5994_v39  ;;  %v8504_v14 = vrot.slane %v8496_v22, %v11428_v24  ;;  %9925 = vrot.lane.b32.xlu1 %v8484_v28, %s19383_s19  ;;  %9921 = vrot.lane.b32.xlu0 %v8493_v58, %s19384_s28  ;;  %s19394_s19 = smov 44   ;;  %s19395_s28 = smov 34  }
 0x7b8   : > { %v10414_v2 = vsel %vm19381_vm12, %v10413_v52, %v9690_v4  ;;  %vm19382_vm11 = vcmask 752640   ;;  %vm19386_vm0 = vcmask 211968   ;;  %v6567_v19 = vmul.f32 %v6547_v10, %v6007_v34  ;;  %v19403_v34 = vld [vmem:[#allocation124_spill] sm:$0xff] }
 0x7b9   : > { %v10404_v30 = vsel %vm19382_vm11, %v10403_v63, %v15680_v20  ;;  %v3054_v31 = vsel %vm19386_vm0, %v3053_v35, %v19385_v26  ;;  %v15843_v56 = vadd.s32 1024, %v14519_v6  ;;  %v8513_v55 = vcombine.high %v19359_v27, %v14438_v1  ;;  %v19391_v27 = vld [vmem:[#allocation114_spill] sm:$0xff]  ;;  %v9710_v35 = vpop.permute.xlu1 %9709  ;;  %v9706_v7 = vpop.permute.xlu0 %9705  ;;  %v19414_v26 = vld [vmem:[#allocation527_spill] sm:$0xff] }
 0x7ba   : > { %v8528_v49 = vcombine.low %v8504_v14, %v8520_v59  ;;  %v8491_v36 = vrot.slane %v8477_v38, %v11431_v25  ;;  %vm19387_vm14 = vcmask 605184   ;;  %v8494_v48 = vcombine.high %v8484_v28, %v18440_v12  ;;  %v19404_v38 = vld [vmem:[#allocation123_spill] sm:$0xff] }
 0x7bb   : > { %v10415_v20 = vsel %vm19387_vm14, %v10414_v2, %v9694_v41  ;;  %vm19388_vm8 = vcmask 1014784   ;;  %v8497_v23 = vcombine.high %v19370_v21, %v19369_v15  ;;  %vm19389_vm4 = vcmask 834560   ;;  %v19399_v21 = vld [vmem:[#allocation115_spill] sm:$0xff] }
 0x7bc   : > { %v3051_v57 = vsel %vm19388_vm8, %v3050_v60, %v19344_v44  ;;  %v10405_v46 = vsel %vm19389_vm4, %v10404_v30, %v15677_v5  ;;  %vm19390_vm6 = vcmask 687104   ;;  %vm19392_vm10 = vcmask 293888   ;;  %9933 = vrot.lane.b32.xlu1 %v8491_v36, %s19394_s19  ;;  %9929 = vrot.lane.b32.xlu0 %v8494_v48, %s19395_s28  ;;  %s19401_s19 = smov 64   ;;  %s19402_s28 = smov 54   ;;  %v19413_v30 = vld [vmem:[#allocation571_spill] sm:$0xff] }
 0x7bd   : > { %v10416_v1 = vsel %vm19390_vm6, %v10415_v20, %v9698_v47  ;;  %v3055_v62 = vsel %vm19392_vm10, %v3054_v31, %v19391_v27  ;;  %v6586_v33 = vadd.f32 %v6566_v3, %v3038_v9  ;;  %v15860_v54 = vadd.s32 1152, %v14519_v6  ;;  %v15898_v9 = vpop.permute.xlu1 %9717  ;;  %v15901_v60 = vpop.permute.xlu0 %9713  ;;  %v19411_v3 = vld [vmem:[#allocation116_spill] sm:$0xff]  ;;  %v19417_v27 = vld [vmem:[#allocation363_spill] sm:$0xff] }
 0x7be   : > { %vm19393_vm12 = vcmask 916480   ;;  %v6587_v44 = vadd.f32 %v6567_v19, %v3051_v57  ;;  %v15867_v8 = vmul.u32.u64.low 3435973837, %v15843_v56  ;;  %v15868_v5 = vmul.u32.u64.high 3435973837, %v15843_v56, %v15867_v8  ;;  %v19416_v19 = vld [vmem:[#allocation125_spill] sm:$0xff] }
 0x7bf   : > { %v10406_v13 = vsel %vm19393_vm12, %v10405_v46, %v15708_v42  ;;  %v8527_v61 = vrot.slane %v8513_v55, %v11428_v24  ;;  %v8529_v43 = vcombine.high %v8504_v14, %v8520_v59  ;;  %v8536_v16 = vrot.slane %v8528_v49, %v11431_v25  ;;  %v19423_v8 = vld [vmem:[#allocation126_spill] sm:$0xff] }
 0x7c0   : > { %vm19396_vm11 = vcmask 769024   ;;  %v8495_v42 = vcombine.high %v8491_v36, %v18440_v12  ;;  %v8511_v53 = vrot.slane %v8497_v23, %v11428_v24  ;;  %vm19397_vm0 = vcmask 998400  }
 0x7c1   : > { %v10417_v50 = vsel %vm19396_vm11, %v10416_v1, %v9702_v17  ;;  %v10407_v0 = vsel %vm19397_vm0, %v10406_v13, %v15705_v51  ;;  %vm19398_vm14 = vcmask 850944   ;;  %vm19400_vm8 = vcmask 375808   ;;  %9941 = vrot.lane.b32.xlu1 %v8536_v16, %s19401_s19  ;;  %v19406_v51 = vld [vmem:[#allocation549_spill] sm:$0xff]  ;;  %s19415_s19 = smov 74   ;;  %v15919_v48 = vpop.permute.xlu1 %9725  ;;  %v15922_v23 = vpop.permute.xlu0 %9721 }
 0x7c2   : > { %v10418_v15 = vsel %vm19398_vm14, %v10417_v50, %v9706_v7  ;;  %v3056_v22 = vsel %vm19400_vm8, %v3055_v62, %v19399_v21  ;;  %v15881_v32 = vmul.u32.u64.low 3435973837, %v15860_v54  ;;  %v15882_v39 = vmul.u32.u64.high 3435973837, %v15860_v54, %v15881_v32  ;;  %9937 = vrot.lane.b32.xlu0 %v8495_v42, %s19402_s28  ;;  %v19421_v13 = vld [vmem:[#allocation117_spill] sm:$0xff]  ;;  %s19467_s28 = smov 46  }
 0x7c3   : > { %v10599_v10 = vrot.slane %v6586_v33, %v19017_v18  ;;  %vm19405_vm4 = vcmask 64512   ;;  %v8580_v41 = vcombine.low %v19406_v51, %v14425_v45  ;;  %v8544_v28 = vcombine.low %v8511_v53, %v8527_v61 }
 0x7c4   : > { %v3065_v59 = vsel %vm19405_vm4, %v19404_v38, %v19403_v34  ;;  %v10603_v52 = vrot.slane %v6587_v44, %v19017_v18  ;;  %vm19409_vm10 = vcmask 932864   ;;  %v8543_v11 = vrot.slane %v8529_v43, %v11431_v25  ;;  %v19424_v43 = vld [vmem:[#allocation366_spill] sm:$0xff]  ;;  %v19432_v34 = vld [vmem:[#allocation368_spill] sm:$0xff] }
 0x7c5   : > { %vm15893_vm6 = vcmp.gt.f32.partialorder %v10407_v0, %v10599_v10  ;;  %v10419_v58 = vsel %vm19409_vm10, %v10418_v15, %v9710_v35  ;;  %v8560_v63 = vcombine.high %v8536_v16, %v18440_v12  ;;  %vm19410_vm12 = vcmask 1014784   ;;  %v15942_v50 = vpop.permute.xlu1 %9733  ;;  %v15945_v42 = vpop.permute.xlu0 %9729  ;;  %v19426_v15 = vld [vmem:[#allocation118_spill] sm:$0xff] }
 0x7c6   : > { %v10420_v2 = vsel %vm19410_vm12, %v10419_v58, %v15901_v60  ;;  %vm19412_vm11 = vcmask 457728   ;;  %v8564_v31 = vcombine.low %v19414_v26, %v19413_v30  ;;  %9949 = vrot.lane.b32.xlu1 %v8543_v11, %s19088_s9  ;;  %v3066_v55 = vsel %vm2992_vm5, %v3065_v59, %v19416_v19  ;;  %s19419_s9 = smov 104  }
 0x7c7   : > { %v3057_v14 = vsel %vm19412_vm11, %v3056_v22, %v19411_v3  ;;  %vm10659_vm0 = vcmp.gt.f32.partialorder %v10420_v2, %v10603_v52  ;;  %9945 = vrot.lane.b32.xlu0 %v8560_v63, %s19415_s19  ;;  %v8588_v49 = vrot.slane %v8580_v41, %v11428_v24  ;;  %v10878_v17 = vsel %vm15893_vm6, 1.0, %v18440_v12  ;;  %s19420_s19 = smov 94   ;;  %v19428_v22 = vld [vmem:[#allocation365_spill] sm:$0xff]  ;;  %v19434_v63 = vld [vmem:[#allocation119_spill] sm:$0xff] }
 0x7c8   : > { %v10879_v36 = vsel %vm10659_vm0, 1.0, %v18440_v12  ;;  %v8545_v20 = vcombine.high %v8511_v53, %v8527_v61  ;;  %v8552_v57 = vrot.slane %v8544_v28, %v11431_v25  ;;  %v8561_v46 = vcombine.high %v8543_v11, %v18440_v12 }
 0x7c9   : > { %v10735_v47 = vcombine.low %v10878_v17, %v10879_v36  ;;  %v6274_v1 = vshrl.u32 %v15868_v5, 3  ;;  %vm19418_vm14 = vcmask 48128   ;;  %v8572_v33 = vrot.slane %v8564_v31, %v11428_v24  ;;  %v15961_v52 = vpop.permute.xlu1 %9741  ;;  %v15964_v58 = vpop.permute.xlu0 %9737  ;;  %v19442_v17 = vld [vmem:[#allocation378_spill] sm:$0xff]  ;;  %v19443_v36 = vld [vmem:[#allocation375_spill] sm:$0xff] }
 0x7ca   : > { %v6008_v62 = vsel %vm19418_vm14, %v19374_v40, %v19417_v27  ;;  %9957 = vrot.lane.b32.xlu1 %v8552_v57, %s19419_s9  ;;  %vm19422_vm8 = vcmask 539648   ;;  %v3067_v61 = vsel %vm18053_vm7, %v3066_v55, %v19423_v8  ;;  %vm19425_vm4 = vcmask 130048   ;;  %s19430_s9 = smov 114   ;;  %v19440_v55 = vld [vmem:[#allocation370_spill] sm:$0xff]  ;;  %v19448_v8 = vld [vmem:[#allocation129_spill] sm:$0xff] }
 0x7cb   : > { %10755 = vst [vmem:[%s14929_s24 + $0x18] sm:$0xff] %v10735_v47  ;;  %9953 = vrot.lane.b32.xlu0 %v8561_v46, %s19420_s19  ;;  %v3058_v44 = vsel %vm19422_vm8, %v3057_v14, %v19421_v13  ;;  %v6009_v5 = vsel %vm19425_vm4, %v6008_v62, %v19424_v43  ;;  %v6285_v35 = vshrl.u32 %v15882_v39, 3  ;;  %v8581_v40 = vcombine.high %v19406_v51, %v14425_v45  ;;  %v19431_v45 = vld [vmem:[#allocation127_spill] sm:$0xff]  ;;  %v19436_v14 = vld [vmem:[#allocation128_spill] sm:$0xff]  ;;  %s19454_s19 = smov 26  }
 0x7cc   : > { %v8596_v16 = vcombine.low %v8572_v33, %v8588_v49  ;;  %v8559_v7 = vrot.slane %v8545_v20, %v11431_v25  ;;  %v8562_v53 = vcombine.high %v8552_v57, %v18440_v12  ;;  %v6275_v0 = vmul.u32 10, %v6274_v1  ;;  %v19445_v57 = vld [vmem:[#allocation552_spill] sm:$0xff] }
 0x7cd   : > { %vm19427_vm6 = vcmask 621568   ;;  %vm19429_vm10 = vcmask 211968   ;;  %v8565_v39 = vcombine.high %v19414_v26, %v19413_v30  ;;  %v3068_v10 = vsel %vm2996_vm9, %v3067_v61, %v19431_v45  ;;  %v19437_v26 = vld [vmem:[#allocation367_spill] sm:$0xff]  ;;  %v15987_v1 = vpop.permute.xlu1 %9749  ;;  %v15990_v62 = vpop.permute.xlu0 %9745  ;;  %v19446_v13 = vld [vmem:[#allocation120_spill] sm:$0xff] }
 0x7ce   : > { %v3059_v21 = vsel %vm19427_vm6, %v3058_v44, %v19426_v15  ;;  %v6010_v32 = vsel %vm19429_vm10, %v6009_v5, %v19428_v22  ;;  %9965 = vrot.lane.b32.xlu1 %v8559_v7, %s19111_s13  ;;  %vm19433_vm12 = vcmask 293888   ;;  %v6286_v51 = vmul.u32 10, %v6285_v35  ;;  %v19451_v35 = vld [vmem:[#allocation377_spill] sm:$0xff] }
 0x7cf   : > { %9961 = vrot.lane.b32.xlu0 %v8562_v53, %s19430_s9  ;;  %v6011_v59 = vsel %vm19433_vm12, %v6010_v32, %v19432_v34  ;;  %v8595_v41 = vrot.slane %v8581_v40, %v11428_v24  ;;  %v8597_v28 = vcombine.high %v8572_v33, %v8588_v49  ;;  %v8604_v4 = vrot.slane %v8596_v16, %v11431_v25  ;;  %s19439_s9 = smov 6   ;;  %v19452_v16 = vld [vmem:[#allocation574_spill] sm:$0xff]  ;;  %v19482_v32 = vld [vmem:[#allocation132_spill] sm:$0xff] }
 0x7d0   : > { %v8563_v11 = vcombine.high %v8559_v7, %v18440_v12  ;;  %vm19435_vm11 = vcmask 703488   ;;  %v6276_v3 = vsub.s32 %v15843_v56, %v6275_v0  ;;  %v3069_v30 = vsel %vm2998_vm3, %v3068_v10, %v19436_v14  ;;  %v19453_v7 = vld [vmem:[#allocation530_spill] sm:$0xff]  ;;  %v19455_v0 = vld [vmem:[#allocation372_spill] sm:$0xff]  ;;  %v19463_v14 = vld [vmem:[#allocation379_spill] sm:$0xff] }
 0x7d1   : > { %v3060_v2 = vsel %vm19435_vm11, %v3059_v21, %v19434_v63  ;;  %vm19438_vm0 = vcmask 375808   ;;  %v8579_v19 = vrot.slane %v8565_v39, %v11428_v24  ;;  %vm19441_vm14 = vcmask 457728   ;;  %v19457_v21 = vld [vmem:[#allocation380_spill] sm:$0xff]  ;;  %v16016_v10 = vpop.permute.xlu1 %9757 }
 0x7d2   : > { %v6012_v31 = vsel %vm19438_vm0, %v6011_v59, %v19437_v26  ;;  %9973 = vrot.lane.b32.xlu1 %v8604_v4, %s19122_s26  ;;  %vm19444_vm8 = vcmask 64512   ;;  %v15983_v56 = vsub.s32 %v15860_v54, %v6286_v51  ;;  %v8648_v46 = vcombine.low %v19445_v57, %v14452_v37  ;;  %v19449_v54 = vld [vmem:[#allocation369_spill] sm:$0xff]  ;;  %v16019_v59 = vpop.permute.xlu0 %9753 }
 0x7d3   : > { %9969 = vrot.lane.b32.xlu0 %v8563_v11, %s19439_s9  ;;  %v6013_v49 = vsel %vm19441_vm14, %v6012_v31, %v19440_v55  ;;  %v6021_v20 = vsel %vm19444_vm8, %v19443_v36, %v19442_v17  ;;  %v8612_v47 = vcombine.low %v8579_v19, %v8595_v41  ;;  %v8611_v27 = vrot.slane %v8597_v28, %v11431_v25  ;;  %v19460_v28 = vld [vmem:[#allocation121_spill] sm:$0xff]  ;;  %v19462_v11 = vld [vmem:[#allocation130_spill] sm:$0xff] }
 0x7d4   : > { %v8628_v33 = vcombine.high %v8604_v4, %v18440_v12  ;;  %vm19447_vm4 = vcmask 785408   ;;  %v3070_v61 = vsel %vm3000_vm2, %v3069_v30, %v19448_v8  ;;  %vm6408_vm6 = vcmp.ne.s32.totalorder %v6276_v3, 0  ;;  %v19470_v17 = vld [vmem:[#allocation382_spill] sm:$0xff] }
 0x7d5   : > { %v3061_v44 = vsel %vm19447_vm4, %v3060_v2, %v19446_v13  ;;  %vm6428_vm10 = vcmp.lt.s32.totalorder %v6276_v3, 0  ;;  %vm19450_vm12 = vcmask 539648   ;;  %v6468_v5 = vadd.s32 10, %v6276_v3  ;;  %v19473_v8 = vld [vmem:[#allocation374_spill] sm:$0xff] }
 0x7d6   : > { %v6014_v43 = vsel %vm19450_vm12, %v6013_v49, %v19449_v54  ;;  %v6022_v40 = vsel %vm2992_vm5, %v6021_v20, %v19451_v35  ;;  %v8632_v53 = vcombine.low %v19453_v7, %v19452_v16  ;;  %9981 = vrot.lane.b32.xlu1 %v8611_v27, %s19129_s2  ;;  %vm19456_vm11 = vcmask 621568   ;;  %vm16011_vm8 = vmand %vm6428_vm10, %vm6408_vm6  ;;  %v19478_v35 = vld [vmem:[#allocation122_spill] sm:$0xff] }
 0x7d7   : > { %9977 = vrot.lane.b32.xlu0 %v8628_v33, %s19454_s19  ;;  %v6015_v15 = vsel %vm19456_vm11, %v6014_v43, %v19455_v0  ;;  %v6023_v22 = vsel %vm18053_vm7, %v6022_v40, %v19457_v21  ;;  %vm6409_vm0 = vcmp.ne.s32.totalorder %v15983_v56, 0  ;;  %vm6429_vm14 = vcmp.lt.s32.totalorder %v15983_v56, 0  ;;  %v16052_v33 = vpop.permute.xlu0 %9761  ;;  %v19491_v30 = vld [vmem:[#allocation386_spill] sm:$0xff] }
 0x7d8   : > { %v8613_v39 = vcombine.high %v8579_v19, %v8595_v41  ;;  %v8656_v45 = vrot.slane %v8648_v46, %v11428_v24  ;;  %v8620_v34 = vrot.slane %v8612_v47, %v11431_v25  ;;  %v8629_v51 = vcombine.high %v8611_v27, %v18440_v12  ;;  %vm16029_vm6 = vmand %vm6429_vm14, %vm6409_vm0  ;;  %v19468_v19 = vld [vmem:[#allocation371_spill] sm:$0xff] }
 0x7d9   : > { %vm19461_vm4 = vcmask 867328   ;;  %v3071_v63 = vsel %vm18052_vm15, %v3070_v61, %v19462_v11  ;;  %v6469_v2 = vadd.s32 10, %v15983_v56  ;;  %v6024_v41 = vsel %vm2996_vm9, %v6023_v22, %v19463_v14  ;;  %v19486_v11 = vld [vmem:[#allocation383_spill] sm:$0xff]  ;;  %v19489_v14 = vld [vmem:[#allocation376_spill] sm:$0xff] }
 0x7da   : > { %v3062_v4 = vsel %vm19461_vm4, %v3061_v44, %v19460_v28  ;;  %v8640_v26 = vrot.slane %v8632_v53, %v11428_v24  ;;  %vm19466_vm10 = vcmask 48128   ;;  %9989 = vrot.lane.b32.xlu1 %v8620_v34, %s19131_s15  ;;  %vm19469_vm12 = vcmask 703488   ;;  %v19472_v44 = vld [vmem:[#allocation131_spill] sm:$0xff]  ;;  %s19477_s15 = smov 66   ;;  %v19480_v53 = vld [vmem:[#allocation384_spill] sm:$0xff] }
 0x7db   : > { %v10421_v31 = vsel %vm19466_vm10, %v15901_v60, %v15898_v9  ;;  %9985 = vrot.lane.b32.xlu0 %v8629_v51, %s19467_s28  ;;  %v6016_v55 = vsel %vm19469_vm12, %v6015_v15, %v19468_v19  ;;  %v6488_v49 = vsel %vm16011_vm8, %v6468_v5, %v6276_v3  ;;  %v6025_v20 = vsel %vm2998_vm3, %v6024_v41, %v19470_v17  ;;  %v16049_v60 = vpop.permute.xlu1 %9765  ;;  %v19493_v19 = vld [vmem:[#allocation551_spill] sm:$0xff] }
 0x7dc   : > { %vm19471_vm11 = vcmask 130048   ;;  %v8649_v46 = vcombine.high %v19445_v57, %v14452_v37  ;;  %v8664_v9 = vcombine.low %v8640_v26, %v8656_v45  ;;  %v8627_v27 = vrot.slane %v8613_v39, %v11431_v25  ;;  %v19475_v57 = vld [vmem:[#allocation381_spill] sm:$0xff] }
 0x7dd   : > { %v10422_v47 = vsel %vm19471_vm11, %v10421_v31, %v15922_v23  ;;  %v8630_v13 = vcombine.high %v8620_v34, %v18440_v12  ;;  %v3072_v3 = vsel %vm3004_vm1, %v3071_v63, %v19472_v44  ;;  %vm19474_vm0 = vcmask 785408   ;;  %v19483_v34 = vld [vmem:[#allocation373_spill] sm:$0xff]  ;;  %v19492_v31 = vld [vmem:[#allocation583_spill] sm:$0xff]  ;;  %v19497_v44 = vld [vmem:[#allocation136_spill] sm:$0xff] }
 0x7de   : > { %v6017_v61 = vsel %vm19474_vm0, %v6016_v55, %v19473_v8  ;;  %v6489_v23 = vsel %vm16029_vm6, %v6469_v2, %v15983_v56  ;;  %v6508_v37 = vcvt.s32.f32 %v6488_v49  ;;  %v6026_v54 = vsel %vm3000_vm2, %v6025_v20, %v19475_v57  ;;  %9997 = vrot.lane.b32.xlu1 %v8627_v27, %s19139_s29  ;;  %s19488_s29 = smov 86  }
 0x7df   : > { %v8633_v43 = vcombine.high %v19453_v7, %v19452_v16  ;;  %vm19476_vm14 = vcmask 211968   ;;  %9993 = vrot.lane.b32.xlu0 %v8630_v13, %s19477_s15  ;;  %vm19479_vm8 = vcmask 949248   ;;  %v6027_v56 = vsel %vm18052_vm15, %v6026_v54, %v19480_v53  ;;  %v9774_v16 = vpop.permute.xlu1 %9773  ;;  %v19502_v54 = vld [vmem:[#allocation573_spill] sm:$0xff] }
 0x7e0   : > { %v10423_v5 = vsel %vm19476_vm14, %v10422_v47, %v15919_v48  ;;  %v3063_v40 = vsel %vm19479_vm8, %v3062_v4, %v19478_v35  ;;  %vm19481_vm4 = vcmask 293888   ;;  %v8663_v15 = vrot.slane %v8649_v46, %v11428_v24  ;;  %v9770_v48 = vpop.permute.xlu0 %9769  ;;  %vm19490_vm11 = vmmov %vm19479_vm8 }
 0x7e1   : > { %v10424_v0 = vsel %vm19481_vm4, %v10423_v5, %v15945_v42  ;;  %v8665_v21 = vcombine.high %v8640_v26, %v8656_v45  ;;  %v8672_v7 = vrot.slane %v8664_v9, %v11431_v25  ;;  %v8631_v22 = vcombine.high %v8627_v27, %v18440_v12  ;;  %v19495_v27 = vld [vmem:[#allocation133_spill] sm:$0xff] }
 0x7e2   : > { %v3073_v39 = vsel %vm3006_vm13, %v3072_v3, %v19482_v32  ;;  %vm19484_vm6 = vcmask 867328   ;;  %v6509_v28 = vcvt.s32.f32 %v6489_v23  ;;  %vm19485_vm10 = vcmask 64512   ;;  %v19498_v3 = vld [vmem:[#allocation75_spill] sm:$0xff] }
 0x7e3   : > { %v6018_v51 = vsel %vm19484_vm6, %v6017_v61, %v19483_v34  ;;  %v10434_v4 = vsel %vm19485_vm10, %v16049_v60, %v9770_v48  ;;  %v6528_v42 = vmul.f32 0.1, %v6508_v37  ;;  %v6028_v45 = vsel %vm3004_vm1, %v6027_v56, %v19486_v11  ;;  %10005 = vrot.lane.b32.xlu1 %v8672_v7, %s19143_s27  ;;  %10001 = vrot.lane.b32.xlu0 %v8631_v22, %s19488_s29  ;;  %v9782_v20 = vpop.permute.xlu1 %9781  ;;  %v19500_v37 = vld [vmem:[#allocation385_spill] sm:$0xff]  ;;  %v19506_v56 = vld [vmem:[#allocation388_spill] sm:$0xff]  ;;  %v19509_v34 = vld [vmem:[#allocation134_spill] sm:$0xff]  ;;  %s19534_s27 = smov 38  }
 0x7e4   : > { %v8647_v63 = vrot.slane %v8633_v43, %v11428_v24  ;;  %vm19487_vm12 = vcmask 375808   ;;  %v6019_v41 = vsel %vm19490_vm11, %v6018_v51, %v19489_v14  ;;  %v6029_v26 = vsel %vm3006_vm13, %v6028_v45, %v19491_v30  ;;  %v9778_v46 = vpop.permute.xlu0 %9777  ;;  %v19503_v43 = vld [vmem:[#allocation529_spill] sm:$0xff]  ;;  %v19513_v11 = vld [vmem:[#allocation387_spill] sm:$0xff] }
 0x7e5   : > { %v10425_v2 = vsel %vm19487_vm12, %v10424_v0, %v15942_v50  ;;  %v8716_v55 = vcombine.low %v19493_v19, %v19492_v31  ;;  %vm19494_vm0 = vcmask 457728   ;;  %v8679_v50 = vrot.slane %v8665_v21, %v11431_v25  ;;  %v19511_v51 = vld [vmem:[#allocation137_spill] sm:$0xff] }
 0x7e6   : > { %v10426_v49 = vsel %vm19494_vm0, %v10425_v2, %v15964_v58  ;;  %v8680_v17 = vcombine.low %v8647_v63, %v8663_v15  ;;  %v10435_v47 = vsel %vm2992_vm5, %v10434_v4, %v9774_v16  ;;  %v8696_v9 = vcombine.high %v8672_v7, %v18440_v12 }
 0x7e7   : > { %vm19496_vm14 = vcmask 801792   ;;  %vm19499_vm8 = vcmask 80896   ;;  %v6529_v61 = vmul.f32 0.1, %v6509_v28  ;;  %v10436_v23 = vsel %vm18053_vm7, %v10435_v47, %v9778_v46  ;;  %10013 = vrot.lane.b32.xlu1 %v8679_v50, %s18754_s17  ;;  %v9790_v48 = vpop.permute.xlu1 %9789  ;;  %s19516_s17 = smov 126  }
 0x7e8   : > { %v3074_v13 = vsel %vm19496_vm14, %v3073_v39, %v19495_v27  ;;  %v3077_v8 = vsel %vm19499_vm8, %v19498_v3, %v19497_v44  ;;  %v6548_v58 = vadd.f32 0.05, %v6528_v42  ;;  %vm19501_vm4 = vmmov %vm19496_vm14  ;;  %v8700_v5 = vcombine.low %v19503_v43, %v19502_v54  ;;  %10009 = vrot.lane.b32.xlu0 %v8696_v9, %s18931_s22  ;;  %v9786_v32 = vpop.permute.xlu0 %9785  ;;  %s19524_s22 = smov 18   ;;  %v19525_v44 = vld [vmem:[#allocation585_spill] sm:$0xff]  ;;  %v19526_v3 = vld [vmem:[#allocation554_spill] sm:$0xff] }
 0x7e9   : > { %v6030_v57 = vsel %vm19501_vm4, %v6029_v26, %v19500_v37  ;;  %vm19504_vm6 = vcmask 539648   ;;  %vm19505_vm10 = vcmask 1031168   ;;  %vm19507_vm12 = vcmask 883712  }
 0x7ea   : > { %v10427_v35 = vsel %vm19504_vm6, %v10426_v49, %v15961_v52  ;;  %v6020_v53 = vsel %vm19505_vm10, %v6019_v41, %v19443_v36  ;;  %v6031_v0 = vsel %vm19507_vm12, %v6030_v57, %v19506_v56  ;;  %v8724_v21 = vrot.slane %v8716_v55, %v11428_v24  ;;  %vm19510_vm0 = vmmov %vm19507_vm12  ;;  %v19531_v56 = vld [vmem:[#allocation575_spill] sm:$0xff] }
 0x7eb   : > { %vm19508_vm11 = vcmask 621568   ;;  %v8681_v7 = vcombine.high %v8647_v63, %v8663_v15  ;;  %v8688_v22 = vrot.slane %v8680_v17, %v11431_v25  ;;  %v10437_v52 = vsel %vm2996_vm9, %v10436_v23, %v9782_v20  ;;  %vm19517_vm6 = vmmov %vm19505_vm10  ;;  %v9798_v26 = vpop.permute.xlu1 %9797  ;;  %v19519_v20 = vld [vmem:[#allocation135_spill] sm:$0xff] }
 0x7ec   : > { %v10428_v16 = vsel %vm19508_vm11, %v10427_v35, %v15990_v62  ;;  %v8697_v39 = vcombine.high %v8679_v50, %v18440_v12  ;;  %v3075_v36 = vsel %vm19510_vm0, %v3074_v13, %v19509_v34  ;;  %vm19512_vm14 = vcmask 162816   ;;  %v9794_v49 = vpop.permute.xlu0 %9793 }
 0x7ed   : > { %v3078_v28 = vsel %vm19512_vm14, %v3077_v8, %v19511_v51  ;;  %v6549_v4 = vadd.f32 0.05, %v6529_v61  ;;  %v10438_v42 = vsel %vm2998_vm3, %v10437_v52, %v9786_v32  ;;  %vm19514_vm8 = vcmask 965632   ;;  %10021 = vrot.lane.b32.xlu1 %v8688_v22, %s19158_s25 }
 0x7ee   : > { %v6032_v62 = vsel %vm19514_vm8, %v6031_v0, %v19513_v11  ;;  %v8708_v15 = vrot.slane %v8700_v5, %v11428_v24  ;;  %vm19515_vm4 = vcmask 703488   ;;  %10017 = vrot.lane.b32.xlu0 %v8697_v39, %s19516_s17  ;;  %v3064_v63 = vsel %vm19517_vm6, %v3063_v40, %v19404_v38  ;;  %vm19520_vm12 = vmmov %vm19514_vm8  ;;  %v19521_v38 = vld [vmem:[#allocation138_spill] sm:$0xff]  ;;  %v19529_v5 = vld [vmem:[#allocation148_spill] sm:$0xff] }
 0x7ef   : > { %v10429_v45 = vsel %vm19515_vm4, %v10428_v16, %v15987_v1  ;;  %v6568_v2 = vmul.f32 %v6548_v58, %v6020_v53  ;;  %v8717_v14 = vcombine.high %v19493_v19, %v19492_v31  ;;  %vm19518_vm10 = vcmask 785408   ;;  %v9806_v58 = vpop.permute.xlu1 %9805  ;;  %v19532_v0 = vld [vmem:[#allocation532_spill] sm:$0xff]  ;;  %vm19533_vm4 = vmmov %vm19517_vm6 }
 0x7f0   : > { %v10430_v41 = vsel %vm19518_vm10, %v10429_v45, %v16019_v59  ;;  %v8732_v30 = vcombine.low %v8708_v15, %v8724_v21  ;;  %v8695_v55 = vrot.slane %v8681_v7, %v11431_v25  ;;  %v10439_v1 = vsel %vm3000_vm2, %v10438_v42, %v9790_v48  ;;  %v19537_v45 = vld [vmem:[#allocation140_spill] sm:$0xff] }
 0x7f1   : > { %v8698_v17 = vcombine.high %v8688_v22, %v18440_v12  ;;  %v3076_v50 = vsel %vm19520_vm12, %v3075_v36, %v19519_v20  ;;  %vm19522_vm11 = vcmask 244736   ;;  %v6569_v47 = vmul.f32 %v6549_v4, %v6032_v62 }
 0x7f2   : > { %v3079_v40 = vsel %vm19522_vm11, %v3078_v28, %v19521_v38  ;;  %v10440_v31 = vsel %vm18052_vm15, %v10439_v1, %v9794_v49  ;;  %v16154_v59 = vadd.s32 1280, %v14519_v6  ;;  %v16157_v19 = vadd.s32 1408, %v14519_v6  ;;  %10029 = vrot.lane.b32.xlu1 %v8695_v55, %s19168_s4 }
 0x7f3   : > { %v8701_v46 = vcombine.high %v19503_v43, %v19502_v54  ;;  %vm19523_vm0 = vcmask 867328   ;;  %10025 = vrot.lane.b32.xlu0 %v8698_v17, %s19524_s22  ;;  %v6588_v27 = vadd.f32 %v6568_v2, %v3064_v63  ;;  %v8731_v13 = vrot.slane %v8717_v14, %v11428_v24  ;;  %v19528_v43 = vld [vmem:[#allocation149_spill] sm:$0xff]  ;;  %v9814_v51 = vpop.permute.xlu1 %9813  ;;  %v19539_v2 = vld [vmem:[#allocation150_spill] sm:$0xff] }
 0x7f4   : > { %v10431_v9 = vsel %vm19523_vm0, %v10430_v41, %v16016_v10  ;;  %v8784_v8 = vcombine.low %v19526_v3, %v19525_v44  ;;  %vm19527_vm14 = vcmask 949248   ;;  %v8733_v23 = vcombine.high %v8708_v15, %v8724_v21  ;;  %v9802_v10 = vpop.permute.xlu0 %9801 }
 0x7f5   : > { %v10432_v61 = vsel %vm19527_vm14, %v10431_v9, %v16052_v33  ;;  %v8740_v37 = vrot.slane %v8732_v30, %v11431_v25  ;;  %v10441_v57 = vsel %vm3004_vm1, %v10440_v31, %v9798_v26  ;;  %v8699_v54 = vcombine.high %v8695_v55, %v18440_v12  ;;  %v19542_v31 = vld [vmem:[#allocation141_spill] sm:$0xff]  ;;  %v19544_v9 = vld [vmem:[#allocation151_spill] sm:$0xff] }
 0x7f6   : > { %vm19530_vm8 = vcmask 15360   ;;  %v6589_v53 = vadd.f32 %v6569_v47, %v3076_v50  ;;  %v8768_v16 = vcombine.low %v19532_v0, %v19531_v56  ;;  %v10442_v7 = vsel %vm3006_vm13, %v10441_v57, %v9802_v10  ;;  %v19546_v10 = vld [vmem:[#allocation142_spill] sm:$0xff] }
 0x7f7   : > { %v3089_v35 = vsel %vm19530_vm8, %v19529_v5, %v19528_v43  ;;  %v16180_v33 = vmul.u32.u64.low 3435973837, %v16154_v59  ;;  %v16181_v21 = vmul.u32.u64.high 3435973837, %v16154_v59, %v16180_v33  ;;  %v8715_v48 = vrot.slane %v8701_v46, %v11428_v24  ;;  %10037 = vrot.lane.b32.xlu1 %v8740_v37, %s19185_s16  ;;  %10033 = vrot.lane.b32.xlu0 %v8699_v54, %s19534_s27  ;;  %v16211_v17 = vpop.permute.xlu1 %9821 }
 0x7f8   : > { %v10433_v22 = vsel %vm19533_vm4, %v10432_v61, %v16049_v60  ;;  %v16189_v52 = vmul.u32.u64.low 3435973837, %v16157_v19  ;;  %v16190_v32 = vmul.u32.u64.high 3435973837, %v16157_v19, %v16189_v52  ;;  %v8792_v39 = vrot.slane %v8784_v8, %v11428_v24  ;;  %v9810_v42 = vpop.permute.xlu0 %9809  ;;  %v19553_v33 = vld [vmem:[#allocation584_spill] sm:$0xff] }
 0x7f9   : > { %v10607_v34 = vrot.slane %v6588_v27, %v19017_v18  ;;  %v8748_v36 = vcombine.low %v8715_v48, %v8731_v13  ;;  %v8747_v28 = vrot.slane %v8733_v23, %v11431_v25  ;;  %vm19535_vm6 = vcmask 801792  }
 0x7fa   : > { %v10443_v4 = vsel %vm19535_vm6, %v10442_v7, %v9806_v58  ;;  %v8764_v60 = vcombine.high %v8740_v37, %v18440_v12  ;;  %v8776_v11 = vrot.slane %v8768_v16, %v11428_v24  ;;  %v10611_v62 = vrot.slane %v6589_v53, %v19017_v18 }
 0x7fb   : > { %vm10660_vm10 = vcmp.gt.f32.partialorder %v10433_v22, %v10607_v34  ;;  %vm19536_vm12 = vcmask 883712   ;;  %vm19538_vm11 = vcmask 326656   ;;  %vm19540_vm0 = vcmask 97280   ;;  %10045 = vrot.lane.b32.xlu1 %v8747_v28, %s18571_s18  ;;  %v16228_v8 = vpop.permute.xlu1 %9829 }
 0x7fc   : > { %v10444_v15 = vsel %vm19536_vm12, %v10443_v4, %v9810_v42  ;;  %v3080_v63 = vsel %vm19538_vm11, %v3079_v40, %v19537_v45  ;;  %v3090_v14 = vsel %vm19540_vm0, %v3089_v35, %v19539_v2  ;;  %vm19541_vm14 = vcmask 965632   ;;  %10041 = vrot.lane.b32.xlu0 %v8764_v60, %s18939_s5  ;;  %v16214_v50 = vpop.permute.xlu0 %9817  ;;  %v19548_v35 = vld [vmem:[#allocation152_spill] sm:$0xff]  ;;  %v19557_v42 = vld [vmem:[#allocation153_spill] sm:$0xff]  ;;  %v19562_v45 = vld [vmem:[#allocation531_spill] sm:$0xff] }
 0x7fd   : > { %v10445_v41 = vsel %vm19541_vm14, %v10444_v15, %v9814_v51  ;;  %v8749_v30 = vcombine.high %v8715_v48, %v8731_v13  ;;  %v8785_v26 = vcombine.high %v19526_v3, %v19525_v44  ;;  %v8800_v55 = vcombine.low %v8776_v11, %v8792_v39  ;;  %v19555_v51 = vld [vmem:[#allocation143_spill] sm:$0xff]  ;;  %v19561_v15 = vld [vmem:[#allocation576_spill] sm:$0xff]  ;;  %v19563_v2 = vld [vmem:[#allocation393_spill] sm:$0xff] }
 0x7fe   : > { %vm10661_vm8 = vcmp.gt.f32.partialorder %v10445_v41, %v10611_v62  ;;  %v10880_v1 = vsel %vm10660_vm10, 1.0, %v18440_v12  ;;  %v8756_v20 = vrot.slane %v8748_v36, %v11431_v25  ;;  %v8765_v38 = vcombine.high %v8747_v28, %v18440_v12 }
 0x7ff   : > { %v10881_v49 = vsel %vm10661_vm8, 1.0, %v18440_v12  ;;  %v8769_v47 = vcombine.high %v19532_v0, %v19531_v56  ;;  %vm19543_vm4 = vcmask 408576   ;;  %vm19545_vm6 = vcmask 179200   ;;  %v19550_v56 = vld [vmem:[#allocation390_spill] sm:$0xff]  ;;  %v19551_v0 = vld [vmem:[#allocation328_spill] sm:$0xff]  ;;  %v16250_v52 = vpop.permute.xlu1 %9837 }
 0x800   : > { %v10736_v40 = vcombine.low %v10880_v1, %v10881_v49  ;;  %10053 = vrot.lane.b32.xlu1 %v8756_v20, %s18769_s23  ;;  %10049 = vrot.lane.b32.xlu0 %v8765_v38, %s18670_s30  ;;  %v3081_v46 = vsel %vm19543_vm4, %v3080_v63, %v19542_v31  ;;  %v3091_v27 = vsel %vm19545_vm6, %v3090_v14, %v19544_v9  ;;  %v6296_v13 = vshrl.u32 %v16181_v21, 3  ;;  %v16231_v23 = vpop.permute.xlu0 %9825  ;;  %v19554_v21 = vld [vmem:[#allocation553_spill] sm:$0xff]  ;;  %v19568_v31 = vld [vmem:[#allocation144_spill] sm:$0xff] }
 0x801   : > { %v8799_v44 = vrot.slane %v8785_v26, %v11428_v24  ;;  %v8801_v3 = vcombine.high %v8776_v11, %v8792_v39  ;;  %v8763_v61 = vrot.slane %v8749_v30, %v11431_v25  ;;  %v8766_v58 = vcombine.high %v8756_v20, %v18440_v12  ;;  %v19559_v11 = vld [vmem:[#allocation389_spill] sm:$0xff]  ;;  %v19565_v30 = vld [vmem:[#allocation403_spill] sm:$0xff]  ;;  %v19566_v26 = vld [vmem:[#allocation400_spill] sm:$0xff] }
 0x802   : > { %10756 = vst [vmem:[%s14929_s24 + $0x20] sm:$0xff] %v10736_v40  ;;  %v16235_v37 = vrot.slane %v8800_v55, %v11431_v25  ;;  %v6307_v57 = vshrl.u32 %v16190_v32, 3  ;;  %vm19547_vm10 = vcmask 490496   ;;  %v8783_v43 = vrot.slane %v8769_v47, %v11428_v24 }
 0x803   : > { %v3082_v54 = vsel %vm19547_vm10, %v3081_v46, %v19546_v10  ;;  %vm19549_vm12 = vcmask 261120   ;;  %vm19552_vm11 = vcmask 80896   ;;  %v6297_v7 = vmul.u32 10, %v6296_v13  ;;  %v16277_v20 = vpop.permute.xlu1 %9845  ;;  %v19572_v13 = vld [vmem:[#allocation392_spill] sm:$0xff] }
 0x804   : > { %10061 = vrot.lane.b32.xlu1 %v8763_v61, %s18578_s12  ;;  %10057 = vrot.lane.b32.xlu0 %v8766_v58, %s18674_s3  ;;  %v3092_v53 = vsel %vm19549_vm12, %v3091_v27, %v19548_v35  ;;  %v6033_v16 = vsel %vm19552_vm11, %v19551_v0, %v19550_v56  ;;  %v8852_v48 = vcombine.low %v19554_v21, %v19553_v33  ;;  %v16254_v39 = vpop.permute.xlu0 %9833  ;;  %vm19556_vm0 = vcmask 572416  }
 0x805   : > { %v8816_v22 = vcombine.low %v8783_v43, %v8799_v44  ;;  %v8832_v32 = vcombine.high %v16235_v37, %v18440_v12  ;;  %v8767_v34 = vcombine.high %v8763_v61, %v18440_v12  ;;  %v8815_v36 = vrot.slane %v8801_v3, %v11431_v25  ;;  %v19574_v3 = vld [vmem:[#allocation402_spill] sm:$0xff] }
 0x806   : > { %v3083_v28 = vsel %vm19556_vm0, %v3082_v54, %v19555_v51  ;;  %v6308_v4 = vmul.u32 10, %v6307_v57  ;;  %vm19558_vm14 = vcmask 343040   ;;  %vm19560_vm8 = vcmask 162816   ;;  %v19576_v57 = vld [vmem:[#allocation395_spill] sm:$0xff] }
 0x807   : > { %v3093_v60 = vsel %vm19558_vm14, %v3092_v53, %v19557_v42  ;;  %v6034_v62 = vsel %vm19560_vm8, %v6033_v16, %v19559_v11  ;;  %v8836_v63 = vcombine.low %v19562_v45, %v19561_v15  ;;  %vm19564_vm4 = vcmask 244736   ;;  %v16305_v53 = vpop.permute.xlu1 %9853  ;;  %v19592_v11 = vld [vmem:[#allocation407_spill] sm:$0xff] }
 0x808   : > { %10069 = vrot.lane.b32.xlu1 %v8832_v32, %s18581_s14  ;;  %10065 = vrot.lane.b32.xlu0 %v8767_v34, %s18482_s0  ;;  %v6035_v14 = vsel %vm19564_vm4, %v6034_v62, %v19563_v2  ;;  %v16271_v41 = vsub.s32 %v16154_v59, %v6297_v7  ;;  %vm19567_vm6 = vcmask 15360   ;;  %v8860_v1 = vrot.slane %v8852_v48, %v11428_v24  ;;  %v16280_v40 = vpop.permute.xlu0 %9841  ;;  %v19570_v59 = vld [vmem:[#allocation154_spill] sm:$0xff]  ;;  %v19580_v7 = vld [vmem:[#allocation145_spill] sm:$0xff]  ;;  %v19586_v34 = vld [vmem:[#allocation404_spill] sm:$0xff]  ;;  %s19654_s14 = smov 120  }
 0x809   : > { %v6045_v55 = vsel %vm19567_vm6, %v19566_v26, %v19565_v30  ;;  %v8817_v49 = vcombine.high %v8783_v43, %v8799_v44  ;;  %v8833_v38 = vcombine.high %v8815_v36, %v18440_v12  ;;  %v8824_v47 = vrot.slane %v8816_v22, %v11431_v25  ;;  %v19582_v22 = vld [vmem:[#allocation155_spill] sm:$0xff] }
 0x80a   : > { %vm19569_vm10 = vcmask 654336   ;;  %vm19571_vm12 = vcmask 424960   ;;  %v16288_v27 = vsub.s32 %v16157_v19, %v6308_v4  ;;  %vm19573_vm11 = vcmask 326656   ;;  %v19578_v19 = vld [vmem:[#allocation405_spill] sm:$0xff]  ;;  %v19622_v42 = vld [vmem:[#allocation147_spill] sm:$0xff] }
 0x80b   : > { %v3084_v46 = vsel %vm19569_vm10, %v3083_v28, %v19568_v31  ;;  %v3094_v9 = vsel %vm19571_vm12, %v3093_v60, %v19570_v59  ;;  %v6036_v44 = vsel %vm19573_vm11, %v6035_v14, %v19572_v13  ;;  %vm19575_vm0 = vcmask 97280   ;;  %v19588_v28 = vld [vmem:[#allocation397_spill] sm:$0xff]  ;;  %v16346_v14 = vpop.permute.xlu1 %9861  ;;  %v19598_v31 = vld [vmem:[#allocation156_spill] sm:$0xff]  ;;  %v19600_v59 = vld [vmem:[#allocation406_spill] sm:$0xff] }
 0x80c   : > { %v6046_v61 = vsel %vm19575_vm0, %v6045_v55, %v19574_v3  ;;  %v8844_v58 = vrot.slane %v8836_v63, %v11428_v24  ;;  %10077 = vrot.lane.b32.xlu1 %v8833_v38, %s18445_s20  ;;  %10073 = vrot.lane.b32.xlu0 %v8815_v36, %s18485_s7  ;;  %vm19577_vm14 = vcmask 408576   ;;  %vm6410_vm8 = vcmp.ne.s32.totalorder %v16271_v41, 0  ;;  %v16308_v0 = vpop.permute.xlu0 %9849  ;;  %v19596_v38 = vld [vmem:[#allocation146_spill] sm:$0xff]  ;;  %s19636_s7 = smov 110   ;;  %s19665_s20 = smov 22  }
 0x80d   : > { %v6037_v10 = vsel %vm19577_vm14, %v6036_v44, %v19576_v57  ;;  %vm6430_vm4 = vcmp.lt.s32.totalorder %v16271_v41, 0  ;;  %vm19579_vm6 = vcmask 179200   ;;  %v8853_v43 = vcombine.high %v19554_v21, %v19553_v33  ;;  %v19584_v33 = vld [vmem:[#allocation394_spill] sm:$0xff]  ;;  %v19603_v44 = vld [vmem:[#allocation396_spill] sm:$0xff] }
 0x80e   : > { %v6047_v54 = vsel %vm19579_vm6, %v6046_v61, %v19578_v19  ;;  %v8868_v35 = vcombine.low %v8844_v58, %v8860_v1  ;;  %v8834_v56 = vcombine.high %v8824_v47, %v18440_v12  ;;  %v8831_v16 = vrot.slane %v8817_v49, %v11431_v25  ;;  %v19608_v19 = vld [vmem:[#allocation556_spill] sm:$0xff] }
 0x80f   : > { %vm19581_vm10 = vcmask 736256   ;;  %vm19583_vm12 = vcmask 506880   ;;  %vm6411_vm11 = vcmp.ne.s32.totalorder %v16288_v27, 0  ;;  %vm6431_vm0 = vcmp.lt.s32.totalorder %v16288_v27, 0 }
 0x810   : > { %v3085_v48 = vsel %vm19581_vm10, %v3084_v46, %v19580_v7  ;;  %v3095_v32 = vsel %vm19583_vm12, %v3094_v9, %v19582_v22  ;;  %vm19585_vm14 = vcmask 490496   ;;  %vm19587_vm6 = vcmask 261120   ;;  %10085 = vrot.lane.b32.xlu1 %v8834_v56, %s18446_s8  ;;  %10081 = vrot.lane.b32.xlu0 %v8824_v47, %s18488_s1  ;;  %vm16331_vm12 = vmand %vm6430_vm4, %vm6410_vm8  ;;  %v16349_v55 = vpop.permute.xlu0 %9857  ;;  %v19609_v7 = vld [vmem:[#allocation157_spill] sm:$0xff]  ;;  %s19620_s1 = smov 90   ;;  %s19637_s8 = smov 100  }
 0x811   : > { %v6038_v21 = vsel %vm19585_vm14, %v6037_v10, %v19584_v33  ;;  %v6048_v36 = vsel %vm19587_vm6, %v6047_v54, %v19586_v34  ;;  %v8837_v51 = vcombine.high %v19562_v45, %v19561_v15  ;;  %vm19589_vm10 = vcmask 572416   ;;  %vm16339_vm6 = vmand %vm6431_vm0, %vm6411_vm11 }
 0x812   : > { %v6039_v4 = vsel %vm19589_vm10, %v6038_v21, %v19588_v28  ;;  %v6470_v60 = vadd.s32 10, %v16271_v41  ;;  %vm19593_vm14 = vcmask 343040   ;;  %v6471_v15 = vadd.s32 10, %v16288_v27  ;;  %v19615_v21 = vld [vmem:[#allocation408_spill] sm:$0xff] }
 0x813   : > { %v6049_v62 = vsel %vm19593_vm14, %v6048_v36, %v19592_v11  ;;  %v16344_v63 = vrot.slane %v8853_v43, %v11428_v24  ;;  %v8869_v2 = vcombine.high %v8844_v58, %v8860_v1  ;;  %v8835_v30 = vcombine.high %v8831_v16, %v18440_v12  ;;  %v19605_v58 = vld [vmem:[#allocation409_spill] sm:$0xff]  ;;  %v9870_v43 = vpop.permute.xlu1 %9869 }
 0x814   : > { %v8876_v49 = vrot.slane %v8868_v35, %v11431_v25  ;;  %vm19597_vm8 = vcmask 818176   ;;  %vm19599_vm4 = vcmask 588800   ;;  %vm19601_vm11 = vcmask 424960   ;;  %10089 = vrot.lane.b32.xlu0 %v8831_v16, %s18296_s6  ;;  %v9866_v56 = vpop.permute.xlu0 %9865  ;;  %v19617_v36 = vld [vmem:[#allocation577_spill] sm:$0xff]  ;;  %s19621_s6 = smov 80  }
 0x815   : > { %v3086_v47 = vsel %vm19597_vm8, %v3085_v48, %v19596_v38  ;;  %v3096_v46 = vsel %vm19599_vm4, %v3095_v32, %v19598_v31  ;;  %v6050_v9 = vsel %vm19601_vm11, %v6049_v62, %v19600_v59  ;;  %v8851_v13 = vrot.slane %v8837_v51, %v11428_v24  ;;  %10093 = vrot.lane.b32.xlu1 %v8835_v30, %s18447_s10  ;;  %v19611_v48 = vld [vmem:[#allocation399_spill] sm:$0xff]  ;;  %v19618_v51 = vld [vmem:[#allocation534_spill] sm:$0xff]  ;;  %s19653_s10 = smov 2  }
 0x816   : > { %vm19602_vm0 = vcmask 80896   ;;  %vm19604_vm10 = vcmask 654336   ;;  %v6490_v61 = vsel %vm16331_vm12, %v6470_v60, %v16271_v41  ;;  %vm19606_vm14 = vcmask 506880   ;;  %v19624_v60 = vld [vmem:[#allocation411_spill] sm:$0xff]  ;;  %v19627_v31 = vld [vmem:[#allocation158_spill] sm:$0xff] }
 0x817   : > { %v10446_v1 = vsel %vm19602_vm0, %v15473_v29, %v16214_v50  ;;  %v6040_v3 = vsel %vm19604_vm10, %v6039_v4, %v19603_v44  ;;  %v6051_v57 = vsel %vm19606_vm14, %v6050_v9, %v19605_v58  ;;  %v6491_v10 = vsel %vm16339_vm6, %v6471_v15, %v16288_v27  ;;  %v19607_v50 = vld [vmem:[#allocation587_spill] sm:$0xff]  ;;  %v19638_v58 = vld [vmem:[#allocation401_spill] sm:$0xff] }
 0x818   : > { %v8884_v29 = vcombine.low %v8851_v13, %v16344_v63  ;;  %v8920_v54 = vcombine.low %v19608_v19, %v19607_v50  ;;  %v8900_v35 = vcombine.high %v8876_v49, %v18440_v12  ;;  %v8883_v16 = vrot.slane %v8869_v2, %v11431_v25  ;;  %10097 = vrot.lane.b32.xlu0 %v8876_v49, %s19621_s6  ;;  %v9878_v2 = vpop.permute.xlu1 %9877  ;;  %v9874_v38 = vpop.permute.xlu0 %9873  ;;  %s19681_s6 = smov 42  }
 0x819   : > { %vm19610_vm12 = vcmask 670720   ;;  %vm19612_vm8 = vcmask 736256   ;;  %vm19613_vm4 = vcmask 162816   ;;  %vm19614_vm6 = vcmask 15360  }
 0x81a   : > { %v3097_v41 = vsel %vm19610_vm12, %v3096_v46, %v19609_v7  ;;  %v6041_v22 = vsel %vm19612_vm8, %v6040_v3, %v19611_v48  ;;  %v10447_v27 = vsel %vm19613_vm4, %v10446_v1, %v16211_v17  ;;  %v10458_v32 = vsel %vm19614_vm6, %v16346_v14, %v9866_v56  ;;  %10101 = vrot.lane.b32.xlu1 %v8900_v35, %s19620_s1  ;;  %vm19625_vm14 = vmmov %vm19610_vm12  ;;  %v19629_v46 = vld [vmem:[#allocation398_spill] sm:$0xff]  ;;  %s19666_s1 = smov 12  }
 0x81b   : > { %v6510_v33 = vcvt.s32.f32 %v6490_v61  ;;  %vm19616_vm11 = vcmask 588800   ;;  %v8904_v28 = vcombine.low %v19618_v51, %v19617_v36  ;;  %vm19619_vm0 = vcmask 244736   ;;  %v19633_v1 = vld [vmem:[#allocation410_spill] sm:$0xff] }
 0x81c   : > { %v6052_v34 = vsel %vm19616_vm11, %v6051_v57, %v19615_v21  ;;  %v10448_v4 = vsel %vm19619_vm0, %v10447_v27, %v16231_v23  ;;  %vm19623_vm10 = vcmask 900096   ;;  %v6511_v62 = vcvt.s32.f32 %v6491_v10  ;;  %10105 = vrot.lane.b32.xlu0 %v8883_v16, %s19637_s8  ;;  %v19640_v10 = vld [vmem:[#allocation413_spill] sm:$0xff]  ;;  %v9886_v35 = vpop.permute.xlu1 %9885  ;;  %v9882_v7 = vpop.permute.xlu0 %9881  ;;  %v19650_v21 = vld [vmem:[#allocation412_spill] sm:$0xff]  ;;  %s19692_s8 = smov 52  }
 0x81d   : > { %v3087_v17 = vsel %vm19623_vm10, %v3086_v47, %v19622_v42  ;;  %v6053_v11 = vsel %vm19625_vm14, %v6052_v34, %v19624_v60  ;;  %v8885_v15 = vcombine.high %v8851_v13, %v16344_v63  ;;  %v16401_v45 = vrot.slane %v8920_v54, %v11428_v24  ;;  %v19646_v27 = vld [vmem:[#allocation161_spill] sm:$0xff]  ;;  %v19656_v60 = vld [vmem:[#allocation415_spill] sm:$0xff] }
 0x81e   : > { %v8901_v30 = vcombine.high %v8883_v16, %v18440_v12  ;;  %vm19626_vm12 = vcmask 97280   ;;  %v8892_v49 = vrot.slane %v8884_v29, %v11431_v25  ;;  %vm19628_vm8 = vcmask 752640  }
 0x81f   : > { %v10459_v23 = vsel %vm19626_vm12, %v10458_v32, %v9870_v43  ;;  %v3098_v47 = vsel %vm19628_vm8, %v3097_v41, %v19627_v31  ;;  %vm19630_vm4 = vcmask 818176   ;;  %vm19631_vm6 = vcmask 326656   ;;  %vm19634_vm0 = vmmov %vm19628_vm8  ;;  %v19643_v41 = vld [vmem:[#allocation159_spill] sm:$0xff] }
 0x820   : > { %v6042_v59 = vsel %vm19630_vm4, %v6041_v22, %v19629_v46  ;;  %v10449_v63 = vsel %vm19631_vm6, %v10448_v4, %v16228_v8  ;;  %vm19632_vm11 = vcmask 179200   ;;  %v6530_v13 = vmul.f32 0.1, %v6510_v33  ;;  %10109 = vrot.lane.b32.xlu1 %v8901_v30, %s19636_s7  ;;  %v19645_v22 = vld [vmem:[#allocation162_spill] sm:$0xff]  ;;  %10113 = vrot.lane.b32.xlu0 %v8892_v49, %s19654_s14  ;;  %s19682_s7 = smov 32   ;;  %s19713_s14 = smov 92  }
 0x821   : > { %v10460_v9 = vsel %vm19632_vm11, %v10459_v23, %v9874_v38  ;;  %v6054_v44 = vsel %vm19634_vm0, %v6053_v11, %v19633_v1  ;;  %v8912_v3 = vrot.slane %v8904_v28, %v11428_v24  ;;  %vm19635_vm10 = vcmask 408576   ;;  %v19660_v23 = vld [vmem:[#allocation160_spill] sm:$0xff]  ;;  %v19672_v1 = vld [vmem:[#allocation586_spill] sm:$0xff] }
 0x822   : > { %v10450_v61 = vsel %vm19635_vm10, %v10449_v63, %v16254_v39  ;;  %vm19639_vm14 = vcmask 900096   ;;  %vm19641_vm12 = vcmask 834560   ;;  %v6531_v29 = vmul.f32 0.1, %v6511_v62  ;;  %v19669_v63 = vld [vmem:[#allocation175_spill] sm:$0xff] }
 0x823   : > { %v6043_v57 = vsel %vm19639_vm14, %v6042_v59, %v19638_v58  ;;  %v6055_v8 = vsel %vm19641_vm12, %v6054_v44, %v19640_v10  ;;  %v8921_v54 = vcombine.high %v19608_v19, %v19607_v50  ;;  %v8936_v43 = vcombine.low %v8912_v3, %v16401_v45  ;;  %vm19644_vm4 = vmmov %vm19641_vm12  ;;  %v19673_v44 = vld [vmem:[#allocation555_spill] sm:$0xff] }
 0x824   : > { %v8902_v56 = vcombine.high %v8892_v49, %v18440_v12  ;;  %vm19642_vm8 = vcmask 261120   ;;  %v8899_v16 = vrot.slane %v8885_v15, %v11431_v25  ;;  %v3099_v48 = vsel %vm19644_vm4, %v3098_v47, %v19643_v41 }
 0x825   : > { %v10461_v39 = vsel %vm19642_vm8, %v10460_v9, %v9878_v2  ;;  %vm19647_vm6 = vcmask 31744   ;;  %vm19648_vm11 = vcmask 490496   ;;  %vm19649_vm0 = vcmask 343040   ;;  %v9890_v2 = vpop.permute.xlu0 %9889 }
 0x826   : > { %v3102_v32 = vsel %vm19647_vm6, %v19646_v27, %v19645_v22  ;;  %v10451_v50 = vsel %vm19648_vm11, %v10450_v61, %v16250_v52  ;;  %v10462_v19 = vsel %vm19649_vm0, %v10461_v39, %v9882_v7  ;;  %v6550_v33 = vadd.f32 0.05, %v6530_v13  ;;  %10117 = vrot.lane.b32.xlu1 %v8902_v56, %s19653_s10  ;;  %10121 = vrot.lane.b32.xlu0 %v8899_v16, %s19666_s1  ;;  %v19683_v22 = vld [vmem:[#allocation164_spill] sm:$0xff]  ;;  %s19706_s10 = smov 72   ;;  %s19734_s1 = smov 4  }
 0x827   : > { %vm19651_vm10 = vcmask 916480   ;;  %v8905_v28 = vcombine.high %v19618_v51, %v19617_v36  ;;  %vm19652_vm14 = vcmask 572416   ;;  %vm19655_vm12 = vcmask 982016   ;;  %v9894_v36 = vpop.permute.xlu1 %9893 }
 0x828   : > { %v6056_v34 = vsel %vm19651_vm10, %v6055_v8, %v19650_v21  ;;  %v10452_v4 = vsel %vm19652_vm14, %v10451_v50, %v16280_v40  ;;  %v6044_v42 = vsel %vm19655_vm12, %v6043_v57, %v19566_v26  ;;  %v6551_v52 = vadd.f32 0.05, %v6531_v29  ;;  %vm19659_vm6 = vmmov %vm19655_vm12 }
 0x829   : > { %vm19657_vm8 = vcmask 998400   ;;  %v16451_v62 = vrot.slane %v8921_v54, %v11428_v24  ;;  %v8937_v15 = vcombine.high %v8912_v3, %v16401_v45  ;;  %v8903_v51 = vcombine.high %v8899_v16, %v18440_v12  ;;  %vm19661_vm11 = vmmov %vm19651_vm10  ;;  %v9898_v10 = vpop.permute.xlu0 %9897  ;;  %v19676_v54 = vld [vmem:[#allocation578_spill] sm:$0xff] }
 0x82a   : > { %v6057_v11 = vsel %vm19657_vm8, %v6056_v34, %v19656_v60  ;;  %vm19658_vm4 = vcmask 424960   ;;  %v8944_v30 = vrot.slane %v8936_v43, %v11431_v25  ;;  %v3088_v26 = vsel %vm19659_vm6, %v3087_v17, %v19529_v5  ;;  %v19667_v5 = vld [vmem:[#allocation163_spill] sm:$0xff]  ;;  %v19677_v43 = vld [vmem:[#allocation533_spill] sm:$0xff] }
 0x82b   : > { %v10463_v40 = vsel %vm19658_vm4, %v10462_v19, %v9886_v35  ;;  %v3100_v38 = vsel %vm19661_vm11, %v3099_v48, %v19660_v23  ;;  %vm19662_vm0 = vcmask 654336   ;;  %vm19663_vm10 = vcmask 506880   ;;  %10125 = vrot.lane.b32.xlu1 %v8903_v51, %s19665_s20  ;;  %v9902_v58 = vpop.permute.xlu1 %9901  ;;  %v19696_v23 = vld [vmem:[#allocation558_spill] sm:$0xff]  ;;  %s19725_s20 = smov 112  }
 0x82c   : > { %v10453_v49 = vsel %vm19662_vm0, %v10452_v4, %v16277_v20  ;;  %v10464_v31 = vsel %vm19663_vm10, %v10463_v40, %v9890_v2  ;;  %v6570_v45 = vmul.f32 %v6550_v33, %v6044_v42  ;;  %v16465_v47 = vadd.s32 1536, %v14519_v6  ;;  %v19670_v20 = vld [vmem:[#allocation174_spill] sm:$0xff]  ;;  %10129 = vrot.lane.b32.xlu0 %v8944_v30, %s19682_s7  ;;  %v19693_v40 = vld [vmem:[#allocation177_spill] sm:$0xff] }
 0x82d   : > { %v8919_v46 = vrot.slane %v8905_v28, %v11428_v24  ;;  %vm19664_vm14 = vcmask 736256   ;;  %vm19668_vm12 = vcmask 113664   ;;  %vm19671_vm8 = vcmask 48128   ;;  %v9906_v28 = vpop.permute.xlu0 %9905 }
 0x82e   : > { %v10454_v59 = vsel %vm19664_vm14, %v10453_v49, %v16308_v0  ;;  %v3103_v17 = vsel %vm19668_vm12, %v3102_v32, %v19667_v5  ;;  %v3115_v9 = vsel %vm19671_vm8, %v19670_v20, %v19669_v63  ;;  %v6571_v13 = vmul.f32 %v6551_v52, %v6057_v11  ;;  %v19685_v32 = vld [vmem:[#allocation176_spill] sm:$0xff] }
 0x82f   : > { %v8988_v3 = vcombine.low %v19673_v44, %v19672_v1  ;;  %v8952_v61 = vcombine.low %v8919_v46, %v16451_v62  ;;  %v8968_v0 = vcombine.high %v8944_v30, %v18440_v12  ;;  %vm19674_vm4 = vcmask 588800   ;;  %v9910_v21 = vpop.permute.xlu1 %9909 }
 0x830   : > { %v10465_v57 = vsel %vm19674_vm4, %v10464_v31, %v9894_v36  ;;  %v8951_v8 = vrot.slane %v8937_v15, %v11431_v25  ;;  %vm19675_vm6 = vcmask 998400   ;;  %v8972_v35 = vcombine.low %v19677_v43, %v19676_v54 }
 0x831   : > { %v3101_v29 = vsel %vm19675_vm6, %v3100_v38, %v19646_v27  ;;  %vm19678_vm11 = vcmask 818176   ;;  %vm19679_vm0 = vcmask 670720   ;;  %v6590_v7 = vadd.f32 %v6570_v45, %v3088_v26  ;;  %10133 = vrot.lane.b32.xlu1 %v8968_v0, %s19681_s6  ;;  %v19695_v26 = vld [vmem:[#allocation589_spill] sm:$0xff]  ;;  %v19704_v0 = vld [vmem:[#allocation536_spill] sm:$0xff] }
 0x832   : > { %v10455_v56 = vsel %vm19678_vm11, %v10454_v59, %v16305_v53  ;;  %v10466_v39 = vsel %vm19679_vm0, %v10465_v57, %v9898_v10  ;;  %v16491_v16 = vmul.u32.u64.low 3435973837, %v16465_v47  ;;  %v16492_v41 = vmul.u32.u64.high 3435973837, %v16465_v47, %v16491_v16  ;;  %10137 = vrot.lane.b32.xlu0 %v8951_v8, %s19692_s8  ;;  %v16538_v59 = vpop.permute.xlu0 %9913  ;;  %v19707_v10 = vld [vmem:[#allocation178_spill] sm:$0xff]  ;;  %s20199_s8 = sld [smem:[#allocation593_spill]] }
 0x833   : > { %vm19680_vm10 = vcmask 900096   ;;  %vm19684_vm14 = vcmask 195584   ;;  %vm19686_vm12 = vcmask 130048   ;;  %v6591_v50 = vadd.f32 %v6571_v13, %v3101_v29  ;;  %v16535_v45 = vpop.permute.xlu1 %9917  ;;  %v19701_v13 = vld [vmem:[#allocation166_spill] sm:$0xff] }
 0x834   : > { %v10456_v48 = vsel %vm19680_vm10, %v10455_v56, %v16349_v55  ;;  %v3104_v27 = vsel %vm19684_vm14, %v3103_v17, %v19683_v22  ;;  %v3116_v53 = vsel %vm19686_vm12, %v3115_v9, %v19685_v32  ;;  %v16503_v19 = vrot.slane %v8988_v3, %v11428_v24 }
 0x835   : > { %v8953_v33 = vcombine.high %v8919_v46, %v16451_v62  ;;  %v8969_v34 = vcombine.high %v8951_v8, %v18440_v12  ;;  %vm19687_vm8 = vcmask 752640   ;;  %v8960_v4 = vrot.slane %v8952_v61, %v11431_v25  ;;  %v19690_v62 = vld [vmem:[#allocation165_spill] sm:$0xff] }
 0x836   : > { %v10467_v55 = vsel %vm19687_vm8, %v10466_v39, %v9902_v58  ;;  %v16510_v42 = vadd.s32 1664, %v14519_v6  ;;  %v16513_v52 = vrot.slane %v8972_v35, %v11428_v24  ;;  %vm19688_vm4 = vcmask 982016   ;;  %v19703_v58 = vld [vmem:[#allocation579_spill] sm:$0xff] }
 0x837   : > { %v10457_v11 = vsel %vm19688_vm4, %v10456_v48, %v16346_v14  ;;  %vm19689_vm6 = vcmask 834560   ;;  %vm19691_vm11 = vcmask 277504   ;;  %v10615_v51 = vrot.slane %v6590_v7, %v19017_v18  ;;  %10141 = vrot.lane.b32.xlu1 %v8969_v34, %s19323_s21  ;;  %s19705_s21 = smov 82   ;;  %10145 = vrot.lane.b32.xlu0 %v8960_v4, %s19706_s10  ;;  %v19709_v39 = vld [vmem:[#allocation591_spill] sm:$0xff]  ;;  %v19710_v7 = vld [vmem:[#allocation560_spill] sm:$0xff]  ;;  %v16565_v48 = vpop.permute.xlu1 %9925 }
 0x838   : > { %v10468_v15 = vsel %vm19689_vm6, %v10467_v55, %v9906_v28  ;;  %v3105_v36 = vsel %vm19691_vm11, %v3104_v27, %v19690_v62  ;;  %vm19694_vm0 = vcmask 211968   ;;  %v9004_v30 = vcombine.low %v16513_v52, %v16503_v19  ;;  %v16568_v27 = vpop.permute.xlu0 %9921  ;;  %v19714_v55 = vld [vmem:[#allocation167_spill] sm:$0xff]  ;;  %v19719_v62 = vld [vmem:[#allocation557_spill] sm:$0xff] }
 0x839   : > { %v3117_v2 = vsel %vm19694_vm0, %v3116_v53, %v19693_v40  ;;  %v9057_v14 = vcombine.high %v19696_v23, %v19695_v26  ;;  %v10619_v38 = vrot.slane %v6591_v50, %v19017_v18  ;;  %vm16530_vm10 = vcmp.gt.f32.partialorder %v10457_v11, %v10615_v51 }
 0x83a   : > { %vm19699_vm14 = vcmask 916480   ;;  %v8970_v46 = vcombine.high %v8960_v4, %v18440_v12  ;;  %v8967_v5 = vrot.slane %v8953_v33, %v11431_v25  ;;  %vm19700_vm12 = vcmask 998400   ;;  %v19711_v33 = vld [vmem:[#allocation580_spill] sm:$0xff]  ;;  %v19716_v4 = vld [vmem:[#allocation179_spill] sm:$0xff] }
 0x83b   : > { %v10469_v31 = vsel %vm19699_vm14, %v10468_v15, %v9910_v21  ;;  %v16542_v17 = vmul.u32.u64.low 3435973837, %v16510_v42  ;;  %v16543_v63 = vmul.u32.u64.high 3435973837, %v16510_v42, %v16542_v17  ;;  %vm19702_vm8 = vcmask 359424   ;;  %v19712_v21 = vld [vmem:[#allocation538_spill] sm:$0xff]  ;;  %v19718_v15 = vld [vmem:[#allocation588_spill] sm:$0xff] }
 0x83c   : > { %v10470_v9 = vsel %vm19700_vm12, %v10469_v31, %v16538_v59  ;;  %v3106_v3 = vsel %vm19702_vm8, %v3105_v36, %v19701_v13  ;;  %v6318_v61 = vshrl.u32 %v16492_v41, 3  ;;  %v9041_v57 = vcombine.high %v19704_v0, %v19703_v58  ;;  %10149 = vrot.lane.b32.xlu1 %v8970_v46, %s19705_s21  ;;  %10153 = vrot.lane.b32.xlu0 %v8967_v5, %s19713_s14  ;;  %v19720_v31 = vld [vmem:[#allocation581_spill] sm:$0xff]  ;;  %v19721_v46 = vld [vmem:[#allocation535_spill] sm:$0xff]  ;;  %v19722_v17 = vld [vmem:[#allocation180_spill] sm:$0xff]  ;;  %s20200_s21 = smov %s20199_s8 }
 0x83d   : > { %vm10663_vm4 = vcmp.gt.f32.partialorder %v10470_v9, %v10619_v38  ;;  %vm19708_vm6 = vcmask 293888   ;;  %v16557_v29 = vrot.slane %v9057_v14, %v11428_v24  ;;  %v10882_v35 = vsel %vm16530_vm10, 1.0, %v18440_v12  ;;  %v16595_v38 = vpop.permute.xlu0 %9929  ;;  %v19726_v13 = vld [vmem:[#allocation168_spill] sm:$0xff] }
 0x83e   : > { %v3118_v8 = vsel %vm19708_vm6, %v3117_v2, %v19707_v10  ;;  %v10883_v56 = vsel %vm10663_vm4, 1.0, %v18440_v12  ;;  %v9192_v16 = vcombine.low %v19710_v7, %v19709_v39  ;;  %v8971_v22 = vcombine.high %v8967_v5, %v18440_v12 }
 0x83f   : > { %v10737_v41 = vcombine.low %v10882_v35, %v10883_v56  ;;  %v9012_v32 = vrot.slane %v9004_v30, %v11431_v25  ;;  %v6319_v53 = vmul.u32 10, %v6318_v61  ;;  %v16572_v50 = vrot.slane %v9041_v57, %v11428_v24  ;;  %v16592_v30 = vpop.permute.xlu1 %9933 }
 0x840   : > { %v9176_v34 = vcombine.low %v19712_v21, %v19711_v33  ;;  %10157 = vrot.lane.b32.xlu1 %v8971_v22, %s19354_s11  ;;  %vm19715_vm11 = vcmask 441344   ;;  %vm19717_vm0 = vcmask 375808   ;;  %v9124_v36 = vcombine.low %v19719_v62, %v19718_v15  ;;  %s19724_s11 = smov 122  }
 0x841   : > { %10757 = vst [vmem:[%s14929_s24 + $0x28] sm:$0xff] %v10737_v41  ;;  %v3107_v28 = vsel %vm19715_vm11, %v3106_v3, %v19714_v55  ;;  %v3119_v11 = vsel %vm19717_vm0, %v3118_v8, %v19716_v4  ;;  %v9005_v51 = vcombine.high %v16513_v52, %v16503_v19  ;;  %v9089_v40 = vcombine.high %v16572_v50, %v16557_v29  ;;  %v16624_v35 = vpop.permute.xlu0 %9937  ;;  %v19736_v55 = vld [vmem:[#allocation426_spill] sm:$0xff] }
 0x842   : > { %v16590_v2 = vrot.slane %v9192_v16, %v11428_v24  ;;  %v9036_v14 = vcombine.high %v9012_v32, %v18440_v12  ;;  %v6329_v49 = vshrl.u32 %v16543_v63, 3  ;;  %v9108_v5 = vcombine.low %v19721_v46, %v19720_v31  ;;  %10161 = vrot.lane.b32.xlu0 %v9012_v32, %s19725_s20  ;;  %v19728_v16 = vld [vmem:[#allocation181_spill] sm:$0xff]  ;;  %s11250_s20 = smov [#allocation5]  }
 0x843   : > { %vm19723_vm10 = vcmask 457728   ;;  %v16603_v52 = vsub.s32 %v16465_v47, %v6319_v53  ;;  %v16606_v9 = vrot.slane %v9176_v34, %v11428_v24  ;;  %vm19727_vm14 = vcmask 523264   ;;  %v16621_v10 = vpop.permute.xlu1 %9941 }
 0x844   : > { %v3120_v19 = vsel %vm19723_vm10, %v3119_v11, %v19722_v17  ;;  %10165 = vrot.lane.b32.xlu1 %v9036_v14, %s19724_s11  ;;  %v3108_v3 = vsel %vm19727_vm14, %v3107_v28, %v19726_v13  ;;  %v8989_v63 = vcombine.high %v19673_v44, %v19672_v1  ;;  %v16615_v61 = vrot.slane %v9124_v36, %v11428_v24  ;;  %v19730_v44 = vld [vmem:[#allocation414_spill] sm:$0xff]  ;;  %v19742_v17 = vld [vmem:[#allocation416_spill] sm:$0xff] }
 0x845   : > { %v9193_v47 = vcombine.high %v19710_v7, %v19709_v39  ;;  %v9209_v57 = vcombine.high %v16606_v9, %v16590_v2  ;;  %v9103_v8 = vrot.slane %v9089_v40, %v11431_v25  ;;  %v9019_v56 = vrot.slane %v9005_v51, %v11431_v25  ;;  %v19732_v7 = vld [vmem:[#allocation417_spill] sm:$0xff] }
 0x846   : > { %vm19729_vm12 = vcmask 539648   ;;  %vm19731_vm8 = vcmask 31744   ;;  %v6330_v22 = vmul.u32 10, %v6329_v49  ;;  %v16633_v39 = vrot.slane %v9108_v5, %v11428_v24  ;;  %v19738_v40 = vld [vmem:[#allocation169_spill] sm:$0xff]  ;;  %v19740_v49 = vld [vmem:[#allocation182_spill] sm:$0xff] }
 0x847   : > { %v3121_v1 = vsel %vm19729_vm12, %v3120_v19, %v19728_v16  ;;  %v6058_v41 = vsel %vm19731_vm8, %v19656_v60, %v19730_v44  ;;  %vm19733_vm4 = vcmask 113664   ;;  %vm6412_vm6 = vcmp.ne.s32.totalorder %v16603_v52, 0  ;;  %10169 = vrot.lane.b32.xlu0 %v9019_v56, %s19734_s1  ;;  %v19735_v60 = vld [vmem:[#allocation429_spill] sm:$0xff]  ;;  %s11103_s1 = sshll.u32 %s11250_s20, 4  ;;  %s11104_s1 = int_to_ptr.vmem [resolvable:$false] %s11103_s1 }
 0x848   : > { %v6059_v32 = vsel %vm19733_vm4, %v6058_v41, %v19732_v7  ;;  %v8973_v53 = vcombine.high %v19677_v43, %v19676_v54  ;;  %v9177_v34 = vcombine.high %v19712_v21, %v19711_v33  ;;  %10217 = vrot.lane.b32.xlu1 %v9103_v8, %s19111_s13  ;;  %vm6432_vm11 = vcmp.lt.s32.totalorder %v16603_v52, 0  ;;  %v16656_v43 = vpop.permute.xlu1 %9949  ;;  %v16659_v21 = vpop.permute.xlu0 %9945  ;;  %s19746_s13 = smov 14  }
 0x849   : > { %vm19737_vm0 = vcmask 48128   ;;  %v16649_v4 = vrot.slane %v8989_v63, %v11428_v24  ;;  %v9140_v11 = vcombine.low %v16633_v39, %v16615_v61  ;;  %v16654_v54 = vrot.slane %v9193_v47, %v11428_v24  ;;  %v19744_v47 = vld [vmem:[#allocation428_spill] sm:$0xff] }
 0x84a   : > { %v6071_v28 = vsel %vm19737_vm0, %v19736_v55, %v19735_v60  ;;  %v9037_v33 = vcombine.high %v9019_v56, %v18440_v12  ;;  %v9107_v36 = vcombine.high %v9103_v8, %v18440_v12  ;;  %v16663_v51 = vrot.slane %v9209_v57, %v11431_v25  ;;  %vm16689_vm0 = vmand %vm6432_vm11, %vm6412_vm6  ;;  %v19753_v60 = vld [vmem:[#allocation170_spill] sm:$0xff] }
 0x84b   : > { %vm19739_vm10 = vcmask 605184   ;;  %vm19741_vm14 = vcmask 621568   ;;  %vm19743_vm12 = vcmask 195584   ;;  %v6331_v13 = vsub.s32 %v16510_v42, %v6330_v22 }
 0x84c   : > { %v3109_v14 = vsel %vm19739_vm10, %v3108_v3, %v19738_v40  ;;  %v3122_v5 = vsel %vm19741_vm14, %v3121_v1, %v19740_v49  ;;  %v6060_v19 = vsel %vm19743_vm12, %v6059_v32, %v19742_v17  ;;  %v6472_v63 = vadd.s32 10, %v16603_v52  ;;  %10173 = vrot.lane.b32.xlu1 %v9037_v33, %s19746_s13  ;;  %10221 = vrot.lane.b32.xlu0 %v9107_v36, %s19439_s9  ;;  %v19747_v3 = vld [vmem:[#allocation419_spill] sm:$0xff]  ;;  %v16699_v7 = vpop.permute.xlu1 %9957  ;;  %v19757_v40 = vld [vmem:[#allocation418_spill] sm:$0xff]  ;;  %s10779_s9 = sshll.u32 %s14929_s24, 4  ;;  %s11105_s13 = scalar_lea.vmem %s11104_s1, 2560  ;;  %s17617_s9 = int_to_ptr.vmem [resolvable:$true] %s10779_s9 }
 0x84d   : > { %vm19745_vm8 = vcmask 130048   ;;  %v16676_v8 = vrot.slane %v8973_v53, %v11428_v24  ;;  %v16679_v57 = vrot.slane %v9177_v34, %v11428_v24  ;;  %vm19748_vm4 = vcmask 277504   ;;  %v19751_v1 = vld [vmem:[#allocation431_spill] sm:$0xff]  ;;  %v16703_v53 = vpop.permute.xlu0 %9953  ;;  %s11099_s11 = scalar_lea.vmem %s17617_s9, 1280  ;;  %p11106_p7 = scmp.lt.s32.totalorder %s17617_s9, %s11104_s1 }
 0x84e   : > { %v6072_v56 = vsel %vm19745_vm8, %v6071_v28, %v19744_v47  ;;  %v6061_v16 = vsel %vm19748_vm4, %v6060_v19, %v19747_v3  ;;  %vm19752_vm10 = vcmask 211968   ;;  %v9241_v32 = vcombine.high %v16663_v51, %v18440_v12  ;;  %v19755_v33 = vld [vmem:[#allocation183_spill] sm:$0xff]  ;;  %v19759_v19 = vld [vmem:[#allocation430_spill] sm:$0xff]  ;;  %p11100_p8 = scmp.ne.s32.totalorder %s17617_s9, %s11099_s11  ;;  %p11107_p13 = scmp.lt.s32.totalorder %s11105_s13, %s11099_s11 }
 0x84f   : > { %v6073_v44 = vsel %vm19752_vm10, %v6072_v56, %v19751_v1  ;;  %v9020_v41 = vcombine.low %v16676_v8, %v16649_v4  ;;  %v9224_v22 = vcombine.low %v16679_v57, %v16654_v54  ;;  %v9148_v34 = vrot.slane %v9140_v11, %v11431_v25  ;;  %v19761_v11 = vld [vmem:[#allocation421_spill] sm:$0xff] }
 0x850   : > { %vm19754_vm6 = vcmask 687104   ;;  %vm19756_vm11 = vcmask 703488   ;;  %vm6413_vm14 = vcmp.ne.s32.totalorder %v6331_v13, 0  ;;  %vm6433_vm12 = vcmp.lt.s32.totalorder %v6331_v13, 0  ;;  %10269 = vrot.lane.b32.xlu1 %v9241_v32, %s19516_s17  ;;  %v16727_v42 = vpop.permute.xlu1 %9965  ;;  %s19777_s17 = smov 24   ;;  %p11108_p3 = por %p11107_p13, %p11106_p7 }
 0x851   : > { %v3110_v28 = vsel %vm19754_vm6, %v3109_v14, %v19753_v60  ;;  %v3123_v36 = vsel %vm19756_vm11, %v3122_v5, %v19755_v33  ;;  %vm19758_vm8 = vcmask 359424   ;;  %v6492_v17 = vsel %vm16689_vm0, %v6472_v63, %v16603_v52  ;;  %10225 = vrot.lane.b32.xlu0 %v9148_v34, %s19122_s26  ;;  %v19763_v5 = vld [vmem:[#allocation433_spill] sm:$0xff]  ;;  %vm16723_vm11 = vmand %vm6433_vm12, %vm6413_vm14  ;;  %v16730_v63 = vpop.permute.xlu0 %9961  ;;  %v19769_v60 = vld [vmem:[#allocation184_spill] sm:$0xff]  ;;  %s20197_s26 = sld [smem:[#allocation15_spill]] }
 0x852   : > { %v6062_v49 = vsel %vm19758_vm8, %v6061_v16, %v19757_v40  ;;  %vm19760_vm4 = vcmask 293888   ;;  %vm19762_vm10 = vcmask 441344   ;;  %vm19764_vm6 = vcmask 375808   ;;  %v19788_v16 = vld [vmem:[#allocation422_spill] sm:$0xff] }
 0x853   : > { %v6074_v47 = vsel %vm19760_vm4, %v6073_v44, %v19759_v19  ;;  %v6063_v14 = vsel %vm19762_vm10, %v6062_v49, %v19761_v11  ;;  %v6473_v3 = vadd.s32 10, %v6331_v13  ;;  %v9028_v52 = vrot.slane %v9020_v41, %v11431_v25  ;;  %v19767_v44 = vld [vmem:[#allocation171_spill] sm:$0xff]  ;;  %v19772_v19 = vld [vmem:[#allocation420_spill] sm:$0xff] }
 0x854   : > { %v6075_v56 = vsel %vm19764_vm6, %v6074_v47, %v19763_v5  ;;  %v9232_v1 = vrot.slane %v9224_v22, %v11431_v25  ;;  %vm19768_vm0 = vcmask 769024   ;;  %vm19770_vm8 = vcmask 785408   ;;  %v19774_v11 = vld [vmem:[#allocation432_spill] sm:$0xff] }
 0x855   : > { %v3111_v32 = vsel %vm19768_vm0, %v3110_v28, %v19767_v44  ;;  %v3124_v33 = vsel %vm19770_vm8, %v3123_v36, %v19769_v60  ;;  %v6512_v40 = vcvt.s32.f32 %v6492_v17  ;;  %vm19771_vm14 = vcmask 31744   ;;  %10177 = vrot.lane.b32.xlu1 %v9028_v52, %s19777_s17  ;;  %v19778_v28 = vld [vmem:[#allocation423_spill] sm:$0xff]  ;;  %v9970_v60 = vpop.permute.xlu0 %9969 }
 0x856   : > { %v10471_v49 = vsel %vm19771_vm14, %v16538_v59, %v16535_v45  ;;  %vm19773_vm12 = vcmask 523264   ;;  %vm19775_vm4 = vcmask 457728   ;;  %vm19776_vm10 = vcmask 113664   ;;  %10273 = vrot.lane.b32.xlu0 %v9232_v1, %s19158_s25  ;;  %v19780_v17 = vld [vmem:[#allocation435_spill] sm:$0xff]  ;;  %v19782_v59 = vld [vmem:[#allocation172_spill] sm:$0xff]  ;;  %s19912_s25 = smov 114  }
 0x857   : > { %v6064_v47 = vsel %vm19773_vm12, %v6063_v14, %v19772_v19  ;;  %v6076_v41 = vsel %vm19775_vm4, %v6075_v56, %v19774_v11  ;;  %v10472_v22 = vsel %vm19776_vm10, %v10471_v49, %v16568_v27  ;;  %vm19779_vm6 = vcmask 605184   ;;  %v9974_v56 = vpop.permute.xlu1 %9973  ;;  %v19784_v19 = vld [vmem:[#allocation185_spill] sm:$0xff]  ;;  %p20201_p9 = scmp.ne.s32.totalorder %s20197_s26, 0 }
 0x858   : > { %v6065_v36 = vsel %vm19779_vm6, %v6064_v47, %v19778_v28  ;;  %vm19781_vm0 = vcmask 539648   ;;  %v6493_v45 = vsel %vm16723_vm11, %v6473_v3, %v6331_v13  ;;  %vm19783_vm8 = vcmask 850944  }
 0x859   : > { %v6077_v5 = vsel %vm19781_vm0, %v6076_v41, %v19780_v17  ;;  %v16756_v14 = vsel %vm19783_vm8, %v3111_v32, %v19782_v59  ;;  %v9141_v27 = vcombine.high %v16633_v39, %v16615_v61  ;;  %v9242_v44 = vcombine.high %v9232_v1, %v18440_v12  ;;  %v19790_v39 = vld [vmem:[#allocation434_spill] sm:$0xff]  ;;  %p11101_p11 = pnand %p11100_p8, %p20201_p9 }
 0x85a   : > { %v9172_v49 = vcombine.high %v9148_v34, %v18440_v12  ;;  %vm19785_vm14 = vcmask 867328   ;;  %v6532_v11 = vmul.f32 0.1, %v6512_v40  ;;  %vm19786_vm11 = vcmask 195584   ;;  %v19795_v40 = vld [vmem:[#allocation437_spill] sm:$0xff] }
 0x85b   : > { %v16764_v47 = vsel %vm19785_vm14, %v3124_v33, %v19784_v19  ;;  %v10473_v13 = vsel %vm19786_vm11, %v10472_v22, %v16565_v48  ;;  %vm19787_vm12 = vcmask 48128   ;;  %vm19789_vm4 = vcmask 687104   ;;  %10277 = vrot.lane.b32.xlu1 %v9242_v44, %s19524_s22  ;;  %v19793_v33 = vld [vmem:[#allocation425_spill] sm:$0xff]  ;;  %s19820_s22 = smov 44   ;;  %p11102_p0 = pneg %p11101_p11 }
 0x85c   : > { %v10484_v3 = vsel %vm19787_vm12, %v16727_v42, %v9970_v60  ;;  %v6066_v61 = vsel %vm19789_vm4, %v6065_v36, %v19788_v16  ;;  %vm19791_vm10 = vcmask 621568   ;;  %v6513_v32 = vcvt.s32.f32 %v6493_v45  ;;  %10229 = vrot.lane.b32.xlu0 %v9172_v49, %s19454_s19  ;;  %v9978_v45 = vpop.permute.xlu0 %9977  ;;  %s19805_s19 = smov 34  }
 0x85d   : > { %v6078_v1 = vsel %vm19791_vm10, %v6077_v5, %v19790_v39  ;;  %vm19792_vm6 = vcmask 277504   ;;  %vm19794_vm0 = vcmask 769024   ;;  %vm19796_vm8 = vcmask 703488   ;;  %p11109_p6 = pnand %p11108_p3, %p11102_p0 }
 0x85e   : > { %v10474_v34 = vsel %vm19792_vm6, %v10473_v13, %v16595_v38  ;;  %v6067_v48 = vsel %vm19794_vm0, %v6066_v61, %v19793_v33  ;;  %v6079_v41 = vsel %vm19796_vm8, %v6078_v1, %v19795_v40  ;;  %v9021_v22 = vcombine.high %v16676_v8, %v16649_v4  ;;  %v9982_v38 = vpop.permute.xlu1 %9981  ;;  %v19802_v8 = vld [vmem:[#allocation436_spill] sm:$0xff]  ;;  %v19811_v13 = vld [vmem:[#allocation559_spill] sm:$0xff]  ;;  %v19815_v33 = vld [vmem:[#allocation438_spill] sm:$0xff] }
 0x85f   : > { %v9125_v28 = vcombine.high %v19719_v62, %v19718_v15  ;;  %v9225_v36 = vcombine.high %v16679_v57, %v16654_v54  ;;  %v9155_v17 = vrot.slane %v9141_v27, %v11431_v25  ;;  %vm19797_vm14 = vcmask 130048   ;;  %v19800_v62 = vld [vmem:[#allocation424_spill] sm:$0xff] }
 0x860   : > { %v10485_v5 = vsel %vm19797_vm14, %v10484_v3, %v9974_v56  ;;  %v9038_v59 = vcombine.high %v9028_v52, %v18440_v12  ;;  %v6552_v44 = vadd.f32 0.05, %v6532_v11  ;;  %v9109_v60 = vcombine.high %v19721_v46, %v19720_v31  ;;  %v19806_v31 = vld [vmem:[#allocation427_spill] sm:$0xff]  ;;  %v19810_v11 = vld [vmem:[#allocation590_spill] sm:$0xff]  ;;  %v9986_v39 = vpop.permute.xlu0 %9985 }
 0x861   : > { %vm19798_vm11 = vcmask 359424   ;;  %vm19799_vm12 = vcmask 211968   ;;  %vm19801_vm4 = vcmask 850944   ;;  %vm19803_vm10 = vcmask 785408   ;;  %10233 = vrot.lane.b32.xlu1 %v9155_v17, %s19129_s2 }
 0x862   : > { %v10475_v4 = vsel %vm19798_vm11, %v10474_v34, %v16592_v30  ;;  %v10486_v15 = vsel %vm19799_vm12, %v10485_v5, %v9978_v45  ;;  %v6068_v54 = vsel %vm19801_vm4, %v6067_v48, %v19800_v62  ;;  %v6080_v57 = vsel %vm19803_vm10, %v6079_v41, %v19802_v8  ;;  %10181 = vrot.lane.b32.xlu0 %v9038_v59, %s19805_s19  ;;  %v19808_v30 = vld [vmem:[#allocation439_spill] sm:$0xff]  ;;  %v19817_v41 = vld [vmem:[#allocation582_spill] sm:$0xff] }
 0x863   : > { %v6533_v27 = vmul.f32 0.1, %v6513_v32  ;;  %vm19804_vm6 = vcmask 441344   ;;  %vm19807_vm0 = vcmask 932864   ;;  %vm19809_vm8 = vcmask 867328  }
 0x864   : > { %v10476_v56 = vsel %vm19804_vm6, %v10475_v4, %v16624_v35  ;;  %v6069_v46 = vsel %vm19807_vm0, %v6068_v54, %v19806_v31  ;;  %v6081_v52 = vsel %vm19809_vm8, %v6080_v57, %v19808_v30  ;;  %v16809_v49 = vrot.slane %v9125_v28, %v11428_v24  ;;  %v9990_v35 = vpop.permute.xlu1 %9989  ;;  %v9994_v4 = vpop.permute.xlu0 %9993 }
 0x865   : > { %v9056_v19 = vcombine.low %v19696_v23, %v19695_v26  ;;  %v9260_v3 = vcombine.low %v19811_v13, %v19810_v11  ;;  %v9035_v16 = vrot.slane %v9021_v22, %v11431_v25  ;;  %vm19812_vm14 = vcmask 293888   ;;  %v19818_v22 = vld [vmem:[#allocation537_spill] sm:$0xff] }
 0x866   : > { %v10487_v61 = vsel %vm19812_vm14, %v10486_v15, %v9982_v38  ;;  %v9239_v1 = vrot.slane %v9225_v36, %v11431_v25  ;;  %v16819_v32 = vrot.slane %v9109_v60, %v11428_v24  ;;  %v9040_v34 = vcombine.low %v19704_v0, %v19703_v58  ;;  %v19822_v0 = vld [vmem:[#allocation441_spill] sm:$0xff] }
 0x867   : > { %vm19813_vm11 = vcmask 523264   ;;  %vm19814_vm12 = vcmask 375808   ;;  %vm19816_vm4 = vcmask 949248   ;;  %v6553_v40 = vadd.f32 0.05, %v6533_v27  ;;  %10185 = vrot.lane.b32.xlu1 %v9035_v16, %s19820_s22  ;;  %v19825_v15 = vld [vmem:[#allocation173_spill] sm:$0xff] }
 0x868   : > { %v10477_v26 = vsel %vm19813_vm11, %v10476_v56, %v16621_v10  ;;  %v10488_v23 = vsel %vm19814_vm12, %v10487_v61, %v9986_v39  ;;  %v6082_v48 = vsel %vm19816_vm4, %v6081_v52, %v19815_v33  ;;  %v9244_v28 = vcombine.low %v19818_v22, %v19817_v41  ;;  %10281 = vrot.lane.b32.xlu0 %v9239_v1, %s19168_s4  ;;  %s19844_s4 = smov 64  }
 0x869   : > { %vm19819_vm10 = vcmask 605184   ;;  %vm19821_vm6 = vcmask 1014784   ;;  %vm19823_vm0 = vcmask 1031168   ;;  %v9156_v38 = vcombine.low %v16819_v32, %v16809_v49 }
 0x86a   : > { %v10478_v36 = vsel %vm19819_vm10, %v10477_v26, %v16659_v21  ;;  %v6070_v58 = vsel %vm19821_vm6, %v6069_v46, %v19736_v55  ;;  %v6083_v10 = vsel %vm19823_vm0, %v6082_v48, %v19822_v0  ;;  %v16841_v5 = vrot.slane %v9056_v19, %v11428_v24  ;;  %v9998_v21 = vpop.permute.xlu1 %9997 }
 0x86b   : > { %v16844_v45 = vrot.slane %v9260_v3, %v11428_v24  ;;  %v9243_v59 = vcombine.high %v9239_v1, %v18440_v12  ;;  %vm19824_vm8 = vcmask 457728   ;;  %v9173_v55 = vcombine.high %v9155_v17, %v18440_v12  ;;  %v10002_v3 = vpop.permute.xlu0 %10001 }
 0x86c   : > { %v10489_v60 = vsel %vm19824_vm8, %v10488_v23, %v9990_v35  ;;  %vm19826_vm14 = vcmask 932864   ;;  %v16853_v54 = vrot.slane %v9040_v34, %v11428_v24  ;;  %vm19827_vm11 = vcmask 687104   ;;  %v19836_v34 = vld [vmem:[#allocation187_spill] sm:$0xff] }
 0x86d   : > { %v3113_v62 = vsel %vm19826_vm14, %v16756_v14, %v19825_v15  ;;  %v10479_v8 = vsel %vm19827_vm11, %v10478_v36, %v16656_v43  ;;  %vm19828_vm12 = vcmask 539648   ;;  %v6572_v27 = vmul.f32 %v6552_v44, %v6070_v58  ;;  %10285 = vrot.lane.b32.xlu1 %v9243_v59, %s19534_s27  ;;  %10237 = vrot.lane.b32.xlu0 %v9173_v55, %s19467_s28  ;;  %v19830_v14 = vld [vmem:[#allocation186_spill] sm:$0xff]  ;;  %s19839_s28 = smov 56   ;;  %s19840_s27 = smov 54  }
 0x86e   : > { %v10490_v57 = vsel %vm19828_vm12, %v10489_v60, %v9994_v4  ;;  %v16859_v56 = vrot.slane %v9244_v28, %v11428_v24  ;;  %vm19829_vm4 = vcmask 769024   ;;  %vm19831_vm10 = vcmask 949248   ;;  %v10006_v52 = vpop.permute.xlu1 %10005  ;;  %v19845_v60 = vld [vmem:[#allocation188_spill] sm:$0xff] }
 0x86f   : > { %v10480_v31 = vsel %vm19829_vm4, %v10479_v8, %v16703_v53  ;;  %v3126_v17 = vsel %vm19831_vm10, %v16764_v47, %v19830_v14  ;;  %v6573_v46 = vmul.f32 %v6553_v40, %v6083_v10  ;;  %v16869_v43 = vadd.s32 1792, %v14519_v6  ;;  %v10010_v36 = vpop.permute.xlu0 %10009  ;;  %v19848_v14 = vld [vmem:[#allocation189_spill] sm:$0xff] }
 0x870   : > { %v9072_v44 = vcombine.low %v16853_v54, %v16841_v5  ;;  %v9276_v30 = vcombine.low %v16859_v56, %v16844_v45  ;;  %v9164_v53 = vrot.slane %v9156_v38, %v11431_v25  ;;  %vm19832_vm6 = vcmask 621568  }
 0x871   : > { %v10491_v19 = vsel %vm19832_vm6, %v10490_v57, %v9998_v21  ;;  %v9039_v35 = vcombine.high %v9035_v16, %v18440_v12  ;;  %vm19833_vm0 = vcmask 1014784   ;;  %v16881_v61 = vadd.s32 1920, %v14519_v6 }
 0x872   : > { %v3114_v47 = vsel %vm19833_vm0, %v3113_v62, %v19670_v20  ;;  %vm19834_vm8 = vcmask 850944   ;;  %vm19835_vm14 = vcmask 703488   ;;  %vm19837_vm11 = vcmask 1031168   ;;  %10241 = vrot.lane.b32.xlu1 %v9164_v53, %s19839_s28  ;;  %v10014_v40 = vpop.permute.xlu1 %10013  ;;  %vm19842_vm10 = vmmov %vm19833_vm0 }
 0x873   : > { %v10481_v39 = vsel %vm19834_vm8, %v10480_v31, %v16699_v7  ;;  %v10492_v1 = vsel %vm19835_vm14, %v10491_v19, %v10002_v3  ;;  %v3127_v26 = vsel %vm19837_vm11, %v3126_v17, %v19836_v34  ;;  %v6592_v23 = vadd.f32 %v6572_v27, %v3114_v47  ;;  %10189 = vrot.lane.b32.xlu0 %v9039_v35, %s19840_s27  ;;  %v16919_v57 = vpop.permute.xlu0 %10017 }
 0x874   : > { %vm19838_vm12 = vcmask 932864   ;;  %v6593_v20 = vadd.f32 %v6573_v46, %v3127_v26  ;;  %v16893_v16 = vmul.u32.u64.low 3435973837, %v16869_v43  ;;  %v16894_v48 = vmul.u32.u64.high 3435973837, %v16869_v43, %v16893_v16 }
 0x875   : > { %v10482_v33 = vsel %vm19838_vm12, %v10481_v39, %v16730_v63  ;;  %v9080_v7 = vrot.slane %v9072_v44, %v11431_v25  ;;  %vm19841_vm4 = vcmask 785408   ;;  %v9284_v58 = vrot.slane %v9276_v30, %v11431_v25 }
 0x876   : > { %v10493_v28 = vsel %vm19841_vm4, %v10492_v1, %v10006_v52  ;;  %v16900_v10 = vmul.u32.u64.low 3435973837, %v16881_v61  ;;  %v16901_v63 = vmul.u32.u64.high 3435973837, %v16881_v61, %v16900_v10  ;;  %v10483_v38 = vsel %vm19842_vm10, %v10482_v33, %v16727_v42  ;;  %v16915_v62 = vpop.permute.xlu1 %10021 }
 0x877   : > { %vm19843_vm6 = vcmask 867328   ;;  %v10623_v59 = vrot.slane %v6592_v23, %v19017_v18  ;;  %10193 = vrot.lane.b32.xlu1 %v9080_v7, %s19844_s4  ;;  %10289 = vrot.lane.b32.xlu0 %v9284_v58, %s19185_s16  ;;  %vm19846_vm0 = vcmask 64512   ;;  %v9157_v55 = vcombine.high %v16819_v32, %v16809_v49  ;;  %v19849_v49 = vld [vmem:[#allocation200_spill] sm:$0xff]  ;;  %v19850_v32 = vld [vmem:[#allocation139_spill] sm:$0xff]  ;;  %v16941_v39 = vpop.permute.xlu0 %10025  ;;  %s19860_s16 = smov 84  }
 0x878   : > { %v10494_v21 = vsel %vm19843_vm6, %v10493_v28, %v10010_v36  ;;  %v3128_v4 = vsel %vm19846_vm0, %v19836_v34, %v19845_v60  ;;  %v10627_v15 = vrot.slane %v6593_v20, %v19017_v18  ;;  %v9308_v42 = vcombine.high %v9284_v58, %v18440_v12  ;;  %v19858_v36 = vld [vmem:[#allocation202_spill] sm:$0xff] }
 0x879   : > { %vm10664_vm8 = vcmp.gt.f32.partialorder %v10483_v38, %v10623_v59  ;;  %vm19847_vm14 = vcmask 949248   ;;  %v9174_v27 = vcombine.high %v9164_v53, %v18440_v12  ;;  %v3129_v17 = vsel %vm2992_vm5, %v3128_v4, %v19848_v14  ;;  %v19862_v4 = vld [vmem:[#allocation203_spill] sm:$0xff] }
 0x87a   : > { %v10495_v8 = vsel %vm19847_vm14, %v10494_v21, %v10014_v40  ;;  %vm19851_vm12 = vcmask 80896   ;;  %v6340_v44 = vshrl.u32 %v16894_v48, 3  ;;  %v9073_v30 = vcombine.high %v16853_v54, %v16841_v5  ;;  %v16938_v35 = vpop.permute.xlu1 %10029  ;;  %v19854_v5 = vld [vmem:[#allocation190_spill] sm:$0xff] }
 0x87b   : > { %v10496_v31 = vsel %vm19837_vm11, %v10495_v8, %v16919_v57  ;;  %v3140_v46 = vsel %vm19851_vm12, %v19850_v32, %v19849_v49  ;;  %10293 = vrot.lane.b32.xlu1 %v9308_v42, %s18939_s5  ;;  %10245 = vrot.lane.b32.xlu0 %v9174_v27, %s19477_s15  ;;  %v10884_v52 = vsel %vm10664_vm8, 1.0, %v18440_v12  ;;  %v9277_v19 = vcombine.high %v16859_v56, %v16844_v45  ;;  %s19852_s5 = smov 76   ;;  %s19853_s15 = smov 74   ;;  %v19855_v45 = vld [vmem:[#allocation201_spill] sm:$0xff]  ;;  %v16957_v16 = vpop.permute.xlu0 %10033  ;;  %v19867_v42 = vld [vmem:[#allocation391_spill] sm:$0xff]  ;;  %vm19868_vm14 = vmmov %vm19851_vm12 }
 0x87c   : > { %vm10665_vm4 = vcmp.gt.f32.partialorder %v10496_v31, %v10627_v15  ;;  %v9171_v47 = vrot.slane %v9157_v55, %v11431_v25  ;;  %v9104_v1 = vcombine.high %v9080_v7, %v18440_v12  ;;  %v6351_v34 = vshrl.u32 %v16901_v63, 3  ;;  %v19857_v7 = vld [vmem:[#allocation191_spill] sm:$0xff]  ;;  %v19864_v15 = vld [vmem:[#allocation440_spill] sm:$0xff] }
 0x87d   : > { %v10885_v53 = vsel %vm10665_vm4, 1.0, %v18440_v12  ;;  %v3130_v54 = vsel %vm18053_vm7, %v3129_v17, %v19854_v5  ;;  %vm19856_vm10 = vcmask 162816   ;;  %v6341_v26 = vmul.u32 10, %v6340_v44  ;;  %v19869_v31 = vld [vmem:[#allocation443_spill] sm:$0xff] }
 0x87e   : > { %v10738_v3 = vcombine.low %v10884_v52, %v10885_v53  ;;  %v3141_v56 = vsel %vm19856_vm10, %v3140_v46, %v19855_v45  ;;  %v9261_v23 = vcombine.high %v19811_v13, %v19810_v11  ;;  %v16954_v33 = vpop.permute.xlu1 %10037  ;;  %v9087_v20 = vrot.slane %v9073_v30, %v11431_v25  ;;  %vm19871_vm4 = vmmov %vm19856_vm10  ;;  %v19872_v30 = vld [vmem:[#allocation193_spill] sm:$0xff]  ;;  %v19873_v53 = vld [vmem:[#allocation204_spill] sm:$0xff] }
 0x87f   : > { %10249 = vrot.lane.b32.xlu1 %v9171_v47, %s19852_s5  ;;  %10197 = vrot.lane.b32.xlu0 %v9104_v1, %s19853_s15  ;;  %v9291_v48 = vrot.slane %v9277_v19, %v11431_v25  ;;  %v6352_v40 = vmul.u32 10, %v6351_v34  ;;  %v3131_v28 = vsel %vm2996_vm9, %v3130_v54, %v19857_v7  ;;  %vm19859_vm6 = vcmask 244736   ;;  %v16979_v59 = vpop.permute.xlu0 %10041  ;;  %v19880_v1 = vld [vmem:[#allocation445_spill] sm:$0xff] }
 0x880   : > { %10758 = vst [vmem:[%s14929_s24 + $0x30] sm:$0xff] %v10738_v3  ;;  %v3142_v58 = vsel %vm19859_vm6, %v3141_v56, %v19858_v36  ;;  %v9245_v10 = vcombine.high %v19818_v22, %v19817_v41  ;;  %v16969_v11 = vsub.s32 %v16869_v43, %v6341_v26  ;;  %v16972_v13 = vrot.slane %v9261_v23, %v11428_v24  ;;  %v19861_v22 = vld [vmem:[#allocation192_spill] sm:$0xff]  ;;  %v19876_v3 = vld [vmem:[#allocation454_spill] sm:$0xff]  ;;  %v19883_v45 = vld [vmem:[#allocation457_spill] sm:$0xff] }
 0x881   : > { %v9208_v63 = vcombine.low %v16606_v9, %v16590_v2  ;;  %v9309_v21 = vcombine.high %v9291_v48, %v18440_v12  ;;  %v9175_v41 = vcombine.high %v9171_v47, %v18440_v12  ;;  %v3132_v60 = vsel %vm2998_vm3, %v3131_v28, %v19861_v22  ;;  %v19866_v9 = vld [vmem:[#allocation452_spill] sm:$0xff]  ;;  %v19887_v28 = vld [vmem:[#allocation194_spill] sm:$0xff] }
 0x882   : > { %v16976_v38 = vpop.permute.xlu1 %10045  ;;  %vm19863_vm0 = vcmask 326656   ;;  %v6353_v55 = vsub.s32 %v16881_v61, %v6352_v40  ;;  %vm19865_vm8 = vcmask 64512   ;;  %v6096_v8 = vsel %vm19868_vm14, %v19867_v42, %v19866_v9  ;;  %v19870_v61 = vld [vmem:[#allocation455_spill] sm:$0xff] }
 0x883   : > { %10201 = vrot.lane.b32.xlu1 %v9087_v20, %s19860_s16  ;;  %10297 = vrot.lane.b32.xlu0 %v9291_v48, %s18571_s18  ;;  %v3143_v43 = vsel %vm19863_vm0, %v3142_v58, %v19862_v4  ;;  %v6084_v2 = vsel %vm19865_vm8, %v19822_v0, %v19864_v15  ;;  %v16994_v27 = vrot.slane %v9245_v10, %v11428_v24  ;;  %vm6414_vm11 = vcmp.ne.s32.totalorder %v16969_v11, 0  ;;  %v17011_v46 = vpop.permute.xlu0 %10049  ;;  %s19878_s18 = smov 96   ;;  %v19888_v58 = vld [vmem:[#allocation205_spill] sm:$0xff]  ;;  %v19895_v15 = vld [vmem:[#allocation460_spill] sm:$0xff] }
 0x884   : > { %v6085_v14 = vsel %vm2992_vm5, %v6084_v2, %v19869_v31  ;;  %vm6434_vm12 = vcmp.lt.s32.totalorder %v16969_v11, 0  ;;  %v6097_v0 = vsel %vm19871_vm4, %v6096_v8, %v19870_v61  ;;  %v9088_v17 = vcombine.low %v16572_v50, %v16557_v29  ;;  %v19875_v29 = vld [vmem:[#allocation442_spill] sm:$0xff] }
 0x885   : > { %v9292_v24 = vcombine.low %v16994_v27, %v16972_v13  ;;  %v9216_v32 = vrot.slane %v9208_v63, %v11431_v25  ;;  %v9105_v44 = vcombine.high %v9087_v20, %v18440_v12  ;;  %v3133_v52 = vsel %vm3000_vm2, %v3132_v60, %v19872_v30  ;;  %vm17030_vm14 = vmand %vm6434_vm12, %vm6414_vm11  ;;  %v19890_v63 = vld [vmem:[#allocation444_spill] sm:$0xff]  ;;  %v19894_v60 = vld [vmem:[#allocation447_spill] sm:$0xff] }
 0x886   : > { %v17008_v49 = vpop.permute.xlu1 %10053  ;;  %vm6415_vm10 = vcmp.ne.s32.totalorder %v6353_v55, 0  ;;  %vm6435_vm6 = vcmp.lt.s32.totalorder %v6353_v55, 0  ;;  %vm19874_vm0 = vcmask 408576   ;;  %v6086_v50 = vsel %vm18053_vm7, %v6085_v14, %v19875_v29  ;;  %v19904_v30 = vld [vmem:[#allocation459_spill] sm:$0xff] }
 0x887   : > { %10301 = vrot.lane.b32.xlu1 %v9309_v21, %s18670_s30  ;;  %10253 = vrot.lane.b32.xlu0 %v9175_v41, %s19488_s29  ;;  %v3144_v19 = vsel %vm19874_vm0, %v3143_v43, %v19873_v53  ;;  %vm19877_vm8 = vcmask 244736   ;;  %s19879_s29 = smov 94   ;;  %v6087_v34 = vsel %vm2996_vm9, %v6086_v50, %v19880_v1  ;;  %v6474_v54 = vadd.s32 10, %v16969_v11  ;;  %vm17037_vm0 = vmand %vm6435_vm6, %vm6415_vm10  ;;  %v17044_v40 = vpop.permute.xlu0 %10057  ;;  %v19891_v41 = vld [vmem:[#allocation456_spill] sm:$0xff]  ;;  %s19893_s30 = smov 104   ;;  %v19907_v1 = vld [vmem:[#allocation462_spill] sm:$0xff] }
 0x888   : > { %v6098_v47 = vsel %vm19877_vm8, %v6097_v0, %v19876_v3  ;;  %vm19884_vm4 = vcmask 326656   ;;  %v6475_v26 = vadd.s32 10, %v6353_v55  ;;  %v9096_v48 = vrot.slane %v9088_v17, %v11431_v25  ;;  %v19898_v17 = vld [vmem:[#allocation195_spill] sm:$0xff] }
 0x889   : > { %v6099_v56 = vsel %vm19884_vm4, %v6098_v47, %v19883_v45  ;;  %v9300_v7 = vrot.slane %v9292_v24, %v11431_v25  ;;  %v3134_v36 = vsel %vm18052_vm15, %v3133_v52, %v19887_v28  ;;  %vm19889_vm11 = vcmask 490496   ;;  %v19899_v24 = vld [vmem:[#allocation446_spill] sm:$0xff]  ;;  %v19910_v45 = vld [vmem:[#allocation448_spill] sm:$0xff]  ;;  %v19918_v28 = vld [vmem:[#allocation461_spill] sm:$0xff] }
 0x88a   : > { %v17041_v20 = vpop.permute.xlu1 %10061  ;;  %v3145_v10 = vsel %vm19889_vm11, %v3144_v19, %v19888_v58  ;;  %v6088_v21 = vsel %vm2998_vm3, %v6087_v34, %v19890_v63  ;;  %vm19892_vm12 = vcmask 408576   ;;  %v6494_v43 = vsel %vm17030_vm14, %v6474_v54, %v16969_v11  ;;  %vm19896_vm10 = vmmov %vm19889_vm11 }
 0x88b   : > { %10257 = vrot.lane.b32.xlu1 %v9216_v32, %s19878_s18  ;;  %10205 = vrot.lane.b32.xlu0 %v9105_v44, %s19879_s29  ;;  %v6100_v22 = vsel %vm19892_vm12, %v6099_v56, %v19891_v41  ;;  %v6089_v4 = vsel %vm3000_vm2, %v6088_v21, %v19894_v60  ;;  %v6495_v9 = vsel %vm17037_vm0, %v6475_v26, %v6353_v55  ;;  %vm19897_vm6 = vcmask 64512   ;;  %v17072_v61 = vpop.permute.xlu0 %10065  ;;  %v19903_v44 = vld [vmem:[#allocation449_spill] sm:$0xff]  ;;  %v19914_v26 = vld [vmem:[#allocation207_spill] sm:$0xff]  ;;  %v19921_v41 = vld [vmem:[#allocation464_spill] sm:$0xff] }
 0x88c   : > { %v6101_v2 = vsel %vm19896_vm10, %v6100_v22, %v19895_v15  ;;  %v9293_v42 = vcombine.high %v16994_v27, %v16972_v13  ;;  %v10497_v8 = vsel %vm19897_vm6, %v16919_v57, %v16915_v62  ;;  %v9310_v14 = vcombine.high %v9300_v7, %v18440_v12  ;;  %v19901_v62 = vld [vmem:[#allocation206_spill] sm:$0xff] }
 0x88d   : > { %v9240_v11 = vcombine.high %v9216_v32, %v18440_v12  ;;  %v10498_v0 = vsel %vm2992_vm5, %v10497_v8, %v16941_v39  ;;  %v3135_v55 = vsel %vm3004_vm1, %v3134_v36, %v19898_v17  ;;  %v6090_v13 = vsel %vm18052_vm15, %v6089_v4, %v19899_v24 }
 0x88e   : > { %v10070_v31 = vpop.permute.xlu1 %10069  ;;  %v6514_v27 = vcvt.s32.f32 %v6494_v43  ;;  %vm19902_vm8 = vcmask 572416   ;;  %v6091_v32 = vsel %vm3004_vm1, %v6090_v13, %v19903_v44  ;;  %v6515_v52 = vcvt.s32.f32 %v6495_v9  ;;  %v19924_v43 = vld [vmem:[#allocation208_spill] sm:$0xff] }
 0x88f   : > { %10209 = vrot.lane.b32.xlu1 %v9096_v48, %s19893_s30  ;;  %10305 = vrot.lane.b32.xlu0 %v9300_v7, %s18769_s23  ;;  %s19900_s23 = smov 106   ;;  %v3146_v57 = vsel %vm19902_vm8, %v3145_v10, %v19901_v62  ;;  %vm19905_vm14 = vmmov %vm19902_vm8  ;;  %v10499_v53 = vsel %vm18053_vm7, %v10498_v0, %v16938_v35  ;;  %vm19906_vm4 = vcmask 80896   ;;  %v10074_v50 = vpop.permute.xlu0 %10073  ;;  %v9106_v3 = vcombine.high %v9096_v48, %v18440_v12  ;;  %v19916_v48 = vld [vmem:[#allocation451_spill] sm:$0xff] }
 0x890   : > { %v6102_v39 = vsel %vm19905_vm14, %v6101_v2, %v19904_v30  ;;  %v10509_v19 = vsel %vm19906_vm4, %v16235_v37, %v10070_v31  ;;  %v9307_v47 = vrot.slane %v9293_v42, %v11431_v25  ;;  %vm19908_vm0 = vcmask 654336   ;;  %v19913_v37 = vld [vmem:[#allocation196_spill] sm:$0xff]  ;;  %v19926_v2 = vld [vmem:[#allocation450_spill] sm:$0xff]  ;;  %v19928_v42 = vld [vmem:[#allocation197_spill] sm:$0xff] }
 0x891   : > { %v6103_v34 = vsel %vm19908_vm0, %v6102_v39, %v19907_v1  ;;  %v10500_v5 = vsel %vm2996_vm9, %v10499_v53, %v16957_v16  ;;  %vm19909_vm11 = vcmask 162816   ;;  %v6092_v35 = vsel %vm3006_vm13, %v6091_v32, %v19910_v45  ;;  %vm19915_vm12 = vmmov %vm19908_vm0  ;;  %v19930_v31 = vld [vmem:[#allocation453_spill] sm:$0xff]  ;;  %v19939_v39 = vld [vmem:[#allocation198_spill] sm:$0xff] }
 0x892   : > { %v10078_v29 = vpop.permute.xlu1 %10077  ;;  %v10510_v54 = vsel %vm19909_vm11, %v10509_v19, %v10074_v50  ;;  %v6534_v56 = vmul.f32 0.1, %v6514_v27  ;;  %v3136_v25 = vsel %vm3006_vm13, %v3135_v55, %v19913_v37  ;;  %v3147_v23 = vsel %vm19915_vm12, %v3146_v57, %v19914_v26  ;;  %v19935_v27 = vld [vmem:[#allocation209_spill] sm:$0xff]  ;;  %v19936_v57 = vld [vmem:[#allocation466_spill] sm:$0xff] }
 0x893   : > { %10309 = vrot.lane.b32.xlu1 %v9310_v14, %s18674_s3  ;;  %10261 = vrot.lane.b32.xlu0 %v9240_v11, %s19900_s23  ;;  %s19911_s3 = smov 116   ;;  %vm19917_vm10 = vcmask 801792   ;;  %v6535_v7 = vmul.f32 0.1, %v6515_v52  ;;  %vm19919_vm6 = vcmask 736256   ;;  %v10501_v58 = vsel %vm2998_vm3, %v10500_v5, %v16954_v33  ;;  %v10082_v21 = vpop.permute.xlu0 %10081 }
 0x894   : > { %v6093_v16 = vsel %vm19917_vm10, %v6092_v35, %v19916_v48  ;;  %v6104_v36 = vsel %vm19919_vm6, %v6103_v34, %v19918_v28  ;;  %vm19920_vm8 = vcmask 244736   ;;  %vm19922_vm14 = vcmask 818176   ;;  %vm19925_vm0 = vmmov %vm19919_vm6  ;;  %v19943_v34 = vld [vmem:[#allocation199_spill] sm:$0xff] }
 0x895   : > { %v10511_v63 = vsel %vm19920_vm8, %v10510_v54, %v10078_v29  ;;  %v6105_v22 = vsel %vm19922_vm14, %v6104_v36, %v19921_v41  ;;  %v10502_v60 = vsel %vm3000_vm2, %v10501_v58, %v16979_v59  ;;  %vm19923_vm4 = vcmask 326656   ;;  %vm19929_vm12 = vmmov %vm19917_vm10  ;;  %v19932_v59 = vld [vmem:[#allocation463_spill] sm:$0xff] }
 0x896   : > { %v10086_v10 = vpop.permute.xlu1 %10085  ;;  %v10512_v4 = vsel %vm19923_vm4, %v10511_v63, %v10082_v21  ;;  %v3148_v15 = vsel %vm19925_vm0, %v3147_v23, %v19924_v43  ;;  %vm19927_vm11 = vcmask 883712   ;;  %v6554_v9 = vadd.f32 0.05, %v6534_v56  ;;  %v19947_v35 = vld [vmem:[#allocation211_spill] sm:$0xff] }
 0x897   : > { %10265 = vrot.lane.b32.xlu1 %v16663_v51, %s19911_s3  ;;  %10213 = vrot.lane.b32.xlu0 %v9106_v3, %s19912_s25  ;;  %v9311_v51 = vcombine.high %v9307_v47, %v18440_v12  ;;  %v6094_v33 = vsel %vm19927_vm11, %v6093_v16, %v19926_v2  ;;  %v3137_v8 = vsel %vm19929_vm12, %v3136_v25, %v19928_v42  ;;  %vm19931_vm10 = vcmask 965632   ;;  %v10090_v13 = vpop.permute.xlu0 %10089 }
 0x898   : > { %v6095_v14 = vsel %vm19931_vm10, %v6094_v33, %v19930_v31  ;;  %vm19933_vm6 = vcmask 900096   ;;  %v6555_v0 = vadd.f32 0.05, %v6535_v7  ;;  %v10503_v17 = vsel %vm18052_vm15, %v10502_v60, %v16976_v38  ;;  %v19940_v38 = vld [vmem:[#allocation210_spill] sm:$0xff] }
 0x899   : > { %v6106_v11 = vsel %vm19933_vm6, %v6105_v22, %v19932_v59  ;;  %vm19934_vm8 = vcmask 408576   ;;  %v3149_v62 = vsel %vm19922_vm14, %v3148_v15, %v19935_v27  ;;  %vm19937_vm4 = vcmask 982016   ;;  %vm19941_vm12 = vmmov %vm19933_vm6 }
 0x89a   : > { %v10094_v55 = vpop.permute.xlu1 %10093  ;;  %v10513_v24 = vsel %vm19934_vm8, %v10512_v4, %v10086_v10  ;;  %v6107_v44 = vsel %vm19937_vm4, %v6106_v11, %v19936_v57  ;;  %v10504_v32 = vsel %vm3004_vm1, %v10503_v17, %v17011_v46  ;;  %vm19938_vm0 = vcmask 490496  }
 0x89b   : > { %10317 = vrot.lane.b32.xlu1 %v9311_v51, %s18482_s0  ;;  %10313 = vrot.lane.b32.xlu0 %v9307_v47, %s18578_s12  ;;  %v10514_v30 = vsel %vm19938_vm0, %v10513_v24, %v10090_v13  ;;  %v3138_v52 = vsel %vm19927_vm11, %v3137_v8, %v19939_v39  ;;  %v6574_v53 = vmul.f32 %v6554_v9, %v6095_v14  ;;  %vm19942_vm10 = vcmask 572416   ;;  %v10098_v1 = vpop.permute.xlu0 %10097  ;;  %vm19948_vm0 = vmmov %vm19927_vm11  ;;  %s20190_s0 = sld [smem:[#allocation11_spill]]  ;;  %s20195_s12 = sld [smem:[#allocation18_spill]] }
 0x89c   : > { %v3150_v19 = vsel %vm19941_vm12, %v3149_v62, %v19940_v38  ;;  %v6575_v29 = vmul.f32 %v6555_v0, %v6107_v44  ;;  %v10505_v50 = vsel %vm3006_vm13, %v10504_v32, %v17008_v49  ;;  %v10515_v47 = vsel %vm19942_vm10, %v10514_v30, %v10094_v55 }
 0x89d   : > { %vm19944_vm6 = vcmask 965632   ;;  %vm19945_vm8 = vcmask 801792   ;;  %vm19946_vm14 = vcmask 654336   ;;  %v3151_v56 = vsel %vm19937_vm4, %v3150_v19, %v19947_v35 }
 0x89e   : > { %v10102_v3 = vpop.permute.xlu1 %10101  ;;  %v3139_v46 = vsel %vm19944_vm6, %v3138_v52, %v19943_v34  ;;  %v10506_v5 = vsel %vm19945_vm8, %v10505_v50, %v17044_v40  ;;  %v10516_v54 = vsel %vm19946_vm14, %v10515_v47, %v10098_v1  ;;  %v6595_v37 = vadd.f32 %v6575_v29, %v3151_v56  ;;  %vm19950_vm12 = vmmov %vm19944_vm6  ;;  %v19971_v1 = vld [vmem:[#allocation225_spill] sm:$0xff]  ;;  %v19972_v34 = vld [vmem:[#allocation224_spill] sm:$0xff] }
 0x89f   : > { %v6594_v45 = vadd.f32 %v6574_v53, %v3139_v46  ;;  %v10507_v49 = vsel %vm19948_vm0, %v10506_v5, %v17041_v20  ;;  %vm19949_vm11 = vcmask 736256   ;;  %v10106_v23 = vpop.permute.xlu0 %10105  ;;  %vm19951_vm10 = vcmask 818176   ;;  %vm19953_vm14 = vmmov %vm19937_vm4  ;;  %v19967_v53 = vld [vmem:[#allocation212_spill] sm:$0xff]  ;;  %v19976_v56 = vld [vmem:[#allocation226_spill] sm:$0xff] }
 0x8a0   : > { %v10517_v26 = vsel %vm19949_vm11, %v10516_v54, %v10102_v3  ;;  %v10508_v48 = vsel %vm19950_vm12, %v10507_v49, %v17072_v61  ;;  %vm19952_vm8 = vcmask 900096   ;;  %v10635_v36 = vrot.slane %v6595_v37, %v19017_v18  ;;  %v19969_v3 = vld [vmem:[#allocation213_spill] sm:$0xff]  ;;  %v19974_v54 = vld [vmem:[#allocation214_spill] sm:$0xff] }
 0x8a1   : > { %v10518_v16 = vsel %vm19951_vm10, %v10517_v26, %v10106_v23  ;;  %v10631_v40 = vrot.slane %v6594_v45, %v19017_v18  ;;  %vm19954_vm4 = vcmask 15360   ;;  %vm19955_vm11 = vcmask 97280   ;;  %v19978_v23 = vld [vmem:[#allocation238_spill] sm:$0xff]  ;;  %s10937_s2 = smul.u32 1280, %s20190_s0  ;;  %s10763_s14 = scalar_lea.sflag [#allocation4], %s20195_s12 }
 0x8a2   : > { %v10110_v25 = vpop.permute.xlu1 %10109  ;;  %vm19956_vm12 = vcmask 179200   ;;  %vm19957_vm10 = vcmask 261120   ;;  %v6176_v19 = vadd.s32 2048, %v14519_v6  ;;  %v6177_v5 = vadd.s32 2176, %v14519_v6 }
 0x8a3   : > { %vm10666_vm6 = vcmp.gt.f32.partialorder %v10508_v48, %v10631_v40  ;;  %v10519_v28 = vsel %vm19952_vm8, %v10518_v16, %v10110_v25  ;;  %v10114_v58 = vpop.permute.xlu0 %10113  ;;  %vm19958_vm8 = vcmask 343040   ;;  %v19979_v48 = vld [vmem:[#allocation237_spill] sm:$0xff]  ;;  %v19981_v40 = vld [vmem:[#allocation215_spill] sm:$0xff]  ;;  %s17615_s10 = scalar_lea.hbm %s20199_s8, %s10937_s2 }
 0x8a4   : > { %v10520_v20 = vsel %vm19953_vm14, %v10519_v28, %v10114_v58  ;;  %v10886_v51 = vsel %vm10666_vm6, 1.0, %v18440_v12  ;;  %vm19959_vm14 = vcmask 424960   ;;  %vm19960_vm6 = vcmask 506880   ;;  %v19983_v28 = vld [vmem:[#allocation227_spill] sm:$0xff] }
 0x8a5   : > { %vm10667_vm0 = vcmp.gt.f32.partialorder %v10520_v20, %v10635_v36  ;;  %v17215_v37 = vmul.u32.u64.low 3435973837, %v6176_v19  ;;  %v17216_v49 = vmul.u32.u64.high 3435973837, %v6176_v19, %v17215_v37 }
 0x8a6   : > { %v10118_v7 = vpop.permute.xlu1 %10117  ;;  %v10887_v61 = vsel %vm10667_vm0, 1.0, %v18440_v12  ;;  %vm19962_vm0 = vcmask 670720  }
 0x8a7   : > { %v10521_v10 = vsel %vm19954_vm4, %v10114_v58, %v10118_v7  ;;  %v10739_v63 = vcombine.low %v10886_v51, %v10887_v61  ;;  %v10122_v41 = vpop.permute.xlu0 %10121  ;;  %vm19961_vm4 = vcmask 588800   ;;  %v19987_v61 = vld [vmem:[#allocation251_spill] sm:$0xff] }
 0x8a8   : > { %v10522_v22 = vsel %vm19955_vm11, %v10521_v10, %v10122_v41  ;;  %vm19963_vm11 = vcmask 752640   ;;  %v17229_v58 = vmul.u32.u64.low 3435973837, %v6177_v5  ;;  %v17230_v20 = vmul.u32.u64.high 3435973837, %v6177_v5, %v17229_v58  ;;  %v19985_v10 = vld [vmem:[#allocation239_spill] sm:$0xff] }
 0x8a9   : > { %10759 = vst [vmem:[%s14929_s24 + $0x38] sm:$0xff] %v10739_v63  ;;  %v19988_v63 = vld [vmem:[#allocation250_spill] sm:$0xff]  ;;  %v17238_v41 = vadd.s32 2304, %v14519_v6 }
 0x8aa   : > { %v10126_v21 = vpop.permute.xlu1 %10125 }
 0x8ab   : > { %v10523_v60 = vsel %vm19956_vm12, %v10522_v22, %v10126_v21  ;;  %v10130_v43 = vpop.permute.xlu0 %10129  ;;  %vm19964_vm12 = vcmask 834560  }
 0x8ac   : > { %v10524_v15 = vsel %vm19957_vm10, %v10523_v60, %v10130_v43  ;;  %vm19965_vm10 = vcmask 916480   ;;  %v19990_v43 = vld [vmem:[#allocation216_spill] sm:$0xff] }
 0x8ae   : > { %v10134_v4 = vpop.permute.xlu1 %10133 }
 0x8af   : > { %v10525_v2 = vsel %vm19958_vm8, %v10524_v15, %v10134_v4  ;;  %v10138_v9 = vpop.permute.xlu0 %10137  ;;  %vm19966_vm8 = vcmask 998400   ;;  %v17245_v4 = vadd.s32 2432, %v14519_v6 }
 0x8b0   : > { %v10526_v42 = vsel %vm19959_vm14, %v10525_v2, %v10138_v9  ;;  %vm19968_vm14 = vcmask 15360   ;;  %v19992_v2 = vld [vmem:[#allocation228_spill] sm:$0xff] }
 0x8b1   : > { %v3152_v38 = vsel %vm19968_vm14, %v19947_v35, %v19967_v53  ;;  %vm19986_vm14 = vcmask 130048   ;;  %v19994_v9 = vld [vmem:[#allocation240_spill] sm:$0xff] }
 0x8b2   : > { %v10142_v33 = vpop.permute.xlu1 %10141 }
 0x8b3   : > { %v10527_v8 = vsel %vm19960_vm6, %v10526_v42, %v10142_v33  ;;  %v10146_v14 = vpop.permute.xlu0 %10145  ;;  %vm19970_vm6 = vcmask 97280  }
 0x8b4   : > { %v10528_v59 = vsel %vm19961_vm4, %v10527_v8, %v10146_v14  ;;  %v3153_v47 = vsel %vm19970_vm6, %v3152_v38, %v19969_v3  ;;  %vm19973_vm4 = vcmask 31744   ;;  %vm19989_vm6 = vcmask 64512   ;;  %v19996_v8 = vld [vmem:[#allocation252_spill] sm:$0xff]  ;;  %v20001_v38 = vld [vmem:[#allocation241_spill] sm:$0xff] }
 0x8b5   : > { %v3165_v46 = vsel %vm19973_vm4, %v19972_v34, %v19971_v1  ;;  %v3191_v21 = vsel %vm19989_vm6, %v19988_v63, %v19987_v61  ;;  %vm19991_vm4 = vcmask 343040   ;;  %v6362_v14 = vshrl.u32 %v17216_v49, 3  ;;  %v20015_v61 = vld [vmem:[#allocation243_spill] sm:$0xff] }
 0x8b6   : > { %v10150_v31 = vpop.permute.xlu1 %10149  ;;  %vm20007_vm6 = vcmask 441344  }
 0x8b7   : > { %v10529_v11 = vsel %vm19962_vm0, %v10528_v59, %v10150_v31  ;;  %v10154_v17 = vpop.permute.xlu0 %10153  ;;  %vm19975_vm0 = vcmask 179200   ;;  %v3192_v31 = vsel %vm2992_vm5, %v3191_v21, %v19996_v8  ;;  %v6363_v37 = vmul.u32 10, %v6362_v14 }
 0x8b8   : > { %v10530_v55 = vsel %vm19963_vm11, %v10529_v11, %v10154_v17  ;;  %v3154_v45 = vsel %vm19975_vm0, %v3153_v47, %v19974_v54  ;;  %vm19977_vm11 = vcmask 113664   ;;  %vm19993_vm0 = vcmask 277504   ;;  %v19997_v17 = vld [vmem:[#allocation217_spill] sm:$0xff]  ;;  %v20004_v54 = vld [vmem:[#allocation218_spill] sm:$0xff] }
 0x8b9   : > { %v3166_v35 = vsel %vm19977_vm11, %v3165_v46, %v19976_v56  ;;  %vm19995_vm11 = vcmask 211968   ;;  %v17257_v59 = vmul.u32.u64.low 3435973837, %v17238_v41  ;;  %v17258_v11 = vmul.u32.u64.high 3435973837, %v17238_v41, %v17257_v59  ;;  %v20003_v47 = vld [vmem:[#allocation253_spill] sm:$0xff]  ;;  %v20006_v56 = vld [vmem:[#allocation230_spill] sm:$0xff] }
 0x8ba   : > { %v10158_v0 = vpop.permute.xlu1 %10157  ;;  %v3193_v1 = vsel %vm18053_vm7, %v3192_v31, %v20003_v47  ;;  %v6373_v46 = vshrl.u32 %v17230_v20, 3  ;;  %v20013_v20 = vld [vmem:[#allocation231_spill] sm:$0xff]  ;;  %v20018_v31 = vld [vmem:[#allocation220_spill] sm:$0xff] }
 0x8bb   : > { %v10531_v24 = vsel %vm19964_vm12, %v10530_v55, %v10158_v0  ;;  %v10162_v27 = vpop.permute.xlu0 %10161  ;;  %vm19980_vm12 = vcmask 48128   ;;  %v20020_v59 = vld [vmem:[#allocation232_spill] sm:$0xff] }
 0x8bc   : > { %v10532_v62 = vsel %vm19965_vm10, %v10531_v24, %v10162_v27  ;;  %v3178_v16 = vsel %vm19980_vm12, %v19979_v48, %v19978_v23  ;;  %vm19982_vm10 = vcmask 261120   ;;  %vm19998_vm12 = vcmask 424960   ;;  %v19999_v24 = vld [vmem:[#allocation229_spill] sm:$0xff]  ;;  %v20029_v47 = vld [vmem:[#allocation480_spill] sm:$0xff] }
 0x8bd   : > { %v3155_v7 = vsel %vm19982_vm10, %v3154_v45, %v19981_v40  ;;  %v3179_v51 = vsel %vm19986_vm14, %v3178_v16, %v19985_v10  ;;  %vm20000_vm10 = vcmask 359424   ;;  %vm20005_vm14 = vcmask 506880   ;;  %v20008_v16 = vld [vmem:[#allocation242_spill] sm:$0xff] }
 0x8be   : > { %v17182_v13 = vpop.permute.xlu1 %10165  ;;  %v3156_v15 = vsel %vm19991_vm4, %v3155_v7, %v19990_v43  ;;  %v3180_v42 = vsel %vm19995_vm11, %v3179_v51, %v19994_v9  ;;  %vm20009_vm4 = vcmask 375808   ;;  %v20010_v7 = vld [vmem:[#allocation254_spill] sm:$0xff]  ;;  %vm20014_vm11 = vcmask 523264   ;;  %v20017_v43 = vld [vmem:[#allocation255_spill] sm:$0xff] }
 0x8bf   : > { %v17187_v44 = vsel %vm19966_vm8, %v10532_v62, %v17182_v13  ;;  %v17191_v30 = vpop.permute.xlu0 %10169  ;;  %vm19984_vm8 = vcmask 195584   ;;  %v3157_v55 = vsel %vm19998_vm12, %v3156_v15, %v19997_v17  ;;  %v6374_v51 = vmul.u32 10, %v6373_v46 }
 0x8c0   : > { %v3167_v36 = vsel %vm19984_vm8, %v3166_v35, %v19983_v28  ;;  %v17269_v62 = vmul.u32.u64.low 3435973837, %v17245_v4  ;;  %v17270_v53 = vmul.u32.u64.high 3435973837, %v17245_v4, %v17269_v62  ;;  %vm20002_vm8 = vcmask 293888  }
 0x8c1   : > { %v3168_v33 = vsel %vm19993_vm0, %v3167_v36, %v19992_v2  ;;  %v3181_v3 = vsel %vm20002_vm8, %v3180_v42, %v20001_v38  ;;  %v3158_v45 = vsel %vm20005_vm14, %v3157_v55, %v20004_v54  ;;  %v3194_v28 = vsel %vm2996_vm9, %v3193_v1, %v20010_v7  ;;  %v20011_v36 = vld [vmem:[#allocation219_spill] sm:$0xff]  ;;  %v20022_v55 = vld [vmem:[#allocation465_spill] sm:$0xff]  ;;  %v20027_v38 = vld [vmem:[#allocation468_spill] sm:$0xff] }
 0x8c2   : > { %v17189_v32 = vpop.permute.xlu1 %10217  ;;  %v3169_v27 = vsel %vm20000_vm10, %v3168_v33, %v19999_v24  ;;  %v3182_v40 = vsel %vm20009_vm4, %v3181_v3, %v20008_v16  ;;  %vm20012_vm0 = vcmask 588800   ;;  %vm20016_vm12 = vcmask 457728   ;;  %v20030_v1 = vld [vmem:[#allocation477_spill] sm:$0xff] }
 0x8c3   : > { %v17195_v52 = vpop.permute.xlu0 %10221  ;;  %v3170_v35 = vsel %vm20007_vm6, %v3169_v27, %v20006_v56  ;;  %v3159_v58 = vsel %vm20012_vm0, %v3158_v45, %v20011_v36  ;;  %v3183_v21 = vsel %vm20016_vm12, %v3182_v40, %v20015_v61  ;;  %v3195_v15 = vsel %vm2998_vm3, %v3194_v28, %v20017_v43  ;;  %v20024_v27 = vld [vmem:[#allocation244_spill] sm:$0xff]  ;;  %v20032_v56 = vld [vmem:[#allocation221_spill] sm:$0xff]  ;;  %v20045_v43 = vld [vmem:[#allocation479_spill] sm:$0xff] }
 0x8c4   : > { %v3171_v10 = vsel %vm20014_vm11, %v3170_v35, %v20013_v20  ;;  %v6364_v2 = vsub.s32 %v6176_v19, %v6363_v37  ;;  %v6384_v33 = vshrl.u32 %v17258_v11, 3  ;;  %v6395_v8 = vshrl.u32 %v17270_v53, 3  ;;  %v20026_v11 = vld [vmem:[#allocation256_spill] sm:$0xff]  ;;  %v20034_v37 = vld [vmem:[#allocation233_spill] sm:$0xff] }
 0x8c5   : > { %vm20019_vm10 = vcmask 670720   ;;  %vm20021_vm8 = vcmask 605184   ;;  %vm20023_vm14 = vcmask 15360   ;;  %vm20025_vm6 = vcmask 539648   ;;  %v20038_v28 = vld [vmem:[#allocation257_spill] sm:$0xff] }
 0x8c6   : > { %v17193_v39 = vpop.permute.xlu1 %10173  ;;  %v3160_v14 = vsel %vm20019_vm10, %v3159_v58, %v20018_v31  ;;  %v3172_v17 = vsel %vm20021_vm8, %v3171_v10, %v20020_v59  ;;  %v6108_v24 = vsel %vm20023_vm14, %v19936_v57, %v20022_v55  ;;  %v3184_v19 = vsel %vm20025_vm6, %v3183_v21, %v20024_v27  ;;  %v20039_v58 = vld [vmem:[#allocation467_spill] sm:$0xff]  ;;  %v20076_v21 = vld [vmem:[#allocation496_spill] sm:$0xff] }
 0x8c7   : > { %v17203_v50 = vpop.permute.xlu0 %10225  ;;  %v3196_v62 = vsel %vm3000_vm2, %v3195_v15, %v20026_v11  ;;  %vm20028_vm4 = vcmask 97280   ;;  %v17316_v53 = vsub.s32 %v6177_v5, %v6374_v51  ;;  %vm6416_vm0 = vcmp.ne.s32.totalorder %v6364_v2, 0  ;;  %v20036_v5 = vld [vmem:[#allocation245_spill] sm:$0xff]  ;;  %v20041_v51 = vld [vmem:[#allocation470_spill] sm:$0xff] }
 0x8c8   : > { %v6109_v3 = vsel %vm20028_vm4, %v6108_v24, %v20027_v38  ;;  %vm6436_vm11 = vcmp.lt.s32.totalorder %v6364_v2, 0  ;;  %vm20031_vm12 = vcmask 31744   ;;  %v6385_v54 = vmul.u32 10, %v6384_v33  ;;  %v20047_v33 = vld [vmem:[#allocation491_spill] sm:$0xff]  ;;  %v20054_v11 = vld [vmem:[#allocation222_spill] sm:$0xff] }
 0x8c9   : > { %v6121_v46 = vsel %vm20031_vm12, %v20030_v1, %v20029_v47  ;;  %vm20033_vm10 = vcmask 752640   ;;  %vm20035_vm8 = vcmask 687104   ;;  %v6396_v40 = vmul.u32 10, %v6395_v8  ;;  %vm17337_vm12 = vmand %vm6436_vm11, %vm6416_vm0  ;;  %v20048_v8 = vld [vmem:[#allocation492_spill] sm:$0xff]  ;;  %v20056_v38 = vld [vmem:[#allocation234_spill] sm:$0xff] }
 0x8ca   : > { %v17201_v29 = vpop.permute.xlu1 %10269  ;;  %v3161_v35 = vsel %vm20033_vm10, %v3160_v14, %v20032_v56  ;;  %v3173_v16 = vsel %vm20035_vm8, %v3172_v17, %v20034_v37  ;;  %vm20037_vm14 = vcmask 621568   ;;  %v3197_v36 = vsel %vm18052_vm15, %v3196_v62, %v20038_v28  ;;  %v20050_v14 = vld [vmem:[#allocation482_spill] sm:$0xff]  ;;  %v20060_v37 = vld [vmem:[#allocation469_spill] sm:$0xff] }
 0x8cb   : > { %v17220_v26 = vpop.permute.xlu0 %10273  ;;  %v3185_v7 = vsel %vm20037_vm14, %v3184_v19, %v20036_v5  ;;  %vm20040_vm6 = vcmask 179200   ;;  %v6476_v10 = vadd.s32 10, %v6364_v2  ;;  %vm20042_vm4 = vcmask 261120   ;;  %v20052_v17 = vld [vmem:[#allocation494_spill] sm:$0xff] }
 0x8cc   : > { %v6110_v20 = vsel %vm20040_vm6, %v6109_v3, %v20039_v58  ;;  %vm20046_vm10 = vcmask 113664   ;;  %vm6417_vm8 = vcmp.ne.s32.totalorder %v17316_v53, 0  ;;  %vm20049_vm14 = vcmask 48128   ;;  %v20058_v47 = vld [vmem:[#allocation246_spill] sm:$0xff]  ;;  %v20063_v58 = vld [vmem:[#allocation503_spill] sm:$0xff] }
 0x8cd   : > { %v6111_v61 = vsel %vm20042_vm4, %v6110_v20, %v20041_v51  ;;  %v6122_v15 = vsel %vm20046_vm10, %v6121_v46, %v20045_v43  ;;  %v6134_v31 = vsel %vm20049_vm14, %v20048_v8, %v20047_v33  ;;  %vm20051_vm15 = vcmask 195584   ;;  %v20062_v28 = vld [vmem:[#allocation506_spill] sm:$0xff]  ;;  %v20066_v51 = vld [vmem:[#allocation472_spill] sm:$0xff]  ;;  %v20068_v43 = vld [vmem:[#allocation481_spill] sm:$0xff] }
 0x8ce   : > { %v17218_v25 = vpop.permute.xlu1 %10177  ;;  %v6123_v59 = vsel %vm20051_vm15, %v6122_v15, %v20050_v14  ;;  %vm6437_vm6 = vcmp.lt.s32.totalorder %v17316_v53, 0  ;;  %vm20053_vm4 = vcmask 130048   ;;  %v17353_v24 = vsub.s32 %v17238_v41, %v6385_v54  ;;  %v20065_v20 = vld [vmem:[#allocation258_spill] sm:$0xff] }
 0x8cf   : > { %v17242_v60 = vpop.permute.xlu0 %10229  ;;  %v6135_v55 = vsel %vm20053_vm4, %v6134_v31, %v20052_v17  ;;  %vm20055_vm0 = vcmask 834560   ;;  %vm20057_vm11 = vcmask 769024   ;;  %vm20059_vm15 = vcmask 703488  }
 0x8d0   : > { %v3162_v62 = vsel %vm20055_vm0, %v3161_v35, %v20054_v11  ;;  %v3174_v3 = vsel %vm20057_vm11, %v3173_v16, %v20056_v38  ;;  %v3186_v46 = vsel %vm20059_vm15, %v3185_v7, %v20058_v47  ;;  %v6397_v56 = vsub.s32 %v17245_v4, %v6396_v40  ;;  %v20072_v40 = vld [vmem:[#allocation493_spill] sm:$0xff] }
 0x8d1   : > { %vm20061_vm10 = vcmask 343040   ;;  %v6496_v41 = vsel %vm17337_vm12, %v6476_v10, %v6364_v2  ;;  %v6477_v54 = vadd.s32 10, %v17316_v53  ;;  %vm20064_vm14 = vcmask 64512   ;;  %vm17384_vm12 = vmand %vm6437_vm6, %vm6417_vm8  ;;  %v20092_v2 = vld [vmem:[#allocation235_spill] sm:$0xff] }
 0x8d2   : > { %v17240_v22 = vpop.permute.xlu1 %10277  ;;  %v6112_v5 = vsel %vm20061_vm10, %v6111_v61, %v20060_v37  ;;  %v6147_v35 = vsel %vm20064_vm14, %v20063_v58, %v20062_v28  ;;  %v3198_v16 = vsel %vm3004_vm1, %v3197_v36, %v20065_v20  ;;  %vm20067_vm4 = vcmask 424960   ;;  %v20074_v61 = vld [vmem:[#allocation484_spill] sm:$0xff]  ;;  %v20082_v28 = vld [vmem:[#allocation474_spill] sm:$0xff]  ;;  %v20084_v20 = vld [vmem:[#allocation483_spill] sm:$0xff] }
 0x8d3   : > { %v6113_v7 = vsel %vm20067_vm4, %v6112_v5, %v20066_v51  ;;  %vm20069_vm0 = vcmask 277504   ;;  %vm20073_vm11 = vcmask 211968   ;;  %vm20075_vm15 = vcmask 359424   ;;  %v20081_v37 = vld [vmem:[#allocation508_spill] sm:$0xff]  ;;  %v20086_v51 = vld [vmem:[#allocation495_spill] sm:$0xff] }
 0x8d4   : > { %v17262_v0 = vpop.permute.xlu0 %10181  ;;  %v6124_v4 = vsel %vm20069_vm0, %v6123_v59, %v20068_v43  ;;  %v6136_v10 = vsel %vm20073_vm11, %v6135_v55, %v20072_v40  ;;  %vm20077_vm10 = vcmask 293888   ;;  %vm6418_vm14 = vcmp.ne.s32.totalorder %v17353_v24, 0  ;;  %v20078_v59 = vld [vmem:[#allocation505_spill] sm:$0xff]  ;;  %v20079_v55 = vld [vmem:[#allocation471_spill] sm:$0xff] }
 0x8d5   : > { %v6125_v36 = vsel %vm20075_vm15, %v6124_v4, %v20074_v61  ;;  %v6137_v15 = vsel %vm20077_vm10, %v6136_v10, %v20076_v21  ;;  %vm6438_vm4 = vcmp.lt.s32.totalorder %v17353_v24, 0  ;;  %v6516_v14 = vcvt.s32.f32 %v6496_v41  ;;  %v20094_v10 = vld [vmem:[#allocation486_spill] sm:$0xff] }
 0x8d6   : > { %v17260_v6 = vpop.permute.xlu1 %10233  ;;  %v6148_v17 = vsel %vm2992_vm5, %v6147_v35, %v20078_v59  ;;  %vm6419_vm8 = vcmp.ne.s32.totalorder %v6397_v56, 0  ;;  %vm6439_vm6 = vcmp.lt.s32.totalorder %v6397_v56, 0  ;;  %vm20080_vm0 = vcmask 506880  }
 0x8d7   : > { %v6114_v11 = vsel %vm20080_vm0, %v6113_v7, %v20079_v55  ;;  %v6497_v38 = vsel %vm17384_vm12, %v6477_v54, %v17316_v53  ;;  %v6478_v47 = vadd.s32 10, %v17353_v24  ;;  %v6149_v5 = vsel %vm18053_vm7, %v6148_v17, %v20081_v37  ;;  %vm17418_vm0 = vmand %vm6438_vm4, %vm6418_vm14  ;;  %v20090_v54 = vld [vmem:[#allocation223_spill] sm:$0xff]  ;;  %v20115_v7 = vld [vmem:[#allocation500_spill] sm:$0xff] }
 0x8d8   : > { %vm20083_vm11 = vcmask 588800   ;;  %vm20085_vm15 = vcmask 441344   ;;  %vm20087_vm10 = vcmask 375808   ;;  %v6479_v53 = vadd.s32 10, %v6397_v56  ;;  %vm17435_vm14 = vmand %vm6439_vm6, %vm6419_vm8  ;;  %v20102_v37 = vld [vmem:[#allocation507_spill] sm:$0xff] }
 0x8d9   : > { %v6115_v41 = vsel %vm20083_vm11, %v6114_v11, %v20082_v28  ;;  %v6126_v35 = vsel %vm20085_vm15, %v6125_v36, %v20084_v20  ;;  %v6138_v43 = vsel %vm20087_vm10, %v6137_v15, %v20086_v51  ;;  %vm20091_vm12 = vcmask 916480   ;;  %v20096_v36 = vld [vmem:[#allocation498_spill] sm:$0xff]  ;;  %v20103_v20 = vld [vmem:[#allocation259_spill] sm:$0xff]  ;;  %v20104_v51 = vld [vmem:[#allocation473_spill] sm:$0xff] }
 0x8da   : > { %v17281_v49 = vpop.permute.xlu1 %10185  ;;  %v17283_v23 = vpop.permute.xlu0 %10281  ;;  %v17424_v4 = vsel %vm20091_vm12, %v3162_v62, %v20090_v54  ;;  %vm20093_vm7 = vcmask 850944   ;;  %vm20095_vm11 = vcmask 523264   ;;  %vm20097_vm15 = vcmask 457728   ;;  %v20100_v62 = vld [vmem:[#allocation247_spill] sm:$0xff] }
 0x8db   : > { %v17428_v40 = vsel %vm20093_vm7, %v3174_v3, %v20092_v2  ;;  %v6127_v61 = vsel %vm20095_vm11, %v6126_v35, %v20094_v10  ;;  %v6139_v21 = vsel %vm20097_vm15, %v6138_v43, %v20096_v36  ;;  %vm20101_vm4 = vcmask 785408   ;;  %v20106_v2 = vld [vmem:[#allocation510_spill] sm:$0xff]  ;;  %v20107_v36 = vld [vmem:[#allocation476_spill] sm:$0xff] }
 0x8dc   : > { %v3187_v55 = vsel %vm20101_vm4, %v3186_v46, %v20100_v62  ;;  %v6536_v3 = vmul.f32 0.1, %v6516_v14  ;;  %v6517_v11 = vcvt.s32.f32 %v6497_v38  ;;  %v6150_v28 = vsel %vm2996_vm9, %v6149_v5, %v20102_v37  ;;  %v20109_v14 = vld [vmem:[#allocation485_spill] sm:$0xff] }
 0x8dd   : > { %v3199_v35 = vsel %vm3006_vm13, %v3198_v16, %v20103_v20  ;;  %vm20105_vm7 = vcmask 670720   ;;  %v6498_v54 = vsel %vm17418_vm0, %v6478_v47, %v17353_v24  ;;  %v6151_v10 = vsel %vm2998_vm3, %v6150_v28, %v20106_v2  ;;  %v20111_v5 = vld [vmem:[#allocation497_spill] sm:$0xff]  ;;  %v20121_v2 = vld [vmem:[#allocation512_spill] sm:$0xff] }
 0x8de   : > { %v6116_v43 = vsel %vm20105_vm7, %v6115_v41, %v20104_v51  ;;  %vm20108_vm8 = vcmask 752640   ;;  %vm20110_vm6 = vcmask 605184   ;;  %vm20112_vm10 = vcmask 539648   ;;  %v20113_v41 = vld [vmem:[#allocation488_spill] sm:$0xff] }
 0x8df   : > { %v17298_v9 = vpop.permute.xlu1 %10285  ;;  %v17300_v42 = vpop.permute.xlu0 %10237  ;;  %v6117_v46 = vsel %vm20108_vm8, %v6116_v43, %v20107_v36  ;;  %v6128_v38 = vsel %vm20110_vm6, %v6127_v61, %v20109_v14  ;;  %v6140_v62 = vsel %vm20112_vm10, %v6139_v21, %v20111_v5  ;;  %v6499_v16 = vsel %vm17435_vm14, %v6479_v53, %v6397_v56  ;;  %v20119_v53 = vld [vmem:[#allocation509_spill] sm:$0xff]  ;;  %v20124_v36 = vld [vmem:[#allocation475_spill] sm:$0xff] }
 0x8e0   : > { %vm20114_vm12 = vcmask 687104   ;;  %vm20116_vm0 = vcmask 621568   ;;  %vm20117_vm11 = vcmask 31744   ;;  %vm20118_vm15 = vcmask 48128  }
 0x8e1   : > { %v6129_v37 = vsel %vm20114_vm12, %v6128_v38, %v20113_v41  ;;  %v6141_v24 = vsel %vm20116_vm0, %v6140_v62, %v20115_v7  ;;  %v10534_v47 = vsel %vm20117_vm11, %v17182_v13, %v17191_v30  ;;  %v10547_v61 = vsel %vm20118_vm15, %v17189_v32, %v17195_v52  ;;  %v20126_v38 = vld [vmem:[#allocation487_spill] sm:$0xff]  ;;  %v20133_v62 = vld [vmem:[#allocation490_spill] sm:$0xff] }
 0x8e2   : > { %v6556_v15 = vadd.f32 0.05, %v6536_v3  ;;  %v6537_v56 = vmul.f32 0.1, %v6517_v11  ;;  %v6152_v20 = vsel %vm3000_vm2, %v6151_v10, %v20119_v53  ;;  %vm20120_vm14 = vcmask 130048   ;;  %v20128_v11 = vld [vmem:[#allocation499_spill] sm:$0xff] }
 0x8e3   : > { %v10548_v51 = vsel %vm20120_vm14, %v10547_v61, %v17203_v50  ;;  %v6518_v43 = vcvt.s32.f32 %v6498_v54  ;;  %vm20122_vm4 = vcmask 556032   ;;  %v6519_v30 = vcvt.s32.f32 %v6499_v16  ;;  %v20131_v54 = vld [vmem:[#allocation478_spill] sm:$0xff]  ;;  %v20138_v61 = vld [vmem:[#allocation511_spill] sm:$0xff] }
 0x8e4   : > { %v17321_v45 = vpop.permute.xlu1 %10241  ;;  %v6153_v13 = vsel %vm20122_vm4, %v6152_v20, %v20121_v2  ;;  %vm20123_vm7 = vcmask 211968   ;;  %vm20125_vm8 = vcmask 834560   ;;  %vm20127_vm6 = vcmask 769024   ;;  %v20135_v41 = vld [vmem:[#allocation502_spill] sm:$0xff] }
 0x8e5   : > { %v17323_v57 = vpop.permute.xlu0 %10189  ;;  %v10549_v52 = vsel %vm20123_vm7, %v10548_v51, %v17242_v60  ;;  %v6118_v14 = vsel %vm20125_vm8, %v6117_v46, %v20124_v36  ;;  %v6130_v3 = vsel %vm20127_vm6, %v6129_v37, %v20126_v38  ;;  %vm20129_vm10 = vcmask 703488   ;;  %v20142_v2 = vld [vmem:[#allocation514_spill] sm:$0xff]  ;;  %v20147_v38 = vld [vmem:[#allocation501_spill] sm:$0xff] }
 0x8e6   : > { %v6142_v10 = vsel %vm20129_vm10, %v6141_v24, %v20128_v11  ;;  %vm20130_vm12 = vcmask 113664   ;;  %vm20132_vm0 = vcmask 916480   ;;  %vm20134_vm11 = vcmask 850944  }
 0x8e7   : > { %v10535_v50 = vsel %vm20130_vm12, %v10534_v47, %v17193_v39  ;;  %v6119_v5 = vsel %vm20132_vm0, %v6118_v14, %v20131_v54  ;;  %v6131_v16 = vsel %vm20134_vm11, %v6130_v3, %v20133_v62  ;;  %vm20136_vm15 = vcmask 785408   ;;  %v20145_v14 = vld [vmem:[#allocation489_spill] sm:$0xff]  ;;  %v20160_v62 = vld [vmem:[#allocation248_spill] sm:$0xff] }
 0x8e8   : > { %v6143_v60 = vsel %vm20136_vm15, %v6142_v10, %v20135_v41  ;;  %vm20137_vm14 = vcmask 195584   ;;  %v6154_v24 = vsel %vm3004_vm1, %v6153_v13, %v20138_v61  ;;  %vm20139_vm4 = vcmask 64512   ;;  %v20153_v10 = vld [vmem:[#allocation513_spill] sm:$0xff] }
 0x8e9   : > { %v17355_v27 = vpop.permute.xlu1 %10193  ;;  %v17357_v19 = vpop.permute.xlu0 %10289  ;;  %v10536_v46 = vsel %vm20137_vm14, %v10535_v50, %v17218_v25  ;;  %v10560_v39 = vsel %vm20139_vm4, %v17201_v29, %v17220_v26  ;;  %vm20140_vm7 = vcmask 293888   ;;  %vm20141_vm8 = vcmask 277504  }
 0x8ea   : > { %v10550_v47 = vsel %vm20140_vm7, %v10549_v52, %v17260_v6  ;;  %v10537_v53 = vsel %vm20141_vm8, %v10536_v46, %v17262_v0  ;;  %v6557_v20 = vadd.f32 0.05, %v6537_v56  ;;  %v6538_v51 = vmul.f32 0.1, %v6518_v43  ;;  %v20150_v56 = vld [vmem:[#allocation504_spill] sm:$0xff] }
 0x8eb   : > { %v6155_v25 = vsel %vm3006_vm13, %v6154_v24, %v20142_v2  ;;  %vm20143_vm6 = vcmask 375808   ;;  %vm20144_vm10 = vcmask 998400   ;;  %vm20146_vm12 = vcmask 932864   ;;  %v20169_v2 = vld [vmem:[#allocation515_spill] sm:$0xff] }
 0x8ec   : > { %v10551_v36 = vsel %vm20143_vm6, %v10550_v47, %v17300_v42  ;;  %v6120_v13 = vsel %vm20144_vm10, %v6119_v5, %v20030_v1  ;;  %v6132_v26 = vsel %vm20146_vm12, %v6131_v16, %v20145_v14  ;;  %vm20148_vm0 = vcmask 867328   ;;  %v20158_v5 = vld [vmem:[#allocation236_spill] sm:$0xff] }
 0x8ed   : > { %v17396_v33 = vpop.permute.xlu1 %10293  ;;  %v17398_v31 = vpop.permute.xlu0 %10245  ;;  %v6144_v6 = vsel %vm20148_vm0, %v6143_v60, %v20147_v38  ;;  %v6539_v52 = vmul.f32 0.1, %v6519_v30  ;;  %vm20149_vm11 = vcmask 1014784   ;;  %vm20151_vm15 = vcmask 949248   ;;  %vm20161_vm10 = vmmov %vm20148_vm0  ;;  %v20162_v16 = vld [vmem:[#allocation516_spill] sm:$0xff] }
 0x8ee   : > { %v6133_v0 = vsel %vm20149_vm11, %v6132_v26, %v20048_v8  ;;  %v6145_v43 = vsel %vm20151_vm15, %v6144_v6, %v20150_v56  ;;  %v10561_v3 = vsel %vm2992_vm5, %v10560_v39, %v17240_v22  ;;  %vm20152_vm14 = vcmask 359424   ;;  %vm20159_vm5 = vmmov %vm20146_vm12  ;;  %v20186_v56 = vld [vmem:[#allocation262_spill] sm:$0xff] }
 0x8ef   : > { %v10538_v42 = vsel %vm20152_vm14, %v10537_v53, %v17281_v49  ;;  %vm20154_vm4 = vcmask 801792   ;;  %vm20155_vm7 = vcmask 228352   ;;  %vm20156_vm8 = vcmask 457728  }
 0x8f0   : > { %v6156_v50 = vsel %vm20154_vm4, %v6155_v25, %v20153_v10  ;;  %v10562_v30 = vsel %vm20155_vm7, %v10561_v3, %v17283_v23  ;;  %v10552_v8 = vsel %vm20156_vm8, %v10551_v36, %v17321_v45  ;;  %vm20157_vm6 = vcmask 441344   ;;  %v20165_v23 = vld [vmem:[#allocation261_spill] sm:$0xff]  ;;  %vm20166_vm11 = vmmov %vm20154_vm4  ;;  %v20178_v36 = vld [vmem:[#allocation260_spill] sm:$0xff] }
 0x8f1   : > { %v17439_v59 = vpop.permute.xlu1 %10249  ;;  %v17441_v17 = vpop.permute.xlu0 %10197  ;;  %v10539_v54 = vsel %vm20157_vm6, %v10538_v42, %v17323_v57  ;;  %v3176_v22 = vsel %vm20159_vm5, %v17428_v40, %v20158_v5  ;;  %v3188_v49 = vsel %vm20161_vm10, %v3187_v55, %v20160_v62  ;;  %vm20163_vm12 = vcmask 883712  }
 0x8f2   : > { %v6157_v41 = vsel %vm20163_vm12, %v6156_v50, %v20162_v16  ;;  %vm20164_vm0 = vcmask 539648   ;;  %v3200_v46 = vsel %vm20166_vm11, %v3199_v35, %v20165_v23  ;;  %v6576_v45 = vmul.f32 %v6556_v15, %v6120_v13 }
 0x8f3   : > { %v10553_v60 = vsel %vm20164_vm0, %v10552_v8, %v17398_v31  ;;  %v6558_v61 = vadd.f32 0.05, %v6538_v51  ;;  %v6559_v24 = vadd.f32 0.05, %v6539_v52  ;;  %v6577_v57 = vmul.f32 %v6557_v20, %v6133_v0  ;;  %v20176_v51 = vld [vmem:[#allocation249_spill] sm:$0xff] }
 0x8f4   : > { %vm20167_vm15 = vcmask 1031168   ;;  %v10563_v40 = vsel %vm2996_vm9, %v10562_v30, %v17298_v9  ;;  %vm20168_vm14 = vcmask 523264   ;;  %vm20170_vm4 = vcmask 965632  }
 0x8f5   : > { %v17474_v28 = vpop.permute.xlu1 %10201  ;;  %v17476_v21 = vpop.permute.xlu0 %10297  ;;  %v6146_v39 = vsel %vm20167_vm15, %v6145_v43, %v20063_v58  ;;  %v10540_v55 = vsel %vm20168_vm14, %v10539_v54, %v17355_v27  ;;  %v6158_v31 = vsel %vm20170_vm4, %v6157_v41, %v20169_v2  ;;  %v10564_v35 = vsel %vm2998_vm3, %v10563_v40, %v17357_v19  ;;  %vm20179_vm3 = vmmov %vm20163_vm12 }
 0x8f6   : > { %vm20171_vm7 = vcmask 621568   ;;  %vm20172_vm8 = vcmask 605184   ;;  %vm20173_vm9 = vcmask 998400   ;;  %vm20174_vm6 = vcmask 1014784  }
 0x8f7   : > { %v10554_v15 = vsel %vm20171_vm7, %v10553_v60, %v17439_v59  ;;  %v10541_v58 = vsel %vm20172_vm8, %v10540_v55, %v17441_v17  ;;  %v3164_v9 = vsel %vm20173_vm9, %v17424_v4, %v19972_v34  ;;  %v3177_v27 = vsel %vm20174_vm6, %v3176_v22, %v19979_v48 }
 0x8f8   : > { %vm20175_vm5 = vcmask 703488   ;;  %vm20177_vm10 = vcmask 949248   ;;  %v3201_v19 = vsel %vm20179_vm3, %v3200_v46, %v20178_v36  ;;  %v6596_v13 = vadd.f32 %v6576_v45, %v3164_v9 }
 0x8f9   : > { %v17502_v7 = vpop.permute.xlu1 %10301  ;;  %v10254_v37 = vpop.permute.xlu0 %10253  ;;  %v3189_v25 = vsel %vm20177_vm10, %v3188_v49, %v20176_v51  ;;  %v6578_v59 = vmul.f32 %v6558_v61, %v6146_v39  ;;  %v6597_v14 = vadd.f32 %v6577_v57, %v3177_v27  ;;  %v6579_v26 = vmul.f32 %v6559_v24, %v6158_v31  ;;  %vm20189_vm9 = vmmov %vm20177_vm10 }
 0x8fa   : > { %v10555_v20 = vsel %vm20175_vm5, %v10554_v15, %v10254_v37  ;;  %v10565_v17 = vsel %vm3000_vm2, %v10564_v35, %v17396_v33  ;;  %vm20180_vm12 = vcmask 687104   ;;  %vm20181_vm0 = vcmask 556032  }
 0x8fb   : > { %v10542_v34 = vsel %vm20180_vm12, %v10541_v58, %v17474_v28  ;;  %v10566_v37 = vsel %vm20181_vm0, %v10565_v17, %v17476_v21  ;;  %vm20182_vm11 = vcmask 785408   ;;  %vm20183_vm15 = vcmask 769024  }
 0x8fc   : > { %vm20184_vm14 = vcmask 1031168   ;;  %vm20185_vm4 = vcmask 867328   ;;  %vm20187_vm7 = vcmask 965632   ;;  %v10639_v28 = vrot.slane %v6596_v13, %v19017_v18 }
 0x8fd   : > { %v10258_v1 = vpop.permute.xlu1 %10257  ;;  %v10206_v11 = vpop.permute.xlu0 %10205  ;;  %v3190_v52 = vsel %vm20184_vm14, %v3189_v25, %v19988_v63  ;;  %v3202_v33 = vsel %vm20187_vm7, %v3201_v19, %v20186_v56  ;;  %v10567_v42 = vsel %vm3004_vm1, %v10566_v37, %v17502_v7  ;;  %vm20188_vm2 = vcmask 850944   ;;  %vm20192_vm5 = vmmov %vm20184_vm14 }
 0x8fe   : > { %v10556_v38 = vsel %vm20182_vm11, %v10555_v20, %v10258_v1  ;;  %v10543_v6 = vsel %vm20183_vm15, %v10542_v34, %v10206_v11  ;;  %v6598_v43 = vadd.f32 %v6578_v59, %v3190_v52  ;;  %v6599_v3 = vadd.f32 %v6579_v26, %v3202_v33  ;;  %vm20198_vm0 = vmmov %vm20187_vm7 }
 0x8ff   : > { %v10643_v11 = vrot.slane %v6597_v14, %v19017_v18  ;;  %vm10668_vm8 = vcmp.gt.f32.partialorder %v17187_v44, %v10639_v28  ;;  %vm20191_vm6 = vcmask 932864   ;;  %vm20193_vm1 = vcmask 1014784  }
 0x900   : > { %v10647_v54 = vrot.slane %v6598_v43, %v19017_v18  ;;  %v10888_v44 = vsel %vm10668_vm8, 1.0, %v18440_v12  ;;  %vm20194_vm3 = vcmask 801792   ;;  %vm20196_vm12 = vcmask 883712  }
 0x901   : > { %v10210_v47 = vpop.permute.xlu1 %10209  ;;  %v10306_v53 = vpop.permute.xlu0 %10305 }
 0x902   : > { %v10544_v21 = vsel %vm20188_vm2, %v10543_v6, %v10210_v47  ;;  %v10568_v63 = vsel %vm3006_vm13, %v10567_v42, %v10306_v53 }
 0x905   : > { %v10310_v4 = vpop.permute.xlu1 %10309  ;;  %v10262_v48 = vpop.permute.xlu0 %10261 }
 0x906   : > { %v10557_v0 = vsel %vm20185_vm4, %v10556_v38, %v10262_v48  ;;  %v10569_v5 = vsel %vm20194_vm3, %v10568_v63, %v10310_v4 }
 0x909   : > { %v10266_v1 = vpop.permute.xlu1 %10265  ;;  %v10214_v10 = vpop.permute.xlu0 %10213 }
 0x90a   : > { %v10558_v50 = vsel %vm20189_vm9, %v10557_v0, %v10266_v1  ;;  %v10545_v30 = vsel %vm20191_vm6, %v10544_v21, %v10214_v10 }
 0x90b   : > { %v10559_v8 = vsel %vm20192_vm5, %v10558_v50, %v17201_v29  ;;  %v10546_v7 = vsel %vm20193_vm1, %v10545_v30, %v17189_v32  ;;  %v10651_v29 = vrot.slane %v6599_v3, %v19017_v18 }
 0x90c   : > { %vm10669_vm10 = vcmp.gt.f32.partialorder %v10546_v7, %v10643_v11  ;;  %vm10670_vm13 = vcmp.gt.f32.partialorder %v10559_v8, %v10647_v54 }
 0x90d   : > { %v10889_v22 = vsel %vm10669_vm10, 1.0, %v18440_v12  ;;  %v10314_v62 = vpop.permute.xlu0 %10313  ;;  %v10318_v16 = vpop.permute.xlu1 %10317  ;;  %v10890_v60 = vsel %vm10670_vm13, 1.0, %v18440_v12 }
 0x90e   : > { %v10740_v49 = vcombine.low %v10888_v44, %v10889_v22  ;;  %v10570_v32 = vsel %vm20196_vm12, %v10569_v5, %v10314_v62 }
 0x90f   : > { %v10571_v41 = vsel %vm20198_vm0, %v10570_v32, %v10318_v16 }
 0x910   : > { %10760 = vst [vmem:[%s14929_s24 + $0x40] sm:$0xff] %v10740_v49  ;;  %vm10671_vm11 = vcmp.gt.f32.partialorder %v10571_v41, %v10651_v29 }
 0x911   : > { %v10891_v23 = vsel %vm10671_vm11, 1.0, %v18440_v12 }
 0x912   : > { %v10741_v46 = vcombine.low %v10890_v60, %v10891_v23 }
 0x914   : > { %10761 = vst [vmem:[%s14929_s24 + $0x48] sm:$0xff] %v10741_v46 }
 0x915   : > { %11112 = shalt.err (!%p11109_p6)
}
 0x916   : > { %s11113_s24 = scalar_lea.hbm %s17615_s10, 1280  ;;  %s11117_s22 = scalar_lea.hbm %s20200_s21, 2560 }
 0x917   : > { %p11114_p4 = scmp.ne.s32.totalorder %s17615_s10, %s11113_s24  ;;  %p11118_p1 = scmp.lt.u32.totalorder %s17615_s10, %s20200_s21 }
 0x918   : > { %p11119_p2 = scmp.lt.u32.totalorder %s11117_s22, %s11113_s24  ;;  %p11121_p8 = scmp.lt.u32.totalorder %s11113_s24, %s17615_s10 }
 0x919   : > { %p11115_p10 = pnand %p11114_p4, %p20201_p9 }
 0x91a   : > { %p11120_p5 = por %p11119_p2, %p11118_p1 }
 0x91b   : > { %p11116_p12 = pneg %p11115_p10 }
 0x91c   : > { %p11122_p11 = por %p11121_p8, %p11120_p5 }
 0x91e   : > { %p11123_p0 = pnand %p11122_p11, %p11116_p12 }
 0x920   : > { %11126 = shalt.err (!%p11123_p0)
}
 0x921   : > { %10940 = dma.vmem_to_hbm [thread:$0]  (%p20201_p9), %s17617_s9, 1280, %s17615_s10, %s10763_s14  }
 0x922 PF: > { %s20202_s4 = sld [smem:[#allocation8_spill]]  ;;  %s20203_s5 = sld [smem:[#allocation17_spill]] }
 0x923   : > { %s20204_s15 = sld [smem:[#allocation13_spill]] }
 0x928   : > { %s10791_s16 = sand.u32 1, %s20202_s4   ;;  %p20205_p7 = scmp.ne.s32.totalorder %s20203_s5, 0 }
 0x929   : > { %p20206_p13 = scmp.ge.s32.totalorder %s20204_s15, 2  ;;  %s10792_s18 = scalar_lea.sflag [#allocation4], %s10791_s16 }
 0x92b   : > { %p10947_p3 = pnand %p20206_p13, %p20205_p7 }
 0x92d   : > { %11156 = dma.done.wait (!%p10947_p3), %s10792_s18, 1280  }
 0x92e   : > { %11158 = vsyncadd (!%p10947_p3), %s10792_s18, 4294966016  ;;  %s17_s11 = sadd.s32 1, %s20204_s15   ;;  %s20207_s6 = sld [smem:[#allocation9_spill]] }
 0x92f   : > { %p14_p6 = scmp.ge.s32.totalorder %s17_s11, 4   ;;  %s20208_s7 = sld [smem:[#allocation10_spill]] }
 0x930   : > { %s20209_s8 = sld [smem:[#allocation16_spill]]  ;;  %s20210_s9 = sld [smem:[#allocation12_spill]] }
 0x931   : > { %s20211_s10 = sld [smem:[#allocation14_spill]]  ;;  %16 = sbr.rel (!%p14_p6) target bundleno = 9 (0x9), region = 69 }
 0x938   :  { %10797 = vsyncpa [#allocation3], 1 }
 0x939   :  { %10799 = vsyncpa [#allocation3 + $0x1], 1 }
 0x93a   :  { %10800 = vsyncpa [#allocation4], 1 }
 0x93b   :  { %10802 = vsyncpa [#allocation4 + $0x1], 1 }

</bundles_post_ra>
